<compile_context>
chip_gen: v7x
topology: tpu7x:2x2x1
jax: 0.10.0
libtpu: 0.0.40
codegen_flags: <defaults>
</compile_context>

<pallas_src>
import jax
import jax.numpy as jnp
from jax import lax
from jax.experimental import pallas as pl
from jax.experimental.pallas import tpu as pltpu

H = 32                # conv_out_channels == lstm_out_channels
OUT = 4               # final Linear output dim
HPAD = 128            # lane-dense padding of the Linear output
CONV_LAYERS = 3       # conv_num_layers
ADJ_TM = 256          # adjacency output row tile (large-N path)
ADJ_TN = 256          # adjacency output col tile (large-N path)
FUSE_ADJ_MAX_N = 1024  # fuse sigmoid(h @ h.T) into the encoder below this size


# ---------------------------------------------------------------------------
# Encoder body: GatedGraphConv (3 layers, mean aggr, GRUCell update) + 1-step
# LSTM + ReLU + Linear(32 -> 4, zero-padded to 128 lanes).  Returns h_pad.
# ---------------------------------------------------------------------------
def _encoder_body(x_ref, aw_ref, h0_ref, c0_ref, wcat_ref,
                  gru_bih_ref, gru_bhh_ref, lstm_w_ref, lstm_b_ref,
                  lin_w_ref, lin_b_ref):
    x = x_ref[...]                      # [N, 32] f32 node state
    aw = aw_ref[...]                    # [N, N]  bf16, row-normalized adjacency
    gru_bih = gru_bih_ref[...]          # [1, 96]  (hoisted; no re-broadcast per layer)
    gru_bhh = gru_bhh_ref[...]          # [1, 96]

    for i in range(CONV_LAYERS):
        # One fused x-side matmul: [N,32]x[32,192] -> (gi precursor | hidden gates).
        xg = jnp.dot(x.astype(jnp.bfloat16), wcat_ref[i],
                     preferred_element_type=jnp.float32)                      # [N, 192]
        xw = xg[:, :3 * H]                      # x @ (wconv[i] @ Wih_cat)
        gh = xg[:, 3 * H:] + gru_bhh            # x @ Whh_cat + b_hh
        # O(N^2) matmul now carries the GRU input weights (reassociation); aw is
        # already inv-degree normalized on the host.
        gi = jnp.dot(aw, xw.astype(jnp.bfloat16),
                     preferred_element_type=jnp.float32) + gru_bih            # [N, 96]
        r = jax.nn.sigmoid(gi[:, 0:H] + gh[:, 0:H])
        z = jax.nn.sigmoid(gi[:, H:2 * H] + gh[:, H:2 * H])
        n = jnp.tanh(gi[:, 2 * H:3 * H] + r * gh[:, 2 * H:3 * H])
        x = (1.0 - z) * n + z * x

    # Fused LSTM step: [x | h0] @ [Wih^T ; Whh^T] -> all 4 gate pre-acts (i,f,g,o).
    xh = jnp.concatenate([x, h0_ref[...]], axis=1).astype(jnp.bfloat16)       # [N, 64]
    gates = (jnp.dot(xh, lstm_w_ref[...], preferred_element_type=jnp.float32)
             + lstm_b_ref[...])                                               # [N, 128]
    i_g = jax.nn.sigmoid(gates[:, 0:H])
    f_g = jax.nn.sigmoid(gates[:, H:2 * H])
    g_g = jnp.tanh(gates[:, 2 * H:3 * H])
    o_g = jax.nn.sigmoid(gates[:, 3 * H:4 * H])
    c1 = f_g * c0_ref[...] + i_g * g_g
    h1 = o_g * jnp.tanh(c1)                                                   # [N, 32]

    # ReLU -> Linear(32 -> 4); weights/bias zero-padded to 128 output lanes so the
    # store is lane-dense and h_pad @ h_pad.T == h @ h.T exactly.
    h = jnp.maximum(h1, 0.0)
    return (jnp.dot(h.astype(jnp.bfloat16), lin_w_ref[...],
                    preferred_element_type=jnp.float32) + lin_b_ref[...])     # [N, 128]


def encoder_kernel(x_ref, aw_ref, h0_ref, c0_ref, wcat_ref,
                   gru_bih_ref, gru_bhh_ref, lstm_w_ref, lstm_b_ref,
                   lin_w_ref, lin_b_ref, h_out_ref):
    h_out_ref[...] = _encoder_body(x_ref, aw_ref, h0_ref, c0_ref, wcat_ref,
                                   gru_bih_ref, gru_bhh_ref, lstm_w_ref,
                                   lstm_b_ref, lin_w_ref, lin_b_ref)


def encoder_adj_kernel(x_ref, aw_ref, h0_ref, c0_ref, wcat_ref,
                       gru_bih_ref, gru_bhh_ref, lstm_w_ref, lstm_b_ref,
                       lin_w_ref, lin_b_ref, h_out_ref, adj_ref):
    h_pad = _encoder_body(x_ref, aw_ref, h0_ref, c0_ref, wcat_ref,
                          gru_bih_ref, gru_bhh_ref, lstm_w_ref,
                          lstm_b_ref, lin_w_ref, lin_b_ref)
    h_out_ref[...] = h_pad
    hb = h_pad.astype(jnp.bfloat16)
    s = lax.dot_general(hb, hb, (((1,), (1,)), ((), ())),
                        preferred_element_type=jnp.float32)
    adj_ref[...] = jax.nn.sigmoid(s)


# ---------------------------------------------------------------------------
# Large-N adjacency: adj = sigmoid(h @ h.T), 256x256 output tiles, hj resident
# in VMEM (DMA'd once), bf16 operands, ("parallel","parallel") grid.
# ---------------------------------------------------------------------------
def _make_adj_kernel():
    def adj_kernel(hi_ref, hj_ref, adj_ref):
        j0 = pl.multiple_of(pl.program_id(1) * ADJ_TN, ADJ_TN)
        hj = hj_ref[pl.ds(j0, ADJ_TN), :]
        s = lax.dot_general(hi_ref[...], hj, (((1,), (1,)), ((), ())),
                            preferred_element_type=jnp.float32)
        adj_ref[...] = jax.nn.sigmoid(s)
    return adj_kernel


def _adjacency(h_bf16):
    Np = h_bf16.shape[0]
    grid = (Np // ADJ_TM, Np // ADJ_TN)
    return pl.pallas_call(
        _make_adj_kernel(),
        out_shape=jax.ShapeDtypeStruct((Np, Np), jnp.float32),
        grid=grid,
        in_specs=[pl.BlockSpec((ADJ_TM, HPAD), lambda i, j: (i, 0)),
                  pl.BlockSpec((Np, HPAD), lambda i, j: (0, 0))],   # resident hj
        out_specs=pl.BlockSpec((ADJ_TM, ADJ_TN), lambda i, j: (i, j)),
        compiler_params=pltpu.CompilerParams(
            dimension_semantics=("parallel", "parallel")),
    )(h_bf16, h_bf16)


# ---------------------------------------------------------------------------
# Parameter packing (fused / reassociated / padded layouts) -- once, host side.
# ---------------------------------------------------------------------------
def _pack_params(params):
    gru_wih_cat = jnp.transpose(params["gru_wih"], (1, 0, 2)).reshape(H, 3 * H)  # [32, 96]
    gru_whh_cat = jnp.transpose(params["gru_whh"], (1, 0, 2)).reshape(H, 3 * H)  # [32, 96]
    gru_bih = jnp.transpose(params["gru_bih"], (1, 0, 2)).reshape(1, 3 * H)      # [1, 96]
    gru_bhh = jnp.transpose(params["gru_bhh"], (1, 0, 2)).reshape(1, 3 * H)      # [1, 96]

    # Reassociation: W_i = wconv[i] @ Wih_cat, concatenated with Whh_cat so the
    # per-layer x-side matmul is a single [32, 192] weight slab.
    w_in = jnp.einsum("lij,jk->lik", params["wconv"], gru_wih_cat)               # [3, 32, 96]
    wcat = jnp.concatenate(
        [w_in, jnp.broadcast_to(gru_whh_cat, (CONV_LAYERS, H, 3 * H))], axis=2)  # [3, 32, 192]

    lstm_wih_cat = jnp.transpose(params["lstm_wih"], (1, 0, 2)).reshape(H, 4 * H)
    lstm_whh_cat = jnp.transpose(params["lstm_whh"], (1, 0, 2)).reshape(H, 4 * H)
    lstm_w = jnp.concatenate([lstm_wih_cat, lstm_whh_cat], axis=0)               # [64, 128]
    lstm_b = jnp.transpose(params["lstm_bih"] + params["lstm_bhh"],
                           (1, 0, 2)).reshape(1, 4 * H)                          # [1, 128]

    lin_w = jnp.pad(params["lin_w"], ((0, 0), (0, HPAD - OUT)))                  # [32, 128]
    lin_b = jnp.pad(params["lin_b"], ((0, 0), (0, HPAD - OUT)))                  # [1, 128]

    return dict(wcat=wcat.astype(jnp.bfloat16),
                gru_bih=gru_bih, gru_bhh=gru_bhh,
                lstm_w=lstm_w.astype(jnp.bfloat16), lstm_b=lstm_b,
                lin_w=lin_w.astype(jnp.bfloat16), lin_b=lin_b)


def _round_up(n, m):
    return ((n + m - 1) // m) * m


def _encode(x_pad, aw_norm, h0, c0, p, fuse_adj):
    N = x_pad.shape[0]
    args = (x_pad, aw_norm, h0, c0, p["wcat"], p["gru_bih"], p["gru_bhh"],
            p["lstm_w"], p["lstm_b"], p["lin_w"], p["lin_b"])
    vmem = lambda: pl.BlockSpec(memory_space=pltpu.MemorySpace.VMEM)

    # Size the VMEM limit to the real footprint (cap well below v7x's 64 MiB).
    aw_bytes = N * N * 2
    adj_bytes = N * N * 4 if fuse_adj else 0
    vmem_limit = int(min(max(aw_bytes + adj_bytes + 8 * N * 1024 + (8 << 20),
                             16 << 20), 48 << 20))
    cparams = pltpu.CompilerParams(vmem_limit_bytes=vmem_limit)

    if fuse_adj:
        return pl.pallas_call(
            encoder_adj_kernel,
            out_shape=(jax.ShapeDtypeStruct((N, HPAD), jnp.float32),
                       jax.ShapeDtypeStruct((N, N), jnp.float32)),
            in_specs=[vmem() for _ in args],
            out_specs=(vmem(), vmem()),
            compiler_params=cparams,
        )(*args)
    return pl.pallas_call(
        encoder_kernel,
        out_shape=jax.ShapeDtypeStruct((N, HPAD), jnp.float32),
        in_specs=[vmem() for _ in args],
        out_specs=vmem(),
        compiler_params=cparams,
    )(*args)


def recurrent_dygr_encoder(x, edge_index, edge_weight, h0, c0, params):
    N, F = x.shape
    Nr = _round_up(N, 8)                                   # sublane-pad node rows

    x_pad = jnp.zeros((Nr, H), jnp.float32).at[:N, :F].set(x.astype(jnp.float32))
    h0p = jnp.zeros((Nr, H), jnp.float32).at[:N].set(h0.astype(jnp.float32))
    c0p = jnp.zeros((Nr, H), jnp.float32).at[:N].set(c0.astype(jnp.float32))

    # Dense, row-normalized adjacency (PyG: row 0 = source, row 1 = target).
    # Mean aggregation divides by in-degree; fold 1/deg into the edge weight and
    # scatter straight into a bf16 buffer (single N^2 pass, no f32 + cast pass).
    src, dst = edge_index[0], edge_index[1]
    deg = jnp.zeros((N,), jnp.float32).at[dst].add(1.0)
    inv_deg = 1.0 / jnp.maximum(deg, 1.0)
    w_norm = (edge_weight.astype(jnp.float32) * inv_deg[dst]).astype(jnp.bfloat16)
    aw_norm = jnp.zeros((Nr, Nr), jnp.bfloat16).at[dst, src].add(w_norm)

    p = _pack_params(params)
    fuse_adj = Nr <= FUSE_ADJ_MAX_N                        # static (shape-based) branch

    if fuse_adj:
        h_pad, adj = _encode(x_pad, aw_norm, h0p, c0p, p, fuse_adj=True)
        adj = adj[:N, :N]
    else:
        h_pad = _encode(x_pad, aw_norm, h0p, c0p, p, fuse_adj=False)
        Np = _round_up(Nr, ADJ_TM)
        h_rows = h_pad.astype(jnp.bfloat16)                # bf16 halves adjacency DMA
        if Np != Nr:
            h_rows = jnp.pad(h_rows, ((0, Np - Nr), (0, 0)))
        adj = _adjacency(h_rows)[:N, :N]

    h = h_pad[:N, :OUT]                                    # [N, 4]
    return h, adj


if __name__ == "__main__":
    key = jax.random.PRNGKey(0)
    ks = jax.random.split(key, 20)

    N, F, E = 256, 8, 1024
    x = jax.random.normal(ks[0], (N, F), jnp.float32)
    src = jax.random.randint(ks[1], (E,), 0, N)
    dst = jax.random.randint(ks[2], (E,), 0, N)
    edge_index = jnp.stack([src, dst], axis=0)                 # [2, E]
    edge_weight = jax.random.uniform(ks[3], (E,), jnp.float32)
    h0 = 0.1 * jax.random.normal(ks[4], (N, H), jnp.float32)
    c0 = 0.1 * jax.random.normal(ks[5], (N, H), jnp.float32)

    def glorot(k, shape):
        fan_in, fan_out = shape[-2], shape[-1]
        limit = (6.0 / (fan_in + fan_out)) ** 0.5
        return jax.random.uniform(k, shape, jnp.float32, -limit, limit)

    s = 1.0 / (H ** 0.5)
    u = lambda k, shape: jax.random.uniform(k, shape, jnp.float32, -s, s)

    # Deterministic synthetic parameters (shapes follow the PyTorch module);
    # recurrent weights are stored pre-transposed so the kernel uses x @ W.
    params = dict(
        wconv=glorot(ks[6], (CONV_LAYERS, H, H)),     # GatedGraphConv.weight
        gru_wih=u(ks[7], (3, H, H)),                  # GRUCell weight_ih (r,z,n), transposed
        gru_whh=u(ks[8], (3, H, H)),                  # GRUCell weight_hh (r,z,n), transposed
        gru_bih=u(ks[9], (3, 1, H)),
        gru_bhh=u(ks[10], (3, 1, H)),
        lstm_wih=u(ks[11], (4, H, H)),                # LSTM weight_ih_l0 (i,f,g,o), transposed
        lstm_whh=u(ks[12], (4, H, H)),                # LSTM weight_hh_l0 (i,f,g,o), transposed
        lstm_bih=u(ks[13], (4, 1, H)),
        lstm_bhh=u(ks[14], (4, 1, H)),
        lin_w=glorot(ks[15], (H, OUT)),               # Linear(32,4) xavier_uniform, transposed
        lin_b=jnp.zeros((1, OUT), jnp.float32),       # bias filled with 0.0
    )

    h, adj = jax.jit(recurrent_dygr_encoder)(x, edge_index, edge_weight, h0, c0, params)
    jax.block_until_ready((h, adj))
    assert h.shape == (N, OUT) and adj.shape == (N, N)
    assert bool(jnp.all(jnp.isfinite(h))) and bool(jnp.all(jnp.isfinite(adj)))
    print("KERNEL_OK")
</pallas_src>

<mosaic_0001>
module attributes {stable_mosaic.version = 11 : i64} {
  func.func private @main(%arg0: i32) attributes {dimension_semantics = [#tpu.dimension_semantics<core_parallel>], iteration_bounds = array<i64: 2>, tpu.core_type = #tpu.core_type<sc_scalar_subcore>, window_params = []} {
    return
  }
}

module attributes {stable_mosaic.version = 11 : i64} {
  func.func private @main(%arg0: i32) attributes {dimension_semantics = [#tpu.dimension_semantics<core_parallel>], iteration_bounds = array<i64: 2>, tpu.core_type = #tpu.core_type<sc_scalar_subcore>, window_params = []} {
    return
  }
}

module attributes {stable_mosaic.version = 11 : i64} {
  func.func @encoder_adj_kernel(%arg0: memref<256x32xf32, #tpu.memory_space<vmem>>, %arg1: memref<256x256xbf16, #tpu.memory_space<vmem>>, %arg2: memref<256x32xf32, #tpu.memory_space<vmem>>, %arg3: memref<256x32xf32, #tpu.memory_space<vmem>>, %arg4: memref<3x32x192xbf16, #tpu.memory_space<vmem>>, %arg5: memref<1x96xf32, #tpu.memory_space<vmem>>, %arg6: memref<1x96xf32, #tpu.memory_space<vmem>>, %arg7: memref<64x128xbf16, #tpu.memory_space<vmem>>, %arg8: memref<1x128xf32, #tpu.memory_space<vmem>>, %arg9: memref<32x128xbf16, #tpu.memory_space<vmem>>, %arg10: memref<1x128xf32, #tpu.memory_space<vmem>>, %arg11: memref<256x128xf32, #tpu.memory_space<vmem>>, %arg12: memref<256x256xf32, #tpu.memory_space<vmem>>) attributes {dimension_semantics = [], scalar_prefetch = 0 : i64, scratch_operands = 0 : i64, tpu.core_type = #tpu.core_type<tc>} {
    %c0 = arith.constant 0 : index
    %c0_0 = arith.constant 0 : index
    %0 = vector.load %arg0[%c0, %c0_0] : memref<256x32xf32, #tpu.memory_space<vmem>>, vector<256x32xf32>
    %c0_1 = arith.constant 0 : index
    %c0_2 = arith.constant 0 : index
    %1 = vector.load %arg1[%c0_1, %c0_2] : memref<256x256xbf16, #tpu.memory_space<vmem>>, vector<256x256xbf16>
    %c0_3 = arith.constant 0 : index
    %c0_4 = arith.constant 0 : index
    %2 = vector.load %arg5[%c0_3, %c0_4] : memref<1x96xf32, #tpu.memory_space<vmem>>, vector<1x96xf32>
    %c0_5 = arith.constant 0 : index
    %c0_6 = arith.constant 0 : index
    %3 = vector.load %arg6[%c0_5, %c0_6] : memref<1x96xf32, #tpu.memory_space<vmem>>, vector<1x96xf32>
    %4 = arith.truncf %0 : vector<256x32xf32> to vector<256x32xbf16>
    %c0_7 = arith.constant 0 : index
    %c0_8 = arith.constant 0 : index
    %c0_9 = arith.constant 0 : index
    %5 = vector.load %arg4[%c0_7, %c0_8, %c0_9] : memref<3x32x192xbf16, #tpu.memory_space<vmem>>, vector<1x32x192xbf16>
    %6 = vector.shape_cast %5 : vector<1x32x192xbf16> to vector<32x192xbf16>
    %cst = arith.constant dense<0.000000e+00> : vector<256x192xf32>
    %7 = tpu.matmul %4, %6, %cst {dimension_numbers = #tpu.dot_dimension_numbers<[1], [0], [0], [1], [0, 0, 1, 1], [], []>} : vector<256x32xbf16>, vector<32x192xbf16>, vector<256x192xf32> -> vector<256x192xf32>
    %8 = vector.extract_strided_slice %7 {offsets = [0, 0], sizes = [256, 96], strides = [1, 1]} : vector<256x192xf32> to vector<256x96xf32>
    %9 = vector.extract_strided_slice %7 {offsets = [0, 96], sizes = [256, 96], strides = [1, 1]} : vector<256x192xf32> to vector<256x96xf32>
    %10 = vector.broadcast %3 : vector<1x96xf32> to vector<256x96xf32>
    %11 = arith.addf %9, %10 : vector<256x96xf32>
    %12 = arith.truncf %8 : vector<256x96xf32> to vector<256x96xbf16>
    %cst_10 = arith.constant dense<0.000000e+00> : vector<256x96xf32>
    %13 = tpu.matmul %1, %12, %cst_10 {dimension_numbers = #tpu.dot_dimension_numbers<[1], [0], [0], [1], [0, 0, 1, 1], [], []>} : vector<256x256xbf16>, vector<256x96xbf16>, vector<256x96xf32> -> vector<256x96xf32>
    %14 = vector.broadcast %2 : vector<1x96xf32> to vector<256x96xf32>
    %15 = arith.addf %13, %14 : vector<256x96xf32>
    %16 = vector.extract_strided_slice %15 {offsets = [0, 0], sizes = [256, 32], strides = [1, 1]} : vector<256x96xf32> to vector<256x32xf32>
    %17 = vector.extract_strided_slice %11 {offsets = [0, 0], sizes = [256, 32], strides = [1, 1]} : vector<256x96xf32> to vector<256x32xf32>
    %18 = arith.addf %16, %17 : vector<256x32xf32>
    %19 = arith.negf %18 : vector<256x32xf32>
    %20 = math.exp %19 : vector<256x32xf32>
    %cst_11 = arith.constant 1.000000e+00 : f32
    %21 = vector.broadcast %cst_11 : f32 to vector<256x32xf32>
    %22 = arith.addf %21, %20 : vector<256x32xf32>
    %23 = arith.divf %21, %22 : vector<256x32xf32>
    %24 = vector.extract_strided_slice %15 {offsets = [0, 32], sizes = [256, 32], strides = [1, 1]} : vector<256x96xf32> to vector<256x32xf32>
    %25 = vector.extract_strided_slice %11 {offsets = [0, 32], sizes = [256, 32], strides = [1, 1]} : vector<256x96xf32> to vector<256x32xf32>
    %26 = arith.addf %24, %25 : vector<256x32xf32>
    %27 = arith.negf %26 : vector<256x32xf32>
    %28 = math.exp %27 : vector<256x32xf32>
    %cst_12 = arith.constant 1.000000e+00 : f32
    %29 = vector.broadcast %cst_12 : f32 to vector<256x32xf32>
    %30 = arith.addf %29, %28 : vector<256x32xf32>
    %31 = arith.divf %29, %30 : vector<256x32xf32>
    %32 = vector.extract_strided_slice %15 {offsets = [0, 64], sizes = [256, 32], strides = [1, 1]} : vector<256x96xf32> to vector<256x32xf32>
    %33 = vector.extract_strided_slice %11 {offsets = [0, 64], sizes = [256, 32], strides = [1, 1]} : vector<256x96xf32> to vector<256x32xf32>
    %34 = arith.mulf %23, %33 : vector<256x32xf32>
    %35 = arith.addf %32, %34 : vector<256x32xf32>
    %36 = math.tanh %35 : vector<256x32xf32>
    %cst_13 = arith.constant 1.000000e+00 : f32
    %37 = vector.broadcast %cst_13 : f32 to vector<256x32xf32>
    %38 = arith.subf %37, %31 : vector<256x32xf32>
    %39 = arith.mulf %38, %36 : vector<256x32xf32>
    %40 = arith.mulf %31, %0 : vector<256x32xf32>
    %41 = arith.addf %39, %40 : vector<256x32xf32>
    %42 = arith.truncf %41 : vector<256x32xf32> to vector<256x32xbf16>
    %c1 = arith.constant 1 : index
    %c0_14 = arith.constant 0 : index
    %c0_15 = arith.constant 0 : index
    %43 = vector.load %arg4[%c1, %c0_14, %c0_15] : memref<3x32x192xbf16, #tpu.memory_space<vmem>>, vector<1x32x192xbf16>
    %44 = vector.shape_cast %43 : vector<1x32x192xbf16> to vector<32x192xbf16>
    %cst_16 = arith.constant dense<0.000000e+00> : vector<256x192xf32>
    %45 = tpu.matmul %42, %44, %cst_16 {dimension_numbers = #tpu.dot_dimension_numbers<[1], [0], [0], [1], [0, 0, 1, 1], [], []>} : vector<256x32xbf16>, vector<32x192xbf16>, vector<256x192xf32> -> vector<256x192xf32>
    %46 = vector.extract_strided_slice %45 {offsets = [0, 0], sizes = [256, 96], strides = [1, 1]} : vector<256x192xf32> to vector<256x96xf32>
    %47 = vector.extract_strided_slice %45 {offsets = [0, 96], sizes = [256, 96], strides = [1, 1]} : vector<256x192xf32> to vector<256x96xf32>
    %48 = vector.broadcast %3 : vector<1x96xf32> to vector<256x96xf32>
    %49 = arith.addf %47, %48 : vector<256x96xf32>
    %50 = arith.truncf %46 : vector<256x96xf32> to vector<256x96xbf16>
    %cst_17 = arith.constant dense<0.000000e+00> : vector<256x96xf32>
    %51 = tpu.matmul %1, %50, %cst_17 {dimension_numbers = #tpu.dot_dimension_numbers<[1], [0], [0], [1], [0, 0, 1, 1], [], []>} : vector<256x256xbf16>, vector<256x96xbf16>, vector<256x96xf32> -> vector<256x96xf32>
    %52 = vector.broadcast %2 : vector<1x96xf32> to vector<256x96xf32>
    %53 = arith.addf %51, %52 : vector<256x96xf32>
    %54 = vector.extract_strided_slice %53 {offsets = [0, 0], sizes = [256, 32], strides = [1, 1]} : vector<256x96xf32> to vector<256x32xf32>
    %55 = vector.extract_strided_slice %49 {offsets = [0, 0], sizes = [256, 32], strides = [1, 1]} : vector<256x96xf32> to vector<256x32xf32>
    %56 = arith.addf %54, %55 : vector<256x32xf32>
    %57 = arith.negf %56 : vector<256x32xf32>
    %58 = math.exp %57 : vector<256x32xf32>
    %cst_18 = arith.constant 1.000000e+00 : f32
    %59 = vector.broadcast %cst_18 : f32 to vector<256x32xf32>
    %60 = arith.addf %59, %58 : vector<256x32xf32>
    %61 = arith.divf %59, %60 : vector<256x32xf32>
    %62 = vector.extract_strided_slice %53 {offsets = [0, 32], sizes = [256, 32], strides = [1, 1]} : vector<256x96xf32> to vector<256x32xf32>
    %63 = vector.extract_strided_slice %49 {offsets = [0, 32], sizes = [256, 32], strides = [1, 1]} : vector<256x96xf32> to vector<256x32xf32>
    %64 = arith.addf %62, %63 : vector<256x32xf32>
    %65 = arith.negf %64 : vector<256x32xf32>
    %66 = math.exp %65 : vector<256x32xf32>
    %cst_19 = arith.constant 1.000000e+00 : f32
    %67 = vector.broadcast %cst_19 : f32 to vector<256x32xf32>
    %68 = arith.addf %67, %66 : vector<256x32xf32>
    %69 = arith.divf %67, %68 : vector<256x32xf32>
    %70 = vector.extract_strided_slice %53 {offsets = [0, 64], sizes = [256, 32], strides = [1, 1]} : vector<256x96xf32> to vector<256x32xf32>
    %71 = vector.extract_strided_slice %49 {offsets = [0, 64], sizes = [256, 32], strides = [1, 1]} : vector<256x96xf32> to vector<256x32xf32>
    %72 = arith.mulf %61, %71 : vector<256x32xf32>
    %73 = arith.addf %70, %72 : vector<256x32xf32>
    %74 = math.tanh %73 : vector<256x32xf32>
    %cst_20 = arith.constant 1.000000e+00 : f32
    %75 = vector.broadcast %cst_20 : f32 to vector<256x32xf32>
    %76 = arith.subf %75, %69 : vector<256x32xf32>
    %77 = arith.mulf %76, %74 : vector<256x32xf32>
    %78 = arith.mulf %69, %41 : vector<256x32xf32>
    %79 = arith.addf %77, %78 : vector<256x32xf32>
    %80 = arith.truncf %79 : vector<256x32xf32> to vector<256x32xbf16>
    %c2 = arith.constant 2 : index
    %c0_21 = arith.constant 0 : index
    %c0_22 = arith.constant 0 : index
    %81 = vector.load %arg4[%c2, %c0_21, %c0_22] : memref<3x32x192xbf16, #tpu.memory_space<vmem>>, vector<1x32x192xbf16>
    %82 = vector.shape_cast %81 : vector<1x32x192xbf16> to vector<32x192xbf16>
    %cst_23 = arith.constant dense<0.000000e+00> : vector<256x192xf32>
    %83 = tpu.matmul %80, %82, %cst_23 {dimension_numbers = #tpu.dot_dimension_numbers<[1], [0], [0], [1], [0, 0, 1, 1], [], []>} : vector<256x32xbf16>, vector<32x192xbf16>, vector<256x192xf32> -> vector<256x192xf32>
    %84 = vector.extract_strided_slice %83 {offsets = [0, 0], sizes = [256, 96], strides = [1, 1]} : vector<256x192xf32> to vector<256x96xf32>
    %85 = vector.extract_strided_slice %83 {offsets = [0, 96], sizes = [256, 96], strides = [1, 1]} : vector<256x192xf32> to vector<256x96xf32>
    %86 = vector.broadcast %3 : vector<1x96xf32> to vector<256x96xf32>
    %87 = arith.addf %85, %86 : vector<256x96xf32>
    %88 = arith.truncf %84 : vector<256x96xf32> to vector<256x96xbf16>
    %cst_24 = arith.constant dense<0.000000e+00> : vector<256x96xf32>
    %89 = tpu.matmul %1, %88, %cst_24 {dimension_numbers = #tpu.dot_dimension_numbers<[1], [0], [0], [1], [0, 0, 1, 1], [], []>} : vector<256x256xbf16>, vector<256x96xbf16>, vector<256x96xf32> -> vector<256x96xf32>
    %90 = vector.broadcast %2 : vector<1x96xf32> to vector<256x96xf32>
    %91 = arith.addf %89, %90 : vector<256x96xf32>
    %92 = vector.extract_strided_slice %91 {offsets = [0, 0], sizes = [256, 32], strides = [1, 1]} : vector<256x96xf32> to vector<256x32xf32>
    %93 = vector.extract_strided_slice %87 {offsets = [0, 0], sizes = [256, 32], strides = [1, 1]} : vector<256x96xf32> to vector<256x32xf32>
    %94 = arith.addf %92, %93 : vector<256x32xf32>
    %95 = arith.negf %94 : vector<256x32xf32>
    %96 = math.exp %95 : vector<256x32xf32>
    %cst_25 = arith.constant 1.000000e+00 : f32
    %97 = vector.broadcast %cst_25 : f32 to vector<256x32xf32>
    %98 = arith.addf %97, %96 : vector<256x32xf32>
    %99 = arith.divf %97, %98 : vector<256x32xf32>
    %100 = vector.extract_strided_slice %91 {offsets = [0, 32], sizes = [256, 32], strides = [1, 1]} : vector<256x96xf32> to vector<256x32xf32>
    %101 = vector.extract_strided_slice %87 {offsets = [0, 32], sizes = [256, 32], strides = [1, 1]} : vector<256x96xf32> to vector<256x32xf32>
    %102 = arith.addf %100, %101 : vector<256x32xf32>
    %103 = arith.negf %102 : vector<256x32xf32>
    %104 = math.exp %103 : vector<256x32xf32>
    %cst_26 = arith.constant 1.000000e+00 : f32
    %105 = vector.broadcast %cst_26 : f32 to vector<256x32xf32>
    %106 = arith.addf %105, %104 : vector<256x32xf32>
    %107 = arith.divf %105, %106 : vector<256x32xf32>
    %108 = vector.extract_strided_slice %91 {offsets = [0, 64], sizes = [256, 32], strides = [1, 1]} : vector<256x96xf32> to vector<256x32xf32>
    %109 = vector.extract_strided_slice %87 {offsets = [0, 64], sizes = [256, 32], strides = [1, 1]} : vector<256x96xf32> to vector<256x32xf32>
    %110 = arith.mulf %99, %109 : vector<256x32xf32>
    %111 = arith.addf %108, %110 : vector<256x32xf32>
    %112 = math.tanh %111 : vector<256x32xf32>
    %cst_27 = arith.constant 1.000000e+00 : f32
    %113 = vector.broadcast %cst_27 : f32 to vector<256x32xf32>
    %114 = arith.subf %113, %107 : vector<256x32xf32>
    %115 = arith.mulf %114, %112 : vector<256x32xf32>
    %116 = arith.mulf %107, %79 : vector<256x32xf32>
    %117 = arith.addf %115, %116 : vector<256x32xf32>
    %c0_28 = arith.constant 0 : index
    %c0_29 = arith.constant 0 : index
    %118 = vector.load %arg2[%c0_28, %c0_29] : memref<256x32xf32, #tpu.memory_space<vmem>>, vector<256x32xf32>
    %119 = tpu.concatenate %117, %118 in 1 : vector<256x32xf32>, vector<256x32xf32> -> vector<256x64xf32>
    %120 = arith.truncf %119 : vector<256x64xf32> to vector<256x64xbf16>
    %c0_30 = arith.constant 0 : index
    %c0_31 = arith.constant 0 : index
    %121 = vector.load %arg7[%c0_30, %c0_31] : memref<64x128xbf16, #tpu.memory_space<vmem>>, vector<64x128xbf16>
    %cst_32 = arith.constant dense<0.000000e+00> : vector<256x128xf32>
    %122 = tpu.matmul %120, %121, %cst_32 {dimension_numbers = #tpu.dot_dimension_numbers<[1], [0], [0], [1], [0, 0, 1, 1], [], []>} : vector<256x64xbf16>, vector<64x128xbf16>, vector<256x128xf32> -> vector<256x128xf32>
    %c0_33 = arith.constant 0 : index
    %c0_34 = arith.constant 0 : index
    %123 = vector.load %arg8[%c0_33, %c0_34] : memref<1x128xf32, #tpu.memory_space<vmem>>, vector<1x128xf32>
    %124 = vector.broadcast %123 : vector<1x128xf32> to vector<256x128xf32>
    %125 = arith.addf %122, %124 : vector<256x128xf32>
    %126 = vector.extract_strided_slice %125 {offsets = [0, 0], sizes = [256, 32], strides = [1, 1]} : vector<256x128xf32> to vector<256x32xf32>
    %127 = arith.negf %126 : vector<256x32xf32>
    %128 = math.exp %127 : vector<256x32xf32>
    %cst_35 = arith.constant 1.000000e+00 : f32
    %129 = vector.broadcast %cst_35 : f32 to vector<256x32xf32>
    %130 = arith.addf %129, %128 : vector<256x32xf32>
    %131 = arith.divf %129, %130 : vector<256x32xf32>
    %132 = vector.extract_strided_slice %125 {offsets = [0, 32], sizes = [256, 32], strides = [1, 1]} : vector<256x128xf32> to vector<256x32xf32>
    %133 = arith.negf %132 : vector<256x32xf32>
    %134 = math.exp %133 : vector<256x32xf32>
    %cst_36 = arith.constant 1.000000e+00 : f32
    %135 = vector.broadcast %cst_36 : f32 to vector<256x32xf32>
    %136 = arith.addf %135, %134 : vector<256x32xf32>
    %137 = arith.divf %135, %136 : vector<256x32xf32>
    %138 = vector.extract_strided_slice %125 {offsets = [0, 64], sizes = [256, 32], strides = [1, 1]} : vector<256x128xf32> to vector<256x32xf32>
    %139 = math.tanh %138 : vector<256x32xf32>
    %140 = vector.extract_strided_slice %125 {offsets = [0, 96], sizes = [256, 32], strides = [1, 1]} : vector<256x128xf32> to vector<256x32xf32>
    %141 = arith.negf %140 : vector<256x32xf32>
    %142 = math.exp %141 : vector<256x32xf32>
    %cst_37 = arith.constant 1.000000e+00 : f32
    %143 = vector.broadcast %cst_37 : f32 to vector<256x32xf32>
    %144 = arith.addf %143, %142 : vector<256x32xf32>
    %145 = arith.divf %143, %144 : vector<256x32xf32>
    %c0_38 = arith.constant 0 : index
    %c0_39 = arith.constant 0 : index
    %146 = vector.load %arg3[%c0_38, %c0_39] : memref<256x32xf32, #tpu.memory_space<vmem>>, vector<256x32xf32>
    %147 = arith.mulf %137, %146 : vector<256x32xf32>
    %148 = arith.mulf %131, %139 : vector<256x32xf32>
    %149 = arith.addf %147, %148 : vector<256x32xf32>
    %150 = math.tanh %149 : vector<256x32xf32>
    %151 = arith.mulf %145, %150 : vector<256x32xf32>
    %cst_40 = arith.constant 0.000000e+00 : f32
    %152 = vector.broadcast %cst_40 : f32 to vector<256x32xf32>
    %153 = arith.maximumf %151, %152 : vector<256x32xf32>
    %154 = arith.truncf %153 : vector<256x32xf32> to vector<256x32xbf16>
    %c0_41 = arith.constant 0 : index
    %c0_42 = arith.constant 0 : index
    %155 = vector.load %arg9[%c0_41, %c0_42] : memref<32x128xbf16, #tpu.memory_space<vmem>>, vector<32x128xbf16>
    %cst_43 = arith.constant dense<0.000000e+00> : vector<256x128xf32>
    %156 = tpu.matmul %154, %155, %cst_43 {dimension_numbers = #tpu.dot_dimension_numbers<[1], [0], [0], [1], [0, 0, 1, 1], [], []>} : vector<256x32xbf16>, vector<32x128xbf16>, vector<256x128xf32> -> vector<256x128xf32>
    %c0_44 = arith.constant 0 : index
    %c0_45 = arith.constant 0 : index
    %157 = vector.load %arg10[%c0_44, %c0_45] : memref<1x128xf32, #tpu.memory_space<vmem>>, vector<1x128xf32>
    %158 = vector.broadcast %157 : vector<1x128xf32> to vector<256x128xf32>
    %159 = arith.addf %156, %158 : vector<256x128xf32>
    %c0_46 = arith.constant 0 : index
    %c0_47 = arith.constant 0 : index
    %160 = vector.load %arg11[%c0_46, %c0_47] : memref<256x128xf32, #tpu.memory_space<vmem>>, vector<256x128xf32>
    tpu.vector_store %arg11[%c0_46, %c0_47], %159 {strides = array<i32>} : memref<256x128xf32, #tpu.memory_space<vmem>>, vector<256x128xf32>,
    %161 = arith.truncf %159 : vector<256x128xf32> to vector<256x128xbf16>
    %cst_48 = arith.constant dense<0.000000e+00> : vector<256x256xf32>
    %162 = tpu.matmul %161, %161, %cst_48 {dimension_numbers = #tpu.dot_dimension_numbers<[1], [1], [0], [0], [0, 0, 1, 0], [], []>} : vector<256x128xbf16>, vector<256x128xbf16>, vector<256x256xf32> -> vector<256x256xf32>
    %163 = arith.negf %162 : vector<256x256xf32>
    %164 = math.exp %163 : vector<256x256xf32>
    %cst_49 = arith.constant 1.000000e+00 : f32
    %165 = vector.broadcast %cst_49 : f32 to vector<256x256xf32>
    %166 = arith.addf %165, %164 : vector<256x256xf32>
    %167 = arith.divf %165, %166 : vector<256x256xf32>
    %c0_50 = arith.constant 0 : index
    %c0_51 = arith.constant 0 : index
    %168 = vector.load %arg12[%c0_50, %c0_51] : memref<256x256xf32, #tpu.memory_space<vmem>>, vector<256x256xf32>
    tpu.vector_store %arg12[%c0_50, %c0_51], %167 {strides = array<i32>} : memref<256x256xf32, #tpu.memory_space<vmem>>, vector<256x256xf32>,
    return
  }
}

</mosaic_0001>

<bundles_post_ra>
// kernel: recurrent_dygr_encoder.1
= control target key start
LH: loop header
LB: loop body
LE: loop exit
PB: predicated region body
PF: predicated region fallthrough
CT: control target
= control target key end

     0   :  { %v15915_v2 = vmov 0   ;;  %s11214_s19 = smov 32   ;;  %vm148_vm0 = vcmask 261120   ;;  %s11215_s16 = smov 96   ;;  %s15902_s0 = inlined_call_operand.vmem [shape: f32[256,32], index: 0, kind: input, shape index: {}]   ;;  %s15903_s1 = inlined_call_operand.vmem [shape: bf16[256,256], index: 1, kind: input, shape index: {}]   ;;  %s15904_s2 = inlined_call_operand.vmem [shape: f32[256,32], index: 2, kind: input, shape index: {}]   ;;  %s15905_s3 = inlined_call_operand.vmem [shape: f32[256,32], index: 3, kind: input, shape index: {}]   ;;  %s15906_s4 = inlined_call_operand.vmem [shape: bf16[3,32,192], index: 4, kind: input, shape index: {}]   ;;  %s15907_s5 = inlined_call_operand.vmem [shape: f32[1,96], index: 5, kind: input, shape index: {}]   ;;  %s15908_s6 = inlined_call_operand.vmem [shape: f32[1,96], index: 6, kind: input, shape index: {}]   ;;  %s15909_s7 = inlined_call_operand.vmem [shape: bf16[64,128], index: 7, kind: input, shape index: {}]   ;;  %s15910_s8 = inlined_call_operand.vmem [shape: f32[1,128], index: 8, kind: input, shape index: {}]   ;;  %s15911_s9 = inlined_call_operand.vmem [shape: bf16[32,128], index: 9, kind: input, shape index: {}]   ;;  %s15912_s10 = inlined_call_operand.vmem [shape: f32[1,128], index: 10, kind: input, shape index: {}]   ;;  %s15913_s11 = inlined_call_operand.vmem [shape: f32[256,128], index: 11, kind: output, shape index: {0}]   ;;  %s15914_s12 = inlined_call_operand.hbm [shape: f32[256,256], index: 12, kind: output, shape index: {1}]  }
   0x1   :  { %v9564_v0 = vld [vmem:[%s15906_s4 + $0x4] ss:$8 sps:$4 sm:$0xff]   ;;  %v9566_v1 = vld [vmem:[%s15906_s4] ss:$8 sps:$4 sm:$0xff]   ;;  %229 = vmatprep.mubr.bf16.mxu0 %v15915_v2  ;;  %309 = vmatprep.mubr.bf16.mxu1 %v15915_v2  ;;  %v9567_v3 = vld [vmem:[%s15906_s4 + $0x14] ss:$8 sps:$4 sm:$0xff]  }
   0x2   :  { %197 = vmatprep.subr.bf16.mxu0 %v9564_v0  ;;  %9393 = vmatprep.subr.bf16.mxu1 %v9564_v0  ;;  %v9569_v4 = vld [vmem:[%s15906_s4 + $0x10] ss:$8 sps:$4 sm:$0xff]   ;;  %v42_v5 = vld [vmem:[%s15902_s0] sm:$0xff]  ;;  %v43_v6 = vld [vmem:[%s15902_s0 + $0x8] sm:$0xff] }
   0x3   :  { %198 = vmatpush1.bf16.msra.mxu0 %v9566_v1  ;;  %9395 = vmatpush1.bf16.msra.mxu1 %v9566_v1  ;;  %v58_v7 = vld [vmem:[%s15902_s0 + $0x80] sm:$0xff]  ;;  %v59_v8 = vld [vmem:[%s15902_s0 + $0x88] sm:$0xff]  ;;  %v108_v9 = vpack.c.bf16 %v43_v6, %v42_v5  ;;  %v44_v11 = vld [vmem:[%s15902_s0 + $0x10] sm:$0xff] }
   0x4   :  { %199 = vmatprep.subr.bf16.mxu0 %v9567_v3  ;;  %9394 = vmatprep.subr.bf16.mxu1 %v9567_v3  ;;  %v116_v10 = vpack.c.bf16 %v59_v8, %v58_v7  ;;  %v45_v12 = vld [vmem:[%s15902_s0 + $0x18] sm:$0xff]  ;;  %v60_v13 = vld [vmem:[%s15902_s0 + $0x90] sm:$0xff]  ;;  %v46_v15 = vld [vmem:[%s15902_s0 + $0x20] sm:$0xff] }
   0x5   :  { %2053 = vrot.lane.b32.xlu1 %v42_v5, %s11214_s19  ;;  %v61_v14 = vld [vmem:[%s15902_s0 + $0x98] sm:$0xff]  ;;  %v8485_v16 = vld [vmem:[%s15908_s6] ss:$0 sm:$0xff]  ;;  %v109_v17 = vpack.c.bf16 %v45_v12, %v44_v11  ;;  %v48_v19 = vld [vmem:[%s15902_s0 + $0x30] sm:$0xff] }
   0x6   :  { %v117_v18 = vpack.c.bf16 %v61_v14, %v60_v13  ;;  %395 = vrot.lane.b32.xlu0 %v8485_v16, %s11215_s16  ;;  %v47_v20 = vld [vmem:[%s15902_s0 + $0x28] sm:$0xff]  ;;  %v62_v21 = vld [vmem:[%s15902_s0 + $0xa0] sm:$0xff]  ;;  %v52_v26 = vld [vmem:[%s15902_s0 + $0x50] sm:$0xff] }
   0x7   :  { %200 = vmatpush1.bf16.msra.mxu0 %v9569_v4  ;;  %9396 = vmatpush1.bf16.msra.mxu1 %v9569_v4  ;;  %v63_v22 = vld [vmem:[%s15902_s0 + $0xa8] sm:$0xff]  ;;  %v50_v23 = vld [vmem:[%s15902_s0 + $0x40] sm:$0xff]  ;;  %v110_v24 = vpack.c.bf16 %v47_v20, %v46_v15  ;;  %v49_v27 = vld [vmem:[%s15902_s0 + $0x38] sm:$0xff] }
   0x8   :  { %v118_v25 = vpack.c.bf16 %v63_v22, %v62_v21  ;;  %v64_v28 = vld [vmem:[%s15902_s0 + $0xb0] sm:$0xff]  ;;  %v65_v29 = vld [vmem:[%s15902_s0 + $0xb8] sm:$0xff]  ;;  %v111_v30 = vpack.c.bf16 %v49_v27, %v48_v19 }
   0x9   :  { %2057 = vrot.lane.b32.xlu1 %v44_v11, %s11214_s19  ;;  %v119_v31 = vpack.c.bf16 %v65_v29, %v64_v28 }
   0xa   :  { %8469 = vmatmul.mubr.msk.bf16.vlgmr.msra.gmra.mrb[0].mxu0 %vm148_vm0, %v108_v9  ;;  %8477 = vmatmul.mubr.msk.bf16.vlgmr.msra.gmra.mrb[0].mxu1 %vm148_vm0, %v116_v10 }
   0xb   :  { %239 = vmatprep.mubr.bf16.mxu0 %v15915_v2  ;;  %319 = vmatprep.mubr.bf16.mxu1 %v15915_v2 }
   0xc   :  { %2055 = vrot.lane.b32.xlu0 %v43_v6, %s11214_s19 }
   0xd   :  { %2061 = vrot.lane.b32.xlu1 %v46_v15, %s11214_s19 }
  0x10   :  { %2059 = vrot.lane.b32.xlu0 %v45_v12, %s11214_s19 }
  0x11   :  { %2065 = vrot.lane.b32.xlu1 %v48_v19, %s11214_s19 }
  0x12   :  { %8470 = vmatmul.mubr.msk.bf16.gmra.mrb[4].mxu0 %vm148_vm0, %v109_v17  ;;  %8478 = vmatmul.mubr.msk.bf16.gmra.mrb[4].mxu1 %vm148_vm0, %v117_v18 }
  0x13   :  { %249 = vmatprep.mubr.bf16.mxu0 %v15915_v2  ;;  %329 = vmatprep.mubr.bf16.mxu1 %v15915_v2 }
  0x14   :  { %2063 = vrot.lane.b32.xlu0 %v47_v20, %s11214_s19 }
  0x15   :  { %2069 = vrot.lane.b32.xlu1 %v50_v23, %s11214_s19 }
  0x19   :  { %2073 = vrot.lane.b32.xlu1 %v52_v26, %s11214_s19 }
  0x1a   :  { %8471 = vmatmul.mubr.msk.bf16.gmra.mrb[8].mxu0 %vm148_vm0, %v110_v24  ;;  %8479 = vmatmul.mubr.msk.bf16.gmra.mrb[8].mxu1 %vm148_vm0, %v118_v25 }
  0x1b   :  { %259 = vmatprep.mubr.bf16.mxu0 %v15915_v2  ;;  %339 = vmatprep.mubr.bf16.mxu1 %v15915_v2 }
  0x1c   :  { %18 = vsyncpa [#allocation3], 0  ;;  %2067 = vrot.lane.b32.xlu0 %v49_v27, %s11214_s19  ;;  %v51_v32 = vld [vmem:[%s15902_s0 + $0x48] sm:$0xff]  ;;  %v66_v33 = vld [vmem:[%s15902_s0 + $0xc0] sm:$0xff]  ;;  %s11216_s25 = smov 64   ;;  %vm6290_vm1 = vcmask 523264  }
  0x1d   :  { %v67_v34 = vld [vmem:[%s15902_s0 + $0xc8] sm:$0xff]  ;;  %v112_v35 = vpack.c.bf16 %v51_v32, %v50_v23  ;;  %v53_v37 = vld [vmem:[%s15902_s0 + $0x58] sm:$0xff]  ;;  %v68_v38 = vld [vmem:[%s15902_s0 + $0xd0] sm:$0xff] }
  0x1e   :  { %v120_v36 = vpack.c.bf16 %v67_v34, %v66_v33  ;;  %v69_v39 = vld [vmem:[%s15902_s0 + $0xd8] sm:$0xff]  ;;  %v113_v40 = vpack.c.bf16 %v53_v37, %v52_v26  ;;  %v11412_v42 = vld [vmem:[%s15902_s0 + $0x60] sm:$0xff]  ;;  %v11419_v43 = vld [vmem:[%s15902_s0 + $0x68] sm:$0xff] }
  0x1f   :  { %v121_v41 = vpack.c.bf16 %v69_v39, %v68_v38  ;;  %v70_v44 = vld [vmem:[%s15902_s0 + $0xe0] sm:$0xff]  ;;  %v71_v45 = vld [vmem:[%s15902_s0 + $0xe8] sm:$0xff]  ;;  %v114_v46 = vpack.c.bf16 %v11419_v43, %v11412_v42  ;;  %v11434_v48 = vld [vmem:[%s15902_s0 + $0x70] sm:$0xff] }
  0x20   :  { %2071 = vrot.lane.b32.xlu0 %v51_v32, %s11214_s19  ;;  %v122_v47 = vpack.c.bf16 %v71_v45, %v70_v44  ;;  %v11441_v49 = vld [vmem:[%s15902_s0 + $0x78] sm:$0xff]  ;;  %v72_v50 = vld [vmem:[%s15902_s0 + $0xf0] sm:$0xff]  ;;  %v11457_v54 = vld [vmem:[%s15903_s1 + $0x4] ss:$8 sps:$4 sm:$0xff]  }
  0x21   :  { %v73_v51 = vld [vmem:[%s15902_s0 + $0xf8] sm:$0xff]  ;;  %v115_v52 = vpack.c.bf16 %v11441_v49, %v11434_v48 }
  0x22   :  { %8472 = vmatmul.mubr.msk.bf16.gmra.mrb[12].mxu0 %vm148_vm0, %v111_v30  ;;  %8480 = vmatmul.mubr.msk.bf16.gmra.mrb[12].mxu1 %vm148_vm0, %v119_v31  ;;  %v123_v53 = vpack.c.bf16 %v73_v51, %v72_v50 }
  0x23   :  { %269 = vmatprep.mubr.bf16.mxu0 %v15915_v2  ;;  %349 = vmatprep.mubr.bf16.mxu1 %v15915_v2 }
  0x24   :  { %2075 = vrot.lane.b32.xlu0 %v53_v37, %s11214_s19 }
  0x2a   :  { %8473 = vmatmul.mubr.msk.bf16.gmra.mrb[16].mxu0 %vm148_vm0, %v112_v35  ;;  %8481 = vmatmul.mubr.msk.bf16.gmra.mrb[16].mxu1 %vm148_vm0, %v120_v36 }
  0x2b   :  { %279 = vmatprep.mubr.bf16.mxu0 %v15915_v2  ;;  %359 = vmatprep.mubr.bf16.mxu1 %v15915_v2 }
  0x32   :  { %8474 = vmatmul.mubr.msk.bf16.gmra.mrb[20].mxu0 %vm148_vm0, %v113_v40  ;;  %8482 = vmatmul.mubr.msk.bf16.gmra.mrb[20].mxu1 %vm148_vm0, %v121_v41 }
  0x33   :  { %289 = vmatprep.mubr.bf16.mxu0 %v15915_v2  ;;  %369 = vmatprep.mubr.bf16.mxu1 %v15915_v2 }
  0x3a   :  { %8475 = vmatmul.mubr.msk.bf16.gmra.mrb[24].mxu0 %vm148_vm0, %v114_v46  ;;  %8483 = vmatmul.mubr.msk.bf16.gmra.mrb[24].mxu1 %vm148_vm0, %v122_v47 }
  0x3b   :  { %299 = vmatprep.mubr.bf16.mxu0 %v15915_v2  ;;  %379 = vmatprep.mubr.bf16.mxu1 %v15915_v2 }
  0x42   :  { %8476 = vmatmul.mubr.msk.bf16.gmra.mrb[28].mxu0 %vm148_vm0, %v115_v52  ;;  %8484 = vmatmul.mubr.msk.bf16.gmra.mrb[28].mxu1 %vm148_vm0, %v123_v53 }
  0x43   :  { %2382 = vmatprep.mubr.bf16.mxu0 %v15915_v2  ;;  %676 = vmatprep.mubr.bf16.mxu1 %v11457_v54 }
  0x78   :  { %v11460_v55 = vpop.permute.xlu0 %395 }
  0x79   :  { %16021 = vst [vmem:[#allocation5_spill] sm:$0xff] %v11460_v55 }
  0xdd   :  { %v231_v56 = vpop.f32.mrb[0].mxu0  ;;  %v311_v57 = vpop.f32.mrb[0].mxu1 }
  0xde   :  { %v398_v58 = vadd.f32 %v11460_v55, %v231_v56  ;;  %v430_v59 = vadd.f32 %v11460_v55, %v311_v57  ;;  %v233_v60 = vpop.f32.mrb[1].mxu0  ;;  %v313_v61 = vpop.f32.mrb[1].mxu1 }
  0xdf   :  { %v235_v62 = vpop.f32.mrb[2].mxu0  ;;  %v315_v63 = vpop.f32.mrb[2].mxu1  ;;  %v399_v5 = vadd.f32 %v11460_v55, %v233_v60  ;;  %v431_v9 = vadd.f32 %v11460_v55, %v313_v61 }
  0xe0   :  { %v462_v0 = vpack.c.bf16 %v235_v62, %v231_v56  ;;  %v470_v1 = vpack.c.bf16 %v315_v63, %v311_v57  ;;  %v317_v3 = vpop.f32.mrb[3].mxu1  ;;  %869 = vrot.lane.b32.xlu1 %v430_v59, %s11214_s19  ;;  %v237_v4 = vpop.f32.mrb[3].mxu0  ;;  %837 = vrot.lane.b32.xlu0 %v398_v58, %s11214_s19  ;;  %v432_v6 = vadd.f32 %v11460_v55, %v315_v63 }
  0xe1   :  { %v401_v12 = vadd.f32 %v11460_v55, %v237_v4  ;;  %v433_v19 = vadd.f32 %v11460_v55, %v317_v3  ;;  %v400_v30 = vadd.f32 %v11460_v55, %v235_v62 }
  0xe2   :  { %8895 = vmatprep.subr.bf16.mxu1 %v470_v1 }
  0xe3   :  { %8896 = vmatpush3.bf16.msra.mxu1 %v462_v0 }
  0xe4   :  { %1509 = vrot.lane.b32.xlu1 %v399_v5, %s11215_s16  ;;  %871 = vrot.lane.b32.xlu0 %v432_v6, %s11214_s19 }
  0xe5   :  { %v241_v7 = vpop.f32.mrb[4].mxu0  ;;  %v321_v8 = vpop.f32.mrb[4].mxu1 }
  0xe6   :  { %v243_v10 = vpop.f32.mrb[5].mxu0  ;;  %v11471_v11 = vpop.f32.mrb[5].mxu1  ;;  %v402_v33 = vadd.f32 %v11460_v55, %v241_v7  ;;  %v434_v45 = vadd.f32 %v11460_v55, %v321_v8 }
  0xe7   :  { %v245_v13 = vpop.f32.mrb[6].mxu0  ;;  %v325_v14 = vpop.f32.mrb[6].mxu1  ;;  %v403_v51 = vadd.f32 %v11460_v55, %v243_v10  ;;  %v435_v63 = vadd.f32 %v11460_v55, %v11471_v11 }
  0xe8   :  { %v463_v15 = vpack.c.bf16 %v245_v13, %v241_v7  ;;  %v471_v16 = vpack.c.bf16 %v325_v14, %v321_v8  ;;  %v327_v17 = vpop.f32.mrb[7].mxu1  ;;  %1541 = vrot.lane.b32.xlu1 %v431_v9, %s11215_s16  ;;  %v247_v18 = vpop.f32.mrb[7].mxu0  ;;  %1511 = vrot.lane.b32.xlu0 %v401_v12, %s11215_s16  ;;  %v404_v36 = vadd.f32 %v11460_v55, %v245_v13 }
  0xe9   :  { %v436_v46 = vadd.f32 %v11460_v55, %v325_v14  ;;  %v405_v56 = vadd.f32 %v11460_v55, %v247_v18  ;;  %v437_v0 = vadd.f32 %v11460_v55, %v327_v17 }
  0xea   :  { %8897 = vmatprep.subr.bf16.mxu1 %v471_v16 }
  0xeb   :  { %8898 = vmatpush3.bf16.msra.mxu1 %v463_v15 }
  0xec   :  { %1189 = vrot.lane.b32.xlu1 %v399_v5, %s11214_s19  ;;  %1543 = vrot.lane.b32.xlu0 %v433_v19, %s11215_s16 }
  0xed   :  { %v11479_v20 = vpop.f32.mrb[8].mxu0  ;;  %v11481_v21 = vpop.f32.mrb[8].mxu1 }
  0xee   :  { %v11483_v22 = vpop.f32.mrb[9].mxu0  ;;  %v11485_v23 = vpop.f32.mrb[9].mxu1  ;;  %v406_v14 = vadd.f32 %v11460_v55, %v11479_v20 }
  0xef   :  { %v11487_v24 = vpop.f32.mrb[10].mxu0  ;;  %v11489_v25 = vpop.f32.mrb[10].mxu1 }
  0xf0   :  { %v464_v26 = vpack.c.bf16 %v11487_v24, %v11479_v20  ;;  %v472_v27 = vpack.c.bf16 %v11489_v25, %v11481_v21  ;;  %v11495_v28 = vpop.f32.mrb[11].mxu1  ;;  %1221 = vrot.lane.b32.xlu1 %v431_v9, %s11214_s19  ;;  %v11498_v29 = vpop.f32.mrb[11].mxu0  ;;  %1191 = vrot.lane.b32.xlu0 %v401_v12, %s11214_s19  ;;  %v408_v17 = vadd.f32 %v11460_v55, %v11487_v24 }
  0xf1   :  { %v438_v24 = vadd.f32 %v11460_v55, %v11481_v21  ;;  %v409_v21 = vadd.f32 %v11460_v55, %v11498_v29  ;;  %v11645_v29 = vadd.f32 %v11460_v55, %v11485_v23 }
  0xf2   :  { %8899 = vmatprep.subr.bf16.mxu1 %v472_v27 }
  0xf3   :  { %8900 = vmatpush3.bf16.msra.mxu1 %v464_v26 }
  0xf4   :  { %839 = vrot.lane.b32.xlu1 %v400_v30, %s11214_s19  ;;  %1223 = vrot.lane.b32.xlu0 %v433_v19, %s11214_s19 }
  0xf5   :  { %v11504_v31 = vpop.f32.mrb[12].mxu0  ;;  %v11506_v32 = vpop.f32.mrb[12].mxu1 }
  0xf6   :  { %v11509_v34 = vpop.f32.mrb[13].mxu0  ;;  %v11511_v35 = vpop.f32.mrb[13].mxu1  ;;  %v410_v23 = vadd.f32 %v11460_v55, %v11504_v31 }
  0xf7   :  { %v11514_v37 = vpop.f32.mrb[14].mxu0  ;;  %v11516_v38 = vpop.f32.mrb[14].mxu1 }
  0xf8   :  { %v465_v39 = vpack.c.bf16 %v11514_v37, %v11504_v31  ;;  %v473_v40 = vpack.c.bf16 %v11516_v38, %v11506_v32  ;;  %v11522_v41 = vpop.f32.mrb[15].mxu1  ;;  %841 = vrot.lane.b32.xlu1 %v402_v33, %s11214_s19  ;;  %v11525_v44 = vpop.f32.mrb[15].mxu0  ;;  %843 = vrot.lane.b32.xlu0 %v404_v36, %s11214_s19  ;;  %v440_v33 = vadd.f32 %v11460_v55, %v11489_v25 }
  0xf9   :  { %v444_v31 = vadd.f32 %v11460_v55, %v11516_v38  ;;  %v11695_v38 = vadd.f32 %v11460_v55, %v11511_v35  ;;  %v9581_v35 = vld [vmem:[%s15903_s1 + $0x30] ss:$8 sps:$4 sm:$0xff]  }
  0xfa   :  { %8901 = vmatprep.subr.bf16.mxu1 %v473_v40  ;;  %v407_v40 = vadd.f32 %v11460_v55, %v11483_v22 }
  0xfb   :  { %8902 = vmatpush3.bf16.msra.mxu1 %v465_v39 }
  0xfc   :  { %873 = vrot.lane.b32.xlu1 %v434_v45, %s11214_s19  ;;  %875 = vrot.lane.b32.xlu0 %v436_v46, %s11214_s19 }
  0xfd   :  { %v11532_v47 = vpop.f32.mrb[16].mxu0  ;;  %v11534_v50 = vpop.f32.mrb[16].mxu1 }
  0xfe   :  { %v11537_v52 = vpop.f32.mrb[17].mxu0  ;;  %v11539_v53 = vpop.f32.mrb[17].mxu1 }
  0xff   :  { %v11542_v57 = vpop.f32.mrb[18].mxu0  ;;  %v11544_v58 = vpop.f32.mrb[18].mxu1 }
 0x100   :  { %v466_v59 = vpack.c.bf16 %v11542_v57, %v11532_v47  ;;  %v474_v60 = vpack.c.bf16 %v11544_v58, %v11534_v50  ;;  %v11550_v61 = vpop.f32.mrb[19].mxu1  ;;  %1513 = vrot.lane.b32.xlu1 %v403_v51, %s11215_s16  ;;  %v11553_v62 = vpop.f32.mrb[19].mxu0  ;;  %1515 = vrot.lane.b32.xlu0 %v405_v56, %s11215_s16 }
 0x102   :  { %8903 = vmatprep.subr.bf16.mxu1 %v474_v60 }
 0x103   :  { %8904 = vmatpush3.bf16.msra.mxu1 %v466_v59 }
 0x104   :  { %1545 = vrot.lane.b32.xlu1 %v435_v63, %s11215_s16  ;;  %1547 = vrot.lane.b32.xlu0 %v437_v0, %s11215_s16 }
 0x105   :  { %v11561_v1 = vpop.f32.mrb[20].mxu0  ;;  %v11563_v3 = vpop.f32.mrb[20].mxu1 }
 0x106   :  { %v11565_v4 = vpop.f32.mrb[21].mxu0  ;;  %v11567_v5 = vpop.f32.mrb[21].mxu1 }
 0x107   :  { %v11569_v6 = vpop.f32.mrb[22].mxu0  ;;  %v11571_v7 = vpop.f32.mrb[22].mxu1 }
 0x108   :  { %v467_v8 = vpack.c.bf16 %v11569_v6, %v11561_v1  ;;  %v475_v9 = vpack.c.bf16 %v11571_v7, %v11563_v3  ;;  %v11577_v10 = vpop.f32.mrb[23].mxu1  ;;  %1193 = vrot.lane.b32.xlu1 %v403_v51, %s11214_s19  ;;  %v11580_v11 = vpop.f32.mrb[23].mxu0  ;;  %1195 = vrot.lane.b32.xlu0 %v405_v56, %s11214_s19 }
 0x10a   :  { %8905 = vmatprep.subr.bf16.mxu1 %v475_v9  ;;  %v412_v9 = vadd.f32 %v11460_v55, %v11514_v37  ;;  %v411_v37 = vadd.f32 %v11460_v55, %v11509_v34  ;;  %v11697_v34 = vpop.permute.xlu1 %2053 }
 0x10b   :  { %8906 = vmatpush3.bf16.msra.mxu1 %v467_v8  ;;  %v9573_v8 = vld [vmem:[%s15903_s1 + $0x14] ss:$8 sps:$4 sm:$0xff]   ;;  %16022 = vst [vmem:[#allocation6_spill] sm:$0xff] %v11697_v34 }
 0x10c   :  { %1225 = vrot.lane.b32.xlu1 %v435_v63, %s11214_s19  ;;  %1227 = vrot.lane.b32.xlu0 %v437_v0, %s11214_s19  ;;  %v9570_v63 = vld [vmem:[%s15903_s1] ss:$8 sps:$4 sm:$0xff]   ;;  %v11652_v0 = vadd.f32 %v11460_v55, %v11495_v28  ;;  %v9575_v28 = vld [vmem:[%s15903_s1 + $0x10] ss:$8 sps:$4 sm:$0xff]  }
 0x10d   :  { %v11585_v12 = vpop.f32.mrb[24].mxu0  ;;  %v11587_v13 = vpop.f32.mrb[24].mxu1 }
 0x10e   :  { %v11591_v15 = vpop.f32.mrb[25].mxu0  ;;  %v11593_v16 = vpop.f32.mrb[25].mxu1 }
 0x10f   :  { %v11597_v18 = vpop.f32.mrb[26].mxu0  ;;  %v11599_v19 = vpop.f32.mrb[26].mxu1 }
 0x110   :  { %v468_v26 = vpack.c.bf16 %v11597_v18, %v11585_v12  ;;  %v476_v27 = vpack.c.bf16 %v11599_v19, %v11587_v13  ;;  %v11605_v30 = vpop.f32.mrb[27].mxu1  ;;  %845 = vrot.lane.b32.xlu1 %v406_v14, %s11214_s19  ;;  %v11608_v20 = vpop.f32.mrb[27].mxu0  ;;  %847 = vrot.lane.b32.xlu0 %v408_v17, %s11214_s19  ;;  %v9576_v14 = vld [vmem:[%s15903_s1 + $0x24] ss:$8 sps:$4 sm:$0xff]   ;;  %v442_v17 = vadd.f32 %v11460_v55, %v11506_v32  ;;  %v9579_v32 = vld [vmem:[%s15903_s1 + $0x34] ss:$8 sps:$4 sm:$0xff]  }
 0x112   :  { %8907 = vmatprep.subr.bf16.mxu1 %v476_v27  ;;  %v413_v27 = vadd.f32 %v11460_v55, %v11525_v44  ;;  %v11703_v44 = vpop.permute.xlu0 %2055 }
 0x113   :  { %8908 = vmatpush3.bf16.msra.mxu1 %v468_v26  ;;  %v9578_v26 = vld [vmem:[%s15903_s1 + $0x20] ss:$8 sps:$4 sm:$0xff]   ;;  %16023 = vst [vmem:[#allocation7_spill] sm:$0xff] %v11703_v44 }
 0x114   :  { %877 = vrot.lane.b32.xlu1 %v438_v24, %s11214_s19  ;;  %879 = vrot.lane.b32.xlu0 %v440_v33, %s11214_s19  ;;  %v11701_v24 = vadd.f32 %v11460_v55, %v11522_v41  ;;  %v9582_v33 = vld [vmem:[%s15903_s1 + $0x44] ss:$8 sps:$4 sm:$0xff]   ;;  %v11716_v41 = vpop.permute.xlu1 %2057 }
 0x115   :  { %v11617_v36 = vpop.f32.mrb[28].mxu0  ;;  %v11619_v39 = vpop.f32.mrb[28].mxu1  ;;  %16024 = vst [vmem:[#allocation8_spill] sm:$0xff] %v11716_v41 }
 0x116   :  { %v11623_v45 = vpop.f32.mrb[29].mxu0  ;;  %v11625_v46 = vpop.f32.mrb[29].mxu1 }
 0x117   :  { %v11629_v25 = vpop.f32.mrb[30].mxu0  ;;  %v11631_v51 = vpop.f32.mrb[30].mxu1 }
 0x118   :  { %v469_v56 = vpack.c.bf16 %v11629_v25, %v11617_v36  ;;  %v477_v59 = vpack.c.bf16 %v11631_v51, %v11619_v39  ;;  %v11637_v60 = vpop.f32.mrb[31].mxu1  ;;  %1517 = vrot.lane.b32.xlu1 %v407_v40, %s11215_s16  ;;  %v11640_v22 = vpop.f32.mrb[31].mxu0  ;;  %1519 = vrot.lane.b32.xlu0 %v409_v21, %s11215_s16 }
 0x11a   :  { %8909 = vmatprep.subr.bf16.mxu1 %v477_v59  ;;  %v446_v59 = vadd.f32 %v11460_v55, %v11534_v50  ;;  %v415_v50 = vadd.f32 %v11460_v55, %v11537_v52  ;;  %v9587_v52 = vld [vmem:[%s15903_s1 + $0x50] ss:$8 sps:$4 sm:$0xff]  }
 0x11b   :  { %8910 = vmatpush3.bf16.msra.mxu1 %v469_v56  ;;  %v416_v56 = vadd.f32 %v11460_v55, %v11542_v57  ;;  %v9585_v57 = vld [vmem:[%s15903_s1 + $0x54] ss:$8 sps:$4 sm:$0xff]  }
 0x11c   :  { %1549 = vrot.lane.b32.xlu1 %v11645_v29, %s11215_s16  ;;  %1551 = vrot.lane.b32.xlu0 %v11652_v0, %s11215_s16 }
 0x11e   :  { %677 = vmatmul.mubr.bf16.vlgmr.msra.gmra.mrb[32].mxu1 %v9570_v63  ;;  %v9584_v63 = vld [vmem:[%s15903_s1 + $0x40] ss:$8 sps:$4 sm:$0xff]  }
 0x11f   :  { %684 = vmatprep.mubr.bf16.mxu1 %v9573_v8  ;;  %v11732_v8 = vpop.permute.xlu1 %2061 }
 0x120   :  { %1197 = vrot.lane.b32.xlu1 %v407_v40, %s11214_s19  ;;  %1199 = vrot.lane.b32.xlu0 %v409_v21, %s11214_s19  ;;  %v11719_v40 = vpop.permute.xlu0 %2059  ;;  %v414_v21 = vadd.f32 %v11460_v55, %v11532_v47  ;;  %16026 = vst [vmem:[#allocation10_spill] sm:$0xff] %v11732_v8  ;;  %v448_v47 = vadd.f32 %v11460_v55, %v11544_v58 }
 0x121   :  { %16025 = vst [vmem:[#allocation9_spill] sm:$0xff] %v11719_v40  ;;  %v12060_v40 = vld [vmem:[%s15907_s5] ss:$0 sm:$0xff] }
 0x123   :  { %v11748_v58 = vpop.permute.xlu1 %2065 }
 0x124   :  { %849 = vrot.lane.b32.xlu1 %v410_v23, %s11214_s19  ;;  %851 = vrot.lane.b32.xlu0 %v412_v9, %s11214_s19  ;;  %v11736_v23 = vpop.permute.xlu0 %2063  ;;  %16028 = vst [vmem:[#allocation12_spill] sm:$0xff] %v11748_v58 }
 0x125   :  { %16027 = vst [vmem:[#allocation11_spill] sm:$0xff] %v11736_v23 }
 0x126   :  { %685 = vmatmul.mubr.bf16.gmra.mrb[36].mxu1 %v9575_v28  ;;  %v417_v28 = vadd.f32 %v11460_v55, %v11553_v62  ;;  %v11762_v62 = vadd.f32 %v11460_v55, %v11550_v61  ;;  %v418_v61 = vadd.f32 %v11460_v55, %v11561_v1  ;;  %v450_v1 = vadd.f32 %v11460_v55, %v11563_v3 }
 0x127   :  { %692 = vmatprep.mubr.bf16.mxu1 %v9576_v14  ;;  %v11755_v14 = vadd.f32 %v11460_v55, %v11539_v53  ;;  %v11771_v53 = vpop.permute.xlu1 %2069  ;;  %v421_v3 = vadd.f32 %v11460_v55, %v11580_v11  ;;  %v11823_v11 = vadd.f32 %v11460_v55, %v11577_v10  ;;  %v422_v10 = vadd.f32 %v11460_v55, %v11585_v12  ;;  %v9599_v12 = vld [vmem:[%s15903_s1 + $0x90] ss:$8 sps:$4 sm:$0xff]  }
 0x128   :  { %881 = vrot.lane.b32.xlu1 %v442_v17, %s11214_s19  ;;  %883 = vrot.lane.b32.xlu0 %v444_v31, %s11214_s19  ;;  %v11751_v9 = vpop.permute.xlu0 %2067  ;;  %16031 = vst [vmem:[#allocation15_spill] sm:$0xff] %v11762_v62  ;;  %v9588_v17 = vld [vmem:[%s15903_s1 + $0x64] ss:$8 sps:$4 sm:$0xff]   ;;  %16032 = vst [vmem:[#allocation16_spill] sm:$0xff] %v11771_v53 }
 0x129   :  { %16029 = vst [vmem:[#allocation13_spill] sm:$0xff] %v11751_v9  ;;  %16030 = vst [vmem:[#allocation14_spill] sm:$0xff] %v11755_v14 }
 0x12a   :  { %16037 = vst [vmem:[#allocation21_spill] sm:$0xff] %v11823_v11 }
 0x12c   :  { %1521 = vrot.lane.b32.xlu1 %v411_v37, %s11215_s16  ;;  %1523 = vrot.lane.b32.xlu0 %v413_v27, %s11215_s16  ;;  %v11773_v31 = vpop.permute.xlu0 %2071 }
 0x12d   :  { %16033 = vst [vmem:[#allocation17_spill] sm:$0xff] %v11773_v31 }
 0x12e   :  { %693 = vmatmul.mubr.bf16.gmra.mrb[40].mxu1 %v9578_v26  ;;  %v420_v26 = vadd.f32 %v11460_v55, %v11569_v6  ;;  %v419_v6 = vadd.f32 %v11460_v55, %v11565_v4  ;;  %v11817_v4 = vadd.f32 %v11460_v55, %v11567_v5  ;;  %v9596_v5 = vld [vmem:[%s15903_s1 + $0x80] ss:$8 sps:$4 sm:$0xff]  }
 0x12f   :  { %700 = vmatprep.mubr.bf16.mxu1 %v9579_v32  ;;  %v11788_v32 = vpop.permute.xlu1 %2073 }
 0x130   :  { %1553 = vrot.lane.b32.xlu1 %v11695_v38, %s11215_s16  ;;  %1555 = vrot.lane.b32.xlu0 %v11701_v24, %s11215_s16  ;;  %16034 = vst [vmem:[#allocation18_spill] sm:$0xff] %v11788_v32  ;;  %16036 = vst [vmem:[#allocation20_spill] sm:$0xff] %v11817_v4 }
 0x134   :  { %1201 = vrot.lane.b32.xlu1 %v411_v37, %s11214_s19  ;;  %1203 = vrot.lane.b32.xlu0 %v413_v27, %s11214_s19  ;;  %v9590_v37 = vld [vmem:[%s15903_s1 + $0x60] ss:$8 sps:$4 sm:$0xff]   ;;  %v9591_v27 = vld [vmem:[%s15903_s1 + $0x74] ss:$8 sps:$4 sm:$0xff]  }
 0x136   :  { %701 = vmatmul.mubr.bf16.gmra.mrb[44].mxu1 %v9581_v35  ;;  %v11791_v35 = vpop.permute.xlu0 %2075 }
 0x137   :  { %708 = vmatprep.mubr.bf16.mxu1 %v9582_v33  ;;  %16035 = vst [vmem:[#allocation19_spill] sm:$0xff] %v11791_v35  ;;  %v452_v33 = vadd.f32 %v11460_v55, %v11571_v7  ;;  %v9594_v7 = vld [vmem:[%s15903_s1 + $0x84] ss:$8 sps:$4 sm:$0xff]  }
 0x138   :  { %853 = vrot.lane.b32.xlu1 %v414_v21, %s11214_s19  ;;  %855 = vrot.lane.b32.xlu0 %v416_v56, %s11214_s19  ;;  %v9593_v56 = vld [vmem:[%s15903_s1 + $0x70] ss:$8 sps:$4 sm:$0xff]  }
 0x13c   :  { %885 = vrot.lane.b32.xlu1 %v446_v59, %s11214_s19  ;;  %887 = vrot.lane.b32.xlu0 %v448_v47, %s11214_s19 }
 0x13e   :  { %709 = vmatmul.mubr.bf16.gmra.mrb[48].mxu1 %v9584_v63 }
 0x13f   :  { %716 = vmatprep.mubr.bf16.mxu1 %v9585_v57  ;;  %v9597_v57 = vld [vmem:[%s15903_s1 + $0x94] ss:$8 sps:$4 sm:$0xff]  }
 0x140   :  { %1525 = vrot.lane.b32.xlu1 %v415_v50, %s11215_s16  ;;  %1527 = vrot.lane.b32.xlu0 %v417_v28, %s11215_s16 }
 0x144   :  { %1557 = vrot.lane.b32.xlu1 %v11755_v14, %s11215_s16  ;;  %1559 = vrot.lane.b32.xlu0 %v11762_v62, %s11215_s16 }
 0x146   :  { %717 = vmatmul.mubr.bf16.gmra.mrb[52].mxu1 %v9587_v52 }
 0x147   :  { %724 = vmatprep.mubr.bf16.mxu1 %v9588_v17  ;;  %v454_v17 = vadd.f32 %v11460_v55, %v11587_v13  ;;  %v423_v13 = vadd.f32 %v11460_v55, %v11591_v15  ;;  %v11882_v15 = vadd.f32 %v11460_v55, %v11605_v30 }
 0x148   :  { %1205 = vrot.lane.b32.xlu1 %v415_v50, %s11214_s19  ;;  %1207 = vrot.lane.b32.xlu0 %v417_v28, %s11214_s19  ;;  %v424_v28 = vadd.f32 %v11460_v55, %v11597_v18  ;;  %v9600_v18 = vld [vmem:[%s15903_s1 + $0xa4] ss:$8 sps:$4 sm:$0xff]  }
 0x149   :  { %16041 = vst [vmem:[#allocation25_spill] sm:$0xff] %v11882_v15 }
 0x14c   :  { %857 = vrot.lane.b32.xlu1 %v418_v61, %s11214_s19  ;;  %859 = vrot.lane.b32.xlu0 %v420_v26, %s11214_s19 }
 0x14e   :  { %725 = vmatmul.mubr.bf16.gmra.mrb[56].mxu1 %v9590_v37  ;;  %v456_v37 = vadd.f32 %v11460_v55, %v11599_v19  ;;  %v11875_v19 = vadd.f32 %v11460_v55, %v11593_v16 }
 0x14f   :  { %732 = vmatprep.mubr.bf16.mxu1 %v9591_v27  ;;  %v425_v27 = vadd.f32 %v11460_v55, %v11608_v20 }
 0x150   :  { %889 = vrot.lane.b32.xlu1 %v450_v1, %s11214_s19  ;;  %891 = vrot.lane.b32.xlu0 %v452_v33, %s11214_s19  ;;  %16040 = vst [vmem:[#allocation24_spill] sm:$0xff] %v11875_v19  ;;  %v9602_v33 = vld [vmem:[%s15903_s1 + $0xa0] ss:$8 sps:$4 sm:$0xff]  }
 0x152   :  { %v11801_v21 = vpop.permute.xlu1 %869  ;;  %v11808_v59 = vpop.permute.xlu0 %837 }
 0x154   :  { %1529 = vrot.lane.b32.xlu1 %v419_v6, %s11215_s16  ;;  %1531 = vrot.lane.b32.xlu0 %v421_v3, %s11215_s16 }
 0x156   :  { %v11819_v63 = vpop.permute.xlu1 %1509  ;;  %733 = vmatmul.mubr.bf16.gmra.mrb[60].mxu1 %v9593_v56  ;;  %v11827_v47 = vpop.permute.xlu0 %871  ;;  %v426_v56 = vadd.f32 %v11460_v55, %v11617_v36  ;;  %v458_v36 = vadd.f32 %v11460_v55, %v11619_v39  ;;  %v11943_v39 = vadd.f32 %v11460_v55, %v11625_v46  ;;  %v429_v46 = vadd.f32 %v11460_v55, %v11640_v22 }
 0x157   :  { %740 = vmatprep.mubr.bf16.mxu1 %v9594_v7  ;;  %v428_v7 = vadd.f32 %v11460_v55, %v11629_v25 }
 0x158   :  { %1561 = vrot.lane.b32.xlu1 %v11817_v4, %s11215_s16  ;;  %1563 = vrot.lane.b32.xlu0 %v11823_v11, %s11215_s16  ;;  %16044 = vst [vmem:[#allocation28_spill] sm:$0xff] %v11943_v39 }
 0x15a   :  { %v11837_v50 = vpop.permute.xlu1 %1541  ;;  %v11845_v52 = vpop.permute.xlu0 %1511 }
 0x15c   :  { %1209 = vrot.lane.b32.xlu1 %v419_v6, %s11214_s19  ;;  %1211 = vrot.lane.b32.xlu0 %v421_v3, %s11214_s19  ;;  %v9603_v6 = vld [vmem:[%s15903_s1 + $0xb4] ss:$8 sps:$4 sm:$0xff]   ;;  %v9605_v3 = vld [vmem:[%s15903_s1 + $0xb0] ss:$8 sps:$4 sm:$0xff]  }
 0x15e   :  { %741 = vmatmul.mubr.bf16.gmra.mrb[64].mxu1 %v9596_v5  ;;  %v11851_v61 = vpop.permute.xlu1 %1189  ;;  %v11862_v26 = vpop.permute.xlu0 %1543  ;;  %v9606_v5 = vld [vmem:[%s15903_s1 + $0xc4] ss:$8 sps:$4 sm:$0xff]  }
 0x15f   :  { %748 = vmatprep.mubr.bf16.mxu1 %v9597_v57  ;;  %16038 = vst [vmem:[#allocation22_spill] sm:$0xff] %v11851_v61 }
 0x160   :  { %861 = vrot.lane.b32.xlu1 %v422_v10, %s11214_s19  ;;  %863 = vrot.lane.b32.xlu0 %v424_v28, %s11214_s19  ;;  %v9608_v28 = vld [vmem:[%s15903_s1 + $0xc0] ss:$8 sps:$4 sm:$0xff]  }
 0x162   :  { %v11869_v1 = vpop.permute.xlu1 %1221  ;;  %v11884_v20 = vpop.permute.xlu0 %1191 }
 0x163   :  { %16039 = vst [vmem:[#allocation23_spill] sm:$0xff] %v11869_v1  ;;  %16042 = vst [vmem:[#allocation26_spill] sm:$0xff] %v11884_v20 }
 0x164   :  { %893 = vrot.lane.b32.xlu1 %v454_v17, %s11214_s19  ;;  %895 = vrot.lane.b32.xlu0 %v456_v37, %s11214_s19  ;;  %v9609_v17 = vld [vmem:[%s15903_s1 + $0xd4] ss:$8 sps:$4 sm:$0xff]  }
 0x166   :  { %749 = vmatmul.mubr.bf16.gmra.mrb[68].mxu1 %v9599_v12  ;;  %v11893_v16 = vpop.permute.xlu1 %839  ;;  %v11896_v30 = vpop.permute.xlu0 %1223 }
 0x167   :  { %756 = vmatprep.mubr.bf16.mxu1 %v9600_v18  ;;  %16043 = vst [vmem:[#allocation27_spill] sm:$0xff] %v11896_v30  ;;  %v9612_v18 = vld [vmem:[%s15903_s1 + $0xe4] ss:$8 sps:$4 sm:$0xff]  }
 0x168   :  { %1533 = vrot.lane.b32.xlu1 %v423_v13, %s11215_s16  ;;  %1535 = vrot.lane.b32.xlu0 %v425_v27, %s11215_s16 }
 0x16a   :  { %v11909_v57 = vpop.permute.xlu1 %841  ;;  %v11913_v10 = vpop.permute.xlu0 %843 }
 0x16c   :  { %1565 = vrot.lane.b32.xlu1 %v11875_v19, %s11215_s16  ;;  %1567 = vrot.lane.b32.xlu0 %v11882_v15, %s11215_s16 }
 0x16e   :  { %757 = vmatmul.mubr.bf16.gmra.mrb[72].mxu1 %v9602_v33  ;;  %v11921_v25 = vpop.permute.xlu1 %873  ;;  %v11930_v12 = vpop.permute.xlu0 %875  ;;  %v9615_v33 = vld [vmem:[%s15903_s1 + $0xf4] ss:$8 sps:$4 sm:$0xff]  }
 0x16f   :  { %764 = vmatprep.mubr.bf16.mxu1 %v9603_v6 }
 0x170   :  { %1213 = vrot.lane.b32.xlu1 %v423_v13, %s11214_s19  ;;  %1215 = vrot.lane.b32.xlu0 %v425_v27, %s11214_s19  ;;  %v9614_v13 = vld [vmem:[%s15903_s1 + $0xe0] ss:$8 sps:$4 sm:$0xff]   ;;  %v11971_v27 = vadd.f32 %v11460_v55, %v11637_v60 }
 0x172   :  { %v11950_v37 = vpop.permute.xlu0 %1515  ;;  %16045 = vst [vmem:[#allocation29_spill] sm:$0xff] %v11971_v27 }
 0x174   :  { %865 = vrot.lane.b32.xlu1 %v426_v56, %s11214_s19  ;;  %867 = vrot.lane.b32.xlu0 %v428_v7, %s11214_s19  ;;  %v9617_v56 = vld [vmem:[%s15903_s1 + $0xf0] ss:$8 sps:$4 sm:$0xff]  }
 0x176   :  { %765 = vmatmul.mubr.bf16.gmra.mrb[76].mxu1 %v9605_v3 }
 0x177   :  { %772 = vmatprep.mubr.bf16.mxu1 %v9606_v5 }
 0x178   :  { %2077 = vrot.lane.b32.xlu1 %v11412_v42, %s11214_s19  ;;  %2079 = vrot.lane.b32.xlu0 %v11419_v43, %s11214_s19  ;;  %v427_v42 = vadd.f32 %v11460_v55, %v11623_v45  ;;  %v11936_v43 = vpop.permute.xlu1 %1513  ;;  %v460_v45 = vadd.f32 %v11460_v55, %v11631_v51  ;;  %v11963_v51 = vpop.permute.xlu0 %1547 }
 0x17c   :  { %897 = vrot.lane.b32.xlu1 %v458_v36, %s11214_s19  ;;  %1231 = vrot.lane.b32.xlu0 %v11652_v0, %s11214_s19  ;;  %v9611_v0 = vld [vmem:[%s15903_s1 + $0xd0] ss:$8 sps:$4 sm:$0xff]   ;;  %v11982_v6 = vpop.permute.xlu0 %1195 }
 0x17d   :  { %16047 = vst [vmem:[#allocation31_spill] sm:$0xff] %v11982_v6 }
 0x17e   :  { %773 = vmatmul.mubr.bf16.gmra.mrb[80].mxu1 %v9608_v28 }
 0x17f   :  { %780 = vmatprep.mubr.bf16.mxu1 %v9609_v17 }
 0x180   :  { %1537 = vrot.lane.b32.xlu1 %v427_v42, %s11215_s16  ;;  %2083 = vrot.lane.b32.xlu0 %v11441_v49, %s11214_s19  ;;  %v11958_v49 = vpop.permute.xlu1 %1545  ;;  %v11992_v3 = vpop.permute.xlu0 %1227 }
 0x181   :  { %16049 = vst [vmem:[#allocation33_spill] sm:$0xff] %v11992_v3 }
 0x184   :  { %1569 = vrot.lane.b32.xlu1 %v11943_v39, %s11215_s16  ;;  %899 = vrot.lane.b32.xlu0 %v460_v45, %s11214_s19  ;;  %v11976_v22 = vpop.permute.xlu1 %1193  ;;  %v11997_v7 = vpop.permute.xlu0 %847 }
 0x185   :  { %16046 = vst [vmem:[#allocation30_spill] sm:$0xff] %v11976_v22 }
 0x186   :  { %781 = vmatmul.mubr.bf16.gmra.mrb[84].mxu1 %v9611_v0 }
 0x187   :  { %788 = vmatprep.mubr.bf16.mxu1 %v9612_v18 }
 0x188   :  { %1217 = vrot.lane.b32.xlu1 %v427_v42, %s11214_s19  ;;  %1539 = vrot.lane.b32.xlu0 %v429_v46, %s11215_s16  ;;  %v11987_v60 = vpop.permute.xlu1 %1225 }
 0x189   :  { %16048 = vst [vmem:[#allocation32_spill] sm:$0xff] %v11987_v60 }
 0x18c   :  { %1229 = vrot.lane.b32.xlu1 %v11645_v29, %s11214_s19  ;;  %1571 = vrot.lane.b32.xlu0 %v11971_v27, %s11215_s16  ;;  %v11995_v29 = vpop.permute.xlu1 %845 }
 0x18e   :  { %789 = vmatmul.mubr.bf16.gmra.mrb[88].mxu1 %v9614_v13 }
 0x18f   :  { %796 = vmatprep.mubr.bf16.mxu1 %v9615_v33 }
 0x190   :  { %2081 = vrot.lane.b32.xlu1 %v11434_v48, %s11214_s19  ;;  %1219 = vrot.lane.b32.xlu0 %v429_v46, %s11214_s19  ;;  %v11999_v5 = vpop.permute.xlu1 %877  ;;  %v12001_v48 = vpop.permute.xlu0 %879 }
 0x194   :  { %v12003_v36 = vpop.permute.xlu1 %1517  ;;  %v12005_v28 = vpop.permute.xlu0 %1519 }
 0x196   :  { %797 = vmatmul.mubr.bf16.gmra.mrb[92].mxu1 %v9617_v56 }
 0x197   :  { %2655 = vmatprep.mubr.bf16.mxu1 %v11457_v54 }
 0x198   :  { %v12007_v17 = vpop.permute.xlu1 %1549  ;;  %v12009_v42 = vpop.permute.xlu0 %1551 }
 0x19c   :  { %v12011_v0 = vpop.permute.xlu1 %1197  ;;  %v12013_v45 = vpop.permute.xlu0 %1199 }
 0x19d   :  { %16050 = vst [vmem:[#allocation34_spill] sm:$0xff] %v12011_v0  ;;  %16051 = vst [vmem:[#allocation35_spill] sm:$0xff] %v12013_v45 }
 0x1a0   :  { %v12015_v54 = vpop.permute.xlu1 %849  ;;  %v12017_v18 = vpop.permute.xlu0 %851 }
 0x1a4   :  { %v12019_v46 = vpop.permute.xlu1 %881  ;;  %v12021_v13 = vpop.permute.xlu0 %883 }
 0x1a8   :  { %v12023_v33 = vpop.permute.xlu1 %1521  ;;  %v12025_v56 = vpop.permute.xlu0 %1523 }
 0x1ac   :  { %v12027_v2 = vpop.permute.xlu1 %1553  ;;  %v12029_v55 = vpop.permute.xlu0 %1555 }
 0x1b0   :  { %v12031_v35 = vpop.permute.xlu1 %1201  ;;  %v12033_v32 = vpop.permute.xlu0 %1203 }
 0x1b1   :  { %16052 = vst [vmem:[#allocation36_spill] sm:$0xff] %v12031_v35  ;;  %16053 = vst [vmem:[#allocation37_spill] sm:$0xff] %v12033_v32 }
 0x1b4   :  { %v12035_v3 = vpop.permute.xlu1 %853  ;;  %v12037_v31 = vpop.permute.xlu0 %855 }
 0x1b8   :  { %v12039_v53 = vpop.permute.xlu1 %885  ;;  %v12041_v60 = vpop.permute.xlu0 %887 }
 0x1bc   :  { %v12043_v30 = vpop.permute.xlu1 %1525  ;;  %v12045_v9 = vpop.permute.xlu0 %1527 }
 0x1c0   :  { %v12047_v1 = vpop.permute.xlu1 %1557  ;;  %v12049_v58 = vpop.permute.xlu0 %1559 }
 0x1c4   :  { %v12051_v27 = vpop.permute.xlu1 %1205  ;;  %v12053_v39 = vpop.permute.xlu0 %1207 }
 0x1c5   :  { %16054 = vst [vmem:[#allocation38_spill] sm:$0xff] %v12051_v27  ;;  %16055 = vst [vmem:[#allocation39_spill] sm:$0xff] %v12053_v39 }
 0x1c8   :  { %v12055_v8 = vpop.permute.xlu1 %857  ;;  %v12062_v35 = vpop.permute.xlu0 %859 }
 0x1cc   :  { %v12072_v6 = vpop.permute.xlu1 %889  ;;  %v12076_v61 = vpop.permute.xlu0 %891 }
 0x1d0   :  { %v12081_v15 = vpop.permute.xlu1 %1529  ;;  %v12088_v11 = vpop.permute.xlu0 %1531 }
 0x1f1   :  { %v8911_v23 = vpop.f32.mrb[32].mxu1 }
 0x1f2   :  { %v8912_v41 = vpop.f32.mrb[33].mxu1 }
 0x1f3   :  { %v8913_v44 = vadd.f32 %v8912_v41, %v8911_v23  ;;  %v8914_v34 = vpop.f32.mrb[34].mxu1 }
 0x1f4   :  { %v8915_v32 = vpop.f32.mrb[35].mxu1 }
 0x1f5   :  { %v12065_v45 = vadd.f32 %v8913_v44, %v12060_v40  ;;  %v8916_v27 = vadd.f32 %v8915_v32, %v8914_v34 }
 0x1f7   :  { %v933_v39 = vadd.f32 %v11808_v59, %v12065_v45  ;;  %v12070_v0 = vadd.f32 %v8916_v27, %v12060_v40 }
 0x1f9   :  { %16056 = vst [vmem:[#allocation40_spill] sm:$0xff] %v12070_v0  ;;  %v8519_v22 = vmul.f32 -1.442695, %v933_v39  ;;  %v934_v41 = vadd.f32 %v11893_v16, %v12070_v0  ;;  %v8917_v23 = vpop.f32.mrb[36].mxu1 }
 0x1fa   :  { %v8918_v20 = vpop.f32.mrb[37].mxu1 }
 0x1fb   :  { %9636 = vpow2.f32 %v8519_v22  ;;  %v8520_v44 = vmul.f32 -1.442695, %v934_v41  ;;  %v8919_v19 = vadd.f32 %v8918_v20, %v8917_v23  ;;  %v8920_v34 = vpop.f32.mrb[38].mxu1 }
 0x1fc   :  { %v8921_v32 = vpop.f32.mrb[39].mxu1 }
 0x1fd   :  { %9638 = vpow2.f32 %v8520_v44  ;;  %v12079_v59 = vadd.f32 %v8919_v19, %v12060_v40  ;;  %v8922_v27 = vadd.f32 %v8921_v32, %v8920_v34  ;;  %v12092_v32 = vpop.permute.xlu1 %1561 }
 0x1ff   :  { %16057 = vst [vmem:[#allocation41_spill] sm:$0xff] %v12079_v59  ;;  %v935_v39 = vadd.f32 %v11909_v57, %v12079_v59  ;;  %v12086_v16 = vadd.f32 %v8922_v27, %v12060_v40  ;;  %v12097_v59 = vpop.permute.xlu0 %1563 }
 0x201   :  { %16058 = vst [vmem:[#allocation42_spill] sm:$0xff] %v12086_v16  ;;  %v8521_v22 = vmul.f32 -1.442695, %v935_v39  ;;  %v936_v20 = vadd.f32 %v11913_v10, %v12086_v16  ;;  %v8923_v41 = vpop.f32.mrb[40].mxu1  ;;  %v12104_v16 = vpop.permute.xlu1 %1209 }
 0x202   :  { %v8924_v23 = vpop.f32.mrb[41].mxu1  ;;  %16060 = vst [vmem:[#allocation44_spill] sm:$0xff] %v12104_v16 }
 0x203   :  { %9640 = vpow2.f32 %v8521_v22  ;;  %v8522_v19 = vmul.f32 -1.442695, %v936_v20  ;;  %v8925_v44 = vadd.f32 %v8924_v23, %v8923_v41  ;;  %v8926_v34 = vpop.f32.mrb[42].mxu1 }
 0x204   :  { %v8927_v4 = vpop.f32.mrb[43].mxu1 }
 0x205   :  { %v9637_v14 = vpop.eup %9636  ;;  %9642 = vpow2.f32 %v8522_v19  ;;  %v12095_v57 = vadd.f32 %v8925_v44, %v12060_v40  ;;  %v8928_v27 = vadd.f32 %v8927_v4, %v8926_v34 }
 0x206   :  { %v1061_v62 = vadd.f32 1.0, %v9637_v14 }
 0x207   :  { %16059 = vst [vmem:[#allocation43_spill] sm:$0xff] %v12095_v57  ;;  %v9639_v39 = vpop.eup %9638  ;;  %v937_v10 = vadd.f32 %v11995_v29, %v12095_v57  ;;  %v12102_v22 = vadd.f32 %v8928_v27, %v12060_v40  ;;  %v12108_v57 = vpop.permute.xlu0 %1211 }
 0x208   :  { %9644 = vrcp.f32 %v1061_v62  ;;  %v1062_v20 = vadd.f32 1.0, %v9639_v39  ;;  %16061 = vst [vmem:[#allocation45_spill] sm:$0xff] %v12108_v57 }
 0x209   :  { %v8523_v41 = vmul.f32 -1.442695, %v937_v10  ;;  %v8929_v23 = vpop.f32.mrb[44].mxu1  ;;  %v938_v4 = vadd.f32 %v11997_v7, %v12102_v22  ;;  %v12115_v7 = vpop.permute.xlu1 %861 }
 0x20a   :  { %9646 = vrcp.f32 %v1062_v20  ;;  %v8930_v14 = vpop.f32.mrb[45].mxu1 }
 0x20b   :  { %v8931_v19 = vadd.f32 %v8930_v14, %v8929_v23  ;;  %v8932_v44 = vpop.f32.mrb[46].mxu1  ;;  %9648 = vpow2.f32 %v8523_v41  ;;  %v8524_v34 = vmul.f32 -1.442695, %v938_v4 }
 0x20c   :  { %v8933_v0 = vpop.f32.mrb[47].mxu1 }
 0x20d   :  { %v9641_v29 = vpop.eup %9640  ;;  %v12111_v62 = vadd.f32 %v8931_v19, %v12060_v40  ;;  %v8934_v27 = vadd.f32 %v8933_v0, %v8932_v44  ;;  %9650 = vpow2.f32 %v8524_v34  ;;  %v12122_v44 = vpop.permute.xlu0 %863 }
 0x20e   :  { %v1063_v39 = vadd.f32 1.0, %v9641_v29 }
 0x20f   :  { %v9643_v10 = vpop.eup %9642  ;;  %v939_v20 = vadd.f32 %v12015_v54, %v12111_v62  ;;  %v12118_v41 = vadd.f32 %v8934_v27, %v12060_v40 }
 0x210   :  { %9652 = vrcp.f32 %v1063_v39  ;;  %v1064_v23 = vadd.f32 1.0, %v9643_v10 }
 0x211   :  { %16062 = vst [vmem:[#allocation46_spill] sm:$0xff] %v12118_v41  ;;  %v8525_v4 = vmul.f32 -1.442695, %v939_v20  ;;  %v8935_v14 = vpop.f32.mrb[48].mxu1  ;;  %v940_v0 = vadd.f32 %v12017_v18, %v12118_v41  ;;  %v12130_v41 = vpop.permute.xlu1 %893 }
 0x212   :  { %v9645_v57 = vpop.eup %9644  ;;  %9654 = vrcp.f32 %v1064_v23  ;;  %v8936_v19 = vpop.f32.mrb[49].mxu1 }
 0x213   :  { %v8937_v34 = vadd.f32 %v8936_v19, %v8935_v14  ;;  %v8938_v29 = vpop.f32.mrb[50].mxu1  ;;  %v1605_v54 = vmul.f32 %v9645_v57, %v11819_v63  ;;  %9656 = vpow2.f32 %v8525_v4  ;;  %v8526_v39 = vmul.f32 -1.442695, %v940_v0  ;;  %v12138_v0 = vpop.permute.xlu0 %895 }
 0x214   :  { %v9647_v16 = vpop.eup %9646  ;;  %v8939_v10 = vpop.f32.mrb[51].mxu1 }
 0x215   :  { %v12126_v27 = vadd.f32 %v8937_v34, %v12060_v40  ;;  %v8940_v20 = vadd.f32 %v8939_v10, %v8938_v29  ;;  %1669 = vrot.lane.b32.xlu1 %v1605_v54, %s11216_s25  ;;  %v1606_v18 = vmul.f32 %v9647_v16, %v11845_v52  ;;  %v9649_v23 = vpop.eup %9648  ;;  %9658 = vpow2.f32 %v8526_v39 }
 0x216   :  { %v1065_v14 = vadd.f32 1.0, %v9649_v23 }
 0x217   :  { %v941_v63 = vadd.f32 %v12035_v3, %v12126_v27  ;;  %1671 = vrot.lane.b32.xlu0 %v1606_v18, %s11216_s25  ;;  %v9651_v57 = vpop.eup %9650  ;;  %v12136_v4 = vadd.f32 %v8940_v20, %v12060_v40  ;;  %v12147_v18 = vpop.permute.xlu1 %1533 }
 0x218   :  { %9660 = vrcp.f32 %v1065_v14  ;;  %v1066_v19 = vadd.f32 1.0, %v9651_v57 }
 0x219   :  { %v8527_v34 = vmul.f32 -1.442695, %v941_v63  ;;  %v8941_v52 = vpop.f32.mrb[52].mxu1  ;;  %1233 = vrot.lane.b32.xlu1 %v11695_v38, %s11214_s19  ;;  %v942_v29 = vadd.f32 %v12037_v31, %v12136_v4 }
 0x21a   :  { %v9653_v16 = vpop.eup %9652  ;;  %v8942_v3 = vpop.f32.mrb[53].mxu1  ;;  %9662 = vrcp.f32 %v1066_v19 }
 0x21b   :  { %v8943_v54 = vadd.f32 %v8942_v3, %v8941_v52  ;;  %v8944_v39 = vpop.f32.mrb[54].mxu1  ;;  %1235 = vrot.lane.b32.xlu0 %v11701_v24, %s11214_s19  ;;  %v1607_v10 = vmul.f32 %v9653_v16, %v11936_v43  ;;  %v8528_v23 = vmul.f32 -1.442695, %v942_v29  ;;  %9664 = vpow2.f32 %v8527_v34  ;;  %v12154_v19 = vpop.permute.xlu0 %1535 }
 0x21c   :  { %v9655_v20 = vpop.eup %9654  ;;  %v8945_v14 = vpop.f32.mrb[55].mxu1 }
 0x21d   :  { %v12150_v38 = vadd.f32 %v8943_v54, %v12060_v40  ;;  %v8946_v63 = vadd.f32 %v8945_v14, %v8944_v39  ;;  %1673 = vrot.lane.b32.xlu1 %v1607_v10, %s11216_s25  ;;  %v1608_v31 = vmul.f32 %v9655_v20, %v11950_v37  ;;  %v9657_v57 = vpop.eup %9656  ;;  %9666 = vpow2.f32 %v8528_v23  ;;  %v11108_v37 = vld [vmem:[%s15902_s0 + $0x80] sm:$0xff]  ;;  %v12166_v54 = vpop.permute.xlu1 %1565  ;;  %v11109_v14 = vld [vmem:[%s15902_s0 + $0x88] sm:$0xff] }
 0x21e   :  { %v1067_v24 = vadd.f32 1.0, %v9657_v57 }
 0x21f   :  { %v943_v43 = vadd.f32 %v12055_v8, %v12150_v38  ;;  %1675 = vrot.lane.b32.xlu0 %v1608_v31, %s11216_s25  ;;  %v9659_v52 = vpop.eup %9658  ;;  %v12160_v34 = vadd.f32 %v8946_v63, %v12060_v40 }
 0x220   :  { %9668 = vrcp.f32 %v1067_v24  ;;  %v1068_v16 = vadd.f32 1.0, %v9659_v52 }
 0x221   :  { %v8529_v29 = vmul.f32 -1.442695, %v943_v43  ;;  %v8947_v3 = vpop.f32.mrb[56].mxu1  ;;  %2085 = vrot.lane.b32.xlu1 %v11108_v37, %s11214_s19  ;;  %v944_v8 = vadd.f32 %v12062_v35, %v12160_v34  ;;  %v12175_v43 = vpop.permute.xlu0 %1567 }
 0x222   :  { %v8948_v39 = vpop.f32.mrb[57].mxu1  ;;  %v9661_v10 = vpop.eup %9660  ;;  %9670 = vrcp.f32 %v1068_v16 }
 0x223   :  { %v8949_v20 = vadd.f32 %v8948_v39, %v8947_v3  ;;  %v8950_v23 = vpop.f32.mrb[58].mxu1  ;;  %2087 = vrot.lane.b32.xlu0 %v11109_v14, %s11214_s19  ;;  %v8530_v63 = vmul.f32 -1.442695, %v944_v8  ;;  %v1609_v57 = vmul.f32 %v9661_v10, %v12003_v36  ;;  %9672 = vpow2.f32 %v8529_v29  ;;  %v12187_v36 = vpop.permute.xlu1 %1213 }
 0x224   :  { %v8951_v31 = vpop.f32.mrb[59].mxu1  ;;  %v9663_v24 = vpop.eup %9662  ;;  %16064 = vst [vmem:[#allocation48_spill] sm:$0xff] %v12187_v36 }
 0x225   :  { %v12178_v35 = vadd.f32 %v8949_v20, %v12060_v40  ;;  %v8952_v52 = vadd.f32 %v8951_v31, %v8950_v23  ;;  %1677 = vrot.lane.b32.xlu1 %v1609_v57, %s11216_s25  ;;  %v1610_v16 = vmul.f32 %v9663_v24, %v12005_v28  ;;  %v9665_v3 = vpop.eup %9664  ;;  %9674 = vpow2.f32 %v8530_v63  ;;  %v12192_v31 = vpop.permute.xlu0 %1215 }
 0x226   :  { %v1069_v39 = vadd.f32 1.0, %v9665_v3 }
 0x227   :  { %v945_v37 = vadd.f32 %v12115_v7, %v12178_v35  ;;  %v12185_v8 = vadd.f32 %v8952_v52, %v12060_v40  ;;  %1679 = vrot.lane.b32.xlu0 %v1610_v16, %s11216_s25  ;;  %v9667_v29 = vpop.eup %9666 }
 0x228   :  { %9676 = vrcp.f32 %v1069_v39  ;;  %v1070_v28 = vadd.f32 1.0, %v9667_v29 }
 0x229   :  { %16063 = vst [vmem:[#allocation47_spill] sm:$0xff] %v12185_v8  ;;  %v946_v10 = vadd.f32 %v12122_v44, %v12185_v8  ;;  %v8953_v20 = vpop.f32.mrb[60].mxu1  ;;  %v8531_v23 = vmul.f32 -1.442695, %v945_v37  ;;  %v866_v8 = vpop.permute.xlu1 %865 }
 0x22a   :  { %v8954_v14 = vpop.f32.mrb[61].mxu1  ;;  %v9669_v63 = vpop.eup %9668  ;;  %9678 = vrcp.f32 %v1070_v28 }
 0x22b   :  { %v8955_v7 = vadd.f32 %v8954_v14, %v8953_v20  ;;  %v8956_v57 = vpop.f32.mrb[62].mxu1  ;;  %v8532_v24 = vmul.f32 -1.442695, %v946_v10  ;;  %v1611_v3 = vmul.f32 %v9669_v63, %v12023_v33  ;;  %9680 = vpow2.f32 %v8531_v23  ;;  %v868_v28 = vpop.permute.xlu0 %867 }
 0x22c   :  { %v8957_v52 = vpop.f32.mrb[63].mxu1  ;;  %v9671_v16 = vpop.eup %9670 }
 0x22d   :  { %v12196_v36 = vadd.f32 %v8955_v7, %v12060_v40  ;;  %v8958_v44 = vadd.f32 %v8957_v52, %v8956_v57  ;;  %1681 = vrot.lane.b32.xlu1 %v1611_v3, %s11216_s25  ;;  %v1612_v37 = vmul.f32 %v9671_v16, %v12025_v56  ;;  %v9673_v39 = vpop.eup %9672  ;;  %9682 = vpow2.f32 %v8532_v24 }
 0x22e   :  { %v1071_v10 = vadd.f32 1.0, %v9673_v39 }
 0x22f   :  { %v947_v29 = vadd.f32 %v866_v8, %v12196_v36  ;;  %v12202_v20 = vadd.f32 %v8958_v44, %v12060_v40  ;;  %1683 = vrot.lane.b32.xlu0 %v1612_v37, %s11216_s25  ;;  %v9675_v33 = vpop.eup %9674 }
 0x230   :  { %9684 = vrcp.f32 %v1071_v10  ;;  %v1072_v63 = vadd.f32 1.0, %v9675_v33  ;;  %v12210_v10 = vpop.permute.xlu0 %2079 }
 0x231   :  { %v8959_v14 = vpop.f32.mrb[64].mxu1  ;;  %v8533_v23 = vmul.f32 -1.442695, %v947_v29  ;;  %v948_v7 = vadd.f32 %v868_v28, %v12202_v20 }
 0x232   :  { %v8960_v57 = vpop.f32.mrb[65].mxu1  ;;  %v9677_v3 = vpop.eup %9676  ;;  %9686 = vrcp.f32 %v1072_v63 }
 0x233   :  { %v8961_v56 = vadd.f32 %v8960_v57, %v8959_v14  ;;  %v8962_v52 = vpop.f32.mrb[66].mxu1  ;;  %v8534_v8 = vmul.f32 -1.442695, %v948_v7  ;;  %v1613_v37 = vmul.f32 %v9677_v3, %v12043_v30  ;;  %9688 = vpow2.f32 %v8533_v23 }
 0x234   :  { %v8963_v16 = vpop.f32.mrb[67].mxu1  ;;  %v9679_v39 = vpop.eup %9678 }
 0x235   :  { %v12207_v44 = vadd.f32 %v8961_v56, %v12060_v40  ;;  %v8964_v24 = vadd.f32 %v8963_v16, %v8962_v52  ;;  %1685 = vrot.lane.b32.xlu1 %v1613_v37, %s11216_s25  ;;  %v9681_v28 = vpop.eup %9680  ;;  %9690 = vpow2.f32 %v8534_v8  ;;  %v1614_v14 = vmul.f32 %v9679_v39, %v12045_v9  ;;  %v12222_v8 = vpop.permute.xlu0 %1231 }
 0x236   :  { %v1073_v63 = vadd.f32 1.0, %v9681_v28 }
 0x237   :  { %v949_v29 = vadd.f32 %v11801_v21, %v12207_v44  ;;  %v12215_v33 = vadd.f32 %v8964_v24, %v12060_v40  ;;  %v9683_v57 = vpop.eup %9682  ;;  %1687 = vrot.lane.b32.xlu0 %v1614_v14, %s11216_s25 }
 0x238   :  { %9692 = vrcp.f32 %v1073_v63  ;;  %v1074_v21 = vadd.f32 1.0, %v9683_v57  ;;  %v12235_v57 = vpop.permute.xlu1 %2077 }
 0x239   :  { %v8965_v7 = vpop.f32.mrb[68].mxu1  ;;  %v950_v30 = vadd.f32 %v11827_v47, %v12215_v33  ;;  %v8535_v56 = vmul.f32 -1.442695, %v949_v29 }
 0x23a   :  { %v8966_v23 = vpop.f32.mrb[69].mxu1  ;;  %v9685_v16 = vpop.eup %9684  ;;  %9694 = vrcp.f32 %v1074_v21 }
 0x23b   :  { %v8967_v52 = vadd.f32 %v8966_v23, %v8965_v7  ;;  %v8968_v3 = vpop.f32.mrb[70].mxu1  ;;  %v8536_v24 = vmul.f32 -1.442695, %v950_v30  ;;  %v1615_v47 = vmul.f32 %v9685_v16, %v12081_v15  ;;  %9696 = vpow2.f32 %v8535_v56  ;;  %v12240_v56 = vpop.permute.xlu0 %2083 }
 0x23c   :  { %v8969_v37 = vpop.f32.mrb[71].mxu1  ;;  %v9687_v28 = vpop.eup %9686  ;;  %16065 = vst [vmem:[#allocation49_spill] sm:$0xff] %v12240_v56 }
 0x23d   :  { %v12225_v9 = vadd.f32 %v8967_v52, %v12060_v40  ;;  %v8970_v39 = vadd.f32 %v8969_v37, %v8968_v3  ;;  %1689 = vrot.lane.b32.xlu1 %v1615_v47, %s11216_s25  ;;  %v9689_v63 = vpop.eup %9688  ;;  %v1616_v7 = vmul.f32 %v9687_v28, %v12088_v11  ;;  %9698 = vpow2.f32 %v8536_v24 }
 0x23e   :  { %v1075_v30 = vadd.f32 1.0, %v9689_v63 }
 0x23f   :  { %v951_v14 = vadd.f32 %v11921_v25, %v12225_v9  ;;  %v12231_v29 = vadd.f32 %v8970_v39, %v12060_v40  ;;  %v9691_v21 = vpop.eup %9690  ;;  %1691 = vrot.lane.b32.xlu0 %v1616_v7, %s11216_s25  ;;  %v12246_v7 = vpop.permute.xlu1 %897 }
 0x240   :  { %9700 = vrcp.f32 %v1075_v30  ;;  %v1076_v52 = vadd.f32 1.0, %v9691_v21 }
 0x241   :  { %v8971_v23 = vpop.f32.mrb[72].mxu1  ;;  %v952_v15 = vadd.f32 %v11930_v12, %v12231_v29  ;;  %v8537_v3 = vmul.f32 -1.442695, %v951_v14 }
 0x242   :  { %v8972_v25 = vpop.f32.mrb[73].mxu1  ;;  %v9693_v39 = vpop.eup %9692  ;;  %9702 = vrcp.f32 %v1076_v52 }
 0x243   :  { %v8973_v16 = vadd.f32 %v8972_v25, %v8971_v23  ;;  %v8974_v37 = vpop.f32.mrb[74].mxu1  ;;  %v8538_v47 = vmul.f32 -1.442695, %v952_v15  ;;  %v1617_v12 = vmul.f32 %v9693_v39, %v12147_v18  ;;  %9704 = vpow2.f32 %v8537_v3  ;;  %v12255_v15 = vpop.permute.xlu0 %899 }
 0x244   :  { %v8975_v11 = vpop.f32.mrb[75].mxu1  ;;  %v9695_v63 = vpop.eup %9694 }
 0x245   :  { %v12243_v24 = vadd.f32 %v8973_v16, %v12060_v40  ;;  %v8976_v28 = vadd.f32 %v8975_v11, %v8974_v37  ;;  %1693 = vrot.lane.b32.xlu1 %v1617_v12, %s11216_s25  ;;  %v1618_v23 = vmul.f32 %v9695_v63, %v12154_v19  ;;  %v9697_v21 = vpop.eup %9696  ;;  %9706 = vpow2.f32 %v8538_v47  ;;  %v1538_v12 = vpop.permute.xlu1 %1537 }
 0x246   :  { %v1077_v3 = vadd.f32 1.0, %v9697_v21 }
 0x247   :  { %v953_v30 = vadd.f32 %v11999_v5, %v12243_v24  ;;  %v12251_v14 = vadd.f32 %v8976_v28, %v12060_v40  ;;  %1695 = vrot.lane.b32.xlu0 %v1618_v23, %s11216_s25  ;;  %v9699_v16 = vpop.eup %9698  ;;  %v1540_v56 = vpop.permute.xlu0 %1539 }
 0x248   :  { %v1078_v39 = vadd.f32 1.0, %v9699_v16 }
 0x249   :  { %v8539_v25 = vmul.f32 -1.442695, %v953_v30  ;;  %v954_v18 = vadd.f32 %v12001_v48, %v12251_v14  ;;  %v8977_v52 = vpop.f32.mrb[76].mxu1 }
 0x24a   :  { %v8978_v5 = vpop.f32.mrb[77].mxu1  ;;  %v9701_v28 = vpop.eup %9700 }
 0x24b   :  { %9708 = vpow2.f32 %v8539_v25  ;;  %v8979_v37 = vadd.f32 %v8978_v5, %v8977_v52  ;;  %v8980_v11 = vpop.f32.mrb[78].mxu1  ;;  %v8540_v63 = vmul.f32 -1.442695, %v954_v18  ;;  %v1619_v48 = vmul.f32 %v9701_v28, %v1538_v12 }
 0x24c   :  { %9710 = vrcp.f32 %v1077_v3  ;;  %v8981_v19 = vpop.f32.mrb[79].mxu1  ;;  %v9703_v21 = vpop.eup %9702 }
 0x24d   :  { %v12261_v47 = vadd.f32 %v8979_v37, %v12060_v40  ;;  %v8982_v30 = vadd.f32 %v8981_v19, %v8980_v11  ;;  %9712 = vrcp.f32 %v1078_v39  ;;  %1697 = vrot.lane.b32.xlu1 %v1619_v48, %s11216_s25  ;;  %v1620_v52 = vmul.f32 %v9703_v21, %v1540_v56  ;;  %v9705_v3 = vpop.eup %9704 }
 0x24e   :  { %9714 = vpow2.f32 %v8540_v63  ;;  %v1079_v37 = vadd.f32 1.0, %v9705_v3 }
 0x24f   :  { %v955_v23 = vadd.f32 %v12019_v46, %v12261_v47  ;;  %v12266_v25 = vadd.f32 %v8982_v30, %v12060_v40  ;;  %1699 = vrot.lane.b32.xlu0 %v1620_v52, %s11216_s25  ;;  %v9707_v39 = vpop.eup %9706 }
 0x250   :  { %v1080_v28 = vadd.f32 1.0, %v9707_v39 }
 0x251   :  { %16066 = vst [vmem:[#allocation50_spill] sm:$0xff] %v12266_v25  ;;  %v8541_v18 = vmul.f32 -1.442695, %v955_v23  ;;  %v956_v5 = vadd.f32 %v12021_v13, %v12266_v25  ;;  %v8983_v16 = vpop.f32.mrb[80].mxu1 }
 0x252   :  { %v8984_v11 = vpop.f32.mrb[81].mxu1 }
 0x253   :  { %9716 = vpow2.f32 %v8541_v18  ;;  %v8985_v46 = vadd.f32 %v8984_v11, %v8983_v16  ;;  %v8986_v19 = vpop.f32.mrb[82].mxu1  ;;  %v8542_v56 = vmul.f32 -1.442695, %v956_v5 }
 0x254   :  { %9718 = vrcp.f32 %v1079_v37  ;;  %v8987_v12 = vpop.f32.mrb[83].mxu1 }
 0x255   :  { %v9709_v30 = vpop.eup %9708  ;;  %v12273_v63 = vadd.f32 %v8985_v46, %v12060_v40  ;;  %v8988_v48 = vadd.f32 %v8987_v12, %v8986_v19  ;;  %9720 = vrcp.f32 %v1080_v28 }
 0x256   :  { %v9711_v21 = vpop.eup %9710  ;;  %v1081_v13 = vadd.f32 1.0, %v9709_v30 }
 0x257   :  { %v957_v23 = vadd.f32 %v12039_v53, %v12273_v63  ;;  %v12278_v52 = vadd.f32 %v8988_v48, %v12060_v40  ;;  %v1621_v3 = vmul.f32 %v9711_v21, %v11837_v50  ;;  %v9713_v18 = vpop.eup %9712 }
 0x258   :  { %9722 = vrcp.f32 %v1081_v13  ;;  %v1622_v37 = vmul.f32 %v9713_v18, %v11862_v26  ;;  %v9715_v46 = vpop.eup %9714 }
 0x259   :  { %9724 = vpow2.f32 %v8542_v56  ;;  %v8543_v16 = vmul.f32 -1.442695, %v957_v23  ;;  %v958_v5 = vadd.f32 %v12041_v60, %v12278_v52  ;;  %1701 = vrot.lane.b32.xlu1 %v1621_v3, %s11216_s25  ;;  %v8989_v11 = vpop.f32.mrb[84].mxu1  ;;  %v1082_v50 = vadd.f32 1.0, %v9715_v46 }
 0x25a   :  { %v8990_v39 = vpop.f32.mrb[85].mxu1  ;;  %1703 = vrot.lane.b32.xlu0 %v1622_v37, %s11216_s25 }
 0x25b   :  { %9726 = vpow2.f32 %v8543_v16  ;;  %v8991_v53 = vadd.f32 %v8990_v39, %v8989_v11  ;;  %v8992_v19 = vpop.f32.mrb[86].mxu1  ;;  %v8544_v30 = vmul.f32 -1.442695, %v958_v5 }
 0x25c   :  { %v8993_v28 = vpop.f32.mrb[87].mxu1  ;;  %9728 = vrcp.f32 %v1082_v50 }
 0x25d   :  { %v9717_v12 = vpop.eup %9716  ;;  %v12287_v56 = vadd.f32 %v8991_v53, %v12060_v40  ;;  %v8994_v60 = vadd.f32 %v8993_v28, %v8992_v19 }
 0x25e   :  { %v9719_v48 = vpop.eup %9718  ;;  %v1083_v21 = vadd.f32 1.0, %v9717_v12 }
 0x25f   :  { %v959_v26 = vadd.f32 %v12072_v6, %v12287_v56  ;;  %v12292_v13 = vadd.f32 %v8994_v60, %v12060_v40  ;;  %v1623_v23 = vmul.f32 %v9719_v48, %v11958_v49  ;;  %v9721_v3 = vpop.eup %9720 }
 0x260   :  { %9730 = vrcp.f32 %v1083_v21  ;;  %v1624_v5 = vmul.f32 %v9721_v3, %v11963_v51 }
 0x261   :  { %9732 = vpow2.f32 %v8544_v30  ;;  %v8545_v18 = vmul.f32 -1.442695, %v959_v26  ;;  %v960_v16 = vadd.f32 %v12076_v61, %v12292_v13  ;;  %1705 = vrot.lane.b32.xlu1 %v1623_v23, %s11216_s25  ;;  %v8995_v37 = vpop.f32.mrb[88].mxu1 }
 0x262   :  { %v9723_v11 = vpop.eup %9722  ;;  %v8996_v39 = vpop.f32.mrb[89].mxu1  ;;  %1707 = vrot.lane.b32.xlu0 %v1624_v5, %s11216_s25 }
 0x263   :  { %v9725_v6 = vpop.eup %9724  ;;  %9734 = vpow2.f32 %v8545_v18  ;;  %v8546_v46 = vmul.f32 -1.442695, %v960_v16  ;;  %v8997_v49 = vadd.f32 %v8996_v39, %v8995_v37  ;;  %v8998_v53 = vpop.f32.mrb[90].mxu1  ;;  %v1625_v19 = vmul.f32 %v9723_v11, %v12007_v17 }
 0x264   :  { %v1084_v50 = vadd.f32 1.0, %v9725_v6  ;;  %v8999_v28 = vpop.f32.mrb[91].mxu1 }
 0x265   :  { %v9727_v12 = vpop.eup %9726  ;;  %9736 = vpow2.f32 %v8546_v46  ;;  %v12302_v61 = vadd.f32 %v8997_v49, %v12060_v40  ;;  %v9000_v51 = vadd.f32 %v8999_v28, %v8998_v53  ;;  %1709 = vrot.lane.b32.xlu1 %v1625_v19, %s11216_s25 }
 0x266   :  { %9738 = vrcp.f32 %v1084_v50  ;;  %v1085_v30 = vadd.f32 1.0, %v9727_v12  ;;  %v9729_v21 = vpop.eup %9728 }
 0x267   :  { %v961_v60 = vadd.f32 %v12130_v41, %v12302_v61  ;;  %v12308_v48 = vadd.f32 %v9000_v51, %v12060_v40  ;;  %v1626_v23 = vmul.f32 %v9729_v21, %v12009_v42 }
 0x268   :  { %9740 = vrcp.f32 %v1085_v30 }
 0x269   :  { %v8547_v17 = vmul.f32 -1.442695, %v961_v60  ;;  %v962_v26 = vadd.f32 %v12138_v0, %v12308_v48  ;;  %v9001_v3 = vpop.f32.mrb[92].mxu1  ;;  %1711 = vrot.lane.b32.xlu0 %v1626_v23, %s11216_s25 }
 0x26a   :  { %v9731_v18 = vpop.eup %9730  ;;  %v9002_v16 = vpop.f32.mrb[93].mxu1 }
 0x26b   :  { %v9733_v5 = vpop.eup %9732  ;;  %9742 = vpow2.f32 %v8547_v17  ;;  %v8548_v37 = vmul.f32 -1.442695, %v962_v26  ;;  %v9003_v41 = vadd.f32 %v9002_v16, %v9001_v3  ;;  %v9004_v11 = vpop.f32.mrb[94].mxu1  ;;  %v1627_v39 = vmul.f32 %v9731_v18, %v12027_v2 }
 0x26c   :  { %v1086_v6 = vadd.f32 1.0, %v9733_v5  ;;  %v9005_v46 = vpop.f32.mrb[95].mxu1  ;;  %v1570_v17 = vpop.permute.xlu1 %1569 }
 0x26d   :  { %v9735_v49 = vpop.eup %9734  ;;  %9744 = vpow2.f32 %v8548_v37  ;;  %v12316_v0 = vadd.f32 %v9003_v41, %v12060_v40  ;;  %v9006_v42 = vadd.f32 %v9005_v46, %v9004_v11  ;;  %1713 = vrot.lane.b32.xlu1 %v1627_v39, %s11216_s25 }
 0x26e   :  { %9746 = vrcp.f32 %v1086_v6  ;;  %v1087_v53 = vadd.f32 1.0, %v9735_v49  ;;  %v1572_v49 = vpop.permute.xlu0 %1571 }
 0x26f   :  { %v9737_v19 = vpop.eup %9736  ;;  %v963_v50 = vadd.f32 %v12246_v7, %v12316_v0  ;;  %v12322_v28 = vadd.f32 %v9006_v42, %v12060_v40 }
 0x270   :  { %v9739_v2 = vpop.eup %9738  ;;  %9748 = vrcp.f32 %v1087_v53  ;;  %v1088_v12 = vadd.f32 1.0, %v9737_v19  ;;  %v12330_v16 = vpop.permute.xlu1 %1217 }
 0x271   :  { %v8549_v51 = vmul.f32 -1.442695, %v963_v50  ;;  %v964_v30 = vadd.f32 %v12255_v15, %v12322_v28  ;;  %v1628_v60 = vmul.f32 %v9739_v2, %v12029_v55 }
 0x272   :  { %v9741_v21 = vpop.eup %9740  ;;  %9750 = vrcp.f32 %v1088_v12  ;;  %v12343_v50 = vpop.permute.xlu0 %1219 }
 0x273   :  { %9752 = vpow2.f32 %v8549_v51  ;;  %v8550_v26 = vmul.f32 -1.442695, %v964_v30  ;;  %1715 = vrot.lane.b32.xlu0 %v1628_v60, %s11216_s25  ;;  %v1629_v7 = vmul.f32 %v9741_v21, %v12047_v1  ;;  %v16067_v60 = vld [vmem:[#allocation40_spill] sm:$0xff] }
 0x274   :  { %v12337_v46 = vpop.permute.xlu1 %1229 }
 0x275   :  { %v9743_v40 = vpop.eup %9742  ;;  %9754 = vpow2.f32 %v8550_v26  ;;  %1717 = vrot.lane.b32.xlu1 %v1629_v7, %s11216_s25 }
 0x276   :  { %v1089_v23 = vadd.f32 1.0, %v9743_v40 }
 0x277   :  { %v9745_v3 = vpop.eup %9744 }
 0x278   :  { %v9747_v18 = vpop.eup %9746  ;;  %9756 = vrcp.f32 %v1089_v23  ;;  %v1090_v15 = vadd.f32 1.0, %v9745_v3  ;;  %v12340_v53 = vpop.permute.xlu1 %2081  ;;  %v16070_v3 = vld [vmem:[#allocation41_spill] sm:$0xff] }
 0x279   :  { %v1630_v55 = vmul.f32 %v9747_v18, %v12049_v58 }
 0x27a   :  { %v9749_v5 = vpop.eup %9748  ;;  %9758 = vrcp.f32 %v1090_v15 }
 0x27b   :  { %1719 = vrot.lane.b32.xlu0 %v1630_v55, %s11216_s25  ;;  %v1631_v37 = vmul.f32 %v9749_v5, %v12092_v32  ;;  %v16071_v55 = vld [vmem:[#allocation42_spill] sm:$0xff] }
 0x27c   :  { %v9751_v1 = vpop.eup %9750 }
 0x27d   :  { %v9753_v41 = vpop.eup %9752  ;;  %1721 = vrot.lane.b32.xlu1 %v1631_v37, %s11216_s25  ;;  %v1632_v11 = vmul.f32 %v9751_v1, %v12097_v59 }
 0x27e   :  { %v1091_v39 = vadd.f32 1.0, %v9753_v41 }
 0x27f   :  { %v9755_v6 = vpop.eup %9754  ;;  %1723 = vrot.lane.b32.xlu0 %v1632_v11, %s11216_s25 }
 0x280   :  { %9760 = vrcp.f32 %v1091_v39  ;;  %v1092_v58 = vadd.f32 1.0, %v9755_v6  ;;  %v16072_v39 = vld [vmem:[#allocation43_spill] sm:$0xff] }
 0x282   :  { %v9757_v42 = vpop.eup %9756  ;;  %9762 = vrcp.f32 %v1092_v58 }
 0x283   :  { %v1633_v32 = vmul.f32 %v9757_v42, %v12166_v54 }
 0x284   :  { %v9759_v19 = vpop.eup %9758 }
 0x285   :  { %1725 = vrot.lane.b32.xlu1 %v1633_v32, %s11216_s25  ;;  %v1634_v59 = vmul.f32 %v9759_v19, %v12175_v43  ;;  %v16074_v32 = vld [vmem:[#allocation14_spill] sm:$0xff] }
 0x287   :  { %v1670_v2 = vpop.permute.xlu1 %1669  ;;  %1727 = vrot.lane.b32.xlu0 %v1634_v59, %s11216_s25 }
 0x288   :  { %v1765_v12 = vadd.f32 %v1670_v2, %v12065_v45 }
 0x289   :  { %v1672_v51 = vpop.permute.xlu0 %1671 }
 0x28a   :  { %v9761_v30 = vpop.eup %9760  ;;  %9764 = vtanh.f32 %v1765_v12  ;;  %v1766_v21 = vadd.f32 %v1672_v51, %v16067_v60  ;;  %v11110_v51 = vld [vmem:[%s15902_s0 + $0x98] sm:$0xff] }
 0x28b   :  { %v12350_v26 = vpop.permute.xlu1 %1233  ;;  %v1635_v54 = vmul.f32 %v9761_v30, %v1570_v17 }
 0x28c   :  { %16068 = vst [vmem:[#allocation40_spill] sm:$0xff] %v12350_v26  ;;  %v9763_v7 = vpop.eup %9762  ;;  %9766 = vtanh.f32 %v1766_v21  ;;  %v16075_v21 = vld [vmem:[#allocation46_spill] sm:$0xff] }
 0x28d   :  { %1729 = vrot.lane.b32.xlu1 %v1635_v54, %s11216_s25  ;;  %v12353_v40 = vpop.permute.xlu0 %1235  ;;  %v1636_v43 = vmul.f32 %v9763_v7, %v1572_v49  ;;  %v16073_v49 = vld [vmem:[#allocation15_spill] sm:$0xff] }
 0x28e   :  { %16069 = vst [vmem:[#allocation51_spill] sm:$0xff] %v12353_v40  ;;  %v11111_v7 = vld [vmem:[%s15902_s0 + $0x90] sm:$0xff] }
 0x28f   :  { %v1674_v23 = vpop.permute.xlu1 %1673  ;;  %1731 = vrot.lane.b32.xlu0 %v1636_v43, %s11216_s25 }
 0x290   :  { %v1767_v18 = vadd.f32 %v1674_v23, %v16070_v3 }
 0x291   :  { %v1676_v15 = vpop.permute.xlu0 %1675 }
 0x292   :  { %v1768_v5 = vadd.f32 %v1676_v15, %v16071_v55  ;;  %9768 = vtanh.f32 %v1767_v18 }
 0x293   :  { %v12358_v37 = vpop.permute.xlu1 %2085 }
 0x294   :  { %v9765_v1 = vpop.eup %9764  ;;  %9770 = vtanh.f32 %v1768_v5  ;;  %v16076_v5 = vld [vmem:[#allocation20_spill] sm:$0xff] }
 0x295   :  { %1893 = vrot.lane.b32.xlu1 %v9765_v1, %s11215_s16  ;;  %v12361_v17 = vpop.permute.xlu0 %2087 }
 0x296   :  { %v9767_v41 = vpop.eup %9766 }
 0x297   :  { %1895 = vrot.lane.b32.xlu0 %v9767_v41, %s11215_s16  ;;  %v1678_v11 = vpop.permute.xlu1 %1677 }
 0x298   :  { %v1769_v6 = vadd.f32 %v1678_v11, %v16072_v39 }
 0x299   :  { %1239 = vrot.lane.b32.xlu1 %v16073_v49, %s11214_s19  ;;  %v1680_v58 = vpop.permute.xlu0 %1679 }
 0x29a   :  { %9772 = vtanh.f32 %v1769_v6  ;;  %v1770_v42 = vadd.f32 %v1680_v58, %v12102_v22  ;;  %v16077_v6 = vld [vmem:[#allocation21_spill] sm:$0xff] }
 0x29b   :  { %1237 = vrot.lane.b32.xlu0 %v16074_v32, %s11214_s19  ;;  %v11112_v32 = vld [vmem:[%s15902_s0 + $0xa0] sm:$0xff] }
 0x29c   :  { %v9769_v19 = vpop.eup %9768  ;;  %9774 = vtanh.f32 %v1770_v42 }
 0x29d   :  { %1897 = vrot.lane.b32.xlu1 %v9769_v19, %s11215_s16 }
 0x29e   :  { %v9771_v59 = vpop.eup %9770 }
 0x29f   :  { %1899 = vrot.lane.b32.xlu0 %v9771_v59, %s11215_s16  ;;  %v1682_v2 = vpop.permute.xlu1 %1681 }
 0x2a0   :  { %v1771_v12 = vadd.f32 %v1682_v2, %v12111_v62  ;;  %v11113_v2 = vld [vmem:[%s15902_s0 + $0xa8] sm:$0xff] }
 0x2a1   :  { %2091 = vrot.lane.b32.xlu1 %v11110_v51, %s11214_s19  ;;  %v1684_v30 = vpop.permute.xlu0 %1683 }
 0x2a2   :  { %9776 = vtanh.f32 %v1771_v12  ;;  %v1772_v54 = vadd.f32 %v1684_v30, %v16075_v21 }
 0x2a3   :  { %2089 = vrot.lane.b32.xlu0 %v11111_v7, %s11214_s19  ;;  %v16078_v7 = vld [vmem:[#allocation25_spill] sm:$0xff] }
 0x2a4   :  { %v9773_v43 = vpop.eup %9772  ;;  %9778 = vtanh.f32 %v1772_v54 }
 0x2a5   :  { %1901 = vrot.lane.b32.xlu1 %v9773_v43, %s11215_s16 }
 0x2a6   :  { %v9775_v23 = vpop.eup %9774 }
 0x2a7   :  { %v1686_v18 = vpop.permute.xlu1 %1685  ;;  %1903 = vrot.lane.b32.xlu0 %v9775_v23, %s11215_s16  ;;  %v16079_v23 = vld [vmem:[#allocation47_spill] sm:$0xff] }
 0x2a8   :  { %v1773_v15 = vadd.f32 %v1686_v18, %v12126_v27 }
 0x2a9   :  { %1241 = vrot.lane.b32.xlu1 %v16076_v5, %s11214_s19  ;;  %v1688_v1 = vpop.permute.xlu0 %1687  ;;  %v16080_v5 = vld [vmem:[#allocation24_spill] sm:$0xff] }
 0x2aa   :  { %9780 = vtanh.f32 %v1773_v15  ;;  %v1774_v11 = vadd.f32 %v1688_v1, %v12136_v4 }
 0x2ab   :  { %1243 = vrot.lane.b32.xlu0 %v16077_v6, %s11214_s19 }
 0x2ac   :  { %v9777_v41 = vpop.eup %9776  ;;  %9782 = vtanh.f32 %v1774_v11 }
 0x2ad   :  { %1905 = vrot.lane.b32.xlu1 %v9777_v41, %s11215_s16 }
 0x2ae   :  { %v9779_v49 = vpop.eup %9778 }
 0x2af   :  { %v1690_v58 = vpop.permute.xlu1 %1689  ;;  %1907 = vrot.lane.b32.xlu0 %v9779_v49, %s11215_s16 }
 0x2b0   :  { %v1775_v42 = vadd.f32 %v1690_v58, %v12150_v38 }
 0x2b1   :  { %2093 = vrot.lane.b32.xlu1 %v11112_v32, %s11214_s19  ;;  %v1692_v19 = vpop.permute.xlu0 %1691 }
 0x2b2   :  { %9784 = vtanh.f32 %v1775_v42  ;;  %v1776_v59 = vadd.f32 %v1692_v19, %v12160_v34 }
 0x2b3   :  { %2095 = vrot.lane.b32.xlu0 %v11113_v2, %s11214_s19 }
 0x2b4   :  { %v9781_v12 = vpop.eup %9780  ;;  %9786 = vtanh.f32 %v1776_v59 }
 0x2b5   :  { %1909 = vrot.lane.b32.xlu1 %v9781_v12, %s11215_s16 }
 0x2b6   :  { %v9783_v51 = vpop.eup %9782 }
 0x2b7   :  { %v1694_v30 = vpop.permute.xlu1 %1693  ;;  %1911 = vrot.lane.b32.xlu0 %v9783_v51, %s11215_s16 }
 0x2b8   :  { %v1777_v54 = vadd.f32 %v1694_v30, %v12178_v35 }
 0x2b9   :  { %1247 = vrot.lane.b32.xlu1 %v16078_v7, %s11214_s19  ;;  %v1696_v43 = vpop.permute.xlu0 %1695 }
 0x2ba   :  { %9788 = vtanh.f32 %v1777_v54  ;;  %v1778_v18 = vadd.f32 %v1696_v43, %v16079_v23 }
 0x2bb   :  { %1245 = vrot.lane.b32.xlu0 %v16080_v5, %s11214_s19 }
 0x2bc   :  { %v9785_v15 = vpop.eup %9784  ;;  %9790 = vtanh.f32 %v1778_v18 }
 0x2bd   :  { %1913 = vrot.lane.b32.xlu1 %v9785_v15, %s11215_s16 }
 0x2be   :  { %v9787_v1 = vpop.eup %9786 }
 0x2bf   :  { %v1698_v41 = vpop.permute.xlu1 %1697  ;;  %1915 = vrot.lane.b32.xlu0 %v9787_v1, %s11215_s16 }
 0x2c0   :  { %v1779_v11 = vadd.f32 %v1698_v41, %v12196_v36 }
 0x2c1   :  { %v1700_v6 = vpop.permute.xlu0 %1699 }
 0x2c2   :  { %9792 = vtanh.f32 %v1779_v11  ;;  %v1780_v49 = vadd.f32 %v1700_v6, %v12202_v20  ;;  %v16081_v6 = vld [vmem:[#allocation22_spill] sm:$0xff] }
 0x2c4   :  { %v9789_v58 = vpop.eup %9788  ;;  %9794 = vtanh.f32 %v1780_v49  ;;  %v1285_v49 = vadd.f32 %v16081_v6, %v12065_v45  ;;  %v16083_v45 = vld [vmem:[#allocation30_spill] sm:$0xff] }
 0x2c5   :  { %1917 = vrot.lane.b32.xlu1 %v9789_v58, %s11215_s16 }
 0x2c6   :  { %v9791_v42 = vpop.eup %9790 }
 0x2c7   :  { %1919 = vrot.lane.b32.xlu0 %v9791_v42, %s11215_s16 }
 0x2cb   :  { %v1702_v32 = vpop.permute.xlu1 %1701 }
 0x2cc   :  { %v1781_v19 = vadd.f32 %v1702_v32, %v12207_v44  ;;  %v1704_v59 = vpop.permute.xlu0 %1703  ;;  %v9793_v12 = vpop.eup %9792  ;;  %v16082_v32 = vld [vmem:[#allocation26_spill] sm:$0xff] }
 0x2cd   :  { %v1782_v2 = vadd.f32 %v1704_v59, %v12215_v33  ;;  %1921 = vrot.lane.b32.xlu1 %v9793_v12, %s11215_s16  ;;  %v8551_v12 = vmul.f32 -1.442695, %v1285_v49 }
 0x2ce   :  { %9796 = vtanh.f32 %v1781_v19  ;;  %v9795_v51 = vpop.eup %9794  ;;  %v1286_v19 = vadd.f32 %v16082_v32, %v16067_v60  ;;  %v9618_v60 = vld [vmem:[%s15906_s4 + $0x20] ss:$8 sps:$4 sm:$0xff]  }
 0x2cf   :  { %9798 = vtanh.f32 %v1782_v2  ;;  %1923 = vrot.lane.b32.xlu0 %v9795_v51, %s11215_s16 }
 0x2d3   :  { %v1706_v30 = vpop.permute.xlu1 %1705 }
 0x2d4   :  { %v1783_v54 = vadd.f32 %v1706_v30, %v12225_v9  ;;  %v1708_v7 = vpop.permute.xlu0 %1707  ;;  %v8552_v30 = vmul.f32 -1.442695, %v1286_v19  ;;  %v11114_v19 = vld [vmem:[%s15902_s0 + $0xb0] sm:$0xff] }
 0x2d5   :  { %v1784_v43 = vadd.f32 %v1708_v7, %v12231_v29  ;;  %v9620_v7 = vld [vmem:[%s15906_s4 + $0x24] ss:$8 sps:$4 sm:$0xff]  }
 0x2d6   :  { %9800 = vtanh.f32 %v1783_v54  ;;  %v1287_v54 = vadd.f32 %v16083_v45, %v16070_v3  ;;  %2350 = vmatprep.subr.bf16.mxu0 %v9620_v7  ;;  %v16088_v7 = vld [vmem:[#allocation37_spill] sm:$0xff] }
 0x2d7   :  { %v1710_v18 = vpop.permute.xlu1 %1709  ;;  %9802 = vtanh.f32 %v1784_v43  ;;  %v9623_v43 = vld [vmem:[%s15906_s4 + $0x34] ss:$8 sps:$4 sm:$0xff]   ;;  %2351 = vmatpush1.bf16.msra.mxu0 %v9618_v60 }
 0x2d8   :  { %v9797_v15 = vpop.eup %9796  ;;  %v1785_v5 = vadd.f32 %v1710_v18, %v12243_v24  ;;  %v8553_v3 = vmul.f32 -1.442695, %v1287_v54  ;;  %2352 = vmatprep.subr.bf16.mxu0 %v9623_v43  ;;  %v1292_v43 = vadd.f32 %v16088_v7, %v16075_v21 }
 0x2d9   :  { %1925 = vrot.lane.b32.xlu1 %v9797_v15, %s11215_s16  ;;  %v9799_v1 = vpop.eup %9798  ;;  %v16084_v15 = vld [vmem:[#allocation31_spill] sm:$0xff] }
 0x2da   :  { %9804 = vtanh.f32 %v1785_v5  ;;  %1927 = vrot.lane.b32.xlu0 %v9799_v1, %s11215_s16  ;;  %v1288_v5 = vadd.f32 %v16084_v15, %v16071_v55  ;;  %v9621_v1 = vld [vmem:[%s15906_s4 + $0x30] ss:$8 sps:$4 sm:$0xff]   ;;  %v16085_v55 = vld [vmem:[#allocation34_spill] sm:$0xff] }
 0x2db   :  { %v1712_v41 = vpop.permute.xlu0 %1711  ;;  %2353 = vmatpush1.bf16.msra.mxu0 %v9621_v1 }
 0x2dc   :  { %v1786_v11 = vadd.f32 %v1712_v41, %v12251_v14 }
 0x2de   :  { %9806 = vtanh.f32 %v1786_v11  ;;  %v8554_v11 = vmul.f32 -1.442695, %v1288_v5 }
 0x2df   :  { %v1714_v58 = vpop.permute.xlu1 %1713 }
 0x2e0   :  { %v9801_v42 = vpop.eup %9800  ;;  %v1787_v59 = vadd.f32 %v1714_v58, %v12261_v47  ;;  %v1289_v58 = vadd.f32 %v16085_v55, %v16072_v39  ;;  %v16087_v39 = vld [vmem:[#allocation36_spill] sm:$0xff] }
 0x2e1   :  { %1929 = vrot.lane.b32.xlu0 %v9801_v42, %s11215_s16  ;;  %v9803_v2 = vpop.eup %9802  ;;  %v16086_v42 = vld [vmem:[#allocation35_spill] sm:$0xff]  ;;  %v1291_v60 = vadd.f32 %v16087_v39, %v12111_v62  ;;  %v16089_v62 = vld [vmem:[#allocation38_spill] sm:$0xff] }
 0x2e2   :  { %9808 = vtanh.f32 %v1787_v59  ;;  %1931 = vrot.lane.b32.xlu1 %v9803_v2, %s11215_s16  ;;  %v1290_v32 = vadd.f32 %v16086_v42, %v12102_v22 }
 0x2e3   :  { %9810 = vpow2.f32 %v8551_v12 }
 0x2e4   :  { %v9805_v51 = vpop.eup %9804  ;;  %9812 = vpow2.f32 %v8552_v30  ;;  %v8556_v30 = vmul.f32 -1.442695, %v1290_v32 }
 0x2e5   :  { %9814 = vpow2.f32 %v8553_v3  ;;  %v1716_v12 = vpop.permute.xlu0 %1715  ;;  %v8557_v3 = vmul.f32 -1.442695, %v1291_v60  ;;  %v16091_v60 = vld [vmem:[#allocation44_spill] sm:$0xff] }
 0x2e6   :  { %1933 = vrot.lane.b32.xlu1 %v9805_v51, %s11215_s16  ;;  %9816 = vpow2.f32 %v8554_v11  ;;  %v8555_v51 = vmul.f32 -1.442695, %v1289_v58  ;;  %v1295_v7 = vadd.f32 %v16091_v60, %v12150_v38 }
 0x2e7   :  { %v12460_v45 = vpop.permute.xlu1 %1717 }
 0x2e8   :  { %v9807_v18 = vpop.eup %9806 }
 0x2e9   :  { %1935 = vrot.lane.b32.xlu0 %v9807_v18, %s11215_s16 }
 0x2ec   :  { %v9809_v41 = vpop.eup %9808 }
 0x2ed   :  { %1937 = vrot.lane.b32.xlu0 %v9809_v41, %s11215_s16  ;;  %v9811_v6 = vpop.eup %9810  ;;  %v12464_v22 = vpop.permute.xlu0 %1719  ;;  %v8558_v41 = vmul.f32 -1.442695, %v1292_v43 }
 0x2ee   :  { %v9813_v49 = vpop.eup %9812  ;;  %v1413_v59 = vadd.f32 1.0, %v9811_v6 }
 0x2ef   :  { %v1414_v2 = vadd.f32 1.0, %v9813_v49  ;;  %v9815_v54 = vpop.eup %9814  ;;  %v12468_v18 = vpop.permute.xlu1 %1721  ;;  %v1293_v49 = vadd.f32 %v16089_v62, %v12126_v27 }
 0x2f0   :  { %9818 = vrcp.f32 %v1413_v59  ;;  %v9817_v15 = vpop.eup %9816  ;;  %v1415_v5 = vadd.f32 1.0, %v9815_v54 }
 0x2f1   :  { %2097 = vrot.lane.b32.xlu0 %v11114_v19, %s11214_s19  ;;  %9820 = vrcp.f32 %v1414_v2  ;;  %v12470_v1 = vpop.permute.xlu0 %1723  ;;  %v1416_v11 = vadd.f32 1.0, %v9817_v15  ;;  %v8559_v19 = vmul.f32 -1.442695, %v1293_v49  ;;  %v16090_v2 = vld [vmem:[#allocation39_spill] sm:$0xff]  ;;  %v16092_v49 = vld [vmem:[#allocation6_spill] sm:$0xff] }
 0x2f2   :  { %9822 = vpow2.f32 %v8555_v51  ;;  %v1294_v51 = vadd.f32 %v16090_v2, %v12136_v4  ;;  %v16093_v2 = vld [vmem:[#allocation7_spill] sm:$0xff] }
 0x2f3   :  { %9824 = vpow2.f32 %v8556_v30  ;;  %v1788_v30 = vadd.f32 %v1716_v12, %v12266_v25 }
 0x2f4   :  { %9826 = vrcp.f32 %v1415_v5 }
 0x2f5   :  { %9828 = vpow2.f32 %v8557_v3 }
 0x2f6   :  { %9830 = vpow2.f32 %v8558_v41  ;;  %v8560_v41 = vmul.f32 -1.442695, %v1294_v51 }
 0x2f7   :  { %v12472_v6 = vpop.permute.xlu1 %1725  ;;  %9832 = vrcp.f32 %v1416_v11 }
 0x2f8   :  { %9834 = vpow2.f32 %v8559_v19  ;;  %v16094_v19 = vld [vmem:[#allocation45_spill] sm:$0xff] }
 0x2f9   :  { %v12476_v55 = vpop.permute.xlu0 %1727  ;;  %9836 = vtanh.f32 %v1788_v30 }
 0x2fa   :  { %v9819_v21 = vpop.eup %9818 }
 0x2fb   :  { %v9821_v58 = vpop.eup %9820  ;;  %v1829_v27 = vsub.f32 1.0, %v9819_v21  ;;  %v2149_v4 = vmul.f32 %v9819_v21, %v16092_v49  ;;  %v16098_v49 = vld [vmem:[#allocation8_spill] sm:$0xff] }
 0x2fc   :  { %v9823_v32 = vpop.eup %9822  ;;  %v1830_v3 = vsub.f32 1.0, %v9821_v58  ;;  %v2150_v12 = vmul.f32 %v9821_v58, %v16093_v2  ;;  %v16099_v2 = vld [vmem:[#allocation9_spill] sm:$0xff] }
 0x2fd   :  { %v9825_v59 = vpop.eup %9824  ;;  %v1417_v39 = vadd.f32 1.0, %v9823_v32  ;;  %v8561_v32 = vmul.f32 -1.442695, %v1295_v7 }
 0x2fe   :  { %v1418_v15 = vadd.f32 1.0, %v9825_v59  ;;  %v9827_v62 = vpop.eup %9826  ;;  %v1296_v59 = vadd.f32 %v16094_v19, %v12160_v34  ;;  %v1298_v19 = vadd.f32 %v12192_v31, %v16079_v23  ;;  %v1789_v31 = vadd.f32 %v12460_v45, %v12273_v63 }
 0x2ff   :  { %v12478_v42 = vpop.permute.xlu1 %1729  ;;  %v9829_v25 = vpop.eup %9828  ;;  %9838 = vrcp.f32 %v1417_v39  ;;  %v1831_v7 = vsub.f32 1.0, %v9827_v62 }
 0x300   :  { %v9831_v38 = vpop.eup %9830  ;;  %9840 = vrcp.f32 %v1418_v15  ;;  %v1419_v58 = vadd.f32 1.0, %v9829_v25  ;;  %v8564_v23 = vmul.f32 -1.442695, %v1298_v19  ;;  %v1300_v19 = vadd.f32 %v12343_v50, %v12202_v20 }
 0x301   :  { %v12483_v54 = vpop.permute.xlu0 %1731  ;;  %v9833_v30 = vpop.eup %9832  ;;  %9842 = vpow2.f32 %v8560_v41  ;;  %v1420_v60 = vadd.f32 1.0, %v9831_v38  ;;  %v1792_v50 = vadd.f32 %v12470_v1, %v12292_v13  ;;  %v16108_v1 = vld [vmem:[#allocation12_spill] sm:$0xff] }
 0x302   :  { %9844 = vpow2.f32 %v8561_v32  ;;  %v1832_v34 = vsub.f32 1.0, %v9833_v30  ;;  %v9835_v25 = vpop.eup %9834 }
 0x303   :  { %9846 = vrcp.f32 %v1419_v58  ;;  %v9837_v38 = vpop.eup %9836 }
 0x304   :  { %9848 = vrcp.f32 %v1420_v60 }
 0x307   :  { %v1894_v43 = vpop.permute.xlu1 %1893 }
 0x308   :  { %v1989_v5 = vmul.f32 %v1894_v43, %v1829_v27  ;;  %v8562_v43 = vmul.f32 -1.442695, %v1296_v59 }
 0x309   :  { %v1896_v11 = vpop.permute.xlu0 %1895  ;;  %v9839_v58 = vpop.eup %9838 }
 0x30a   :  { %v1990_v40 = vmul.f32 %v1896_v11, %v1830_v3  ;;  %v12493_v27 = vadd.f32 %v2149_v4, %v1989_v5  ;;  %v16097_v5 = vld [vmem:[#allocation48_spill] sm:$0xff]  ;;  %v1790_v3 = vadd.f32 %v12464_v22, %v12278_v52  ;;  %v2151_v4 = vmul.f32 %v9827_v62, %v16098_v49 }
 0x30b   :  { %v12489_v26 = vpop.permute.xlu1 %1239  ;;  %9850 = vpow2.f32 %v8562_v43 }
 0x30c   :  { %16095 = vst [vmem:[#allocation41_spill] sm:$0xff] %v12493_v27  ;;  %v12495_v51 = vadd.f32 %v2150_v12, %v1990_v40  ;;  %v1297_v40 = vadd.f32 %v16097_v5, %v12178_v35  ;;  %v2152_v12 = vmul.f32 %v9833_v30, %v16099_v2  ;;  %9852 = vtanh.f32 %v1790_v3  ;;  %v9841_v30 = vpop.eup %9840  ;;  %v11115_v5 = vld [vmem:[%s15902_s0 + $0xb8] sm:$0xff] }
 0x30d   :  { %v12497_v21 = vpop.permute.xlu0 %1237  ;;  %v9843_v43 = vpop.eup %9842  ;;  %v1299_v3 = vadd.f32 %v12330_v16, %v12196_v36  ;;  %v1834_v45 = vsub.f32 1.0, %v9841_v30  ;;  %v16104_v36 = vld [vmem:[#allocation28_spill] sm:$0xff]  ;;  %v16105_v16 = vld [vmem:[#allocation29_spill] sm:$0xff] }
 0x30e   :  { %16096 = vst [vmem:[#allocation42_spill] sm:$0xff] %v12495_v51  ;;  %v2213_v39 = vpack.c.bf16 %v12495_v51, %v12493_v27 }
 0x30f   :  { %v1898_v15 = vpop.permute.xlu1 %1897 }
 0x310   :  { %2250 = vrot.lane.b32.xlu1 %v2213_v39, %s11215_s16  ;;  %v1991_v41 = vmul.f32 %v1898_v15, %v1831_v7  ;;  %v8563_v39 = vmul.f32 -1.442695, %v1297_v40  ;;  %v1421_v7 = vadd.f32 1.0, %v9835_v25  ;;  %v1833_v15 = vsub.f32 1.0, %v9839_v58  ;;  %v9845_v40 = vpop.eup %9844  ;;  %v16102_v25 = vld [vmem:[#allocation10_spill] sm:$0xff] }
 0x311   :  { %v1900_v11 = vpop.permute.xlu0 %1899  ;;  %v2153_v49 = vmul.f32 %v9839_v58, %v16102_v25  ;;  %v8565_v58 = vmul.f32 -1.442695, %v1299_v3 }
 0x312   :  { %v1992_v32 = vmul.f32 %v1900_v11, %v1832_v34  ;;  %v12510_v59 = vadd.f32 %v2151_v4, %v1991_v41  ;;  %9854 = vpow2.f32 %v8563_v39  ;;  %v1422_v41 = vadd.f32 1.0, %v9843_v43  ;;  %v16103_v4 = vld [vmem:[#allocation11_spill] sm:$0xff] }
 0x313   :  { %v12514_v22 = vpop.permute.xlu1 %2091  ;;  %9856 = vrcp.f32 %v1421_v7  ;;  %v2154_v2 = vmul.f32 %v9841_v30, %v16103_v4  ;;  %v1791_v30 = vadd.f32 %v12468_v18, %v12287_v56 }
 0x314   :  { %16100 = vst [vmem:[#allocation43_spill] sm:$0xff] %v12510_v59  ;;  %v12512_v35 = vadd.f32 %v2152_v12, %v1992_v32  ;;  %1939 = vrot.lane.b32.xlu1 %v9837_v38, %s11215_s16  ;;  %9858 = vtanh.f32 %v1789_v31  ;;  %v9847_v32 = vpop.eup %9846  ;;  %v1423_v38 = vadd.f32 1.0, %v9845_v40 }
 0x315   :  { %v12517_v62 = vpop.permute.xlu0 %2089  ;;  %9860 = vpow2.f32 %v8564_v23  ;;  %v9849_v7 = vpop.eup %9848  ;;  %v1835_v40 = vsub.f32 1.0, %v9847_v32  ;;  %v2155_v25 = vmul.f32 %v9847_v32, %v16108_v1  ;;  %v11117_v1 = vld [vmem:[%s15902_s0 + $0xc0] sm:$0xff] }
 0x316   :  { %16101 = vst [vmem:[#allocation15_spill] sm:$0xff] %v12512_v35  ;;  %v2214_v60 = vpack.c.bf16 %v12512_v35, %v12510_v59  ;;  %v9851_v43 = vpop.eup %9850  ;;  %9862 = vrcp.f32 %v1422_v41 }
 0x317   :  { %v1902_v34 = vpop.permute.xlu1 %1901  ;;  %v9853_v20 = vpop.eup %9852  ;;  %9864 = vrcp.f32 %v1423_v38  ;;  %v1424_v18 = vadd.f32 1.0, %v9851_v43  ;;  %v16110_v38 = vld [vmem:[#allocation13_spill] sm:$0xff] }
 0x318   :  { %2099 = vrot.lane.b32.xlu1 %v11115_v5, %s11214_s19  ;;  %2252 = vrot.lane.b32.xlu0 %v2214_v60, %s11215_s16  ;;  %v1993_v11 = vmul.f32 %v1902_v34, %v1833_v15  ;;  %v8566_v34 = vmul.f32 -1.442695, %v1300_v19  ;;  %9866 = vpow2.f32 %v8565_v58  ;;  %v2156_v19 = vmul.f32 %v9849_v7, %v16110_v38 }
 0x319   :  { %v1904_v12 = vpop.permute.xlu0 %1903  ;;  %9868 = vtanh.f32 %v1791_v30  ;;  %v16111_v30 = vld [vmem:[#allocation27_spill] sm:$0xff] }
 0x31a   :  { %v1994_v39 = vmul.f32 %v1904_v12, %v1834_v45  ;;  %v12542_v31 = vadd.f32 %v2153_v49, %v1993_v11  ;;  %v1836_v11 = vsub.f32 1.0, %v9849_v7  ;;  %9870 = vtanh.f32 %v1792_v50 }
 0x31b   :  { %v12534_v60 = vpop.permute.xlu1 %1241  ;;  %9872 = vpow2.f32 %v8566_v34  ;;  %v1794_v7 = vadd.f32 %v12476_v55, %v12308_v48 }
 0x31c   :  { %1249 = vrot.lane.b32.xlu1 %v16104_v36, %s11214_s19  ;;  %1251 = vrot.lane.b32.xlu0 %v16105_v16, %s11214_s19  ;;  %16106 = vst [vmem:[#allocation14_spill] sm:$0xff] %v12542_v31  ;;  %v12544_v23 = vadd.f32 %v2154_v2, %v1994_v39  ;;  %v9855_v45 = vpop.eup %9854  ;;  %v16109_v2 = vld [vmem:[#allocation23_spill] sm:$0xff]  ;;  %v11116_v16 = vld [vmem:[%s15902_s0 + $0xc8] sm:$0xff]  ;;  %9874 = vrcp.f32 %v1424_v18 }
 0x31d   :  { %v12548_v15 = vpop.permute.xlu0 %1243  ;;  %v9857_v4 = vpop.eup %9856  ;;  %v1301_v12 = vadd.f32 %v16109_v2, %v12207_v44  ;;  %v1425_v43 = vadd.f32 1.0, %v9855_v45 }
 0x31e   :  { %16107 = vst [vmem:[#allocation46_spill] sm:$0xff] %v12544_v23  ;;  %v2215_v5 = vpack.c.bf16 %v12544_v23, %v12542_v31  ;;  %v9859_v58 = vpop.eup %9858 }
 0x31f   :  { %v1906_v3 = vpop.permute.xlu1 %1905  ;;  %v9861_v32 = vpop.eup %9860  ;;  %9876 = vrcp.f32 %v1425_v43  ;;  %v16116_v43 = vld [vmem:[#allocation17_spill] sm:$0xff] }
 0x320   :  { %1943 = vrot.lane.b32.xlu0 %v9853_v20, %s11215_s16  ;;  %v1995_v41 = vmul.f32 %v1906_v3, %v1835_v40  ;;  %2254 = vrot.lane.b32.xlu1 %v2215_v5, %s11215_s16  ;;  %v1302_v20 = vadd.f32 %v16111_v30, %v12215_v33  ;;  %v9863_v5 = vpop.eup %9862  ;;  %v8567_v40 = vmul.f32 -1.442695, %v1301_v12  ;;  %v1426_v18 = vadd.f32 1.0, %v9861_v32  ;;  %v16114_v12 = vld [vmem:[#allocation32_spill] sm:$0xff] }
 0x321   :  { %v1908_v49 = vpop.permute.xlu0 %1907  ;;  %v9865_v33 = vpop.eup %9864  ;;  %9878 = vtanh.f32 %v1794_v7  ;;  %v1303_v38 = vadd.f32 %v16114_v12, %v12225_v9  ;;  %v2158_v30 = vmul.f32 %v9863_v5, %v16116_v43 }
 0x322   :  { %v1996_v39 = vmul.f32 %v1908_v49, %v1836_v11  ;;  %v12566_v50 = vadd.f32 %v2155_v25, %v1995_v41  ;;  %v1837_v11 = vsub.f32 1.0, %v9857_v4  ;;  %v8568_v41 = vmul.f32 -1.442695, %v1302_v20  ;;  %v9867_v55 = vpop.eup %9866 }
 0x323   :  { %v12558_v36 = vpop.permute.xlu1 %2093  ;;  %v1838_v49 = vsub.f32 1.0, %v9863_v5  ;;  %v9869_v2 = vpop.eup %9868  ;;  %9880 = vpow2.f32 %v8567_v40  ;;  %v16117_v40 = vld [vmem:[#allocation33_spill] sm:$0xff] }
 0x324   :  { %2103 = vrot.lane.b32.xlu0 %v11116_v16, %s11214_s19  ;;  %16112 = vst [vmem:[#allocation20_spill] sm:$0xff] %v12566_v50  ;;  %v12568_v44 = vadd.f32 %v2156_v19, %v1996_v39  ;;  %1941 = vrot.lane.b32.xlu1 %v9859_v58, %s11215_s16  ;;  %v1793_v19 = vadd.f32 %v12472_v6, %v12302_v61  ;;  %v9871_v16 = vpop.eup %9870  ;;  %9882 = vrcp.f32 %v1426_v18  ;;  %v16115_v58 = vld [vmem:[#allocation16_spill] sm:$0xff]  ;;  %v1427_v6 = vadd.f32 1.0, %v9867_v55 }
 0x325   :  { %v12573_v34 = vpop.permute.xlu0 %2095  ;;  %v2157_v32 = vmul.f32 %v9857_v4, %v16115_v58  ;;  %v9873_v7 = vpop.eup %9872  ;;  %9884 = vpow2.f32 %v8568_v41  ;;  %v8569_v4 = vmul.f32 -1.442695, %v1303_v38  ;;  %v1305_v55 = vadd.f32 %v12337_v46, %v12243_v24 }
 0x326   :  { %16113 = vst [vmem:[#allocation21_spill] sm:$0xff] %v12568_v44  ;;  %v2216_v3 = vpack.c.bf16 %v12568_v44, %v12566_v50  ;;  %v9875_v9 = vpop.eup %9874  ;;  %9886 = vtanh.f32 %v1793_v19  ;;  %v1306_v24 = vadd.f32 %v12222_v8, %v12251_v14 }
 0x327   :  { %v1910_v45 = vpop.permute.xlu1 %1909  ;;  %9888 = vrcp.f32 %v1427_v6  ;;  %v1840_v38 = vsub.f32 1.0, %v9875_v9 }
 0x328   :  { %2101 = vrot.lane.b32.xlu1 %v11117_v1, %s11214_s19  ;;  %2256 = vrot.lane.b32.xlu0 %v2216_v3, %s11215_s16  ;;  %v1997_v25 = vmul.f32 %v1910_v45, %v1837_v11  ;;  %v1304_v11 = vadd.f32 %v16117_v40, %v12231_v29  ;;  %v1428_v1 = vadd.f32 1.0, %v9873_v7  ;;  %9890 = vpow2.f32 %v8569_v4 }
 0x329   :  { %v1912_v39 = vpop.permute.xlu0 %1911  ;;  %v9877_v19 = vpop.eup %9876  ;;  %v1796_v4 = vadd.f32 %v12483_v54, %v12322_v28 }
 0x32a   :  { %v1998_v20 = vmul.f32 %v1912_v39, %v1838_v49  ;;  %v12594_v45 = vadd.f32 %v2157_v32, %v1997_v25  ;;  %v1839_v49 = vsub.f32 1.0, %v9865_v33  ;;  %v8570_v12 = vmul.f32 -1.442695, %v1304_v11  ;;  %v16120_v32 = vld [vmem:[#allocation18_spill] sm:$0xff] }
 0x32b   :  { %v12588_v3 = vpop.permute.xlu1 %1247  ;;  %v1795_v39 = vadd.f32 %v12478_v42, %v12316_v0  ;;  %v9879_v58 = vpop.eup %9878  ;;  %9892 = vrcp.f32 %v1428_v1  ;;  %v2159_v43 = vmul.f32 %v9865_v33, %v16120_v32  ;;  %v8571_v11 = vmul.f32 -1.442695, %v1305_v55  ;;  %v11119_v33 = vld [vmem:[%s15902_s0 + $0xd8] sm:$0xff] }
 0x32c   :  { %1947 = vrot.lane.b32.xlu1 %v9871_v16, %s11215_s16  ;;  %1945 = vrot.lane.b32.xlu0 %v9869_v2, %s11215_s16  ;;  %16118 = vst [vmem:[#allocation25_spill] sm:$0xff] %v12594_v45  ;;  %v12596_v18 = vadd.f32 %v2158_v30, %v1998_v20  ;;  %v11118_v2 = vld [vmem:[%s15902_s0 + $0xd0] sm:$0xff]  ;;  %9894 = vpow2.f32 %v8570_v12  ;;  %v1841_v1 = vsub.f32 1.0, %v9877_v19  ;;  %v2161_v54 = vmul.f32 %v9877_v19, %v12235_v57  ;;  %v11121_v57 = vld [vmem:[%s15902_s0 + $0xe8] sm:$0xff] }
 0x32d   :  { %v12598_v5 = vpop.permute.xlu0 %1245  ;;  %v16121_v30 = vld [vmem:[#allocation19_spill] sm:$0xff]  ;;  %v9881_v40 = vpop.eup %9880  ;;  %9896 = vtanh.f32 %v1795_v39 }
 0x32e   :  { %16119 = vst [vmem:[#allocation47_spill] sm:$0xff] %v12596_v18  ;;  %v2217_v41 = vpack.c.bf16 %v12596_v18, %v12594_v45  ;;  %v2160_v20 = vmul.f32 %v9875_v9, %v16121_v30  ;;  %v9883_v46 = vpop.eup %9882  ;;  %v1429_v8 = vadd.f32 1.0, %v9881_v40  ;;  %9898 = vpow2.f32 %v8571_v11 }
 0x32f   :  { %v1914_v29 = vpop.permute.xlu1 %1913  ;;  %v9885_v9 = vpop.eup %9884  ;;  %v1842_v55 = vsub.f32 1.0, %v9883_v46  ;;  %9900 = vtanh.f32 %v1796_v4  ;;  %v2162_v39 = vmul.f32 %v9883_v46, %v12210_v10 }
 0x330   :  { %2105 = vrot.lane.b32.xlu0 %v11118_v2, %s11214_s19  ;;  %v1999_v25 = vmul.f32 %v1914_v29, %v1839_v49  ;;  %2258 = vrot.lane.b32.xlu1 %v2217_v41, %s11215_s16  ;;  %v9887_v41 = vpop.eup %9886  ;;  %v8572_v49 = vmul.f32 -1.442695, %v1306_v24  ;;  %v1430_v12 = vadd.f32 1.0, %v9885_v9  ;;  %9902 = vrcp.f32 %v1429_v8 }
 0x331   :  { %v1916_v16 = vpop.permute.xlu0 %1915 }
 0x332   :  { %v2000_v7 = vmul.f32 %v1916_v16, %v1840_v38  ;;  %v12616_v6 = vadd.f32 %v2159_v43, %v1999_v25  ;;  %v9889_v38 = vpop.eup %9888  ;;  %9904 = vpow2.f32 %v8572_v49 }
 0x333   :  { %9906 = vrcp.f32 %v1430_v12  ;;  %v1843_v40 = vsub.f32 1.0, %v9889_v38 }
 0x334   :  { %1951 = vrot.lane.b32.xlu0 %v9879_v58, %s11215_s16  ;;  %16122 = vst [vmem:[#allocation24_spill] sm:$0xff] %v12616_v6  ;;  %v12618_v42 = vadd.f32 %v2160_v20, %v2000_v7  ;;  %2107 = vrot.lane.b32.xlu1 %v11119_v33, %s11214_s19  ;;  %v9891_v58 = vpop.eup %9890  ;;  %v11120_v20 = vld [vmem:[%s15902_s0 + $0xe0] sm:$0xff] }
 0x335   :  { %v9893_v32 = vpop.eup %9892  ;;  %v1431_v19 = vadd.f32 1.0, %v9891_v58 }
 0x336   :  { %16123 = vst [vmem:[#allocation22_spill] sm:$0xff] %v12618_v42  ;;  %v2218_v14 = vpack.c.bf16 %v12618_v42, %v12616_v6  ;;  %v9895_v10 = vpop.eup %9894  ;;  %v1844_v9 = vsub.f32 1.0, %v9893_v32  ;;  %v13211_v6 = vld [vmem:[%s15907_s5] ss:$0 sm:$0xff] }
 0x337   :  { %v1918_v29 = vpop.permute.xlu1 %1917  ;;  %v9897_v24 = vpop.eup %9896  ;;  %v1432_v11 = vadd.f32 1.0, %v9895_v10  ;;  %9908 = vrcp.f32 %v1431_v19 }
 0x338   :  { %v2001_v2 = vmul.f32 %v1918_v29, %v1841_v1  ;;  %1949 = vrot.lane.b32.xlu1 %v9887_v41, %s11215_s16  ;;  %2260 = vrot.lane.b32.xlu0 %v2218_v14, %s11215_s16  ;;  %v9899_v8 = vpop.eup %9898  ;;  %v2163_v14 = vmul.f32 %v9889_v38, %v12340_v53  ;;  %v16126_v1 = vld [vmem:[#allocation49_spill] sm:$0xff] }
 0x339   :  { %v1920_v25 = vpop.permute.xlu0 %1919  ;;  %v2164_v41 = vmul.f32 %v9893_v32, %v16126_v1  ;;  %v9901_v29 = vpop.eup %9900  ;;  %9910 = vrcp.f32 %v1432_v11  ;;  %v1433_v38 = vadd.f32 1.0, %v9899_v8 }
 0x33a   :  { %v2002_v16 = vmul.f32 %v1920_v25, %v1842_v55  ;;  %v12632_v43 = vadd.f32 %v2161_v54, %v2001_v2  ;;  %v9903_v12 = vpop.eup %9902  ;;  %v11122_v25 = vld [vmem:[%s15902_s0 + $0xf0] sm:$0xff] }
 0x33b   :  { %9912 = vrcp.f32 %v1433_v38 }
 0x33c   :  { %16124 = vst [vmem:[#allocation26_spill] sm:$0xff] %v12632_v43  ;;  %v12634_v30 = vadd.f32 %v2162_v39, %v2002_v16  ;;  %2109 = vrot.lane.b32.xlu1 %v11120_v20, %s11214_s19  ;;  %2111 = vrot.lane.b32.xlu0 %v11121_v57, %s11214_s19  ;;  %v9905_v54 = vpop.eup %9904  ;;  %v1845_v16 = vsub.f32 1.0, %v9903_v12  ;;  %v11123_v20 = vld [vmem:[%s15902_s0 + $0xf8] sm:$0xff] }
 0x33d   :  { %v9907_v53 = vpop.eup %9906  ;;  %v1434_v58 = vadd.f32 1.0, %v9905_v54 }
 0x33e   :  { %16125 = vst [vmem:[#allocation30_spill] sm:$0xff] %v12634_v30  ;;  %v2219_v7 = vpack.c.bf16 %v12634_v30, %v12632_v43  ;;  %v1846_v10 = vsub.f32 1.0, %v9907_v53 }
 0x33f   :  { %v1922_v46 = vpop.permute.xlu1 %1921  ;;  %9914 = vrcp.f32 %v1434_v58 }
 0x340   :  { %v2003_v33 = vmul.f32 %v1922_v46, %v1843_v40  ;;  %1953 = vrot.lane.b32.xlu0 %v9897_v24, %s11215_s16  ;;  %2262 = vrot.lane.b32.xlu1 %v2219_v7, %s11215_s16  ;;  %v2165_v7 = vmul.f32 %v9903_v12, %v12358_v37  ;;  %v2166_v40 = vmul.f32 %v9907_v53, %v12361_v17 }
 0x341   :  { %v1924_v4 = vpop.permute.xlu0 %1923  ;;  %v9909_v46 = vpop.eup %9908 }
 0x342   :  { %v2004_v49 = vmul.f32 %v1924_v4, %v1844_v9  ;;  %v12650_v2 = vadd.f32 %v2163_v14, %v2003_v33  ;;  %v1847_v8 = vsub.f32 1.0, %v9909_v46 }
 0x343   :  { %v9911_v9 = vpop.eup %9910 }
 0x344   :  { %16127 = vst [vmem:[#allocation31_spill] sm:$0xff] %v12650_v2  ;;  %v12652_v55 = vadd.f32 %v2164_v41, %v2004_v49  ;;  %2113 = vrot.lane.b32.xlu0 %v11122_v25, %s11214_s19  ;;  %1955 = vrot.lane.b32.xlu1 %v9901_v29, %s11215_s16  ;;  %v1848_v41 = vsub.f32 1.0, %v9911_v9  ;;  %v2168_v17 = vmul.f32 %v9911_v9, %v12514_v22 }
 0x345   :  { %v2167_v49 = vmul.f32 %v9909_v46, %v12517_v62  ;;  %v9913_v12 = vpop.eup %9912  ;;  %v16137_v46 = vld [vmem:[#allocation51_spill] sm:$0xff] }
 0x346   :  { %16128 = vst [vmem:[#allocation34_spill] sm:$0xff] %v12652_v55  ;;  %v2220_v39 = vpack.c.bf16 %v12652_v55, %v12650_v2  ;;  %v2169_v22 = vmul.f32 %v9913_v12, %v12558_v36 }
 0x348   :  { %2115 = vrot.lane.b32.xlu1 %v11123_v20, %s11214_s19  ;;  %2264 = vrot.lane.b32.xlu0 %v2220_v39, %s11215_s16 }
 0x349   :  { %v9915_v53 = vpop.eup %9914 }
 0x34a   :  { %v2170_v62 = vmul.f32 %v9915_v53, %v12573_v34 }
 0x34b   :  { %v1926_v32 = vpop.permute.xlu1 %1925 }
 0x34c   :  { %v2005_v57 = vmul.f32 %v1926_v32, %v1845_v16  ;;  %v1928_v19 = vpop.permute.xlu0 %1927  ;;  %v1849_v16 = vsub.f32 1.0, %v9913_v12  ;;  %v1850_v32 = vsub.f32 1.0, %v9915_v53  ;;  %v1311_v12 = vadd.f32 %v12534_v60, %v12287_v56 }
 0x34d   :  { %v2006_v24 = vmul.f32 %v1928_v19, %v1846_v10  ;;  %v1312_v53 = vadd.f32 %v12548_v15, %v12292_v13  ;;  %v1314_v56 = vadd.f32 %v12588_v3, %v12308_v48  ;;  %v1313_v15 = vadd.f32 %v12598_v5, %v12302_v61 }
 0x34e   :  { %v12668_v11 = vadd.f32 %v2165_v7, %v2005_v57  ;;  %v16135_v7 = vld [vmem:[#allocation40_spill] sm:$0xff] }
 0x34f   :  { %v12670_v33 = vadd.f32 %v2166_v40, %v2006_v24  ;;  %v1307_v40 = vadd.f32 %v16135_v7, %v12261_v47  ;;  %v16136_v24 = vld [vmem:[#allocation50_spill] sm:$0xff]  ;;  %v1309_v47 = vadd.f32 %v12497_v21, %v12273_v63  ;;  %v16138_v63 = vmov 0  }
 0x350   :  { %16129 = vst [vmem:[#allocation35_spill] sm:$0xff] %v12668_v11  ;;  %v1308_v9 = vadd.f32 %v16137_v46, %v16136_v24  ;;  %v8577_v21 = vmul.f32 -1.442695, %v1311_v12  ;;  %v8579_v3 = vmul.f32 -1.442695, %v1313_v15 }
 0x351   :  { %16130 = vst [vmem:[#allocation36_spill] sm:$0xff] %v12670_v33  ;;  %v2221_v4 = vpack.c.bf16 %v12670_v33, %v12668_v11 }
 0x352   :  { %v8574_v36 = vmul.f32 -1.442695, %v1308_v9 }
 0x353   :  { %v1930_v14 = vpop.permute.xlu0 %1929  ;;  %2266 = vrot.lane.b32.xlu1 %v2221_v4, %s11215_s16 }
 0x354   :  { %v2007_v1 = vmul.f32 %v1930_v14, %v1847_v8  ;;  %v1932_v37 = vpop.permute.xlu1 %1931  ;;  %v8573_v8 = vmul.f32 -1.442695, %v1307_v40 }
 0x355   :  { %v2008_v29 = vmul.f32 %v1932_v37, %v1848_v41 }
 0x356   :  { %v12677_v25 = vadd.f32 %v2167_v49, %v2007_v1  ;;  %9916 = vpow2.f32 %v8573_v8  ;;  %v1310_v1 = vadd.f32 %v12489_v26, %v12278_v52  ;;  %v8575_v49 = vmul.f32 -1.442695, %v1309_v47 }
 0x357   :  { %v12679_v54 = vadd.f32 %v2168_v17, %v2008_v29  ;;  %9918 = vpow2.f32 %v8574_v36 }
 0x358   :  { %16131 = vst [vmem:[#allocation37_spill] sm:$0xff] %v12677_v25  ;;  %v1934_v38 = vpop.permute.xlu1 %1933  ;;  %v8576_v17 = vmul.f32 -1.442695, %v1310_v1 }
 0x359   :  { %16132 = vst [vmem:[#allocation38_spill] sm:$0xff] %v12679_v54  ;;  %v2222_v39 = vpack.c.bf16 %v12679_v54, %v12677_v25  ;;  %v2009_v58 = vmul.f32 %v1934_v38, %v1849_v16  ;;  %v8578_v16 = vmul.f32 -1.442695, %v1312_v53 }
 0x35b   :  { %2268 = vrot.lane.b32.xlu0 %v2222_v39, %s11215_s16  ;;  %v1936_v20 = vpop.permute.xlu0 %1935  ;;  %v12686_v10 = vadd.f32 %v2169_v22, %v2009_v58 }
 0x35c   :  { %v2010_v57 = vmul.f32 %v1936_v20, %v1850_v32 }
 0x35d   :  { %16133 = vst [vmem:[#allocation39_spill] sm:$0xff] %v12686_v10 }
 0x35e   :  { %v12688_v19 = vadd.f32 %v2170_v62, %v2010_v57 }
 0x35f   :  { %v1938_v29 = vpop.permute.xlu0 %1937 }
 0x360   :  { %16134 = vst [vmem:[#allocation44_spill] sm:$0xff] %v12688_v19  ;;  %v2223_v4 = vpack.c.bf16 %v12688_v19, %v12686_v10  ;;  %v9917_v34 = vpop.eup %9916 }
 0x361   :  { %v9919_v14 = vpop.eup %9918  ;;  %v1435_v41 = vadd.f32 1.0, %v9917_v34 }
 0x362   :  { %2270 = vrot.lane.b32.xlu1 %v2223_v4, %s11215_s16  ;;  %v1436_v37 = vadd.f32 1.0, %v9919_v14  ;;  %v8580_v4 = vmul.f32 -1.442695, %v1314_v56 }
 0x363   :  { %9920 = vrcp.f32 %v1435_v41  ;;  %v2098_v58 = vpop.permute.xlu0 %2097 }
 0x364   :  { %9922 = vrcp.f32 %v1436_v37 }
 0x365   :  { %9924 = vpow2.f32 %v8576_v17 }
 0x366   :  { %9926 = vpow2.f32 %v8575_v49 }
 0x367   :  { %9928 = vpow2.f32 %v8577_v21 }
 0x368   :  { %9930 = vpow2.f32 %v8578_v16 }
 0x36d   :  { %v9921_v52 = vpop.eup %9920 }
 0x36e   :  { %v9923_v26 = vpop.eup %9922  ;;  %v1851_v22 = vsub.f32 1.0, %v9921_v52  ;;  %v2171_v13 = vmul.f32 %v9921_v52, %v2098_v58 }
 0x36f   :  { %v9925_v39 = vpop.eup %9924  ;;  %v1852_v62 = vsub.f32 1.0, %v9923_v26 }
 0x370   :  { %v9927_v20 = vpop.eup %9926  ;;  %v1438_v57 = vadd.f32 1.0, %v9925_v39  ;;  %v2011_v24 = vmul.f32 %v1938_v29, %v1851_v22 }
 0x371   :  { %v1437_v60 = vadd.f32 1.0, %v9927_v20  ;;  %v9929_v14 = vpop.eup %9928 }
 0x372   :  { %9932 = vrcp.f32 %v1438_v57  ;;  %v12713_v8 = vadd.f32 %v2171_v13, %v2011_v24  ;;  %v9931_v1 = vpop.eup %9930  ;;  %v1439_v37 = vadd.f32 1.0, %v9929_v14 }
 0x373   :  { %9934 = vrcp.f32 %v1437_v60  ;;  %v1440_v12 = vadd.f32 1.0, %v9931_v1 }
 0x374   :  { %16139 = vst [vmem:[#allocation6_spill] sm:$0xff] %v12713_v8  ;;  %9936 = vpow2.f32 %v8580_v4 }
 0x375   :  { %9938 = vpow2.f32 %v8579_v3 }
 0x376   :  { %9940 = vrcp.f32 %v1439_v37 }
 0x377   :  { %9942 = vrcp.f32 %v1440_v12 }
 0x37c   :  { %v9933_v29 = vpop.eup %9932 }
 0x37d   :  { %v9935_v53 = vpop.eup %9934  ;;  %v1854_v39 = vsub.f32 1.0, %v9933_v29 }
 0x37e   :  { %v9937_v21 = vpop.eup %9936  ;;  %v1853_v16 = vsub.f32 1.0, %v9935_v53 }
 0x37f   :  { %v9939_v58 = vpop.eup %9938  ;;  %v1442_v57 = vadd.f32 1.0, %v9937_v21 }
 0x380   :  { %v1441_v56 = vadd.f32 1.0, %v9939_v58  ;;  %v9941_v24 = vpop.eup %9940 }
 0x382   :  { %v2251_v38 = vpop.permute.xlu1 %2250 }
 0x383   :  { %8591 = vmatmul.mubr.msk.bf16.vlgmr.msra.gmra.mrb[32].mxu0 %vm148_vm0, %v2251_v38 }
 0x384   :  { %2392 = vmatprep.mubr.bf16.mxu0 %v16138_v63 }
 0x386   :  { %v1940_v32 = vpop.permute.xlu1 %1939 }
 0x387   :  { %v2012_v46 = vmul.f32 %v1940_v32, %v1852_v62 }
 0x38a   :  { %v2100_v7 = vpop.permute.xlu1 %2099  ;;  %v2253_v40 = vpop.permute.xlu0 %2252 }
 0x38b   :  { %v2172_v9 = vmul.f32 %v9923_v26, %v2100_v7  ;;  %8592 = vmatmul.mubr.msk.bf16.gmra.mrb[36].mxu0 %vm148_vm0, %v2253_v40 }
 0x38c   :  { %2402 = vmatprep.mubr.bf16.mxu0 %v16138_v63 }
 0x38d   :  { %v12715_v48 = vadd.f32 %v2172_v9, %v2012_v46  ;;  %v9943_v9 = vpop.eup %9942 }
 0x38e   :  { %v1250_v36 = vpop.permute.xlu1 %1249  ;;  %v1252_v34 = vpop.permute.xlu0 %1251 }
 0x38f   :  { %16140 = vst [vmem:[#allocation7_spill] sm:$0xff] %v12715_v48  ;;  %v2224_v61 = vpack.c.bf16 %v12715_v48, %v12713_v8  ;;  %v1315_v41 = vadd.f32 %v1250_v36, %v12316_v0  ;;  %v1316_v17 = vadd.f32 %v1252_v34, %v12322_v28  ;;  %v1856_v34 = vsub.f32 1.0, %v9943_v9 }
 0x391   :  { %2272 = vrot.lane.b32.xlu0 %v2224_v61, %s11215_s16  ;;  %v8581_v52 = vmul.f32 -1.442695, %v1315_v41  ;;  %v8582_v26 = vmul.f32 -1.442695, %v1316_v17  ;;  %v1855_v61 = vsub.f32 1.0, %v9941_v24 }
 0x392   :  { %v1944_v5 = vpop.permute.xlu0 %1943  ;;  %v2255_v47 = vpop.permute.xlu1 %2254 }
 0x393   :  { %8593 = vmatmul.mubr.msk.bf16.gmra.mrb[40].mxu0 %vm148_vm0, %v2255_v47  ;;  %9944 = vpow2.f32 %v8581_v52  ;;  %v2014_v28 = vmul.f32 %v1944_v5, %v1854_v39 }
 0x394   :  { %2412 = vmatprep.mubr.bf16.mxu0 %v16138_v63  ;;  %9946 = vpow2.f32 %v8582_v26 }
 0x395   :  { %9948 = vrcp.f32 %v1442_v57 }
 0x396   :  { %v2104_v49 = vpop.permute.xlu0 %2103  ;;  %v1942_v38 = vpop.permute.xlu1 %1941  ;;  %9950 = vrcp.f32 %v1441_v56 }
 0x397   :  { %v2174_v0 = vmul.f32 %v9933_v29, %v2104_v49  ;;  %v2013_v22 = vmul.f32 %v1942_v38, %v1853_v16 }
 0x399   :  { %v12726_v13 = vadd.f32 %v2174_v0, %v2014_v28 }
 0x39a   :  { %v2102_v32 = vpop.permute.xlu1 %2101  ;;  %v2257_v20 = vpop.permute.xlu0 %2256 }
 0x39b   :  { %v2173_v62 = vmul.f32 %v9935_v53, %v2102_v32  ;;  %8594 = vmatmul.mubr.msk.bf16.gmra.mrb[44].mxu0 %vm148_vm0, %v2257_v20  ;;  %16141 = vst [vmem:[#allocation45_spill] sm:$0xff] %v12726_v13 }
 0x39c   :  { %2422 = vmatprep.mubr.bf16.mxu0 %v16138_v63 }
 0x39d   :  { %v12728_v60 = vadd.f32 %v2173_v62, %v2013_v22  ;;  %v9945_v3 = vpop.eup %9944 }
 0x39e   :  { %v1948_v15 = vpop.permute.xlu1 %1947  ;;  %v1946_v7 = vpop.permute.xlu0 %1945  ;;  %v1443_v47 = vadd.f32 1.0, %v9945_v3 }
 0x39f   :  { %16142 = vst [vmem:[#allocation48_spill] sm:$0xff] %v12728_v60  ;;  %v2225_v40 = vpack.c.bf16 %v12726_v13, %v12728_v60  ;;  %v9947_v36 = vpop.eup %9946  ;;  %v2016_v41 = vmul.f32 %v1948_v15, %v1856_v34  ;;  %v2015_v37 = vmul.f32 %v1946_v7, %v1855_v61 }
 0x3a0   :  { %v1444_v49 = vadd.f32 1.0, %v9947_v36  ;;  %v9949_v29 = vpop.eup %9948  ;;  %9952 = vrcp.f32 %v1443_v47 }
 0x3a1   :  { %2274 = vrot.lane.b32.xlu1 %v2225_v40, %s11215_s16  ;;  %v9951_v38 = vpop.eup %9950  ;;  %v1858_v39 = vsub.f32 1.0, %v9949_v29 }
 0x3a2   :  { %v2106_v46 = vpop.permute.xlu0 %2105  ;;  %v2259_v4 = vpop.permute.xlu1 %2258  ;;  %9954 = vrcp.f32 %v1444_v49  ;;  %v1857_v16 = vsub.f32 1.0, %v9951_v38 }
 0x3a3   :  { %8595 = vmatmul.mubr.msk.bf16.gmra.mrb[48].mxu0 %vm148_vm0, %v2259_v4  ;;  %v2175_v5 = vmul.f32 %v9941_v24, %v2106_v46 }
 0x3a4   :  { %2432 = vmatprep.mubr.bf16.mxu0 %v16138_v63 }
 0x3a5   :  { %v12735_v12 = vadd.f32 %v2175_v5, %v2015_v37 }
 0x3a6   :  { %v1952_v14 = vpop.permute.xlu0 %1951  ;;  %v2108_v1 = vpop.permute.xlu1 %2107 }
 0x3a7   :  { %v2176_v17 = vmul.f32 %v9943_v9, %v2108_v1  ;;  %16143 = vst [vmem:[#allocation8_spill] sm:$0xff] %v12735_v12  ;;  %v2018_v32 = vmul.f32 %v1952_v14, %v1858_v39 }
 0x3a9   :  { %v12737_v53 = vadd.f32 %v2176_v17, %v2016_v41 }
 0x3aa   :  { %v1950_v52 = vpop.permute.xlu1 %1949  ;;  %v2261_v26 = vpop.permute.xlu0 %2260 }
 0x3ab   :  { %16144 = vst [vmem:[#allocation9_spill] sm:$0xff] %v12737_v53  ;;  %v2226_v21 = vpack.c.bf16 %v12737_v53, %v12735_v12  ;;  %8596 = vmatmul.mubr.msk.bf16.gmra.mrb[52].mxu0 %vm148_vm0, %v2261_v26  ;;  %v2017_v20 = vmul.f32 %v1950_v52, %v1857_v16  ;;  %v9953_v40 = vpop.eup %9952 }
 0x3ac   :  { %2442 = vmatprep.mubr.bf16.mxu0 %v16138_v63  ;;  %v9955_v24 = vpop.eup %9954  ;;  %v1859_v4 = vsub.f32 1.0, %v9953_v40 }
 0x3ad   :  { %2276 = vrot.lane.b32.xlu0 %v2226_v21, %s11215_s16  ;;  %v1860_v3 = vsub.f32 1.0, %v9955_v24 }
 0x3ae   :  { %v2110_v0 = vpop.permute.xlu1 %2109  ;;  %v2112_v58 = vpop.permute.xlu0 %2111 }
 0x3af   :  { %v2177_v28 = vmul.f32 %v9951_v38, %v2110_v0  ;;  %v2178_v22 = vmul.f32 %v9949_v29, %v2112_v58  ;;  %v16149_v0 = vld [vmem:[#allocation5_spill] sm:$0xff] }
 0x3b1   :  { %v12744_v62 = vadd.f32 %v2177_v28, %v2017_v20  ;;  %v12746_v57 = vadd.f32 %v2178_v22, %v2018_v32 }
 0x3b2   :  { %v2263_v56 = vpop.permute.xlu1 %2262  ;;  %v1954_v15 = vpop.permute.xlu0 %1953 }
 0x3b3   :  { %16145 = vst [vmem:[#allocation10_spill] sm:$0xff] %v12744_v62  ;;  %16146 = vst [vmem:[#allocation11_spill] sm:$0xff] %v12746_v57  ;;  %v2227_v7 = vpack.c.bf16 %v12746_v57, %v12744_v62  ;;  %8597 = vmatmul.mubr.msk.bf16.gmra.mrb[56].mxu0 %vm148_vm0, %v2263_v56  ;;  %v2019_v5 = vmul.f32 %v1954_v15, %v1859_v4 }
 0x3b4   :  { %2452 = vmatprep.mubr.bf16.mxu0 %v16138_v63 }
 0x3b5   :  { %2278 = vrot.lane.b32.xlu1 %v2227_v7, %s11215_s16 }
 0x3b6   :  { %v1956_v46 = vpop.permute.xlu1 %1955  ;;  %v2114_v9 = vpop.permute.xlu0 %2113 }
 0x3b7   :  { %v2179_v36 = vmul.f32 %v9953_v40, %v2114_v9  ;;  %v2020_v14 = vmul.f32 %v1956_v46, %v1860_v3 }
 0x3b9   :  { %v12755_v47 = vadd.f32 %v2179_v36, %v2019_v5 }
 0x3ba   :  { %v2116_v34 = vpop.permute.xlu1 %2115  ;;  %v2265_v61 = vpop.permute.xlu0 %2264 }
 0x3bb   :  { %v2180_v1 = vmul.f32 %v9955_v24, %v2116_v34  ;;  %8598 = vmatmul.mubr.msk.bf16.gmra.mrb[60].mxu0 %vm148_vm0, %v2265_v61  ;;  %16147 = vst [vmem:[#allocation28_spill] sm:$0xff] %v12755_v47 }
 0x3bc   :  { %2462 = vmatprep.mubr.bf16.mxu0 %v16138_v63 }
 0x3bd   :  { %v12757_v41 = vadd.f32 %v2180_v1, %v2020_v14 }
 0x3bf   :  { %16148 = vst [vmem:[#allocation29_spill] sm:$0xff] %v12757_v41  ;;  %v2228_v37 = vpack.c.bf16 %v12757_v41, %v12755_v47 }
 0x3c1   :  { %2280 = vrot.lane.b32.xlu0 %v2228_v37, %s11215_s16 }
 0x3c5   :  { %v2267_v17 = vpop.permute.xlu1 %2266 }
 0x3c6   :  { %8599 = vmatmul.mubr.msk.bf16.gmra.mrb[64].mxu0 %vm148_vm0, %v2267_v17 }
 0x3c7   :  { %2472 = vmatprep.mubr.bf16.mxu0 %v16138_v63 }
 0x3cd   :  { %v2269_v49 = vpop.permute.xlu0 %2268 }
 0x3ce   :  { %8600 = vmatmul.mubr.msk.bf16.gmra.mrb[68].mxu0 %vm148_vm0, %v2269_v49 }
 0x3cf   :  { %2482 = vmatprep.mubr.bf16.mxu0 %v16138_v63 }
 0x3d4   :  { %v2271_v29 = vpop.permute.xlu1 %2270 }
 0x3d6   :  { %8601 = vmatmul.mubr.msk.bf16.gmra.mrb[72].mxu0 %vm148_vm0, %v2271_v29 }
 0x3d7   :  { %2492 = vmatprep.mubr.bf16.mxu0 %v16138_v63 }
 0x403   :  { %v2273_v38 = vpop.permute.xlu0 %2272 }
 0x404   :  { %8602 = vmatmul.mubr.msk.bf16.gmra.mrb[76].mxu0 %vm148_vm0, %v2273_v38 }
 0x405   :  { %2502 = vmatprep.mubr.bf16.mxu0 %v16138_v63 }
 0x413   :  { %v2275_v52 = vpop.permute.xlu1 %2274 }
 0x414   :  { %8603 = vmatmul.mubr.msk.bf16.gmra.mrb[80].mxu0 %vm148_vm0, %v2275_v52 }
 0x415   :  { %2512 = vmatprep.mubr.bf16.mxu0 %v16138_v63 }
 0x41f   :  { %v2277_v26 = vpop.permute.xlu0 %2276 }
 0x420   :  { %8604 = vmatmul.mubr.msk.bf16.gmra.mrb[84].mxu0 %vm148_vm0, %v2277_v26 }
 0x421   :  { %2522 = vmatprep.mubr.bf16.mxu0 %v16138_v63 }
 0x427   :  { %v2279_v21 = vpop.permute.xlu1 %2278 }
 0x428   :  { %8605 = vmatmul.mubr.msk.bf16.gmra.mrb[88].mxu0 %vm148_vm0, %v2279_v21 }
 0x429   :  { %2532 = vmatprep.mubr.bf16.mxu0 %v16138_v63 }
 0x433   :  { %v2281_v39 = vpop.permute.xlu0 %2280 }
 0x434   :  { %8606 = vmatmul.mubr.msk.bf16.gmra.mrb[92].mxu0 %vm148_vm0, %v2281_v39 }
 0x435   :  { %4233 = vmatprep.mubr.bf16.mxu0 %v16138_v63 }
 0x456   :  { %v12778_v16 = vpop.f32.mrb[32].mxu0 }
 0x457   :  { %v2543_v58 = vadd.f32 %v12778_v16, %v16149_v0  ;;  %v2386_v32 = vpop.f32.mrb[33].mxu0 }
 0x458   :  { %v12782_v20 = vpop.f32.mrb[34].mxu0  ;;  %v2544_v15 = vadd.f32 %v2386_v32, %v16149_v0 }
 0x459   :  { %v2545_v28 = vadd.f32 %v12782_v20, %v16149_v0  ;;  %v2390_v56 = vpop.f32.mrb[35].mxu0  ;;  %2816 = vrot.lane.b32.xlu1 %v2543_v58, %s11214_s19  ;;  %v16150_v57 = vpack.c.bf16 %v12782_v20, %v12778_v16 }
 0x45a   :  { %v2546_v7 = vadd.f32 %v2390_v56, %v16149_v0 }
 0x45b   :  { %2818 = vrot.lane.b32.xlu0 %v2545_v28, %s11214_s19 }
 0x45d   :  { %3488 = vrot.lane.b32.xlu1 %v2544_v15, %s11215_s16 }
 0x45e   :  { %v12793_v40 = vpop.f32.mrb[36].mxu0 }
 0x45f   :  { %v2396_v24 = vpop.f32.mrb[37].mxu0  ;;  %3490 = vrot.lane.b32.xlu0 %v2546_v7, %s11215_s16  ;;  %v2547_v3 = vadd.f32 %v12793_v40, %v16149_v0 }
 0x460   :  { %v12796_v46 = vpop.f32.mrb[38].mxu0  ;;  %v2548_v34 = vadd.f32 %v2396_v24, %v16149_v0 }
 0x461   :  { %v2400_v4 = vpop.f32.mrb[39].mxu0  ;;  %3168 = vrot.lane.b32.xlu1 %v2544_v15, %s11214_s19  ;;  %v2549_v36 = vadd.f32 %v12796_v46, %v16149_v0  ;;  %v16151_v20 = vpack.c.bf16 %v12796_v46, %v12793_v40 }
 0x462   :  { %v2550_v5 = vadd.f32 %v2400_v4, %v16149_v0 }
 0x463   :  { %3170 = vrot.lane.b32.xlu0 %v2546_v7, %s11214_s19 }
 0x465   :  { %2820 = vrot.lane.b32.xlu1 %v2547_v3, %s11214_s19 }
 0x466   :  { %v12809_v61 = vpop.f32.mrb[40].mxu0 }
 0x467   :  { %2822 = vrot.lane.b32.xlu0 %v2549_v36, %s11214_s19  ;;  %v2406_v14 = vpop.f32.mrb[41].mxu0  ;;  %v2551_v49 = vadd.f32 %v12809_v61, %v16149_v0 }
 0x468   :  { %v12813_v1 = vpop.f32.mrb[42].mxu0  ;;  %v2552_v21 = vadd.f32 %v2406_v14, %v16149_v0 }
 0x469   :  { %3492 = vrot.lane.b32.xlu1 %v2548_v34, %s11215_s16  ;;  %v2410_v17 = vpop.f32.mrb[43].mxu0  ;;  %v2553_v38 = vadd.f32 %v12813_v1, %v16149_v0  ;;  %v16152_v46 = vpack.c.bf16 %v12813_v1, %v12809_v61 }
 0x46a   :  { %v2554_v32 = vadd.f32 %v2410_v17, %v16149_v0 }
 0x46b   :  { %3494 = vrot.lane.b32.xlu0 %v2550_v5, %s11215_s16 }
 0x46d   :  { %3172 = vrot.lane.b32.xlu1 %v2548_v34, %s11214_s19 }
 0x46e   :  { %v12822_v29 = vpop.f32.mrb[44].mxu0 }
 0x46f   :  { %3174 = vrot.lane.b32.xlu0 %v2550_v5, %s11214_s19  ;;  %v2416_v52 = vpop.f32.mrb[45].mxu0  ;;  %v2555_v15 = vadd.f32 %v12822_v29, %v16149_v0 }
 0x470   :  { %v12827_v26 = vpop.f32.mrb[46].mxu0  ;;  %v2556_v36 = vadd.f32 %v2416_v52, %v16149_v0 }
 0x471   :  { %2824 = vrot.lane.b32.xlu1 %v2551_v49, %s11214_s19  ;;  %v2420_v58 = vpop.f32.mrb[47].mxu0  ;;  %v2557_v3 = vadd.f32 %v12827_v26, %v16149_v0 }
 0x472   :  { %v2558_v34 = vadd.f32 %v2420_v58, %v16149_v0 }
 0x473   :  { %2826 = vrot.lane.b32.xlu0 %v2553_v38, %s11214_s19 }
 0x475   :  { %3496 = vrot.lane.b32.xlu1 %v2552_v21, %s11215_s16 }
 0x476   :  { %v12836_v28 = vpop.f32.mrb[48].mxu0 }
 0x477   :  { %3498 = vrot.lane.b32.xlu0 %v2554_v32, %s11215_s16  ;;  %v2426_v56 = vpop.f32.mrb[49].mxu0  ;;  %v2559_v52 = vadd.f32 %v12836_v28, %v16149_v0 }
 0x478   :  { %v12841_v7 = vpop.f32.mrb[50].mxu0 }
 0x479   :  { %3176 = vrot.lane.b32.xlu1 %v2552_v21, %s11214_s19  ;;  %v2430_v4 = vpop.f32.mrb[51].mxu0  ;;  %v2561_v21 = vadd.f32 %v12841_v7, %v16149_v0 }
 0x47b   :  { %3178 = vrot.lane.b32.xlu0 %v2554_v32, %s11214_s19 }
 0x47d   :  { %2828 = vrot.lane.b32.xlu1 %v2555_v15, %s11214_s19  ;;  %v2560_v15 = vadd.f32 %v2426_v56, %v16149_v0 }
 0x47e   :  { %v12852_v5 = vpop.f32.mrb[52].mxu0 }
 0x47f   :  { %2830 = vrot.lane.b32.xlu0 %v2557_v3, %s11214_s19  ;;  %v2436_v14 = vpop.f32.mrb[53].mxu0 }
 0x480   :  { %v12855_v17 = vpop.f32.mrb[54].mxu0  ;;  %v12898_v9 = vadd.f32 %v2436_v14, %v16149_v0 }
 0x481   :  { %3500 = vrot.lane.b32.xlu1 %v2556_v36, %s11215_s16  ;;  %v2440_v38 = vpop.f32.mrb[55].mxu0 }
 0x482   :  { %v12894_v37 = vadd.f32 %v2440_v38, %v16149_v0 }
 0x483   :  { %3502 = vrot.lane.b32.xlu0 %v2558_v34, %s11215_s16 }
 0x485   :  { %3180 = vrot.lane.b32.xlu1 %v2556_v36, %s11214_s19  ;;  %v2563_v36 = vadd.f32 %v12852_v5, %v16149_v0 }
 0x486   :  { %v12866_v58 = vpop.f32.mrb[56].mxu0 }
 0x487   :  { %3182 = vrot.lane.b32.xlu0 %v2558_v34, %s11214_s19  ;;  %v2446_v32 = vpop.f32.mrb[57].mxu0  ;;  %v12876_v34 = vadd.f32 %v2430_v4, %v16149_v0  ;;  %v2567_v4 = vadd.f32 %v12866_v58, %v16149_v0 }
 0x488   :  { %v12870_v3 = vpop.f32.mrb[58].mxu0  ;;  %v12914_v47 = vadd.f32 %v2446_v32, %v16149_v0 }
 0x489   :  { %2832 = vrot.lane.b32.xlu1 %v2559_v52, %s11214_s19  ;;  %v2450_v49 = vpop.f32.mrb[59].mxu0  ;;  %v2565_v52 = vadd.f32 %v12855_v17, %v16149_v0 }
 0x48a   :  { %v12910_v14 = vadd.f32 %v2450_v49, %v16149_v0 }
 0x48b   :  { %2834 = vrot.lane.b32.xlu0 %v2561_v21, %s11214_s19 }
 0x48d   :  { %3504 = vrot.lane.b32.xlu1 %v2560_v15, %s11215_s16 }
 0x48e   :  { %v12883_v56 = vpop.f32.mrb[60].mxu0 }
 0x48f   :  { %3506 = vrot.lane.b32.xlu0 %v12876_v34, %s11215_s16  ;;  %v2456_v21 = vpop.f32.mrb[61].mxu0 }
 0x490   :  { %v12888_v24 = vpop.f32.mrb[62].mxu0 }
 0x491   :  { %3184 = vrot.lane.b32.xlu1 %v2560_v15, %s11214_s19  ;;  %v2460_v39 = vpop.f32.mrb[63].mxu0  ;;  %v2569_v15 = vadd.f32 %v12870_v3, %v16149_v0 }
 0x492   :  { %v12929_v62 = vadd.f32 %v2460_v39, %v16149_v0 }
 0x493   :  { %2838 = vrot.lane.b32.xlu0 %v2565_v52, %s11214_s19 }
 0x495   :  { %2836 = vrot.lane.b32.xlu1 %v2563_v36, %s11214_s19 }
 0x497   :  { %3510 = vrot.lane.b32.xlu0 %v12894_v37, %s11215_s16 }
 0x499   :  { %3508 = vrot.lane.b32.xlu1 %v12898_v9, %s11215_s16  ;;  %v2464_v52 = vpop.f32.mrb[64].mxu0 }
 0x49a   :  { %v2466_v38 = vpop.f32.mrb[65].mxu0  ;;  %v2575_v12 = vadd.f32 %v2464_v52, %v16149_v0 }
 0x49b   :  { %2842 = vrot.lane.b32.xlu0 %v2569_v15, %s11214_s19  ;;  %v2468_v36 = vpop.f32.mrb[66].mxu0  ;;  %v2573_v15 = vadd.f32 %v12888_v24, %v16149_v0  ;;  %v12950_v40 = vadd.f32 %v2466_v38, %v16149_v0 }
 0x49c   :  { %v2615_v22 = vpack.c.bf16 %v2468_v36, %v2464_v52  ;;  %v2470_v41 = vpop.f32.mrb[67].mxu0 }
 0x49d   :  { %2840 = vrot.lane.b32.xlu1 %v2567_v4, %s11214_s19  ;;  %v2571_v4 = vadd.f32 %v12883_v56, %v16149_v0 }
 0x49e   :  { %9007 = vmatprep.subr.bf16.mxu1 %v2615_v22 }
 0x49f   :  { %3514 = vrot.lane.b32.xlu0 %v12910_v14, %s11215_s16  ;;  %9008 = vmatpush3.bf16.msra.mxu1 %v16150_v57  ;;  %v12933_v57 = vadd.f32 %v2456_v21, %v16149_v0 }
 0x4a1   :  { %3512 = vrot.lane.b32.xlu1 %v12914_v47, %s11215_s16  ;;  %v2474_v49 = vpop.f32.mrb[68].mxu0 }
 0x4a2   :  { %v2476_v32 = vpop.f32.mrb[69].mxu0 }
 0x4a3   :  { %2846 = vrot.lane.b32.xlu0 %v2573_v15, %s11214_s19  ;;  %v2478_v22 = vpop.f32.mrb[70].mxu0  ;;  %v2577_v15 = vadd.f32 %v2468_v36, %v16149_v0 }
 0x4a4   :  { %v2616_v53 = vpack.c.bf16 %v2478_v22, %v2474_v49  ;;  %v2480_v16 = vpop.f32.mrb[71].mxu0  ;;  %v2581_v52 = vadd.f32 %v2478_v22, %v16149_v0 }
 0x4a5   :  { %2844 = vrot.lane.b32.xlu1 %v2571_v4, %s11214_s19 }
 0x4a6   :  { %9009 = vmatprep.subr.bf16.mxu1 %v2616_v53  ;;  %v12946_v53 = vadd.f32 %v2470_v41, %v16149_v0  ;;  %v2579_v41 = vadd.f32 %v2474_v49, %v16149_v0 }
 0x4a7   :  { %3518 = vrot.lane.b32.xlu0 %v12929_v62, %s11215_s16  ;;  %9010 = vmatpush3.bf16.msra.mxu1 %v16151_v20 }
 0x4a9   :  { %3516 = vrot.lane.b32.xlu1 %v12933_v57, %s11215_s16  ;;  %v2484_v39 = vpop.f32.mrb[72].mxu0 }
 0x4aa   :  { %v2486_v4 = vpop.f32.mrb[73].mxu0  ;;  %v2583_v1 = vadd.f32 %v2484_v39, %v16149_v0 }
 0x4ab   :  { %2850 = vrot.lane.b32.xlu0 %v2577_v15, %s11214_s19  ;;  %v2488_v21 = vpop.f32.mrb[74].mxu0  ;;  %v12981_v36 = vadd.f32 %v2486_v4, %v16149_v0  ;;  %v16153_v4 = vpack.c.bf16 %v12827_v26, %v12822_v29 }
 0x4ac   :  { %v2617_v13 = vpack.c.bf16 %v2488_v21, %v2484_v39  ;;  %v2490_v60 = vpop.f32.mrb[75].mxu0  ;;  %v2585_v61 = vadd.f32 %v2488_v21, %v16149_v0 }
 0x4ad   :  { %2848 = vrot.lane.b32.xlu1 %v2575_v12, %s11214_s19  ;;  %v12963_v12 = vadd.f32 %v2480_v16, %v16149_v0  ;;  %v12977_v38 = vadd.f32 %v2490_v60, %v16149_v0 }
 0x4ae   :  { %9011 = vmatprep.subr.bf16.mxu1 %v2617_v13  ;;  %v12967_v13 = vadd.f32 %v2476_v32, %v16149_v0 }
 0x4af   :  { %3522 = vrot.lane.b32.xlu0 %v12946_v53, %s11215_s16  ;;  %9012 = vmatpush3.bf16.msra.mxu1 %v16152_v46 }
 0x4b1   :  { %3520 = vrot.lane.b32.xlu1 %v12950_v40, %s11215_s16 }
 0x4b3   :  { %2854 = vrot.lane.b32.xlu0 %v2581_v52, %s11214_s19 }
 0x4b5   :  { %2852 = vrot.lane.b32.xlu1 %v2579_v41, %s11214_s19 }
 0x4b7   :  { %3526 = vrot.lane.b32.xlu0 %v12963_v12, %s11215_s16 }
 0x4b9   :  { %3524 = vrot.lane.b32.xlu1 %v12967_v13, %s11215_s16 }
 0x4bb   :  { %2858 = vrot.lane.b32.xlu0 %v2585_v61, %s11214_s19 }
 0x4bd   :  { %2856 = vrot.lane.b32.xlu1 %v2583_v1, %s11214_s19 }
 0x4bf   :  { %3530 = vrot.lane.b32.xlu0 %v12977_v38, %s11215_s16 }
 0x4c1   :  { %3528 = vrot.lane.b32.xlu1 %v12981_v36, %s11215_s16 }
 0x4d7   :  { %v2494_v49 = vpop.f32.mrb[76].mxu0 }
 0x4d8   :  { %v2587_v32 = vadd.f32 %v2494_v49, %v16149_v0  ;;  %v2496_v22 = vpop.f32.mrb[77].mxu0 }
 0x4d9   :  { %v2498_v16 = vpop.f32.mrb[78].mxu0  ;;  %v12991_v39 = vadd.f32 %v2496_v22, %v16149_v0 }
 0x4da   :  { %v2589_v20 = vadd.f32 %v2498_v16, %v16149_v0  ;;  %v2618_v60 = vpack.c.bf16 %v2498_v16, %v2494_v49  ;;  %2860 = vrot.lane.b32.xlu1 %v2587_v32, %s11214_s19  ;;  %v2500_v15 = vpop.f32.mrb[79].mxu0  ;;  %v16154_v32 = vpack.c.bf16 %v12841_v7, %v12836_v28 }
 0x4db   :  { %v12998_v21 = vadd.f32 %v2500_v15, %v16149_v0 }
 0x4dc   :  { %9013 = vmatprep.subr.bf16.mxu1 %v2618_v60  ;;  %2862 = vrot.lane.b32.xlu0 %v2589_v20, %s11214_s19 }
 0x4dd   :  { %9014 = vmatpush3.bf16.msra.mxu1 %v16153_v4 }
 0x4de   :  { %3532 = vrot.lane.b32.xlu1 %v12991_v39, %s11215_s16 }
 0x4e0   :  { %3534 = vrot.lane.b32.xlu0 %v12998_v21, %s11215_s16 }
 0x4e7   :  { %v2504_v46 = vpop.f32.mrb[80].mxu0 }
 0x4e8   :  { %v2591_v52 = vadd.f32 %v2504_v46, %v16149_v0  ;;  %v2506_v41 = vpop.f32.mrb[81].mxu0 }
 0x4e9   :  { %v2508_v61 = vpop.f32.mrb[82].mxu0  ;;  %v13008_v26 = vadd.f32 %v2506_v41, %v16149_v0 }
 0x4ea   :  { %v2593_v1 = vadd.f32 %v2508_v61, %v16149_v0  ;;  %v2619_v49 = vpack.c.bf16 %v2508_v61, %v2504_v46  ;;  %2864 = vrot.lane.b32.xlu1 %v2591_v52, %s11214_s19  ;;  %v2510_v29 = vpop.f32.mrb[83].mxu0  ;;  %v16156_v52 = vpack.c.bf16 %v12855_v17, %v12852_v5 }
 0x4eb   :  { %v13015_v22 = vadd.f32 %v2510_v29, %v16149_v0 }
 0x4ec   :  { %9015 = vmatprep.subr.bf16.mxu1 %v2619_v49  ;;  %2866 = vrot.lane.b32.xlu0 %v2593_v1, %s11214_s19 }
 0x4ed   :  { %9016 = vmatpush3.bf16.msra.mxu1 %v16154_v32 }
 0x4ee   :  { %3536 = vrot.lane.b32.xlu1 %v13008_v26, %s11215_s16 }
 0x4f0   :  { %3538 = vrot.lane.b32.xlu0 %v13015_v22, %s11215_s16 }
 0x4f3   :  { %v2514_v16 = vpop.f32.mrb[84].mxu0 }
 0x4f4   :  { %v2595_v20 = vadd.f32 %v2514_v16, %v16149_v0  ;;  %v2516_v60 = vpop.f32.mrb[85].mxu0 }
 0x4f5   :  { %v2518_v15 = vpop.f32.mrb[86].mxu0  ;;  %v13025_v7 = vadd.f32 %v2516_v60, %v16149_v0 }
 0x4f6   :  { %v2597_v4 = vadd.f32 %v2518_v15, %v16149_v0  ;;  %v2620_v46 = vpack.c.bf16 %v2518_v15, %v2514_v16  ;;  %2868 = vrot.lane.b32.xlu1 %v2595_v20, %s11214_s19  ;;  %v2520_v28 = vpop.f32.mrb[87].mxu0  ;;  %v16158_v20 = vpack.c.bf16 %v12870_v3, %v12866_v58 }
 0x4f7   :  { %16155 = vst [vmem:[#allocation12_spill] sm:$0xff] %v13025_v7  ;;  %v13032_v41 = vadd.f32 %v2520_v28, %v16149_v0 }
 0x4f8   :  { %9017 = vmatprep.subr.bf16.mxu1 %v2620_v46  ;;  %2870 = vrot.lane.b32.xlu0 %v2597_v4, %s11214_s19 }
 0x4f9   :  { %9018 = vmatpush3.bf16.msra.mxu1 %v16156_v52 }
 0x4fa   :  { %3540 = vrot.lane.b32.xlu1 %v13025_v7, %s11215_s16 }
 0x4fb   :  { %v2524_v61 = vpop.f32.mrb[88].mxu0 }
 0x4fc   :  { %v2599_v1 = vadd.f32 %v2524_v61, %v16149_v0  ;;  %3542 = vrot.lane.b32.xlu0 %v13032_v41, %s11215_s16  ;;  %v2526_v49 = vpop.f32.mrb[89].mxu0 }
 0x4fd   :  { %v2528_v29 = vpop.f32.mrb[90].mxu0  ;;  %v13042_v17 = vadd.f32 %v2526_v49, %v16149_v0 }
 0x4fe   :  { %v2601_v32 = vadd.f32 %v2528_v29, %v16149_v0  ;;  %v2621_v16 = vpack.c.bf16 %v2528_v29, %v2524_v61  ;;  %2872 = vrot.lane.b32.xlu1 %v2599_v1, %s11214_s19  ;;  %v2530_v5 = vpop.f32.mrb[91].mxu0  ;;  %v16161_v1 = vpack.c.bf16 %v12888_v24, %v12883_v56  ;;  %v11124_v29 = vld [vmem:[%s15903_s1] ss:$8 sps:$4 sm:$0xff]   ;;  %v11126_v24 = vld [vmem:[%s15903_s1 + $0x10] ss:$8 sps:$4 sm:$0xff]  }
 0x4ff   :  { %16157 = vst [vmem:[#allocation23_spill] sm:$0xff] %v13042_v17  ;;  %v13049_v60 = vadd.f32 %v2530_v5, %v16149_v0  ;;  %v11127_v56 = vld [vmem:[%s15903_s1 + $0x24] ss:$8 sps:$4 sm:$0xff]   ;;  %v11129_v5 = vld [vmem:[%s15903_s1 + $0x34] ss:$8 sps:$4 sm:$0xff]  }
 0x500   :  { %9019 = vmatprep.subr.bf16.mxu1 %v2621_v16  ;;  %2874 = vrot.lane.b32.xlu0 %v2601_v32, %s11214_s19  ;;  %v11125_v32 = vld [vmem:[%s15903_s1 + $0x14] ss:$8 sps:$4 sm:$0xff]   ;;  %v11128_v16 = vld [vmem:[%s15903_s1 + $0x20] ss:$8 sps:$4 sm:$0xff]  }
 0x501   :  { %9020 = vmatpush3.bf16.msra.mxu1 %v16158_v20  ;;  %16159 = vst [vmem:[#allocation13_spill] sm:$0xff] %v13049_v60  ;;  %v11130_v20 = vld [vmem:[%s15903_s1 + $0x30] ss:$8 sps:$4 sm:$0xff]  }
 0x502   :  { %3544 = vrot.lane.b32.xlu1 %v13042_v17, %s11215_s16 }
 0x504   :  { %3546 = vrot.lane.b32.xlu0 %v13049_v60, %s11215_s16 }
 0x507   :  { %v2534_v15 = vpop.f32.mrb[92].mxu0 }
 0x508   :  { %v2603_v4 = vadd.f32 %v2534_v15, %v16149_v0  ;;  %v2536_v46 = vpop.f32.mrb[93].mxu0 }
 0x509   :  { %v2538_v28 = vpop.f32.mrb[94].mxu0  ;;  %v13059_v3 = vadd.f32 %v2536_v46, %v16149_v0  ;;  %v11133_v46 = vld [vmem:[%s15903_s1 + $0x54] ss:$8 sps:$4 sm:$0xff]  }
 0x50a   :  { %v2605_v52 = vadd.f32 %v2538_v28, %v16149_v0  ;;  %v2622_v61 = vpack.c.bf16 %v2538_v28, %v2534_v15  ;;  %2876 = vrot.lane.b32.xlu1 %v2603_v4, %s11214_s19  ;;  %v2540_v58 = vpop.f32.mrb[95].mxu0  ;;  %v11131_v15 = vld [vmem:[%s15903_s1 + $0x44] ss:$8 sps:$4 sm:$0xff]   ;;  %v11132_v4 = vld [vmem:[%s15903_s1 + $0x40] ss:$8 sps:$4 sm:$0xff]  }
 0x50b   :  { %16160 = vst [vmem:[#allocation27_spill] sm:$0xff] %v13059_v3  ;;  %v13066_v49 = vadd.f32 %v2540_v58, %v16149_v0  ;;  %v11134_v28 = vld [vmem:[%s15903_s1 + $0x50] ss:$8 sps:$4 sm:$0xff]   ;;  %v11137_v58 = vld [vmem:[%s15903_s1 + $0x74] ss:$8 sps:$4 sm:$0xff]  }
 0x50c   :  { %9021 = vmatprep.subr.bf16.mxu1 %v2622_v61  ;;  %2878 = vrot.lane.b32.xlu0 %v2605_v52, %s11214_s19  ;;  %v11135_v52 = vld [vmem:[%s15903_s1 + $0x64] ss:$8 sps:$4 sm:$0xff]   ;;  %v11136_v61 = vld [vmem:[%s15903_s1 + $0x60] ss:$8 sps:$4 sm:$0xff]  }
 0x50d   :  { %9022 = vmatpush3.bf16.msra.mxu1 %v16161_v1  ;;  %16162 = vst [vmem:[#allocation32_spill] sm:$0xff] %v13066_v49  ;;  %v11138_v1 = vld [vmem:[%s15903_s1 + $0x70] ss:$8 sps:$4 sm:$0xff]  }
 0x50e   :  { %3548 = vrot.lane.b32.xlu1 %v13059_v3, %s11215_s16 }
 0x510   :  { %2656 = vmatmul.mubr.bf16.vlgmr.msra.gmra.mrb[96].mxu1 %v11124_v29  ;;  %3550 = vrot.lane.b32.xlu0 %v13066_v49, %s11215_s16  ;;  %v11139_v29 = vld [vmem:[%s15903_s1 + $0x84] ss:$8 sps:$4 sm:$0xff]  }
 0x511   :  { %2663 = vmatprep.mubr.bf16.mxu1 %v11125_v32  ;;  %v11140_v32 = vld [vmem:[%s15903_s1 + $0x80] ss:$8 sps:$4 sm:$0xff]  }
 0x518   :  { %2664 = vmatmul.mubr.bf16.gmra.mrb[100].mxu1 %v11126_v24  ;;  %v11141_v24 = vld [vmem:[%s15903_s1 + $0x94] ss:$8 sps:$4 sm:$0xff]  }
 0x519   :  { %2671 = vmatprep.mubr.bf16.mxu1 %v11127_v56  ;;  %v11142_v56 = vld [vmem:[%s15903_s1 + $0x90] ss:$8 sps:$4 sm:$0xff]  }
 0x520   :  { %2672 = vmatmul.mubr.bf16.gmra.mrb[104].mxu1 %v11128_v16  ;;  %v11143_v16 = vld [vmem:[%s15903_s1 + $0xa4] ss:$8 sps:$4 sm:$0xff]  }
 0x521   :  { %2679 = vmatprep.mubr.bf16.mxu1 %v11129_v5  ;;  %v11144_v5 = vld [vmem:[%s15903_s1 + $0xa0] ss:$8 sps:$4 sm:$0xff]  }
 0x528   :  { %2680 = vmatmul.mubr.bf16.gmra.mrb[108].mxu1 %v11130_v20  ;;  %v11145_v20 = vld [vmem:[%s15903_s1 + $0xb4] ss:$8 sps:$4 sm:$0xff]  }
 0x529   :  { %2687 = vmatprep.mubr.bf16.mxu1 %v11131_v15  ;;  %v11146_v15 = vld [vmem:[%s15903_s1 + $0xb0] ss:$8 sps:$4 sm:$0xff]  }
 0x530   :  { %2688 = vmatmul.mubr.bf16.gmra.mrb[112].mxu1 %v11132_v4  ;;  %v11147_v4 = vld [vmem:[%s15903_s1 + $0xc4] ss:$8 sps:$4 sm:$0xff]  }
 0x531   :  { %2695 = vmatprep.mubr.bf16.mxu1 %v11133_v46  ;;  %v11148_v46 = vld [vmem:[%s15903_s1 + $0xc0] ss:$8 sps:$4 sm:$0xff]  }
 0x538   :  { %2696 = vmatmul.mubr.bf16.gmra.mrb[116].mxu1 %v11134_v28  ;;  %v11149_v28 = vld [vmem:[%s15903_s1 + $0xd4] ss:$8 sps:$4 sm:$0xff]  }
 0x539   :  { %2703 = vmatprep.mubr.bf16.mxu1 %v11135_v52  ;;  %v11150_v52 = vld [vmem:[%s15903_s1 + $0xd0] ss:$8 sps:$4 sm:$0xff]  }
 0x540   :  { %2704 = vmatmul.mubr.bf16.gmra.mrb[120].mxu1 %v11136_v61  ;;  %v11151_v61 = vld [vmem:[%s15903_s1 + $0xe4] ss:$8 sps:$4 sm:$0xff]  }
 0x541   :  { %2711 = vmatprep.mubr.bf16.mxu1 %v11137_v58  ;;  %v11152_v58 = vld [vmem:[%s15903_s1 + $0xe0] ss:$8 sps:$4 sm:$0xff]  }
 0x548   :  { %2712 = vmatmul.mubr.bf16.gmra.mrb[124].mxu1 %v11138_v1  ;;  %v11153_v1 = vld [vmem:[%s15903_s1 + $0xf4] ss:$8 sps:$4 sm:$0xff]  }
 0x549   :  { %2719 = vmatprep.mubr.bf16.mxu1 %v11139_v29  ;;  %v11154_v29 = vld [vmem:[%s15903_s1 + $0xf0] ss:$8 sps:$4 sm:$0xff]  }
 0x550   :  { %2720 = vmatmul.mubr.bf16.gmra.mrb[128].mxu1 %v11140_v32  ;;  %v11155_v32 = vld [vmem:[%s15903_s1 + $0x4] ss:$8 sps:$4 sm:$0xff]  }
 0x551   :  { %2727 = vmatprep.mubr.bf16.mxu1 %v11141_v24  ;;  %v2817_v24 = vpop.permute.xlu1 %2816 }
 0x558   :  { %2728 = vmatmul.mubr.bf16.gmra.mrb[132].mxu1 %v11142_v56  ;;  %v13168_v56 = vpop.permute.xlu1 %3488 }
 0x559   :  { %2735 = vmatprep.mubr.bf16.mxu1 %v11143_v16  ;;  %v2819_v16 = vpop.permute.xlu0 %2818 }
 0x560   :  { %2736 = vmatmul.mubr.bf16.gmra.mrb[136].mxu1 %v11144_v5  ;;  %v13170_v5 = vpop.permute.xlu1 %3168 }
 0x561   :  { %2743 = vmatprep.mubr.bf16.mxu1 %v11145_v20  ;;  %v13172_v20 = vpop.permute.xlu0 %3490 }
 0x568   :  { %2744 = vmatmul.mubr.bf16.gmra.mrb[140].mxu1 %v11146_v15  ;;  %v2821_v15 = vpop.permute.xlu1 %2820 }
 0x569   :  { %2751 = vmatprep.mubr.bf16.mxu1 %v11147_v4  ;;  %v13174_v4 = vpop.permute.xlu0 %3170 }
 0x570   :  { %2752 = vmatmul.mubr.bf16.gmra.mrb[144].mxu1 %v11148_v46  ;;  %v13176_v46 = vpop.permute.xlu1 %3492 }
 0x571   :  { %2759 = vmatprep.mubr.bf16.mxu1 %v11149_v28  ;;  %v2823_v28 = vpop.permute.xlu0 %2822 }
 0x578   :  { %2760 = vmatmul.mubr.bf16.gmra.mrb[148].mxu1 %v11150_v52  ;;  %v13178_v52 = vpop.permute.xlu1 %3172 }
 0x579   :  { %2767 = vmatprep.mubr.bf16.mxu1 %v11151_v61  ;;  %16163 = vst [vmem:[#allocation16_spill] sm:$0xff] %v13178_v52  ;;  %v13180_v61 = vpop.permute.xlu0 %3494 }
 0x580   :  { %2768 = vmatmul.mubr.bf16.gmra.mrb[152].mxu1 %v11152_v58  ;;  %v2825_v58 = vpop.permute.xlu1 %2824 }
 0x581   :  { %2775 = vmatprep.mubr.bf16.mxu1 %v11153_v1  ;;  %v13182_v1 = vpop.permute.xlu0 %3174 }
 0x582   :  { %16164 = vst [vmem:[#allocation17_spill] sm:$0xff] %v13182_v1 }
 0x588   :  { %2776 = vmatmul.mubr.bf16.gmra.mrb[156].mxu1 %v11154_v29  ;;  %v13184_v29 = vpop.permute.xlu1 %3496 }
 0x589   :  { %4506 = vmatprep.mubr.bf16.mxu1 %v11155_v32  ;;  %v13186_v32 = vpop.permute.xlu0 %2826 }
 0x58c   :  { %v13188_v0 = vpop.permute.xlu1 %3176 }
 0x58d   :  { %16165 = vst [vmem:[#allocation33_spill] sm:$0xff] %v13188_v0  ;;  %v13190_v48 = vpop.permute.xlu0 %3498 }
 0x590   :  { %v13192_v8 = vpop.permute.xlu1 %2828 }
 0x591   :  { %v13194_v19 = vpop.permute.xlu0 %3178 }
 0x592   :  { %16166 = vst [vmem:[#allocation18_spill] sm:$0xff] %v13194_v19 }
 0x594   :  { %v13196_v10 = vpop.permute.xlu1 %3500 }
 0x595   :  { %v13198_v63 = vpop.permute.xlu0 %2830 }
 0x598   :  { %v13200_v54 = vpop.permute.xlu1 %3180 }
 0x599   :  { %16167 = vst [vmem:[#allocation19_spill] sm:$0xff] %v13200_v54  ;;  %v13202_v25 = vpop.permute.xlu0 %3502 }
 0x59c   :  { %v13204_v11 = vpop.permute.xlu1 %2832 }
 0x59d   :  { %v13206_v43 = vpop.permute.xlu0 %3182 }
 0x59e   :  { %16168 = vst [vmem:[#allocation49_spill] sm:$0xff] %v13206_v43 }
 0x5a0   :  { %v13220_v44 = vpop.permute.xlu1 %3504 }
 0x5a1   :  { %v13223_v17 = vpop.permute.xlu0 %2834 }
 0x5e3   :  { %v9023_v33 = vpop.f32.mrb[96].mxu1 }
 0x5e4   :  { %v9024_v55 = vpop.f32.mrb[97].mxu1 }
 0x5e5   :  { %v9025_v2 = vadd.f32 %v9024_v55, %v9023_v33  ;;  %v9026_v30 = vpop.f32.mrb[98].mxu1 }
 0x5e6   :  { %v9027_v42 = vpop.f32.mrb[99].mxu1 }
 0x5e7   :  { %v13214_v49 = vadd.f32 %v13211_v6, %v9025_v2  ;;  %v9028_v18 = vadd.f32 %v9027_v42, %v9026_v30  ;;  %v13228_v30 = vpop.permute.xlu1 %3184 }
 0x5e8   :  { %16169 = vst [vmem:[#allocation40_spill] sm:$0xff] %v13228_v30 }
 0x5e9   :  { %v2912_v45 = vadd.f32 %v2817_v24, %v13214_v49  ;;  %v13218_v3 = vadd.f32 %v13211_v6, %v9028_v18 }
 0x5eb   :  { %v8607_v55 = vmul.f32 -1.442695, %v2912_v45  ;;  %v2913_v33 = vadd.f32 %v2819_v16, %v13218_v3  ;;  %v9029_v50 = vpop.f32.mrb[100].mxu1  ;;  %v13234_v16 = vpop.permute.xlu0 %3506 }
 0x5ec   :  { %v9030_v60 = vpop.f32.mrb[101].mxu1  ;;  %v13237_v59 = vpop.permute.xlu1 %2836 }
 0x5ed   :  { %9956 = vpow2.f32 %v8607_v55  ;;  %v8608_v23 = vmul.f32 -1.442695, %v2913_v33  ;;  %v9031_v31 = vadd.f32 %v9030_v60, %v9029_v50  ;;  %v9032_v2 = vpop.f32.mrb[102].mxu1 }
 0x5ee   :  { %v9033_v7 = vpop.f32.mrb[103].mxu1 }
 0x5ef   :  { %9958 = vpow2.f32 %v8608_v23  ;;  %v13226_v42 = vadd.f32 %v13211_v6, %v9031_v31  ;;  %v9034_v18 = vadd.f32 %v9033_v7, %v9032_v2  ;;  %v13242_v51 = vpop.permute.xlu0 %2838 }
 0x5f0   :  { %v13248_v30 = vpop.permute.xlu1 %3508 }
 0x5f1   :  { %v2914_v45 = vadd.f32 %v2821_v15, %v13226_v42  ;;  %v13232_v24 = vadd.f32 %v13211_v6, %v9034_v18 }
 0x5f3   :  { %v8609_v35 = vmul.f32 -1.442695, %v2914_v45  ;;  %v2915_v55 = vadd.f32 %v2823_v28, %v13232_v24  ;;  %v9035_v50 = vpop.f32.mrb[104].mxu1 }
 0x5f4   :  { %v9036_v60 = vpop.f32.mrb[105].mxu1 }
 0x5f5   :  { %9960 = vpow2.f32 %v8609_v35  ;;  %v8610_v23 = vmul.f32 -1.442695, %v2915_v55  ;;  %v9037_v33 = vadd.f32 %v9036_v60, %v9035_v50  ;;  %v9038_v31 = vpop.f32.mrb[106].mxu1 }
 0x5f6   :  { %v9039_v7 = vpop.f32.mrb[107].mxu1 }
 0x5f7   :  { %v9957_v2 = vpop.eup %9956  ;;  %9962 = vpow2.f32 %v8610_v23  ;;  %v13240_v15 = vadd.f32 %v13211_v6, %v9037_v33  ;;  %v9040_v18 = vadd.f32 %v9039_v7, %v9038_v31 }
 0x5f8   :  { %v3040_v45 = vadd.f32 1.0, %v9957_v2  ;;  %v13252_v2 = vpop.permute.xlu0 %3510 }
 0x5f9   :  { %v9959_v27 = vpop.eup %9958  ;;  %v2916_v28 = vadd.f32 %v2825_v58, %v13240_v15  ;;  %v13246_v35 = vadd.f32 %v13211_v6, %v9040_v18 }
 0x5fa   :  { %9964 = vrcp.f32 %v3040_v45  ;;  %v3041_v55 = vadd.f32 1.0, %v9959_v27 }
 0x5fb   :  { %v8611_v50 = vmul.f32 -1.442695, %v2916_v28  ;;  %v9041_v60 = vpop.f32.mrb[108].mxu1  ;;  %v2917_v23 = vadd.f32 %v13186_v32, %v13246_v35  ;;  %v13259_v32 = vpop.permute.xlu1 %2840 }
 0x5fc   :  { %9966 = vrcp.f32 %v3041_v55  ;;  %v9042_v33 = vpop.f32.mrb[109].mxu1  ;;  %v13264_v0 = vpop.permute.xlu0 %2842 }
 0x5fd   :  { %v9043_v31 = vadd.f32 %v9042_v33, %v9041_v60  ;;  %v9044_v7 = vpop.f32.mrb[110].mxu1  ;;  %9968 = vpow2.f32 %v8611_v50  ;;  %v8612_v58 = vmul.f32 -1.442695, %v2917_v23 }
 0x5fe   :  { %v9045_v43 = vpop.f32.mrb[111].mxu1 }
 0x5ff   :  { %v9961_v18 = vpop.eup %9960  ;;  %v13255_v45 = vadd.f32 %v13211_v6, %v9043_v31  ;;  %v9046_v27 = vadd.f32 %v9045_v43, %v9044_v7  ;;  %9970 = vpow2.f32 %v8612_v58  ;;  %v13274_v52 = vpop.permute.xlu1 %3512 }
 0x600   :  { %v3042_v28 = vadd.f32 1.0, %v9961_v18 }
 0x601   :  { %v9963_v54 = vpop.eup %9962  ;;  %v2918_v55 = vadd.f32 %v13192_v8, %v13255_v45  ;;  %v13262_v33 = vadd.f32 %v13211_v6, %v9046_v27 }
 0x602   :  { %9972 = vrcp.f32 %v3042_v28  ;;  %v3043_v60 = vadd.f32 1.0, %v9963_v54 }
 0x603   :  { %v8613_v50 = vmul.f32 -1.442695, %v2918_v55  ;;  %v9047_v23 = vpop.f32.mrb[112].mxu1  ;;  %v2919_v43 = vadd.f32 %v13198_v63, %v13262_v33 }
 0x604   :  { %v9965_v19 = vpop.eup %9964  ;;  %9974 = vrcp.f32 %v3043_v60  ;;  %v9048_v31 = vpop.f32.mrb[113].mxu1 }
 0x605   :  { %v9049_v7 = vadd.f32 %v9048_v31, %v9047_v23  ;;  %v9050_v58 = vpop.f32.mrb[114].mxu1  ;;  %v3584_v8 = vmul.f32 %v9965_v19, %v13168_v56  ;;  %9976 = vpow2.f32 %v8613_v50  ;;  %v8614_v54 = vmul.f32 -1.442695, %v2919_v43  ;;  %v13279_v50 = vpop.permute.xlu0 %3514 }
 0x606   :  { %v9967_v18 = vpop.eup %9966  ;;  %v9051_v28 = vpop.f32.mrb[115].mxu1 }
 0x607   :  { %v13270_v27 = vadd.f32 %v13211_v6, %v9049_v7  ;;  %v9052_v55 = vadd.f32 %v9051_v28, %v9050_v58  ;;  %3648 = vrot.lane.b32.xlu1 %v3584_v8, %s11216_s25  ;;  %v3585_v60 = vmul.f32 %v9967_v18, %v13172_v20  ;;  %v9969_v1 = vpop.eup %9968  ;;  %9978 = vpow2.f32 %v8614_v54  ;;  %v13291_v28 = vpop.permute.xlu1 %2844 }
 0x608   :  { %v3044_v63 = vadd.f32 1.0, %v9969_v1 }
 0x609   :  { %v2920_v19 = vadd.f32 %v13204_v11, %v13270_v27  ;;  %3650 = vrot.lane.b32.xlu0 %v3585_v60, %s11216_s25  ;;  %v9971_v56 = vpop.eup %9970  ;;  %v13282_v23 = vadd.f32 %v13211_v6, %v9052_v55 }
 0x60a   :  { %9980 = vrcp.f32 %v3044_v63  ;;  %v3045_v43 = vadd.f32 1.0, %v9971_v56  ;;  %v13298_v56 = vpop.permute.xlu0 %2846 }
 0x60b   :  { %v8615_v31 = vmul.f32 -1.442695, %v2920_v19  ;;  %v9053_v20 = vpop.f32.mrb[116].mxu1  ;;  %3188 = vrot.lane.b32.xlu1 %v12898_v9, %s11214_s19  ;;  %v2921_v1 = vadd.f32 %v13223_v17, %v13282_v23 }
 0x60c   :  { %v9973_v7 = vpop.eup %9972  ;;  %v9054_v11 = vpop.f32.mrb[117].mxu1  ;;  %9982 = vrcp.f32 %v3045_v43 }
 0x60d   :  { %v9055_v58 = vadd.f32 %v9054_v11, %v9053_v20  ;;  %v9056_v8 = vpop.f32.mrb[118].mxu1  ;;  %3186 = vrot.lane.b32.xlu0 %v12876_v34, %s11214_s19  ;;  %v3586_v18 = vmul.f32 %v9973_v7, %v13176_v46  ;;  %v8616_v55 = vmul.f32 -1.442695, %v2921_v1  ;;  %9984 = vpow2.f32 %v8615_v31  ;;  %v13310_v11 = vpop.permute.xlu1 %3516 }
 0x60e   :  { %v9975_v54 = vpop.eup %9974  ;;  %v9057_v60 = vpop.f32.mrb[119].mxu1 }
 0x60f   :  { %v13294_v9 = vadd.f32 %v13211_v6, %v9055_v58  ;;  %v9058_v63 = vadd.f32 %v9057_v60, %v9056_v8  ;;  %3652 = vrot.lane.b32.xlu1 %v3586_v18, %s11216_s25  ;;  %v3587_v17 = vmul.f32 %v9975_v54, %v13180_v61  ;;  %v9977_v19 = vpop.eup %9976  ;;  %9986 = vpow2.f32 %v8616_v55  ;;  %v13314_v55 = vpop.permute.xlu0 %3518 }
 0x610   :  { %v3046_v34 = vadd.f32 1.0, %v9977_v19 }
 0x611   :  { %v2922_v46 = vadd.f32 %v13237_v59, %v13294_v9  ;;  %v13303_v43 = vadd.f32 %v13211_v6, %v9058_v63  ;;  %3654 = vrot.lane.b32.xlu0 %v3587_v17, %s11216_s25  ;;  %v9979_v31 = vpop.eup %9978 }
 0x612   :  { %9988 = vrcp.f32 %v3046_v34  ;;  %v3047_v20 = vadd.f32 1.0, %v9979_v31  ;;  %v2849_v31 = vpop.permute.xlu1 %2848 }
 0x613   :  { %v8617_v7 = vmul.f32 -1.442695, %v2922_v46  ;;  %v2923_v61 = vadd.f32 %v13242_v51, %v13303_v43  ;;  %v9059_v1 = vpop.f32.mrb[120].mxu1  ;;  %3192 = vrot.lane.b32.xlu1 %v12914_v47, %s11214_s19 }
 0x614   :  { %v9060_v58 = vpop.f32.mrb[121].mxu1  ;;  %v9981_v59 = vpop.eup %9980  ;;  %9990 = vrcp.f32 %v3047_v20 }
 0x615   :  { %v8618_v8 = vmul.f32 -1.442695, %v2923_v61  ;;  %v9061_v18 = vadd.f32 %v9060_v58, %v9059_v1  ;;  %v9062_v54 = vpop.f32.mrb[122].mxu1  ;;  %3190 = vrot.lane.b32.xlu0 %v12894_v37, %s11214_s19  ;;  %v3588_v51 = vmul.f32 %v9981_v59, %v13184_v29  ;;  %9992 = vpow2.f32 %v8617_v7  ;;  %v2851_v58 = vpop.permute.xlu0 %2850 }
 0x616   :  { %v9063_v60 = vpop.f32.mrb[123].mxu1  ;;  %v9983_v63 = vpop.eup %9982 }
 0x617   :  { %v13318_v47 = vadd.f32 %v13211_v6, %v9061_v18  ;;  %v9064_v17 = vadd.f32 %v9063_v60, %v9062_v54  ;;  %9994 = vpow2.f32 %v8618_v8  ;;  %3656 = vrot.lane.b32.xlu1 %v3588_v51, %s11216_s25  ;;  %v3589_v19 = vmul.f32 %v9983_v63, %v13190_v48  ;;  %v9985_v34 = vpop.eup %9984 }
 0x618   :  { %v3048_v29 = vadd.f32 1.0, %v9985_v34 }
 0x619   :  { %v2924_v37 = vadd.f32 %v13259_v32, %v13318_v47  ;;  %v13325_v46 = vadd.f32 %v13211_v6, %v9064_v17  ;;  %3658 = vrot.lane.b32.xlu0 %v3589_v19, %s11216_s25  ;;  %v9987_v20 = vpop.eup %9986  ;;  %v13338_v19 = vpop.permute.xlu1 %3520 }
 0x61a   :  { %9996 = vrcp.f32 %v3048_v29  ;;  %v3049_v48 = vadd.f32 1.0, %v9987_v20  ;;  %v13347_v29 = vpop.permute.xlu0 %3522 }
 0x61b   :  { %v8619_v7 = vmul.f32 -1.442695, %v2924_v37  ;;  %v2925_v61 = vadd.f32 %v13264_v0, %v13325_v46  ;;  %v9065_v1 = vpop.f32.mrb[124].mxu1  ;;  %3196 = vrot.lane.b32.xlu1 %v12933_v57, %s11214_s19 }
 0x61c   :  { %v9066_v32 = vpop.f32.mrb[125].mxu1  ;;  %v9989_v59 = vpop.eup %9988  ;;  %9998 = vrcp.f32 %v3049_v48 }
 0x61d   :  { %v8620_v8 = vmul.f32 -1.442695, %v2925_v61  ;;  %v9067_v18 = vadd.f32 %v9066_v32, %v9065_v1  ;;  %v9068_v54 = vpop.f32.mrb[126].mxu1  ;;  %3194 = vrot.lane.b32.xlu0 %v12910_v14, %s11214_s19  ;;  %v3590_v51 = vmul.f32 %v9989_v59, %v13196_v10  ;;  %10000 = vpow2.f32 %v8619_v7 }
 0x61e   :  { %v9069_v60 = vpop.f32.mrb[127].mxu1  ;;  %v9991_v0 = vpop.eup %9990 }
 0x61f   :  { %v13336_v63 = vadd.f32 %v13211_v6, %v9067_v18  ;;  %v9070_v17 = vadd.f32 %v9069_v60, %v9068_v54  ;;  %10002 = vpow2.f32 %v8620_v8  ;;  %3660 = vrot.lane.b32.xlu1 %v3590_v51, %s11216_s25  ;;  %v3591_v57 = vmul.f32 %v9991_v0, %v13202_v25  ;;  %v9993_v34 = vpop.eup %9992  ;;  %v2853_v18 = vpop.permute.xlu1 %2852 }
 0x620   :  { %v3050_v20 = vadd.f32 1.0, %v9993_v34  ;;  %v2855_v0 = vpop.permute.xlu0 %2854 }
 0x621   :  { %v2926_v14 = vadd.f32 %v13291_v28, %v13336_v63  ;;  %v13345_v37 = vadd.f32 %v13211_v6, %v9070_v17  ;;  %v9995_v10 = vpop.eup %9994  ;;  %3662 = vrot.lane.b32.xlu0 %v3591_v57, %s11216_s25 }
 0x622   :  { %v3051_v7 = vadd.f32 1.0, %v9995_v10  ;;  %10004 = vrcp.f32 %v3050_v20 }
 0x623   :  { %v8621_v61 = vmul.f32 -1.442695, %v2926_v14  ;;  %v2927_v1 = vadd.f32 %v13298_v56, %v13345_v37  ;;  %v9071_v48 = vpop.f32.mrb[128].mxu1  ;;  %3200 = vrot.lane.b32.xlu1 %v12950_v40, %s11214_s19 }
 0x624   :  { %v9072_v25 = vpop.f32.mrb[129].mxu1  ;;  %10006 = vrcp.f32 %v3051_v7  ;;  %v9997_v8 = vpop.eup %9996 }
 0x625   :  { %v8622_v28 = vmul.f32 -1.442695, %v2927_v1  ;;  %v9073_v32 = vadd.f32 %v9072_v25, %v9071_v48  ;;  %v9074_v59 = vpop.f32.mrb[130].mxu1  ;;  %10008 = vpow2.f32 %v8621_v61  ;;  %3198 = vrot.lane.b32.xlu0 %v12929_v62, %s11214_s19  ;;  %v3592_v51 = vmul.f32 %v9997_v8, %v13220_v44  ;;  %v13368_v1 = vpop.permute.xlu1 %3524 }
 0x626   :  { %v9075_v54 = vpop.f32.mrb[131].mxu1  ;;  %v9999_v40 = vpop.eup %9998 }
 0x627   :  { %10010 = vpow2.f32 %v8622_v28  ;;  %v13357_v56 = vadd.f32 %v13211_v6, %v9073_v32  ;;  %v9076_v60 = vadd.f32 %v9075_v54, %v9074_v59  ;;  %v10001_v17 = vpop.eup %10000  ;;  %3664 = vrot.lane.b32.xlu1 %v3592_v51, %s11216_s25  ;;  %v3593_v62 = vmul.f32 %v9999_v40, %v13234_v16  ;;  %v13370_v59 = vpop.permute.xlu0 %3526 }
 0x628   :  { %v3052_v10 = vadd.f32 1.0, %v10001_v17 }
 0x629   :  { %v2928_v57 = vadd.f32 %v2849_v31, %v13357_v56  ;;  %v13362_v34 = vadd.f32 %v13211_v6, %v9076_v60  ;;  %v10003_v14 = vpop.eup %10002  ;;  %3666 = vrot.lane.b32.xlu0 %v3593_v62, %s11216_s25 }
 0x62a   :  { %v3053_v20 = vadd.f32 1.0, %v10003_v14  ;;  %10012 = vrcp.f32 %v3052_v10  ;;  %v2857_v10 = vpop.permute.xlu1 %2856 }
 0x62b   :  { %v8623_v7 = vmul.f32 -1.442695, %v2928_v57  ;;  %v2929_v61 = vadd.f32 %v2851_v58, %v13362_v34  ;;  %v9077_v44 = vpop.f32.mrb[132].mxu1 }
 0x62c   :  { %v9078_v31 = vpop.f32.mrb[133].mxu1  ;;  %10014 = vrcp.f32 %v3053_v20  ;;  %v10005_v32 = vpop.eup %10004 }
 0x62d   :  { %v8624_v48 = vmul.f32 -1.442695, %v2929_v61  ;;  %v9079_v25 = vadd.f32 %v9078_v31, %v9077_v44  ;;  %v9080_v28 = vpop.f32.mrb[134].mxu1  ;;  %10016 = vpow2.f32 %v8623_v7  ;;  %v3594_v60 = vmul.f32 %v10005_v32, %v13248_v30  ;;  %v2859_v44 = vpop.permute.xlu0 %2858 }
 0x62e   :  { %v9081_v16 = vpop.f32.mrb[135].mxu1  ;;  %v10007_v8 = vpop.eup %10006 }
 0x62f   :  { %10018 = vpow2.f32 %v8624_v48  ;;  %v13373_v58 = vadd.f32 %v13211_v6, %v9079_v25  ;;  %v9082_v54 = vadd.f32 %v9081_v16, %v9080_v28  ;;  %v10009_v51 = vpop.eup %10008  ;;  %v3595_v40 = vmul.f32 %v10007_v8, %v13252_v2  ;;  %3668 = vrot.lane.b32.xlu1 %v3594_v60, %s11216_s25 }
 0x630   :  { %v3054_v57 = vadd.f32 1.0, %v10009_v51 }
 0x631   :  { %v10011_v17 = vpop.eup %10010  ;;  %v2930_v62 = vadd.f32 %v2853_v18, %v13373_v58  ;;  %v13379_v14 = vadd.f32 %v13211_v6, %v9082_v54  ;;  %3670 = vrot.lane.b32.xlu0 %v3595_v40, %s11216_s25 }
 0x632   :  { %v3055_v20 = vadd.f32 1.0, %v10011_v17  ;;  %10020 = vrcp.f32 %v3054_v57 }
 0x633   :  { %v8625_v7 = vmul.f32 -1.442695, %v2930_v62  ;;  %v2931_v30 = vadd.f32 %v2855_v0, %v13379_v14  ;;  %v9083_v61 = vpop.f32.mrb[136].mxu1  ;;  %v13388_v0 = vpop.permute.xlu1 %3528 }
 0x634   :  { %10022 = vrcp.f32 %v3055_v20  ;;  %v9084_v2 = vpop.f32.mrb[137].mxu1  ;;  %v10013_v25 = vpop.eup %10012 }
 0x635   :  { %10024 = vpow2.f32 %v8625_v7  ;;  %v8626_v31 = vmul.f32 -1.442695, %v2931_v30  ;;  %v9085_v18 = vadd.f32 %v9084_v2, %v9083_v61  ;;  %v9086_v48 = vpop.f32.mrb[138].mxu1  ;;  %v3596_v54 = vmul.f32 %v10013_v25, %v13274_v52  ;;  %v13396_v20 = vpop.permute.xlu0 %3530 }
 0x636   :  { %v9087_v28 = vpop.f32.mrb[139].mxu1  ;;  %v10015_v32 = vpop.eup %10014 }
 0x637   :  { %10026 = vpow2.f32 %v8626_v31  ;;  %v13385_v16 = vadd.f32 %v13211_v6, %v9085_v18  ;;  %v9088_v8 = vadd.f32 %v9087_v28, %v9086_v48  ;;  %v10017_v60 = vpop.eup %10016  ;;  %v3597_v51 = vmul.f32 %v10015_v32, %v13279_v50  ;;  %3672 = vrot.lane.b32.xlu1 %v3596_v54, %s11216_s25  ;;  %v2861_v50 = vpop.permute.xlu1 %2860 }
 0x638   :  { %v3056_v17 = vadd.f32 1.0, %v10017_v60 }
 0x639   :  { %v10019_v40 = vpop.eup %10018  ;;  %v2932_v57 = vadd.f32 %v2857_v10, %v13385_v16  ;;  %v13393_v62 = vadd.f32 %v13211_v6, %v9088_v8  ;;  %3674 = vrot.lane.b32.xlu0 %v3597_v51, %s11216_s25  ;;  %v2863_v28 = vpop.permute.xlu0 %2862 }
 0x63a   :  { %v3057_v7 = vadd.f32 1.0, %v10019_v40  ;;  %10028 = vrcp.f32 %v3056_v17 }
 0x63b   :  { %v8627_v52 = vmul.f32 -1.442695, %v2932_v57  ;;  %v2933_v30 = vadd.f32 %v2859_v44, %v13393_v62  ;;  %v9089_v61 = vpop.f32.mrb[140].mxu1 }
 0x63c   :  { %10030 = vrcp.f32 %v3057_v7  ;;  %v9090_v2 = vpop.f32.mrb[141].mxu1  ;;  %v10021_v31 = vpop.eup %10020 }
 0x63d   :  { %10032 = vpow2.f32 %v8627_v52  ;;  %v8628_v10 = vmul.f32 -1.442695, %v2933_v30  ;;  %v9091_v18 = vadd.f32 %v9090_v2, %v9089_v61  ;;  %v9092_v48 = vpop.f32.mrb[142].mxu1  ;;  %v3598_v8 = vmul.f32 %v10021_v31, %v13310_v11  ;;  %v13411_v11 = vpop.permute.xlu1 %3532 }
 0x63e   :  { %v10023_v25 = vpop.eup %10022  ;;  %v9093_v32 = vpop.f32.mrb[143].mxu1 }
 0x63f   :  { %v10025_v54 = vpop.eup %10024  ;;  %10034 = vpow2.f32 %v8628_v10  ;;  %v13402_v60 = vadd.f32 %v13211_v6, %v9091_v18  ;;  %v9094_v44 = vadd.f32 %v9093_v32, %v9092_v48  ;;  %v3599_v51 = vmul.f32 %v10023_v25, %v13314_v55  ;;  %3676 = vrot.lane.b32.xlu1 %v3598_v8, %s11216_s25  ;;  %v13414_v55 = vpop.permute.xlu0 %3534 }
 0x640   :  { %v3058_v40 = vadd.f32 1.0, %v10025_v54 }
 0x641   :  { %v10027_v17 = vpop.eup %10026  ;;  %v2934_v57 = vadd.f32 %v2861_v50, %v13402_v60  ;;  %v13408_v7 = vadd.f32 %v13211_v6, %v9094_v44  ;;  %3678 = vrot.lane.b32.xlu0 %v3599_v51, %s11216_s25  ;;  %v2865_v32 = vpop.permute.xlu1 %2864 }
 0x642   :  { %10036 = vrcp.f32 %v3058_v40  ;;  %v3059_v52 = vadd.f32 1.0, %v10027_v17 }
 0x643   :  { %v8629_v30 = vmul.f32 -1.442695, %v2934_v57  ;;  %v2935_v61 = vadd.f32 %v2863_v28, %v13408_v7  ;;  %v9095_v2 = vpop.f32.mrb[144].mxu1  ;;  %v2867_v17 = vpop.permute.xlu0 %2866 }
 0x644   :  { %10038 = vrcp.f32 %v3059_v52  ;;  %v9096_v31 = vpop.f32.mrb[145].mxu1  ;;  %v10029_v10 = vpop.eup %10028 }
 0x645   :  { %10040 = vpow2.f32 %v8629_v30  ;;  %v8630_v50 = vmul.f32 -1.442695, %v2935_v61  ;;  %v9097_v18 = vadd.f32 %v9096_v31, %v9095_v2  ;;  %v9098_v48 = vpop.f32.mrb[146].mxu1  ;;  %v3600_v54 = vmul.f32 %v10029_v10, %v13338_v19 }
 0x646   :  { %v10031_v25 = vpop.eup %10030  ;;  %v9099_v8 = vpop.f32.mrb[147].mxu1 }
 0x647   :  { %v10033_v44 = vpop.eup %10032  ;;  %10042 = vpow2.f32 %v8630_v50  ;;  %v13418_v51 = vadd.f32 %v13211_v6, %v9097_v18  ;;  %v9100_v28 = vadd.f32 %v9099_v8, %v9098_v48  ;;  %v3601_v40 = vmul.f32 %v10031_v25, %v13347_v29  ;;  %3680 = vrot.lane.b32.xlu1 %v3600_v54, %s11216_s25  ;;  %v13428_v29 = vpop.permute.xlu1 %3536 }
 0x648   :  { %v3060_v57 = vadd.f32 1.0, %v10033_v44  ;;  %v13431_v44 = vpop.permute.xlu0 %3538 }
 0x649   :  { %v10035_v52 = vpop.eup %10034  ;;  %v2936_v30 = vadd.f32 %v2865_v32, %v13418_v51  ;;  %v13424_v61 = vadd.f32 %v13211_v6, %v9100_v28  ;;  %3682 = vrot.lane.b32.xlu0 %v3601_v40, %s11216_s25 }
 0x64a   :  { %10044 = vrcp.f32 %v3060_v57  ;;  %v3061_v19 = vadd.f32 1.0, %v10035_v52 }
 0x64b   :  { %v8631_v2 = vmul.f32 -1.442695, %v2936_v30  ;;  %v2937_v31 = vadd.f32 %v2867_v17, %v13424_v61  ;;  %v9101_v10 = vpop.f32.mrb[148].mxu1  ;;  %v2869_v30 = vpop.permute.xlu1 %2868 }
 0x64c   :  { %v10037_v50 = vpop.eup %10036  ;;  %10046 = vrcp.f32 %v3061_v19  ;;  %v9102_v18 = vpop.f32.mrb[149].mxu1 }
 0x64d   :  { %10048 = vpow2.f32 %v8631_v2  ;;  %v8632_v48 = vmul.f32 -1.442695, %v2937_v31  ;;  %v9103_v25 = vadd.f32 %v9102_v18, %v9101_v10  ;;  %v9104_v32 = vpop.f32.mrb[150].mxu1  ;;  %v3602_v8 = vmul.f32 %v10037_v50, %v13368_v1  ;;  %v2871_v10 = vpop.permute.xlu0 %2870 }
 0x64e   :  { %v10039_v54 = vpop.eup %10038  ;;  %v9105_v28 = vpop.f32.mrb[151].mxu1 }
 0x64f   :  { %v10041_v40 = vpop.eup %10040  ;;  %10050 = vpow2.f32 %v8632_v48  ;;  %v13434_v17 = vadd.f32 %v13211_v6, %v9103_v25  ;;  %v9106_v57 = vadd.f32 %v9105_v28, %v9104_v32  ;;  %3684 = vrot.lane.b32.xlu1 %v3602_v8, %s11216_s25  ;;  %v3603_v52 = vmul.f32 %v10039_v54, %v13370_v59 }
 0x650   :  { %v3062_v19 = vadd.f32 1.0, %v10041_v40 }
 0x651   :  { %16170 = vst [vmem:[#allocation50_spill] sm:$0xff] %v13434_v17  ;;  %v10043_v2 = vpop.eup %10042  ;;  %v2938_v31 = vadd.f32 %v2869_v30, %v13434_v17  ;;  %v13440_v1 = vadd.f32 %v13211_v6, %v9106_v57  ;;  %3686 = vrot.lane.b32.xlu0 %v3603_v52, %s11216_s25 }
 0x652   :  { %10052 = vrcp.f32 %v3062_v19  ;;  %v3063_v50 = vadd.f32 1.0, %v10043_v2 }
 0x653   :  { %v8633_v18 = vmul.f32 -1.442695, %v2938_v31  ;;  %v2939_v48 = vadd.f32 %v2871_v10, %v13440_v1  ;;  %v9107_v25 = vpop.f32.mrb[152].mxu1 }
 0x654   :  { %v10045_v32 = vpop.eup %10044  ;;  %10054 = vrcp.f32 %v3063_v50  ;;  %v9108_v59 = vpop.f32.mrb[153].mxu1 }
 0x655   :  { %10056 = vpow2.f32 %v8633_v18  ;;  %v8634_v8 = vmul.f32 -1.442695, %v2939_v48  ;;  %v9109_v54 = vadd.f32 %v9108_v59, %v9107_v25  ;;  %v9110_v28 = vpop.f32.mrb[154].mxu1  ;;  %v3604_v40 = vmul.f32 %v10045_v32, %v13388_v0  ;;  %v3541_v50 = vpop.permute.xlu1 %3540 }
 0x656   :  { %v10047_v57 = vpop.eup %10046  ;;  %v9111_v30 = vpop.f32.mrb[155].mxu1 }
 0x657   :  { %v10049_v17 = vpop.eup %10048  ;;  %10058 = vpow2.f32 %v8634_v8  ;;  %v9112_v52 = vadd.f32 %v9111_v30, %v9110_v28  ;;  %3688 = vrot.lane.b32.xlu1 %v3604_v40, %s11216_s25  ;;  %v3605_v19 = vmul.f32 %v10047_v57, %v13396_v20  ;;  %v13450_v28 = vadd.f32 %v13211_v6, %v9109_v54 }
 0x658   :  { %v3064_v2 = vadd.f32 1.0, %v10049_v17 }
 0x659   :  { %v10051_v31 = vpop.eup %10050  ;;  %3690 = vrot.lane.b32.xlu0 %v3605_v19, %s11216_s25 }
 0x65a   :  { %10060 = vrcp.f32 %v3064_v2  ;;  %v3065_v10 = vadd.f32 1.0, %v10051_v31  ;;  %v3543_v2 = vpop.permute.xlu0 %3542  ;;  %v2873_v31 = vpop.permute.xlu1 %2872 }
 0x65b   :  { %v9113_v18 = vpop.f32.mrb[156].mxu1 }
 0x65c   :  { %v10053_v48 = vpop.eup %10052  ;;  %10062 = vrcp.f32 %v3065_v10  ;;  %v9114_v0 = vpop.f32.mrb[157].mxu1 }
 0x65d   :  { %v9115_v25 = vadd.f32 %v9114_v0, %v9113_v18  ;;  %v9116_v32 = vpop.f32.mrb[158].mxu1  ;;  %v3606_v59 = vmul.f32 %v10053_v48, %v13411_v11  ;;  %v2940_v11 = vadd.f32 %v2873_v31, %v13450_v28 }
 0x65e   :  { %v10055_v8 = vpop.eup %10054  ;;  %v9117_v20 = vpop.f32.mrb[159].mxu1 }
 0x65f   :  { %v10057_v17 = vpop.eup %10056  ;;  %v9118_v40 = vadd.f32 %v9117_v20, %v9116_v32  ;;  %3692 = vrot.lane.b32.xlu1 %v3606_v59, %s11216_s25  ;;  %v3607_v57 = vmul.f32 %v10055_v8, %v13414_v55  ;;  %v8635_v0 = vmul.f32 -1.442695, %v2940_v11  ;;  %v2875_v32 = vpop.permute.xlu0 %2874  ;;  %v13458_v59 = vadd.f32 %v13211_v6, %v9112_v52 }
 0x660   :  { %v3066_v30 = vadd.f32 1.0, %v10057_v17  ;;  %v3545_v8 = vpop.permute.xlu1 %3544 }
 0x661   :  { %v10059_v19 = vpop.eup %10058  ;;  %3694 = vrot.lane.b32.xlu0 %v3607_v57, %s11216_s25  ;;  %v2941_v20 = vadd.f32 %v2875_v32, %v13458_v59 }
 0x662   :  { %10064 = vrcp.f32 %v3066_v30  ;;  %v3067_v10 = vadd.f32 1.0, %v10059_v19  ;;  %v13467_v19 = vadd.f32 %v13211_v6, %v9115_v25  ;;  %v13477_v25 = vadd.f32 %v13211_v6, %v9118_v40 }
 0x663   :  { %v13464_v57 = vpop.permute.xlu0 %3546  ;;  %v8636_v31 = vmul.f32 -1.442695, %v2941_v20 }
 0x664   :  { %v10061_v18 = vpop.eup %10060  ;;  %10066 = vrcp.f32 %v3067_v10  ;;  %v2877_v52 = vpop.permute.xlu1 %2876 }
 0x665   :  { %v3608_v54 = vmul.f32 %v10061_v18, %v13428_v29  ;;  %10068 = vpow2.f32 %v8635_v0  ;;  %v2942_v11 = vadd.f32 %v2877_v52, %v13467_v19 }
 0x666   :  { %v10063_v48 = vpop.eup %10062  ;;  %10070 = vpow2.f32 %v8636_v31 }
 0x667   :  { %3696 = vrot.lane.b32.xlu1 %v3608_v54, %s11216_s25  ;;  %v3609_v55 = vmul.f32 %v10063_v48, %v13431_v44  ;;  %v2879_v44 = vpop.permute.xlu0 %2878  ;;  %v8637_v48 = vmul.f32 -1.442695, %v2942_v11 }
 0x668   :  { %v13472_v54 = vpop.permute.xlu1 %3548 }
 0x669   :  { %3698 = vrot.lane.b32.xlu0 %v3609_v55, %s11216_s25  ;;  %10072 = vpow2.f32 %v8637_v48  ;;  %v2943_v55 = vadd.f32 %v2879_v44, %v13477_v25 }
 0x66b   :  { %v8638_v52 = vmul.f32 -1.442695, %v2943_v55 }
 0x66c   :  { %v10065_v17 = vpop.eup %10064 }
 0x66d   :  { %v3610_v29 = vmul.f32 %v10065_v17, %v3541_v50  ;;  %v13474_v50 = vpop.permute.xlu0 %3550 }
 0x66e   :  { %v10067_v30 = vpop.eup %10066 }
 0x66f   :  { %3700 = vrot.lane.b32.xlu1 %v3610_v29, %s11216_s25  ;;  %v3611_v10 = vmul.f32 %v10067_v30, %v3543_v2  ;;  %v10069_v18 = vpop.eup %10068 }
 0x670   :  { %v3068_v0 = vadd.f32 1.0, %v10069_v18  ;;  %v10071_v29 = vpop.eup %10070 }
 0x671   :  { %3702 = vrot.lane.b32.xlu0 %v3611_v10, %s11216_s25  ;;  %v3069_v6 = vadd.f32 1.0, %v10071_v29 }
 0x672   :  { %10074 = vrcp.f32 %v3068_v0 }
 0x673   :  { %v10073_v18 = vpop.eup %10072 }
 0x679   :  { %v3649_v32 = vpop.permute.xlu1 %3648 }
 0x67a   :  { %v3744_v2 = vadd.f32 %v3649_v32, %v13214_v49 }
 0x67b   :  { %v3651_v20 = vpop.permute.xlu0 %3650 }
 0x67c   :  { %10076 = vtanh.f32 %v3744_v2  ;;  %v3745_v17 = vadd.f32 %v3651_v20, %v13218_v3  ;;  %v10075_v48 = vpop.eup %10074  ;;  %v3070_v20 = vadd.f32 1.0, %v10073_v18 }
 0x67d   :  { %v13482_v30 = vpop.permute.xlu1 %3188 }
 0x67e   :  { %10078 = vtanh.f32 %v3745_v17  ;;  %v3612_v17 = vmul.f32 %v10075_v48, %v3545_v8 }
 0x67f   :  { %v13484_v31 = vpop.permute.xlu0 %3186  ;;  %10080 = vpow2.f32 %v8638_v52 }
 0x680   :  { %10082 = vrcp.f32 %v3069_v6 }
 0x681   :  { %v3653_v40 = vpop.permute.xlu1 %3652 }
 0x682   :  { %v3746_v10 = vadd.f32 %v3653_v40, %v13226_v42 }
 0x683   :  { %v3655_v11 = vpop.permute.xlu0 %3654 }
 0x684   :  { %v3747_v44 = vadd.f32 %v3655_v11, %v13232_v24  ;;  %10084 = vtanh.f32 %v3746_v10 }
 0x685   :  { %v13488_v0 = vpop.permute.xlu1 %3192 }
 0x686   :  { %v10077_v32 = vpop.eup %10076  ;;  %10086 = vtanh.f32 %v3747_v44 }
 0x687   :  { %3872 = vrot.lane.b32.xlu1 %v10077_v32, %s11215_s16  ;;  %v13491_v2 = vpop.permute.xlu0 %3190  ;;  %10088 = vrcp.f32 %v3070_v20 }
 0x688   :  { %v10079_v55 = vpop.eup %10078 }
 0x689   :  { %3874 = vrot.lane.b32.xlu0 %v10079_v55, %s11215_s16  ;;  %v3657_v29 = vpop.permute.xlu1 %3656  ;;  %v10081_v40 = vpop.eup %10080 }
 0x68a   :  { %v3748_v52 = vadd.f32 %v3657_v29, %v13240_v15  ;;  %v10083_v11 = vpop.eup %10082  ;;  %v3071_v55 = vadd.f32 1.0, %v10081_v40 }
 0x68b   :  { %3704 = vrot.lane.b32.xlu1 %v3612_v17, %s11216_s25  ;;  %v3659_v6 = vpop.permute.xlu0 %3658  ;;  %v3613_v17 = vmul.f32 %v10083_v11, %v13464_v57 }
 0x68c   :  { %10090 = vtanh.f32 %v3748_v52  ;;  %v3749_v10 = vadd.f32 %v3659_v6, %v13246_v35 }
 0x68d   :  { %3202 = vrot.lane.b32.xlu0 %v12946_v53, %s11214_s19  ;;  %v13499_v44 = vpop.permute.xlu1 %3196 }
 0x68e   :  { %v10085_v18 = vpop.eup %10084  ;;  %10092 = vtanh.f32 %v3749_v10 }
 0x68f   :  { %3876 = vrot.lane.b32.xlu1 %v10085_v18, %s11215_s16  ;;  %v13502_v8 = vpop.permute.xlu0 %3194 }
 0x690   :  { %v10087_v32 = vpop.eup %10086 }
 0x691   :  { %3878 = vrot.lane.b32.xlu0 %v10087_v32, %s11215_s16  ;;  %v3661_v48 = vpop.permute.xlu1 %3660  ;;  %v10089_v52 = vpop.eup %10088 }
 0x692   :  { %v3750_v20 = vadd.f32 %v3661_v48, %v13255_v45  ;;  %v3614_v11 = vmul.f32 %v10089_v52, %v13472_v54 }
 0x693   :  { %3204 = vrot.lane.b32.xlu1 %v12967_v13, %s11214_s19  ;;  %v3663_v53 = vpop.permute.xlu0 %3662 }
 0x694   :  { %v3751_v29 = vadd.f32 %v3663_v53, %v13262_v33  ;;  %10094 = vtanh.f32 %v3750_v20 }
 0x695   :  { %3706 = vrot.lane.b32.xlu0 %v3613_v17, %s11216_s25  ;;  %v13511_v6 = vpop.permute.xlu1 %3200  ;;  %10096 = vrcp.f32 %v3071_v55 }
 0x696   :  { %v10091_v10 = vpop.eup %10090  ;;  %10098 = vtanh.f32 %v3751_v29 }
 0x697   :  { %3880 = vrot.lane.b32.xlu1 %v10091_v10, %s11215_s16  ;;  %v13514_v40 = vpop.permute.xlu0 %3198 }
 0x698   :  { %v10093_v57 = vpop.eup %10092 }
 0x699   :  { %v3665_v13 = vpop.permute.xlu1 %3664  ;;  %3882 = vrot.lane.b32.xlu0 %v10093_v57, %s11215_s16 }
 0x69a   :  { %v3752_v18 = vadd.f32 %v3665_v13, %v13270_v27 }
 0x69b   :  { %3708 = vrot.lane.b32.xlu1 %v3614_v11, %s11216_s25  ;;  %v3667_v32 = vpop.permute.xlu0 %3666 }
 0x69c   :  { %10100 = vtanh.f32 %v3752_v18  ;;  %v3753_v48 = vadd.f32 %v3667_v32, %v13282_v23 }
 0x69d   :  { %3206 = vrot.lane.b32.xlu0 %v12963_v12, %s11214_s19 }
 0x69e   :  { %v10095_v55 = vpop.eup %10094  ;;  %10102 = vtanh.f32 %v3753_v48 }
 0x69f   :  { %v10097_v20 = vpop.eup %10096  ;;  %3884 = vrot.lane.b32.xlu1 %v10095_v55, %s11215_s16 }
 0x6a0   :  { %v10099_v54 = vpop.eup %10098  ;;  %v3615_v10 = vmul.f32 %v10097_v20, %v13474_v50 }
 0x6a1   :  { %v3669_v17 = vpop.permute.xlu1 %3668  ;;  %3886 = vrot.lane.b32.xlu0 %v10099_v54, %s11215_s16 }
 0x6a2   :  { %v3754_v53 = vadd.f32 %v3669_v17, %v13294_v9 }
 0x6a3   :  { %v3671_v29 = vpop.permute.xlu0 %3670  ;;  %3208 = vrot.lane.b32.xlu1 %v12981_v36, %s11214_s19 }
 0x6a4   :  { %v3755_v52 = vadd.f32 %v3671_v29, %v13303_v43  ;;  %10104 = vtanh.f32 %v3754_v53 }
 0x6a5   :  { %3710 = vrot.lane.b32.xlu0 %v3615_v10, %s11216_s25 }
 0x6a6   :  { %10106 = vtanh.f32 %v3755_v52  ;;  %v10101_v12 = vpop.eup %10100 }
 0x6a7   :  { %3888 = vrot.lane.b32.xlu1 %v10101_v12, %s11215_s16 }
 0x6a8   :  { %v10103_v57 = vpop.eup %10102 }
 0x6a9   :  { %v3673_v11 = vpop.permute.xlu1 %3672  ;;  %3890 = vrot.lane.b32.xlu0 %v10103_v57, %s11215_s16 }
 0x6aa   :  { %v3756_v13 = vadd.f32 %v3673_v11, %v13318_v47 }
 0x6ab   :  { %v3675_v18 = vpop.permute.xlu0 %3674  ;;  %3212 = vrot.lane.b32.xlu1 %v12991_v39, %s11214_s19 }
 0x6ac   :  { %v3757_v36 = vadd.f32 %v3675_v18, %v13325_v46  ;;  %10108 = vtanh.f32 %v3756_v13 }
 0x6ad   :  { %3210 = vrot.lane.b32.xlu0 %v12977_v38, %s11214_s19 }
 0x6ae   :  { %10110 = vtanh.f32 %v3757_v36  ;;  %v10105_v50 = vpop.eup %10104 }
 0x6af   :  { %3892 = vrot.lane.b32.xlu1 %v10105_v50, %s11215_s16  ;;  %v3264_v50 = vadd.f32 %v13170_v5, %v13214_v49  ;;  %v9629_v49 = vld [vmem:[%s15906_s4 + $0x54] ss:$8 sps:$4 sm:$0xff]  }
 0x6b0   :  { %v10107_v32 = vpop.eup %10106 }
 0x6b1   :  { %v3677_v48 = vpop.permute.xlu1 %3676  ;;  %3894 = vrot.lane.b32.xlu0 %v10107_v32, %s11215_s16  ;;  %v8639_v32 = vmul.f32 -1.442695, %v3264_v50 }
 0x6b2   :  { %v3758_v55 = vadd.f32 %v3677_v48, %v13336_v63  ;;  %v3265_v48 = vadd.f32 %v13174_v4, %v13218_v3  ;;  %v9627_v3 = vld [vmem:[%s15906_s4 + $0x50] ss:$8 sps:$4 sm:$0xff]   ;;  %v16172_v4 = vld [vmem:[#allocation17_spill] sm:$0xff] }
 0x6b3   :  { %v3679_v20 = vpop.permute.xlu0 %3678 }
 0x6b4   :  { %v3759_v54 = vadd.f32 %v3679_v20, %v13345_v37  ;;  %10112 = vtanh.f32 %v3758_v55  ;;  %v9624_v55 = vld [vmem:[%s15906_s4 + $0x40] ss:$8 sps:$4 sm:$0xff]   ;;  %v9626_v20 = vld [vmem:[%s15906_s4 + $0x44] ss:$8 sps:$4 sm:$0xff]  }
 0x6b5   :  { %3214 = vrot.lane.b32.xlu0 %v12998_v21, %s11214_s19  ;;  %4201 = vmatprep.subr.bf16.mxu0 %v9626_v20 }
 0x6b6   :  { %10114 = vtanh.f32 %v3759_v54  ;;  %v10109_v39 = vpop.eup %10108  ;;  %v8640_v54 = vmul.f32 -1.442695, %v3265_v48  ;;  %4202 = vmatpush1.bf16.msra.mxu0 %v9624_v55 }
 0x6b7   :  { %3896 = vrot.lane.b32.xlu1 %v10109_v39, %s11215_s16  ;;  %v3267_v39 = vadd.f32 %v16172_v4, %v13232_v24  ;;  %4203 = vmatprep.subr.bf16.mxu0 %v9629_v49 }
 0x6b8   :  { %v10111_v17 = vpop.eup %10110 }
 0x6b9   :  { %v3681_v38 = vpop.permute.xlu1 %3680  ;;  %3898 = vrot.lane.b32.xlu0 %v10111_v17, %s11215_s16 }
 0x6ba   :  { %v3760_v53 = vadd.f32 %v3681_v38, %v13357_v56  ;;  %4204 = vmatpush1.bf16.msra.mxu0 %v9627_v3  ;;  %v8642_v38 = vmul.f32 -1.442695, %v3267_v39 }
 0x6bb   :  { %v3683_v29 = vpop.permute.xlu0 %3682  ;;  %3218 = vrot.lane.b32.xlu1 %v13015_v22, %s11214_s19 }
 0x6bc   :  { %v3761_v52 = vadd.f32 %v3683_v29, %v13362_v34  ;;  %10116 = vtanh.f32 %v3760_v53  ;;  %v16173_v29 = vld [vmem:[#allocation33_spill] sm:$0xff] }
 0x6bd   :  { %3216 = vrot.lane.b32.xlu0 %v13008_v26, %s11214_s19 }
 0x6be   :  { %10118 = vtanh.f32 %v3761_v52  ;;  %v10113_v10 = vpop.eup %10112  ;;  %v3268_v52 = vadd.f32 %v16173_v29, %v13240_v15  ;;  %v16176_v15 = vld [vmem:[#allocation49_spill] sm:$0xff] }
 0x6bf   :  { %3900 = vrot.lane.b32.xlu1 %v10113_v10, %s11215_s16 }
 0x6c0   :  { %v10115_v21 = vpop.eup %10114 }
 0x6c1   :  { %v3685_v12 = vpop.permute.xlu1 %3684  ;;  %3902 = vrot.lane.b32.xlu0 %v10115_v21, %s11215_s16 }
 0x6c2   :  { %v3762_v57 = vadd.f32 %v3685_v12, %v13373_v58 }
 0x6c3   :  { %v3687_v11 = vpop.permute.xlu0 %3686 }
 0x6c4   :  { %10120 = vtanh.f32 %v3762_v57  ;;  %v3763_v13 = vadd.f32 %v3687_v11, %v13379_v14  ;;  %v8643_v57 = vmul.f32 -1.442695, %v3268_v52 }
 0x6c6   :  { %10122 = vtanh.f32 %v3763_v13  ;;  %v10117_v18 = vpop.eup %10116 }
 0x6c7   :  { %3904 = vrot.lane.b32.xlu1 %v10117_v18, %s11215_s16  ;;  %10124 = vpow2.f32 %v8639_v32  ;;  %v3271_v32 = vadd.f32 %v16176_v15, %v13262_v33  ;;  %v16177_v33 = vld [vmem:[#allocation40_spill] sm:$0xff] }
 0x6c8   :  { %v10119_v22 = vpop.eup %10118  ;;  %10126 = vpow2.f32 %v8640_v54  ;;  %v3272_v39 = vadd.f32 %v16177_v33, %v13270_v27 }
 0x6c9   :  { %3906 = vrot.lane.b32.xlu0 %v10119_v22, %s11215_s16  ;;  %v3689_v13 = vpop.permute.xlu1 %3688  ;;  %v16175_v22 = vld [vmem:[#allocation19_spill] sm:$0xff]  ;;  %v8646_v49 = vmul.f32 -1.442695, %v3271_v32 }
 0x6ce   :  { %v10121_v26 = vpop.eup %10120 }
 0x6cf   :  { %3908 = vrot.lane.b32.xlu0 %v10121_v26, %s11215_s16  ;;  %v3270_v26 = vadd.f32 %v16175_v22, %v13255_v45 }
 0x6d0   :  { %v10123_v36 = vpop.eup %10122 }
 0x6d1   :  { %3910 = vrot.lane.b32.xlu1 %v10123_v36, %s11215_s16  ;;  %v10125_v53 = vpop.eup %10124  ;;  %v3691_v36 = vpop.permute.xlu0 %3690  ;;  %v8645_v55 = vmul.f32 -1.442695, %v3270_v26  ;;  %v16178_v26 = vld [vmem:[#allocation41_spill] sm:$0xff] }
 0x6d2   :  { %v3392_v21 = vadd.f32 1.0, %v10125_v53  ;;  %v10127_v12 = vpop.eup %10126 }
 0x6d3   :  { %3222 = vrot.lane.b32.xlu0 %v13032_v41, %s11214_s19  ;;  %v16171_v41 = vld [vmem:[#allocation16_spill] sm:$0xff]  ;;  %v3393_v24 = vadd.f32 1.0, %v10127_v12 }
 0x6d4   :  { %v3266_v5 = vadd.f32 %v16171_v41, %v13226_v42  ;;  %v16174_v42 = vld [vmem:[#allocation18_spill] sm:$0xff] }
 0x6d5   :  { %v3269_v10 = vadd.f32 %v16174_v42, %v13246_v35  ;;  %v13591_v35 = vpop.permute.xlu1 %3692  ;;  %v13593_v20 = vpop.permute.xlu0 %3694 }
 0x6d6   :  { %v8641_v17 = vmul.f32 -1.442695, %v3266_v5 }
 0x6d7   :  { %v8644_v11 = vmul.f32 -1.442695, %v3269_v10 }
 0x6d8   :  { %10128 = vpow2.f32 %v8641_v17 }
 0x6d9   :  { %10130 = vpow2.f32 %v8642_v38  ;;  %v13595_v41 = vpop.permute.xlu1 %3696  ;;  %v3273_v38 = vadd.f32 %v13484_v31, %v13282_v23  ;;  %v16179_v23 = vld [vmem:[#allocation42_spill] sm:$0xff] }
 0x6da   :  { %10132 = vrcp.f32 %v3392_v21  ;;  %v8647_v21 = vmul.f32 -1.442695, %v3272_v39 }
 0x6db   :  { %10134 = vpow2.f32 %v8643_v57  ;;  %v13597_v45 = vpop.permute.xlu0 %3698  ;;  %v8648_v57 = vmul.f32 -1.442695, %v3273_v38  ;;  %v3276_v38 = vadd.f32 %v13488_v0, %v13318_v47 }
 0x6dc   :  { %10136 = vpow2.f32 %v8644_v11 }
 0x6dd   :  { %10138 = vrcp.f32 %v3393_v24 }
 0x6e1   :  { %v13601_v17 = vpop.permute.xlu1 %3700 }
 0x6e2   :  { %v10129_v18 = vpop.eup %10128 }
 0x6e3   :  { %v10131_v50 = vpop.eup %10130  ;;  %v3394_v48 = vadd.f32 1.0, %v10129_v18  ;;  %v13605_v52 = vpop.permute.xlu0 %3702  ;;  %v3764_v18 = vadd.f32 %v3689_v13, %v13385_v16 }
 0x6e4   :  { %v3395_v54 = vadd.f32 1.0, %v10131_v50  ;;  %v10133_v5 = vpop.eup %10132 }
 0x6e5   :  { %10140 = vrcp.f32 %v3394_v48  ;;  %v10135_v3 = vpop.eup %10134  ;;  %v3808_v10 = vsub.f32 1.0, %v10133_v5  ;;  %v4000_v50 = vmul.f32 %v10133_v5, %v16178_v26  ;;  %v3274_v48 = vadd.f32 %v13482_v30, %v13294_v9 }
 0x6e6   :  { %10142 = vpow2.f32 %v8645_v55  ;;  %v10137_v4 = vpop.eup %10136  ;;  %v3396_v29 = vadd.f32 1.0, %v10135_v3  ;;  %v3275_v5 = vadd.f32 %v13491_v2, %v13303_v43 }
 0x6e7   :  { %10144 = vrcp.f32 %v3395_v54  ;;  %v10139_v53 = vpop.eup %10138  ;;  %v3397_v42 = vadd.f32 1.0, %v10137_v4  ;;  %v3765_v4 = vadd.f32 %v3691_v36, %v13393_v62  ;;  %v8649_v30 = vmul.f32 -1.442695, %v3274_v48 }
 0x6e8   :  { %10146 = vpow2.f32 %v8646_v49  ;;  %v3809_v24 = vsub.f32 1.0, %v10139_v53  ;;  %v4001_v31 = vmul.f32 %v10139_v53, %v16179_v23  ;;  %v8650_v43 = vmul.f32 -1.442695, %v3275_v5  ;;  %v16186_v23 = vld [vmem:[#allocation12_spill] sm:$0xff] }
 0x6e9   :  { %10148 = vrcp.f32 %v3396_v29  ;;  %v3767_v5 = vadd.f32 %v13593_v20, %v13408_v7  ;;  %v16187_v20 = vld [vmem:[#allocation14_spill] sm:$0xff] }
 0x6ea   :  { %10150 = vrcp.f32 %v3397_v42 }
 0x6eb   :  { %10152 = vpow2.f32 %v8647_v21  ;;  %v16182_v21 = vld [vmem:[#allocation43_spill] sm:$0xff] }
 0x6ec   :  { %10154 = vpow2.f32 %v8648_v57  ;;  %v16183_v57 = vld [vmem:[#allocation15_spill] sm:$0xff] }
 0x6ed   :  { %10156 = vtanh.f32 %v3764_v18 }
 0x6ee   :  { %10158 = vtanh.f32 %v3765_v4 }
 0x6ef   :  { %v10141_v22 = vpop.eup %10140 }
 0x6f0   :  { %v10143_v32 = vpop.eup %10142  ;;  %v3810_v53 = vsub.f32 1.0, %v10141_v22 }
 0x6f1   :  { %v10145_v54 = vpop.eup %10144  ;;  %v3398_v39 = vadd.f32 1.0, %v10143_v32 }
 0x6f2   :  { %v10147_v3 = vpop.eup %10146 }
 0x6f3   :  { %v3399_v29 = vadd.f32 1.0, %v10147_v3  ;;  %10160 = vrcp.f32 %v3398_v39  ;;  %v10149_v18 = vpop.eup %10148 }
 0x6f4   :  { %10162 = vpow2.f32 %v8649_v30  ;;  %v10151_v47 = vpop.eup %10150  ;;  %v3812_v39 = vsub.f32 1.0, %v10149_v18 }
 0x6f5   :  { %10164 = vrcp.f32 %v3399_v29 }
 0x6f6   :  { %10166 = vpow2.f32 %v8650_v43  ;;  %v16188_v43 = vld [vmem:[#allocation46_spill] sm:$0xff] }
 0x6f9   :  { %v3873_v12 = vpop.permute.xlu1 %3872 }
 0x6fa   :  { %v3968_v11 = vmul.f32 %v3873_v12, %v3808_v10  ;;  %v3811_v10 = vsub.f32 1.0, %v10145_v54  ;;  %v4002_v12 = vmul.f32 %v10141_v22, %v16182_v21  ;;  %v3277_v22 = vadd.f32 %v13502_v8, %v13325_v46 }
 0x6fb   :  { %v3875_v27 = vpop.permute.xlu0 %3874 }
 0x6fc   :  { %v3969_v15 = vmul.f32 %v3875_v27, %v3809_v24  ;;  %v13614_v49 = vadd.f32 %v4000_v50, %v3968_v11  ;;  %v4003_v11 = vmul.f32 %v10145_v54, %v16183_v57  ;;  %v8651_v27 = vmul.f32 -1.442695, %v3276_v38 }
 0x6fd   :  { %v13612_v55 = vpop.permute.xlu1 %3704  ;;  %v8652_v46 = vmul.f32 -1.442695, %v3277_v22  ;;  %v3813_v38 = vsub.f32 1.0, %v10151_v47 }
 0x6fe   :  { %16180 = vst [vmem:[#allocation51_spill] sm:$0xff] %v13614_v49  ;;  %v13616_v13 = vadd.f32 %v4001_v31, %v3969_v15  ;;  %v10153_v31 = vpop.eup %10152  ;;  %v3766_v15 = vadd.f32 %v13591_v35, %v13402_v60  ;;  %10168 = vpow2.f32 %v8651_v27  ;;  %v3278_v35 = vadd.f32 %v13499_v44, %v13336_v63 }
 0x6ff   :  { %v13621_v33 = vpop.permute.xlu0 %3202  ;;  %v10155_v48 = vpop.eup %10154  ;;  %v3400_v4 = vadd.f32 1.0, %v10153_v31  ;;  %v3279_v44 = vadd.f32 %v13514_v40, %v13345_v37  ;;  %v3280_v40 = vadd.f32 %v13511_v6, %v13357_v56  ;;  %v16194_v6 = vld [vmem:[#allocation21_spill] sm:$0xff] }
 0x700   :  { %16181 = vst [vmem:[#allocation16_spill] sm:$0xff] %v13616_v13  ;;  %v4064_v9 = vpack.c.bf16 %v13616_v13, %v13614_v49  ;;  %v10157_v3 = vpop.eup %10156  ;;  %10170 = vtanh.f32 %v3766_v15  ;;  %v3401_v8 = vadd.f32 1.0, %v10155_v48  ;;  %v16192_v48 = vld [vmem:[#allocation23_spill] sm:$0xff] }
 0x701   :  { %v3877_v42 = vpop.permute.xlu1 %3876  ;;  %10172 = vtanh.f32 %v3767_v5 }
 0x702   :  { %4101 = vrot.lane.b32.xlu1 %v4064_v9, %s11215_s16  ;;  %v3970_v2 = vmul.f32 %v3877_v42, %v3810_v53  ;;  %v10159_v53 = vpop.eup %10158  ;;  %10174 = vrcp.f32 %v3400_v4 }
 0x703   :  { %v3879_v36 = vpop.permute.xlu0 %3878  ;;  %v10161_v42 = vpop.eup %10160  ;;  %10176 = vpow2.f32 %v8652_v46  ;;  %v3769_v46 = vadd.f32 %v13597_v45, %v13424_v61 }
 0x704   :  { %v3971_v24 = vmul.f32 %v3879_v36, %v3811_v10  ;;  %v13630_v0 = vadd.f32 %v4002_v12, %v3970_v2  ;;  %v4004_v10 = vmul.f32 %v10149_v18, %v16187_v20  ;;  %v4005_v2 = vmul.f32 %v10151_v47, %v16188_v43  ;;  %v16189_v12 = vld [vmem:[#allocation13_spill] sm:$0xff]  ;;  %v10163_v63 = vpop.eup %10162 }
 0x705   :  { %v13634_v50 = vpop.permute.xlu1 %3204  ;;  %v10165_v57 = vpop.eup %10164  ;;  %10178 = vrcp.f32 %v3401_v8  ;;  %v3768_v47 = vadd.f32 %v13595_v41, %v13418_v51  ;;  %v3402_v31 = vadd.f32 1.0, %v10163_v63  ;;  %v3814_v15 = vsub.f32 1.0, %v10161_v42  ;;  %v16193_v8 = vld [vmem:[#allocation20_spill] sm:$0xff] }
 0x706   :  { %16184 = vst [vmem:[#allocation17_spill] sm:$0xff] %v13630_v0  ;;  %v13632_v26 = vadd.f32 %v4003_v11, %v3971_v24  ;;  %3220 = vrot.lane.b32.xlu1 %v16186_v23, %s11214_s19  ;;  %v8653_v11 = vmul.f32 -1.442695, %v3278_v35  ;;  %v10167_v27 = vpop.eup %10166  ;;  %v3815_v5 = vsub.f32 1.0, %v10165_v57  ;;  %v3281_v41 = vadd.f32 %v13621_v33, %v13362_v34 }
 0x707   :  { %v13642_v32 = vpop.permute.xlu0 %3706  ;;  %v3403_v4 = vadd.f32 1.0, %v10167_v27  ;;  %v4006_v35 = vmul.f32 %v10161_v42, %v16193_v8  ;;  %v8655_v34 = vmul.f32 -1.442695, %v3280_v40 }
 0x708   :  { %16185 = vst [vmem:[#allocation33_spill] sm:$0xff] %v13632_v26  ;;  %v4065_v54 = vpack.c.bf16 %v13632_v26, %v13630_v0  ;;  %v10169_v37 = vpop.eup %10168  ;;  %10180 = vpow2.f32 %v8653_v11 }
 0x709   :  { %v3881_v9 = vpop.permute.xlu1 %3880  ;;  %10182 = vtanh.f32 %v3768_v47  ;;  %v3404_v56 = vadd.f32 1.0, %v10169_v37 }
 0x70a   :  { %3912 = vrot.lane.b32.xlu1 %v10157_v3, %s11215_s16  ;;  %4103 = vrot.lane.b32.xlu0 %v4065_v54, %s11215_s16  ;;  %v3972_v30 = vmul.f32 %v3881_v9, %v3812_v39  ;;  %v8654_v54 = vmul.f32 -1.442695, %v3279_v44  ;;  %v10171_v9 = vpop.eup %10170  ;;  %10184 = vrcp.f32 %v3402_v31  ;;  %v3771_v44 = vadd.f32 %v13605_v52, %v13440_v1 }
 0x70b   :  { %v3883_v29 = vpop.permute.xlu0 %3882  ;;  %v3772_v52 = vadd.f32 %v13612_v55, %v13450_v28  ;;  %v16201_v55 = vld [vmem:[#allocation32_spill] sm:$0xff] }
 0x70c   :  { %v3973_v36 = vmul.f32 %v3883_v29, %v3813_v38  ;;  %v13661_v24 = vadd.f32 %v4004_v10, %v3972_v30  ;;  %v4007_v38 = vmul.f32 %v10165_v57, %v16194_v6  ;;  %v10173_v29 = vpop.eup %10172  ;;  %10186 = vpow2.f32 %v8654_v54  ;;  %v16199_v54 = vld [vmem:[#allocation25_spill] sm:$0xff] }
 0x70d   :  { %v13654_v21 = vpop.permute.xlu1 %3708  ;;  %v10175_v20 = vpop.eup %10174  ;;  %10188 = vrcp.f32 %v3403_v4  ;;  %v8656_v10 = vmul.f32 -1.442695, %v3281_v41  ;;  %v3282_v57 = vadd.f32 %v13634_v50, %v13373_v58 }
 0x70e   :  { %3226 = vrot.lane.b32.xlu1 %v16189_v12, %s11214_s19  ;;  %3914 = vrot.lane.b32.xlu0 %v10159_v53, %s11215_s16  ;;  %16190 = vst [vmem:[#allocation18_spill] sm:$0xff] %v13661_v24  ;;  %v13663_v18 = vadd.f32 %v4005_v2, %v3973_v36  ;;  %v10177_v42 = vpop.eup %10176  ;;  %10190 = vtanh.f32 %v3769_v46  ;;  %v16197_v2 = vld [vmem:[#allocation50_spill] sm:$0xff]  ;;  %v3816_v27 = vsub.f32 1.0, %v10175_v20 }
 0x70f   :  { %v3207_v23 = vpop.permute.xlu0 %3206  ;;  %v3770_v36 = vadd.f32 %v13601_v17, %v16197_v2  ;;  %v10179_v63 = vpop.eup %10178  ;;  %10192 = vrcp.f32 %v3404_v56  ;;  %v3405_v31 = vadd.f32 1.0, %v10177_v42  ;;  %v3773_v56 = vadd.f32 %v13642_v32, %v13458_v59 }
 0x710   :  { %16191 = vst [vmem:[#allocation19_spill] sm:$0xff] %v13663_v18  ;;  %v4066_v22 = vpack.c.bf16 %v13663_v18, %v13661_v24  ;;  %10194 = vpow2.f32 %v8655_v34  ;;  %v3283_v17 = vadd.f32 %v3207_v23, %v13379_v14  ;;  %v3817_v50 = vsub.f32 1.0, %v10179_v63 }
 0x711   :  { %v3885_v3 = vpop.permute.xlu1 %3884  ;;  %10196 = vpow2.f32 %v8656_v10 }
 0x712   :  { %3224 = vrot.lane.b32.xlu0 %v16192_v48, %s11214_s19  ;;  %v3974_v39 = vmul.f32 %v3885_v3, %v3814_v15  ;;  %4105 = vrot.lane.b32.xlu1 %v4066_v22, %s11215_s16  ;;  %v16198_v22 = vld [vmem:[#allocation27_spill] sm:$0xff]  ;;  %10198 = vtanh.f32 %v3770_v36  ;;  %v10181_v15 = vpop.eup %10180  ;;  %v8657_v48 = vmul.f32 -1.442695, %v3282_v57  ;;  %v4008_v3 = vmul.f32 %v10175_v20, %v16199_v54 }
 0x713   :  { %v3887_v30 = vpop.permute.xlu0 %3886  ;;  %10200 = vtanh.f32 %v3771_v44  ;;  %v10183_v40 = vpop.eup %10182  ;;  %v3406_v46 = vadd.f32 1.0, %v10181_v15  ;;  %v3774_v44 = vadd.f32 %v13654_v21, %v13467_v19 }
 0x714   :  { %v3975_v53 = vmul.f32 %v3887_v30, %v3815_v5  ;;  %v13683_v43 = vadd.f32 %v4006_v35, %v3974_v39  ;;  %v16200_v5 = vld [vmem:[#allocation47_spill] sm:$0xff]  ;;  %v10185_v41 = vpop.eup %10184  ;;  %10202 = vrcp.f32 %v3405_v31  ;;  %v8658_v39 = vmul.f32 -1.442695, %v3283_v17  ;;  %v16205_v31 = vld [vmem:[#allocation22_spill] sm:$0xff] }
 0x715   :  { %v13681_v33 = vpop.permute.xlu1 %3208  ;;  %v4009_v14 = vmul.f32 %v10179_v63, %v16200_v5  ;;  %10204 = vtanh.f32 %v3772_v52 }
 0x716   :  { %3916 = vrot.lane.b32.xlu0 %v10171_v9, %s11215_s16  ;;  %16195 = vst [vmem:[#allocation49_spill] sm:$0xff] %v13683_v43  ;;  %v13685_v45 = vadd.f32 %v4007_v38, %v3975_v53  ;;  %3918 = vrot.lane.b32.xlu1 %v10173_v29, %s11215_s16  ;;  %v10187_v9 = vpop.eup %10186  ;;  %10206 = vpow2.f32 %v8657_v48  ;;  %v3818_v29 = vsub.f32 1.0, %v10185_v41 }
 0x717   :  { %v13690_v12 = vpop.permute.xlu0 %3710  ;;  %v10189_v30 = vpop.eup %10188  ;;  %v3407_v10 = vadd.f32 1.0, %v10187_v9  ;;  %10208 = vpow2.f32 %v8658_v39 }
 0x718   :  { %16196 = vst [vmem:[#allocation40_spill] sm:$0xff] %v13685_v45  ;;  %v4067_v11 = vpack.c.bf16 %v13685_v45, %v13683_v43  ;;  %v10191_v38 = vpop.eup %10190  ;;  %10210 = vrcp.f32 %v3406_v46  ;;  %v3819_v63 = vsub.f32 1.0, %v10189_v30  ;;  %v4011_v17 = vmul.f32 %v10189_v30, %v16205_v31  ;;  %v16208_v30 = vld [vmem:[#allocation26_spill] sm:$0xff]  ;;  %v14335_v43 = vld [vmem:[%s15907_s5] ss:$0 sm:$0xff] }
 0x719   :  { %v3889_v47 = vpop.permute.xlu1 %3888  ;;  %v10193_v20 = vpop.eup %10192  ;;  %10212 = vtanh.f32 %v3773_v56 }
 0x71a   :  { %3228 = vrot.lane.b32.xlu1 %v16198_v22, %s11214_s19  ;;  %4107 = vrot.lane.b32.xlu0 %v4067_v11, %s11215_s16  ;;  %v3976_v58 = vmul.f32 %v3889_v47, %v3816_v27  ;;  %v10195_v42 = vpop.eup %10194  ;;  %v16204_v27 = vld [vmem:[#allocation24_spill] sm:$0xff]  ;;  %10214 = vrcp.f32 %v3407_v10  ;;  %v3820_v5 = vsub.f32 1.0, %v10193_v20  ;;  %v4012_v56 = vmul.f32 %v10193_v20, %v16208_v30  ;;  %v16216_v30 = vld [vmem:[#allocation35_spill] sm:$0xff] }
 0x71b   :  { %v3891_v37 = vpop.permute.xlu0 %3890  ;;  %v10197_v32 = vpop.eup %10196  ;;  %v4010_v47 = vmul.f32 %v10185_v41, %v16204_v27  ;;  %10216 = vtanh.f32 %v3774_v44 }
 0x71c   :  { %v3977_v23 = vmul.f32 %v3891_v37, %v3817_v50  ;;  %v13711_v8 = vadd.f32 %v4008_v3, %v3976_v58  ;;  %v10199_v11 = vpop.eup %10198  ;;  %v3408_v58 = vadd.f32 1.0, %v10195_v42  ;;  %v3409_v50 = vadd.f32 1.0, %v10197_v32 }
 0x71d   :  { %v13706_v4 = vpop.permute.xlu1 %3212  ;;  %v10201_v52 = vpop.eup %10200  ;;  %v3775_v37 = vadd.f32 %v13690_v12, %v13477_v25 }
 0x71e   :  { %3920 = vrot.lane.b32.xlu1 %v10183_v40, %s11215_s16  ;;  %3230 = vrot.lane.b32.xlu0 %v16201_v55, %s11214_s19  ;;  %16202 = vst [vmem:[#allocation41_spill] sm:$0xff] %v13711_v8  ;;  %v13713_v35 = vadd.f32 %v4009_v14, %v3977_v23  ;;  %v10203_v21 = vpop.eup %10202  ;;  %10218 = vrcp.f32 %v3408_v58  ;;  %v16212_v58 = vld [vmem:[#allocation31_spill] sm:$0xff] }
 0x71f   :  { %v13717_v6 = vpop.permute.xlu0 %3210  ;;  %v10205_v54 = vpop.eup %10204  ;;  %10220 = vrcp.f32 %v3409_v50  ;;  %v3821_v39 = vsub.f32 1.0, %v10203_v21 }
 0x720   :  { %16203 = vst [vmem:[#allocation42_spill] sm:$0xff] %v13713_v35  ;;  %v4068_v53 = vpack.c.bf16 %v13713_v35, %v13711_v8  ;;  %v10207_v23 = vpop.eup %10206  ;;  %10222 = vtanh.f32 %v3775_v37 }
 0x721   :  { %v3893_v34 = vpop.permute.xlu1 %3892  ;;  %v10209_v55 = vpop.eup %10208  ;;  %v3410_v46 = vadd.f32 1.0, %v10207_v23 }
 0x722   :  { %3922 = vrot.lane.b32.xlu0 %v10191_v38, %s11215_s16  ;;  %v3978_v36 = vmul.f32 %v3893_v34, %v3818_v29  ;;  %4109 = vrot.lane.b32.xlu1 %v4068_v53, %s11215_s16  ;;  %v10211_v9 = vpop.eup %10210  ;;  %v16209_v38 = vld [vmem:[#allocation30_spill] sm:$0xff]  ;;  %v3411_v42 = vadd.f32 1.0, %v10209_v55 }
 0x723   :  { %v3895_v57 = vpop.permute.xlu0 %3894  ;;  %v4013_v53 = vmul.f32 %v10203_v21, %v16209_v38  ;;  %v10213_v10 = vpop.eup %10212  ;;  %10224 = vrcp.f32 %v3410_v46  ;;  %v4014_v50 = vmul.f32 %v10211_v9, %v16212_v58  ;;  %v16213_v21 = vld [vmem:[#allocation34_spill] sm:$0xff] }
 0x724   :  { %v3979_v22 = vmul.f32 %v3895_v57, %v3819_v63  ;;  %v13728_v15 = vadd.f32 %v4010_v47, %v3978_v36  ;;  %v10215_v32 = vpop.eup %10214  ;;  %v3822_v57 = vsub.f32 1.0, %v10211_v9  ;;  %10226 = vrcp.f32 %v3411_v42  ;;  %v16221_v58 = vld [vmem:[#allocation38_spill] sm:$0xff] }
 0x725   :  { %v10217_v27 = vpop.eup %10216  ;;  %v3823_v31 = vsub.f32 1.0, %v10215_v32  ;;  %v4015_v37 = vmul.f32 %v10215_v32, %v16213_v21 }
 0x726   :  { %3924 = vrot.lane.b32.xlu0 %v10199_v11, %s11215_s16  ;;  %16206 = vst [vmem:[#allocation43_spill] sm:$0xff] %v13728_v15  ;;  %v13730_v48 = vadd.f32 %v4011_v17, %v3979_v22  ;;  %3926 = vrot.lane.b32.xlu1 %v10201_v52, %s11215_s16 }
 0x727   :  { %v13735_v40 = vpop.permute.xlu0 %3214 }
 0x728   :  { %16207 = vst [vmem:[#allocation15_spill] sm:$0xff] %v13730_v48  ;;  %v4069_v3 = vpack.c.bf16 %v13730_v48, %v13728_v15  ;;  %v10219_v17 = vpop.eup %10218 }
 0x729   :  { %v3897_v14 = vpop.permute.xlu1 %3896  ;;  %v10221_v52 = vpop.eup %10220  ;;  %v3824_v23 = vsub.f32 1.0, %v10219_v17  ;;  %v4016_v9 = vmul.f32 %v10219_v17, %v16216_v30  ;;  %v16220_v17 = vld [vmem:[#allocation37_spill] sm:$0xff] }
 0x72a   :  { %v3980_v41 = vmul.f32 %v3897_v14, %v3820_v5  ;;  %3928 = vrot.lane.b32.xlu1 %v10205_v54, %s11215_s16  ;;  %4111 = vrot.lane.b32.xlu0 %v4069_v3, %s11215_s16  ;;  %v10223_v3 = vpop.eup %10222 }
 0x72b   :  { %v3899_v12 = vpop.permute.xlu0 %3898 }
 0x72c   :  { %v3981_v29 = vmul.f32 %v3899_v12, %v3821_v39  ;;  %v13745_v36 = vadd.f32 %v4012_v56, %v3980_v41  ;;  %v3825_v39 = vsub.f32 1.0, %v10221_v52  ;;  %v16217_v56 = vld [vmem:[#allocation36_spill] sm:$0xff] }
 0x72d   :  { %v13743_v34 = vpop.permute.xlu1 %3218  ;;  %v4017_v38 = vmul.f32 %v10221_v52, %v16217_v56 }
 0x72e   :  { %16210 = vst [vmem:[#allocation12_spill] sm:$0xff] %v13745_v36  ;;  %v13747_v63 = vadd.f32 %v4013_v53, %v3981_v29  ;;  %3930 = vrot.lane.b32.xlu0 %v10213_v10, %s11215_s16  ;;  %v10225_v29 = vpop.eup %10224 }
 0x72f   :  { %v13750_v44 = vpop.permute.xlu0 %3216  ;;  %v10227_v32 = vpop.eup %10226 }
 0x730   :  { %16211 = vst [vmem:[#allocation14_spill] sm:$0xff] %v13747_v63  ;;  %v4070_v20 = vpack.c.bf16 %v13747_v63, %v13745_v36 }
 0x731   :  { %v3901_v11 = vpop.permute.xlu1 %3900 }
 0x732   :  { %v3982_v47 = vmul.f32 %v3901_v11, %v3822_v57  ;;  %3932 = vrot.lane.b32.xlu0 %v10217_v27, %s11215_s16  ;;  %4113 = vrot.lane.b32.xlu1 %v4070_v20, %s11215_s16  ;;  %v3826_v57 = vsub.f32 1.0, %v10225_v29 }
 0x733   :  { %v3903_v22 = vpop.permute.xlu0 %3902 }
 0x734   :  { %v3983_v54 = vmul.f32 %v3903_v22, %v3823_v31  ;;  %v13758_v5 = vadd.f32 %v4014_v50, %v3982_v47  ;;  %v3827_v47 = vsub.f32 1.0, %v10227_v32  ;;  %v4018_v22 = vmul.f32 %v10225_v29, %v16220_v17 }
 0x735   :  { %v4019_v50 = vmul.f32 %v10227_v32, %v16221_v58 }
 0x736   :  { %16214 = vst [vmem:[#allocation46_spill] sm:$0xff] %v13758_v5  ;;  %v13760_v14 = vadd.f32 %v4015_v37, %v3983_v54  ;;  %3934 = vrot.lane.b32.xlu1 %v10223_v3, %s11215_s16  ;;  %v3284_v3 = vadd.f32 %v13681_v33, %v13385_v16 }
 0x738   :  { %16215 = vst [vmem:[#allocation13_spill] sm:$0xff] %v13760_v14  ;;  %v4071_v55 = vpack.c.bf16 %v13760_v14, %v13758_v5 }
 0x739   :  { %v3905_v41 = vpop.permute.xlu1 %3904 }
 0x73a   :  { %v3984_v12 = vmul.f32 %v3905_v41, %v3824_v23  ;;  %4115 = vrot.lane.b32.xlu0 %v4071_v55, %s11215_s16  ;;  %v3285_v23 = vadd.f32 %v13717_v6, %v13393_v62  ;;  %v8659_v41 = vmul.f32 -1.442695, %v3284_v3  ;;  %v3286_v55 = vadd.f32 %v13706_v4, %v13402_v60 }
 0x73b   :  { %v3907_v46 = vpop.permute.xlu0 %3906  ;;  %v3288_v62 = vadd.f32 %v13750_v44, %v13418_v51  ;;  %v3289_v6 = vadd.f32 %v13743_v34, %v13424_v61 }
 0x73c   :  { %v3985_v53 = vmul.f32 %v3907_v46, %v3825_v39  ;;  %v13768_v10 = vadd.f32 %v4016_v9, %v3984_v12  ;;  %v8660_v39 = vmul.f32 -1.442695, %v3285_v23  ;;  %10228 = vpow2.f32 %v8659_v41  ;;  %v16226_v41 = vld [vmem:[#allocation44_spill] sm:$0xff] }
 0x73d   :  { %v3287_v12 = vadd.f32 %v13735_v40, %v13408_v7  ;;  %v8661_v46 = vmul.f32 -1.442695, %v3286_v55  ;;  %v8663_v60 = vmul.f32 -1.442695, %v3288_v62  ;;  %v8664_v7 = vmul.f32 -1.442695, %v3289_v6 }
 0x73e   :  { %16218 = vst [vmem:[#allocation23_spill] sm:$0xff] %v13768_v10  ;;  %v13770_v42 = vadd.f32 %v4017_v38, %v3985_v53  ;;  %10230 = vpow2.f32 %v8660_v39 }
 0x73f   :  { %v8662_v30 = vmul.f32 -1.442695, %v3287_v12  ;;  %10232 = vpow2.f32 %v8661_v46 }
 0x740   :  { %16219 = vst [vmem:[#allocation20_spill] sm:$0xff] %v13770_v42  ;;  %v4072_v20 = vpack.c.bf16 %v13770_v42, %v13768_v10 }
 0x741   :  { %v3909_v11 = vpop.permute.xlu0 %3908  ;;  %10234 = vpow2.f32 %v8662_v30 }
 0x742   :  { %v3986_v27 = vmul.f32 %v3909_v11, %v3826_v57  ;;  %4117 = vrot.lane.b32.xlu1 %v4072_v20, %s11215_s16  ;;  %v16224_v20 = vmov 0  }
 0x743   :  { %v3911_v31 = vpop.permute.xlu1 %3910 }
 0x744   :  { %v3987_v52 = vmul.f32 %v3911_v31, %v3827_v47  ;;  %v13777_v21 = vadd.f32 %v4018_v22, %v3986_v27 }
 0x745   :  { %v3223_v4 = vpop.permute.xlu0 %3222 }
 0x746   :  { %16222 = vst [vmem:[#allocation21_spill] sm:$0xff] %v13777_v21  ;;  %v13779_v37 = vadd.f32 %v4019_v50, %v3987_v52  ;;  %v10229_v9 = vpop.eup %10228  ;;  %v3291_v53 = vadd.f32 %v3223_v4, %v13440_v1 }
 0x747   :  { %v3412_v16 = vadd.f32 1.0, %v10229_v9 }
 0x748   :  { %16223 = vst [vmem:[#allocation50_spill] sm:$0xff] %v13779_v37  ;;  %v4073_v54 = vpack.c.bf16 %v13779_v37, %v13777_v21  ;;  %v10231_v56 = vpop.eup %10230  ;;  %v8666_v44 = vmul.f32 -1.442695, %v3291_v53 }
 0x749   :  { %v3413_v33 = vadd.f32 1.0, %v10231_v56  ;;  %10236 = vrcp.f32 %v3412_v16  ;;  %v10233_v38 = vpop.eup %10232 }
 0x74a   :  { %4119 = vrot.lane.b32.xlu0 %v4073_v54, %s11215_s16  ;;  %v3414_v32 = vadd.f32 1.0, %v10233_v38  ;;  %v16225_v54 = vld [vmem:[#allocation39_spill] sm:$0xff] }
 0x74b   :  { %10238 = vrcp.f32 %v3413_v33  ;;  %v10235_v40 = vpop.eup %10234 }
 0x74c   :  { %10240 = vpow2.f32 %v8663_v60  ;;  %v3415_v51 = vadd.f32 1.0, %v10235_v40 }
 0x74d   :  { %10242 = vpow2.f32 %v8664_v7 }
 0x74e   :  { %10244 = vrcp.f32 %v3414_v32 }
 0x74f   :  { %10246 = vrcp.f32 %v3415_v51 }
 0x750   :  { %10248 = vpow2.f32 %v8666_v44 }
 0x753   :  { %v10237_v57 = vpop.eup %10236 }
 0x754   :  { %v3828_v31 = vsub.f32 1.0, %v10237_v57  ;;  %v4020_v3 = vmul.f32 %v10237_v57, %v16225_v54 }
 0x755   :  { %v10239_v27 = vpop.eup %10238 }
 0x756   :  { %v10241_v17 = vpop.eup %10240  ;;  %v3829_v52 = vsub.f32 1.0, %v10239_v27  ;;  %v4021_v39 = vmul.f32 %v10239_v27, %v16226_v41 }
 0x757   :  { %v3416_v12 = vadd.f32 1.0, %v10241_v17 }
 0x774   :  { %v4102_v29 = vpop.permute.xlu1 %4101 }
 0x775   :  { %8679 = vmatmul.mubr.msk.bf16.vlgmr.msra.gmra.mrb[96].mxu0 %vm148_vm0, %v4102_v29  ;;  %v16229_v29 = vld [vmem:[#allocation6_spill] sm:$0xff] }
 0x776   :  { %4243 = vmatprep.mubr.bf16.mxu0 %v16224_v20 }
 0x778   :  { %v3221_v61 = vpop.permute.xlu1 %3220 }
 0x779   :  { %v3290_v34 = vadd.f32 %v3221_v61, %v16197_v2  ;;  %v10243_v2 = vpop.eup %10242 }
 0x77a   :  { %v10245_v56 = vpop.eup %10244  ;;  %v3417_v16 = vadd.f32 1.0, %v10243_v2 }
 0x77b   :  { %v8665_v11 = vmul.f32 -1.442695, %v3290_v34  ;;  %v10247_v33 = vpop.eup %10246  ;;  %v3830_v40 = vsub.f32 1.0, %v10245_v56  ;;  %v4022_v32 = vmul.f32 %v10245_v56, %v16229_v29 }
 0x77c   :  { %v3913_v1 = vpop.permute.xlu1 %3912  ;;  %v4104_v47 = vpop.permute.xlu0 %4103 }
 0x77d   :  { %10250 = vpow2.f32 %v8665_v11  ;;  %8680 = vmatmul.mubr.msk.bf16.gmra.mrb[100].mxu0 %vm148_vm0, %v4104_v47  ;;  %v3988_v22 = vmul.f32 %v3913_v1, %v3828_v31  ;;  %v16230_v11 = vld [vmem:[#allocation7_spill] sm:$0xff] }
 0x77e   :  { %4253 = vmatprep.mubr.bf16.mxu0 %v16224_v20  ;;  %v4023_v27 = vmul.f32 %v10247_v33, %v16230_v11 }
 0x77f   :  { %v13805_v46 = vadd.f32 %v4020_v3, %v3988_v22 }
 0x780   :  { %v3227_v58 = vpop.permute.xlu1 %3226  ;;  %v3915_v50 = vpop.permute.xlu0 %3914 }
 0x781   :  { %v3293_v23 = vadd.f32 %v3227_v58, %v13458_v59  ;;  %v3989_v55 = vmul.f32 %v3915_v50, %v3829_v52  ;;  %16227 = vst [vmem:[#allocation27_spill] sm:$0xff] %v13805_v46  ;;  %v10249_v59 = vpop.eup %10248 }
 0x782   :  { %v3419_v44 = vadd.f32 1.0, %v10249_v59 }
 0x783   :  { %v8668_v30 = vmul.f32 -1.442695, %v3293_v23  ;;  %v13807_v9 = vadd.f32 %v4021_v39, %v3989_v55 }
 0x784   :  { %v3225_v62 = vpop.permute.xlu0 %3224  ;;  %v4106_v4 = vpop.permute.xlu1 %4105 }
 0x785   :  { %16228 = vst [vmem:[#allocation25_spill] sm:$0xff] %v13807_v9  ;;  %10252 = vpow2.f32 %v8668_v30  ;;  %v4074_v6 = vpack.c.bf16 %v13807_v9, %v13805_v46  ;;  %v3292_v60 = vadd.f32 %v3225_v62, %v13450_v28  ;;  %8681 = vmatmul.mubr.msk.bf16.gmra.mrb[104].mxu0 %vm148_vm0, %v4106_v4  ;;  %v3831_v28 = vsub.f32 1.0, %v10247_v33 }
 0x786   :  { %10254 = vrcp.f32 %v3416_v12  ;;  %4263 = vmatprep.mubr.bf16.mxu0 %v16224_v20 }
 0x787   :  { %v10251_v38 = vpop.eup %10250  ;;  %v8667_v7 = vmul.f32 -1.442695, %v3292_v60  ;;  %4121 = vrot.lane.b32.xlu1 %v4074_v6, %s11215_s16  ;;  %10256 = vrcp.f32 %v3417_v16  ;;  %v16233_v60 = vld [vmem:[#allocation48_spill] sm:$0xff] }
 0x788   :  { %v3418_v53 = vadd.f32 1.0, %v10251_v38  ;;  %v3917_v51 = vpop.permute.xlu0 %3916  ;;  %v3919_v34 = vpop.permute.xlu1 %3918  ;;  %v16234_v38 = vld [vmem:[#allocation45_spill] sm:$0xff] }
 0x789   :  { %10258 = vpow2.f32 %v8667_v7  ;;  %v3990_v61 = vmul.f32 %v3917_v51, %v3830_v40  ;;  %v3991_v57 = vmul.f32 %v3919_v34, %v3831_v28 }
 0x78a   :  { %10260 = vrcp.f32 %v3418_v53 }
 0x78b   :  { %v13817_v1 = vadd.f32 %v4022_v32, %v3990_v61  ;;  %10262 = vrcp.f32 %v3419_v44  ;;  %v13819_v47 = vadd.f32 %v4023_v27, %v3991_v57  ;;  %v16237_v61 = vld [vmem:[#allocation8_spill] sm:$0xff]  ;;  %v16238_v27 = vld [vmem:[#allocation9_spill] sm:$0xff] }
 0x78c   :  { %v3229_v31 = vpop.permute.xlu1 %3228  ;;  %v4108_v17 = vpop.permute.xlu0 %4107 }
 0x78d   :  { %16231 = vst [vmem:[#allocation47_spill] sm:$0xff] %v13817_v1  ;;  %16232 = vst [vmem:[#allocation32_spill] sm:$0xff] %v13819_v47  ;;  %v4075_v52 = vpack.c.bf16 %v13819_v47, %v13817_v1  ;;  %v3294_v58 = vadd.f32 %v3229_v31, %v13467_v19  ;;  %8682 = vmatmul.mubr.msk.bf16.gmra.mrb[108].mxu0 %vm148_vm0, %v4108_v17 }
 0x78e   :  { %4273 = vmatprep.mubr.bf16.mxu0 %v16224_v20 }
 0x78f   :  { %v10253_v22 = vpop.eup %10252  ;;  %v8669_v54 = vmul.f32 -1.442695, %v3294_v58  ;;  %4123 = vrot.lane.b32.xlu0 %v4075_v52, %s11215_s16 }
 0x790   :  { %v10255_v50 = vpop.eup %10254  ;;  %v3421_v2 = vadd.f32 1.0, %v10253_v22  ;;  %v3921_v23 = vpop.permute.xlu1 %3920 }
 0x791   :  { %v10257_v3 = vpop.eup %10256  ;;  %v3231_v41 = vpop.permute.xlu0 %3230  ;;  %10264 = vpow2.f32 %v8669_v54  ;;  %v3832_v55 = vsub.f32 1.0, %v10255_v50  ;;  %v4024_v59 = vmul.f32 %v10255_v50, %v16233_v60 }
 0x792   :  { %v3295_v12 = vadd.f32 %v3231_v41, %v13477_v25  ;;  %10266 = vrcp.f32 %v3421_v2  ;;  %v3833_v16 = vsub.f32 1.0, %v10257_v3  ;;  %v4025_v7 = vmul.f32 %v10257_v3, %v16234_v38 }
 0x793   :  { %v10259_v39 = vpop.eup %10258  ;;  %v3992_v19 = vmul.f32 %v3921_v23, %v3832_v55 }
 0x794   :  { %v3420_v30 = vadd.f32 1.0, %v10259_v39  ;;  %v8670_v56 = vmul.f32 -1.442695, %v3295_v12  ;;  %v10261_v62 = vpop.eup %10260  ;;  %v4110_v4 = vpop.permute.xlu1 %4109 }
 0x795   :  { %v3923_v33 = vpop.permute.xlu0 %3922  ;;  %v10263_v6 = vpop.eup %10262  ;;  %8683 = vmatmul.mubr.msk.bf16.gmra.mrb[112].mxu0 %vm148_vm0, %v4110_v4  ;;  %v13831_v53 = vadd.f32 %v4024_v59, %v3992_v19  ;;  %v3834_v29 = vsub.f32 1.0, %v10261_v62  ;;  %v4026_v34 = vmul.f32 %v10261_v62, %v16237_v61  ;;  %v16241_v19 = vld [vmem:[#allocation10_spill] sm:$0xff]  ;;  %v16242_v62 = vld [vmem:[#allocation11_spill] sm:$0xff] }
 0x796   :  { %10268 = vrcp.f32 %v3420_v30  ;;  %v3993_v40 = vmul.f32 %v3923_v33, %v3833_v16  ;;  %4283 = vmatprep.mubr.bf16.mxu0 %v16224_v20  ;;  %v3835_v32 = vsub.f32 1.0, %v10263_v6  ;;  %v4027_v31 = vmul.f32 %v10263_v6, %v16238_v27  ;;  %v16246_v27 = vld [vmem:[#allocation29_spill] sm:$0xff] }
 0x797   :  { %10270 = vpow2.f32 %v8670_v56  ;;  %16235 = vst [vmem:[#allocation24_spill] sm:$0xff] %v13831_v53 }
 0x798   :  { %v13833_v25 = vadd.f32 %v4025_v7, %v3993_v40  ;;  %v3927_v28 = vpop.permute.xlu1 %3926 }
 0x799   :  { %v3925_v51 = vpop.permute.xlu0 %3924  ;;  %v3995_v11 = vmul.f32 %v3927_v28, %v3835_v32 }
 0x79a   :  { %16236 = vst [vmem:[#allocation22_spill] sm:$0xff] %v13833_v25  ;;  %v4076_v44 = vpack.c.bf16 %v13833_v25, %v13831_v53  ;;  %v3994_v57 = vmul.f32 %v3925_v51, %v3834_v29 }
 0x79b   :  { %v10265_v17 = vpop.eup %10264  ;;  %v13843_v58 = vadd.f32 %v4027_v31, %v3995_v11 }
 0x79c   :  { %v13840_v22 = vadd.f32 %v4026_v34, %v3994_v57  ;;  %4125 = vrot.lane.b32.xlu1 %v4076_v44, %s11215_s16  ;;  %v3422_v52 = vadd.f32 1.0, %v10265_v17  ;;  %v10267_v50 = vpop.eup %10266  ;;  %v3929_v55 = vpop.permute.xlu1 %3928  ;;  %v16245_v34 = vld [vmem:[#allocation28_spill] sm:$0xff] }
 0x79d   :  { %16240 = vst [vmem:[#allocation30_spill] sm:$0xff] %v13843_v58  ;;  %v4112_v2 = vpop.permute.xlu0 %4111  ;;  %v3837_v12 = vsub.f32 1.0, %v10267_v50  ;;  %v4029_v33 = vmul.f32 %v10267_v50, %v16242_v62 }
 0x79e   :  { %16239 = vst [vmem:[#allocation26_spill] sm:$0xff] %v13840_v22  ;;  %10272 = vrcp.f32 %v3422_v52  ;;  %v4077_v3 = vpack.c.bf16 %v13843_v58, %v13840_v22  ;;  %8684 = vmatmul.mubr.msk.bf16.gmra.mrb[116].mxu0 %vm148_vm0, %v4112_v2 }
 0x79f   :  { %4293 = vmatprep.mubr.bf16.mxu0 %v16224_v20 }
 0x7a0   :  { %v10269_v54 = vpop.eup %10268  ;;  %4127 = vrot.lane.b32.xlu0 %v4077_v3, %s11215_s16 }
 0x7a1   :  { %v10271_v23 = vpop.eup %10270  ;;  %v3836_v41 = vsub.f32 1.0, %v10269_v54  ;;  %v4028_v56 = vmul.f32 %v10269_v54, %v16241_v19  ;;  %v3931_v16 = vpop.permute.xlu0 %3930  ;;  %v16249_v19 = vld [vmem:[#allocation5_spill] sm:$0xff] }
 0x7a2   :  { %v3423_v39 = vadd.f32 1.0, %v10271_v23  ;;  %v3997_v6 = vmul.f32 %v3931_v16, %v3837_v12 }
 0x7a3   :  { %v3996_v30 = vmul.f32 %v3929_v55, %v3836_v41 }
 0x7a4   :  { %10274 = vrcp.f32 %v3423_v39  ;;  %v13854_v59 = vadd.f32 %v4029_v33, %v3997_v6  ;;  %v4114_v4 = vpop.permute.xlu1 %4113 }
 0x7a5   :  { %v13852_v60 = vadd.f32 %v4028_v56, %v3996_v30  ;;  %v3933_v29 = vpop.permute.xlu0 %3932 }
 0x7a6   :  { %16244 = vst [vmem:[#allocation34_spill] sm:$0xff] %v13854_v59  ;;  %8685 = vmatmul.mubr.msk.bf16.gmra.mrb[120].mxu0 %vm148_vm0, %v4114_v4 }
 0x7a7   :  { %16243 = vst [vmem:[#allocation31_spill] sm:$0xff] %v13852_v60  ;;  %v4078_v38 = vpack.c.bf16 %v13854_v59, %v13852_v60  ;;  %4303 = vmatprep.mubr.bf16.mxu0 %v16224_v20 }
 0x7a8   :  { %v10273_v7 = vpop.eup %10272  ;;  %v3935_v61 = vpop.permute.xlu1 %3934 }
 0x7a9   :  { %4129 = vrot.lane.b32.xlu1 %v4078_v38, %s11215_s16  ;;  %v3838_v40 = vsub.f32 1.0, %v10273_v7  ;;  %v4030_v57 = vmul.f32 %v10273_v7, %v16245_v34 }
 0x7ab   :  { %v3998_v51 = vmul.f32 %v3933_v29, %v3838_v40 }
 0x7ac   :  { %v4116_v28 = vpop.permute.xlu0 %4115 }
 0x7ad   :  { %v13865_v17 = vadd.f32 %v4030_v57, %v3998_v51 }
 0x7ae   :  { %v10275_v32 = vpop.eup %10274  ;;  %8686 = vmatmul.mubr.msk.bf16.gmra.mrb[124].mxu0 %vm148_vm0, %v4116_v28 }
 0x7af   :  { %v3839_v44 = vsub.f32 1.0, %v10275_v32  ;;  %v4031_v31 = vmul.f32 %v10275_v32, %v16246_v27  ;;  %4313 = vmatprep.mubr.bf16.mxu0 %v16224_v20  ;;  %16247 = vst [vmem:[#allocation35_spill] sm:$0xff] %v13865_v17 }
 0x7b1   :  { %v3999_v11 = vmul.f32 %v3935_v61, %v3839_v44 }
 0x7b3   :  { %v13867_v52 = vadd.f32 %v4031_v31, %v3999_v11 }
 0x7b4   :  { %v4118_v2 = vpop.permute.xlu1 %4117 }
 0x7b5   :  { %16248 = vst [vmem:[#allocation36_spill] sm:$0xff] %v13867_v52  ;;  %v4079_v50 = vpack.c.bf16 %v13867_v52, %v13865_v17 }
 0x7b6   :  { %8687 = vmatmul.mubr.msk.bf16.gmra.mrb[128].mxu0 %vm148_vm0, %v4118_v2 }
 0x7b7   :  { %4131 = vrot.lane.b32.xlu0 %v4079_v50, %s11215_s16  ;;  %4323 = vmatprep.mubr.bf16.mxu0 %v16224_v20 }
 0x7bc   :  { %v4120_v54 = vpop.permute.xlu0 %4119 }
 0x7be   :  { %8688 = vmatmul.mubr.msk.bf16.gmra.mrb[132].mxu0 %vm148_vm0, %v4120_v54 }
 0x7bf   :  { %4333 = vmatprep.mubr.bf16.mxu0 %v16224_v20 }
 0x7f9   :  { %v4122_v3 = vpop.permute.xlu1 %4121 }
 0x7fa   :  { %8689 = vmatmul.mubr.msk.bf16.gmra.mrb[136].mxu0 %vm148_vm0, %v4122_v3 }
 0x7fb   :  { %4343 = vmatprep.mubr.bf16.mxu0 %v16224_v20 }
 0x801   :  { %v4124_v23 = vpop.permute.xlu0 %4123 }
 0x802   :  { %8690 = vmatmul.mubr.msk.bf16.gmra.mrb[140].mxu0 %vm148_vm0, %v4124_v23 }
 0x803   :  { %4353 = vmatprep.mubr.bf16.mxu0 %v16224_v20 }
 0x80e   :  { %v4126_v41 = vpop.permute.xlu1 %4125 }
 0x80f   :  { %8691 = vmatmul.mubr.msk.bf16.gmra.mrb[144].mxu0 %vm148_vm0, %v4126_v41 }
 0x810   :  { %4363 = vmatprep.mubr.bf16.mxu0 %v16224_v20 }
 0x812   :  { %v4128_v39 = vpop.permute.xlu0 %4127 }
 0x817   :  { %8692 = vmatmul.mubr.msk.bf16.gmra.mrb[148].mxu0 %vm148_vm0, %v4128_v39 }
 0x818   :  { %4373 = vmatprep.mubr.bf16.mxu0 %v16224_v20 }
 0x81b   :  { %v4130_v55 = vpop.permute.xlu1 %4129 }
 0x81f   :  { %8693 = vmatmul.mubr.msk.bf16.gmra.mrb[152].mxu0 %vm148_vm0, %v4130_v55 }
 0x820   :  { %4383 = vmatprep.mubr.bf16.mxu0 %v16224_v20 }
 0x829   :  { %v4132_v12 = vpop.permute.xlu0 %4131 }
 0x82a   :  { %8694 = vmatmul.mubr.msk.bf16.gmra.mrb[156].mxu0 %vm148_vm0, %v4132_v12 }
 0x848   :  { %v13887_v30 = vpop.f32.mrb[96].mxu0 }
 0x849   :  { %v4394_v56 = vadd.f32 %v13887_v30, %v16249_v19  ;;  %v4237_v16 = vpop.f32.mrb[97].mxu0 }
 0x84a   :  { %v13891_v62 = vpop.f32.mrb[98].mxu0  ;;  %v4395_v20 = vadd.f32 %v4237_v16, %v16249_v19 }
 0x84b   :  { %v4396_v33 = vadd.f32 %v13891_v62, %v16249_v19  ;;  %v4241_v4 = vpop.f32.mrb[99].mxu0  ;;  %4667 = vrot.lane.b32.xlu1 %v4394_v56, %s11214_s19 }
 0x84c   :  { %v4397_v38 = vadd.f32 %v4241_v4, %v16249_v19 }
 0x84d   :  { %4669 = vrot.lane.b32.xlu0 %v4396_v33, %s11214_s19 }
 0x84f   :  { %5339 = vrot.lane.b32.xlu1 %v4395_v20, %s11215_s16 }
 0x850   :  { %v13902_v7 = vpop.f32.mrb[100].mxu0 }
 0x851   :  { %v4247_v40 = vpop.f32.mrb[101].mxu0  ;;  %5341 = vrot.lane.b32.xlu0 %v4397_v38, %s11215_s16  ;;  %v4398_v44 = vadd.f32 %v13902_v7, %v16249_v19 }
 0x852   :  { %v13905_v29 = vpop.f32.mrb[102].mxu0  ;;  %v4399_v61 = vadd.f32 %v4247_v40, %v16249_v19 }
 0x853   :  { %v4251_v51 = vpop.f32.mrb[103].mxu0  ;;  %5019 = vrot.lane.b32.xlu1 %v4395_v20, %s11214_s19  ;;  %v4400_v28 = vadd.f32 %v13905_v29, %v16249_v19 }
 0x854   :  { %v4401_v57 = vadd.f32 %v4251_v51, %v16249_v19 }
 0x855   :  { %5021 = vrot.lane.b32.xlu0 %v4397_v38, %s11214_s19 }
 0x857   :  { %4671 = vrot.lane.b32.xlu1 %v4398_v44, %s11214_s19 }
 0x858   :  { %v13918_v34 = vpop.f32.mrb[104].mxu0 }
 0x859   :  { %4673 = vrot.lane.b32.xlu0 %v4400_v28, %s11214_s19  ;;  %v4257_v11 = vpop.f32.mrb[105].mxu0  ;;  %v4402_v2 = vadd.f32 %v13918_v34, %v16249_v19 }
 0x85a   :  { %v13922_v27 = vpop.f32.mrb[106].mxu0  ;;  %v4403_v39 = vadd.f32 %v4257_v11, %v16249_v19 }
 0x85b   :  { %5343 = vrot.lane.b32.xlu1 %v4399_v61, %s11215_s16  ;;  %v4261_v50 = vpop.f32.mrb[107].mxu0  ;;  %v4404_v3 = vadd.f32 %v13922_v27, %v16249_v19 }
 0x85c   :  { %v4405_v56 = vadd.f32 %v4261_v50, %v16249_v19 }
 0x85d   :  { %5345 = vrot.lane.b32.xlu0 %v4401_v57, %s11215_s16 }
 0x85f   :  { %5023 = vrot.lane.b32.xlu1 %v4399_v61, %s11214_s19 }
 0x860   :  { %v13931_v54 = vpop.f32.mrb[108].mxu0 }
 0x861   :  { %5025 = vrot.lane.b32.xlu0 %v4401_v57, %s11214_s19  ;;  %v4267_v23 = vpop.f32.mrb[109].mxu0  ;;  %v4406_v4 = vadd.f32 %v13931_v54, %v16249_v19 }
 0x862   :  { %v13936_v41 = vpop.f32.mrb[110].mxu0  ;;  %v4407_v44 = vadd.f32 %v4267_v23, %v16249_v19 }
 0x863   :  { %4675 = vrot.lane.b32.xlu1 %v4402_v2, %s11214_s19  ;;  %v4271_v12 = vpop.f32.mrb[111].mxu0  ;;  %v4408_v51 = vadd.f32 %v13936_v41, %v16249_v19 }
 0x864   :  { %v4409_v28 = vadd.f32 %v4271_v12, %v16249_v19 }
 0x865   :  { %4677 = vrot.lane.b32.xlu0 %v4404_v3, %s11214_s19 }
 0x867   :  { %5347 = vrot.lane.b32.xlu1 %v4403_v39, %s11215_s16 }
 0x868   :  { %v13945_v16 = vpop.f32.mrb[112].mxu0 }
 0x869   :  { %5349 = vrot.lane.b32.xlu0 %v4405_v56, %s11215_s16  ;;  %v4277_v33 = vpop.f32.mrb[113].mxu0  ;;  %v4410_v3 = vadd.f32 %v13945_v16, %v16249_v19 }
 0x86a   :  { %v13950_v20 = vpop.f32.mrb[114].mxu0 }
 0x86b   :  { %5027 = vrot.lane.b32.xlu1 %v4403_v39, %s11214_s19  ;;  %v4281_v40 = vpop.f32.mrb[115].mxu0  ;;  %v4412_v23 = vadd.f32 %v13950_v20, %v16249_v19 }
 0x86d   :  { %5029 = vrot.lane.b32.xlu0 %v4405_v56, %s11214_s19  ;;  %v4411_v56 = vadd.f32 %v4277_v33, %v16249_v19 }
 0x86f   :  { %4679 = vrot.lane.b32.xlu1 %v4406_v4, %s11214_s19 }
 0x871   :  { %4681 = vrot.lane.b32.xlu0 %v4408_v51, %s11214_s19  ;;  %v13961_v61 = vpop.f32.mrb[116].mxu0 }
 0x872   :  { %v4287_v57 = vpop.f32.mrb[117].mxu0  ;;  %v4414_v33 = vadd.f32 %v13961_v61, %v16249_v19 }
 0x873   :  { %5351 = vrot.lane.b32.xlu1 %v4407_v44, %s11215_s16  ;;  %v13964_v11 = vpop.f32.mrb[118].mxu0  ;;  %v4415_v55 = vadd.f32 %v4287_v57, %v16249_v19  ;;  %v16250_v57 = vpack.c.bf16 %v13891_v62, %v13887_v30  ;;  %v16251_v30 = vpack.c.bf16 %v13905_v29, %v13902_v7 }
 0x874   :  { %v4291_v2 = vpop.f32.mrb[119].mxu0  ;;  %v4416_v51 = vadd.f32 %v13964_v11, %v16249_v19 }
 0x875   :  { %5353 = vrot.lane.b32.xlu0 %v4409_v28, %s11215_s16 }
 0x877   :  { %5031 = vrot.lane.b32.xlu1 %v4407_v44, %s11214_s19 }
 0x879   :  { %5033 = vrot.lane.b32.xlu0 %v4409_v28, %s11214_s19  ;;  %v13975_v39 = vpop.f32.mrb[120].mxu0  ;;  %v4413_v28 = vadd.f32 %v4281_v40, %v16249_v19 }
 0x87a   :  { %v4297_v12 = vpop.f32.mrb[121].mxu0 }
 0x87b   :  { %4683 = vrot.lane.b32.xlu1 %v4410_v3, %s11214_s19  ;;  %v13979_v4 = vpop.f32.mrb[122].mxu0  ;;  %v4419_v17 = vadd.f32 %v4297_v12, %v16249_v19 }
 0x87c   :  { %v4301_v44 = vpop.f32.mrb[123].mxu0 }
 0x87d   :  { %4685 = vrot.lane.b32.xlu0 %v4412_v23, %s11214_s19  ;;  %v4421_v60 = vadd.f32 %v4301_v44, %v16249_v19 }
 0x87f   :  { %5355 = vrot.lane.b32.xlu1 %v4411_v56, %s11215_s16 }
 0x881   :  { %5357 = vrot.lane.b32.xlu0 %v4413_v28, %s11215_s16  ;;  %v13987_v50 = vpop.f32.mrb[124].mxu0 }
 0x882   :  { %v4307_v3 = vpop.f32.mrb[125].mxu0  ;;  %v4422_v62 = vadd.f32 %v13987_v50, %v16249_v19 }
 0x883   :  { %5035 = vrot.lane.b32.xlu1 %v4411_v56, %s11214_s19  ;;  %v13992_v38 = vpop.f32.mrb[126].mxu0  ;;  %v4417_v56 = vadd.f32 %v4291_v2, %v16249_v19  ;;  %v4420_v2 = vadd.f32 %v13979_v4, %v16249_v19  ;;  %v4423_v44 = vadd.f32 %v4307_v3, %v16249_v19 }
 0x884   :  { %v4311_v40 = vpop.f32.mrb[127].mxu0  ;;  %v4424_v12 = vadd.f32 %v13992_v38, %v16249_v19 }
 0x885   :  { %5037 = vrot.lane.b32.xlu0 %v4413_v28, %s11214_s19  ;;  %v4425_v7 = vadd.f32 %v4311_v40, %v16249_v19 }
 0x887   :  { %4687 = vrot.lane.b32.xlu1 %v4414_v33, %s11214_s19  ;;  %v4418_v33 = vadd.f32 %v13975_v39, %v16249_v19 }
 0x889   :  { %4689 = vrot.lane.b32.xlu0 %v4416_v51, %s11214_s19  ;;  %v4315_v31 = vpop.f32.mrb[128].mxu0 }
 0x88a   :  { %v4317_v32 = vpop.f32.mrb[129].mxu0 }
 0x88b   :  { %5359 = vrot.lane.b32.xlu1 %v4415_v55, %s11215_s16  ;;  %v4319_v28 = vpop.f32.mrb[130].mxu0  ;;  %v4427_v29 = vadd.f32 %v4317_v32, %v16249_v19 }
 0x88c   :  { %v4466_v23 = vpack.c.bf16 %v4319_v28, %v4315_v31  ;;  %v4321_v6 = vpop.f32.mrb[131].mxu0 }
 0x88d   :  { %5361 = vrot.lane.b32.xlu0 %v4417_v56, %s11215_s16  ;;  %v4429_v3 = vadd.f32 %v4321_v6, %v16249_v19 }
 0x88e   :  { %9119 = vmatprep.subr.bf16.mxu1 %v4466_v23 }
 0x88f   :  { %5039 = vrot.lane.b32.xlu1 %v4415_v55, %s11214_s19  ;;  %9120 = vmatpush3.bf16.msra.mxu1 %v16250_v57 }
 0x891   :  { %5041 = vrot.lane.b32.xlu0 %v4417_v56, %s11214_s19  ;;  %v4325_v51 = vpop.f32.mrb[132].mxu0 }
 0x892   :  { %v4327_v52 = vpop.f32.mrb[133].mxu0 }
 0x893   :  { %4691 = vrot.lane.b32.xlu1 %v4418_v33, %s11214_s19  ;;  %v4329_v55 = vpop.f32.mrb[134].mxu0  ;;  %v4431_v32 = vadd.f32 %v4327_v52, %v16249_v19 }
 0x894   :  { %v4467_v23 = vpack.c.bf16 %v4329_v55, %v4325_v51  ;;  %v4331_v59 = vpop.f32.mrb[135].mxu0  ;;  %v4432_v40 = vadd.f32 %v4329_v55, %v16249_v19  ;;  %v16252_v55 = vpack.c.bf16 %v13922_v27, %v13918_v34  ;;  %v16253_v27 = vpack.c.bf16 %v13936_v41, %v13931_v54 }
 0x895   :  { %4693 = vrot.lane.b32.xlu0 %v4420_v2, %s11214_s19  ;;  %v4433_v6 = vadd.f32 %v4331_v59, %v16249_v19 }
 0x896   :  { %9121 = vmatprep.subr.bf16.mxu1 %v4467_v23 }
 0x897   :  { %5363 = vrot.lane.b32.xlu1 %v4419_v17, %s11215_s16  ;;  %9122 = vmatpush3.bf16.msra.mxu1 %v16251_v30 }
 0x899   :  { %5365 = vrot.lane.b32.xlu0 %v4421_v60, %s11215_s16 }
 0x89b   :  { %5043 = vrot.lane.b32.xlu1 %v4419_v17, %s11214_s19  ;;  %v4426_v17 = vadd.f32 %v4315_v31, %v16249_v19  ;;  %v4430_v31 = vadd.f32 %v4325_v51, %v16249_v19 }
 0x89d   :  { %5045 = vrot.lane.b32.xlu0 %v4421_v60, %s11214_s19  ;;  %v4428_v60 = vadd.f32 %v4319_v28, %v16249_v19 }
 0x89f   :  { %4695 = vrot.lane.b32.xlu1 %v4422_v62, %s11214_s19 }
 0x8a1   :  { %4697 = vrot.lane.b32.xlu0 %v4424_v12, %s11214_s19 }
 0x8a3   :  { %5367 = vrot.lane.b32.xlu1 %v4423_v44, %s11215_s16 }
 0x8a5   :  { %5369 = vrot.lane.b32.xlu0 %v4425_v7, %s11215_s16 }
 0x8a7   :  { %5047 = vrot.lane.b32.xlu1 %v4423_v44, %s11214_s19 }
 0x8a9   :  { %5049 = vrot.lane.b32.xlu0 %v4425_v7, %s11214_s19 }
 0x8ab   :  { %4699 = vrot.lane.b32.xlu1 %v4426_v17, %s11214_s19 }
 0x8ad   :  { %4701 = vrot.lane.b32.xlu0 %v4428_v60, %s11214_s19 }
 0x8af   :  { %5371 = vrot.lane.b32.xlu1 %v4427_v29, %s11215_s16 }
 0x8b1   :  { %5373 = vrot.lane.b32.xlu0 %v4429_v3, %s11215_s16 }
 0x8b3   :  { %5051 = vrot.lane.b32.xlu1 %v4427_v29, %s11214_s19 }
 0x8b5   :  { %5053 = vrot.lane.b32.xlu0 %v4429_v3, %s11214_s19 }
 0x8b7   :  { %4703 = vrot.lane.b32.xlu1 %v4430_v31, %s11214_s19 }
 0x8b9   :  { %4705 = vrot.lane.b32.xlu0 %v4432_v40, %s11214_s19 }
 0x8bb   :  { %5375 = vrot.lane.b32.xlu1 %v4431_v32, %s11215_s16 }
 0x8bd   :  { %5377 = vrot.lane.b32.xlu0 %v4433_v6, %s11215_s16 }
 0x8bf   :  { %5055 = vrot.lane.b32.xlu1 %v4431_v32, %s11214_s19 }
 0x8c1   :  { %5057 = vrot.lane.b32.xlu0 %v4433_v6, %s11214_s19 }
 0x8cd   :  { %v4335_v56 = vpop.f32.mrb[136].mxu0 }
 0x8ce   :  { %v4434_v28 = vadd.f32 %v4335_v56, %v16249_v19  ;;  %v4337_v33 = vpop.f32.mrb[137].mxu0 }
 0x8cf   :  { %v4339_v57 = vpop.f32.mrb[138].mxu0  ;;  %v4435_v59 = vadd.f32 %v4337_v33, %v16249_v19 }
 0x8d0   :  { %v4436_v2 = vadd.f32 %v4339_v57, %v16249_v19  ;;  %v4468_v52 = vpack.c.bf16 %v4339_v57, %v4335_v56  ;;  %4707 = vrot.lane.b32.xlu1 %v4434_v28, %s11214_s19  ;;  %v4341_v51 = vpop.f32.mrb[139].mxu0  ;;  %v16254_v56 = vpack.c.bf16 %v13950_v20, %v13945_v16  ;;  %v16255_v16 = vpack.c.bf16 %v13964_v11, %v13961_v61 }
 0x8d1   :  { %v4437_v23 = vadd.f32 %v4341_v51, %v16249_v19  ;;  %v16256_v11 = vpack.c.bf16 %v13979_v4, %v13975_v39  ;;  %v16257_v4 = vpack.c.bf16 %v13992_v38, %v13987_v50  ;;  %v11158_v38 = vld [vmem:[%s15903_s1 + $0x14] ss:$8 sps:$4 sm:$0xff]  }
 0x8d2   :  { %9123 = vmatprep.subr.bf16.mxu1 %v4468_v52  ;;  %4709 = vrot.lane.b32.xlu0 %v4436_v2, %s11214_s19 }
 0x8d3   :  { %9124 = vmatpush3.bf16.msra.mxu1 %v16252_v55 }
 0x8d4   :  { %5379 = vrot.lane.b32.xlu1 %v4435_v59, %s11215_s16 }
 0x8d5   :  { %v4345_v30 = vpop.f32.mrb[140].mxu0 }
 0x8d6   :  { %5381 = vrot.lane.b32.xlu0 %v4437_v23, %s11215_s16  ;;  %v4347_v62 = vpop.f32.mrb[141].mxu0  ;;  %v4438_v44 = vadd.f32 %v4345_v30, %v16249_v19 }
 0x8d7   :  { %v4349_v12 = vpop.f32.mrb[142].mxu0  ;;  %v4439_v60 = vadd.f32 %v4347_v62, %v16249_v19 }
 0x8d8   :  { %5059 = vrot.lane.b32.xlu1 %v4435_v59, %s11214_s19  ;;  %v4469_v7 = vpack.c.bf16 %v4349_v12, %v4345_v30  ;;  %v4351_v17 = vpop.f32.mrb[143].mxu0  ;;  %v4440_v34 = vadd.f32 %v4349_v12, %v16249_v19 }
 0x8d9   :  { %v4441_v29 = vadd.f32 %v4351_v17, %v16249_v19 }
 0x8da   :  { %5061 = vrot.lane.b32.xlu0 %v4437_v23, %s11214_s19  ;;  %9125 = vmatprep.subr.bf16.mxu1 %v4469_v7 }
 0x8db   :  { %9126 = vmatpush3.bf16.msra.mxu1 %v16253_v27 }
 0x8dc   :  { %4711 = vrot.lane.b32.xlu1 %v4438_v44, %s11214_s19 }
 0x8de   :  { %4713 = vrot.lane.b32.xlu0 %v4440_v34, %s11214_s19 }
 0x8e0   :  { %5383 = vrot.lane.b32.xlu1 %v4439_v60, %s11215_s16 }
 0x8e2   :  { %5385 = vrot.lane.b32.xlu0 %v4441_v29, %s11215_s16  ;;  %v4355_v3 = vpop.f32.mrb[144].mxu0 }
 0x8e3   :  { %v4357_v31 = vpop.f32.mrb[145].mxu0  ;;  %v4442_v32 = vadd.f32 %v4355_v3, %v16249_v19 }
 0x8e4   :  { %5063 = vrot.lane.b32.xlu1 %v4439_v60, %s11214_s19  ;;  %v4359_v40 = vpop.f32.mrb[146].mxu0  ;;  %v4443_v28 = vadd.f32 %v4357_v31, %v16249_v19 }
 0x8e5   :  { %v4470_v6 = vpack.c.bf16 %v4359_v40, %v4355_v3  ;;  %v4361_v54 = vpop.f32.mrb[147].mxu0  ;;  %v4444_v41 = vadd.f32 %v4359_v40, %v16249_v19 }
 0x8e6   :  { %5065 = vrot.lane.b32.xlu0 %v4441_v29, %s11214_s19  ;;  %v4445_v57 = vadd.f32 %v4361_v54, %v16249_v19 }
 0x8e7   :  { %9127 = vmatprep.subr.bf16.mxu1 %v4470_v6  ;;  %v11157_v6 = vld [vmem:[%s15903_s1] ss:$8 sps:$4 sm:$0xff]  }
 0x8e8   :  { %4715 = vrot.lane.b32.xlu1 %v4442_v32, %s11214_s19  ;;  %9128 = vmatpush3.bf16.msra.mxu1 %v16254_v56  ;;  %v11159_v56 = vld [vmem:[%s15903_s1 + $0x10] ss:$8 sps:$4 sm:$0xff]  }
 0x8ea   :  { %4717 = vrot.lane.b32.xlu0 %v4444_v41, %s11214_s19  ;;  %v4365_v33 = vpop.f32.mrb[148].mxu0 }
 0x8eb   :  { %v4367_v2 = vpop.f32.mrb[149].mxu0  ;;  %v4446_v20 = vadd.f32 %v4365_v33, %v16249_v19 }
 0x8ec   :  { %5387 = vrot.lane.b32.xlu1 %v4443_v28, %s11215_s16  ;;  %v4369_v52 = vpop.f32.mrb[150].mxu0  ;;  %v4447_v12 = vadd.f32 %v4367_v2, %v16249_v19  ;;  %v11164_v2 = vld [vmem:[%s15903_s1 + $0x44] ss:$8 sps:$4 sm:$0xff]  }
 0x8ed   :  { %v4471_v51 = vpack.c.bf16 %v4369_v52, %v4365_v33  ;;  %v4371_v59 = vpop.f32.mrb[151].mxu0  ;;  %v4448_v23 = vadd.f32 %v4369_v52, %v16249_v19  ;;  %v11162_v33 = vld [vmem:[%s15903_s1 + $0x34] ss:$8 sps:$4 sm:$0xff]   ;;  %v11165_v52 = vld [vmem:[%s15903_s1 + $0x40] ss:$8 sps:$4 sm:$0xff]  }
 0x8ee   :  { %5389 = vrot.lane.b32.xlu0 %v4445_v57, %s11215_s16  ;;  %v4449_v61 = vadd.f32 %v4371_v59, %v16249_v19  ;;  %v11167_v59 = vld [vmem:[%s15903_s1 + $0x50] ss:$8 sps:$4 sm:$0xff]  }
 0x8ef   :  { %9129 = vmatprep.subr.bf16.mxu1 %v4471_v51  ;;  %v11166_v51 = vld [vmem:[%s15903_s1 + $0x54] ss:$8 sps:$4 sm:$0xff]  }
 0x8f0   :  { %5067 = vrot.lane.b32.xlu1 %v4443_v28, %s11214_s19  ;;  %9130 = vmatpush3.bf16.msra.mxu1 %v16255_v16  ;;  %v11160_v28 = vld [vmem:[%s15903_s1 + $0x24] ss:$8 sps:$4 sm:$0xff]  }
 0x8f1   :  { %v11168_v16 = vld [vmem:[%s15903_s1 + $0x64] ss:$8 sps:$4 sm:$0xff]  }
 0x8f2   :  { %5069 = vrot.lane.b32.xlu0 %v4445_v57, %s11214_s19  ;;  %v4375_v55 = vpop.f32.mrb[152].mxu0  ;;  %v11163_v57 = vld [vmem:[%s15903_s1 + $0x30] ss:$8 sps:$4 sm:$0xff]  }
 0x8f3   :  { %v4377_v30 = vpop.f32.mrb[153].mxu0  ;;  %v4450_v34 = vadd.f32 %v4375_v55, %v16249_v19 }
 0x8f4   :  { %4719 = vrot.lane.b32.xlu1 %v4446_v20, %s11214_s19  ;;  %v4379_v62 = vpop.f32.mrb[154].mxu0  ;;  %v14116_v39 = vadd.f32 %v4377_v30, %v16249_v19  ;;  %v11169_v20 = vld [vmem:[%s15903_s1 + $0x60] ss:$8 sps:$4 sm:$0xff]   ;;  %v11172_v30 = vld [vmem:[%s15903_s1 + $0x84] ss:$8 sps:$4 sm:$0xff]  }
 0x8f5   :  { %v4472_v44 = vpack.c.bf16 %v4379_v62, %v4375_v55  ;;  %v4381_v7 = vpop.f32.mrb[155].mxu0  ;;  %v4452_v29 = vadd.f32 %v4379_v62, %v16249_v19  ;;  %v11170_v55 = vld [vmem:[%s15903_s1 + $0x74] ss:$8 sps:$4 sm:$0xff]   ;;  %v11173_v62 = vld [vmem:[%s15903_s1 + $0x80] ss:$8 sps:$4 sm:$0xff]  }
 0x8f6   :  { %4721 = vrot.lane.b32.xlu0 %v4448_v23, %s11214_s19  ;;  %v14123_v40 = vadd.f32 %v4381_v7, %v16249_v19  ;;  %v11171_v23 = vld [vmem:[%s15903_s1 + $0x70] ss:$8 sps:$4 sm:$0xff]   ;;  %v11176_v7 = vld [vmem:[%s15903_s1 + $0xa4] ss:$8 sps:$4 sm:$0xff]  }
 0x8f7   :  { %9131 = vmatprep.subr.bf16.mxu1 %v4472_v44  ;;  %v11175_v44 = vld [vmem:[%s15903_s1 + $0x90] ss:$8 sps:$4 sm:$0xff]  }
 0x8f8   :  { %5391 = vrot.lane.b32.xlu1 %v4447_v12, %s11215_s16  ;;  %9132 = vmatpush3.bf16.msra.mxu1 %v16256_v11  ;;  %v14205_v11 = vpop.permute.xlu0 %4669 }
 0x8fa   :  { %5393 = vrot.lane.b32.xlu0 %v4449_v61, %s11215_s16 }
 0x8fc   :  { %5071 = vrot.lane.b32.xlu1 %v4447_v12, %s11214_s19  ;;  %v11174_v12 = vld [vmem:[%s15903_s1 + $0x94] ss:$8 sps:$4 sm:$0xff]  }
 0x8fd   :  { %v4385_v17 = vpop.f32.mrb[156].mxu0 }
 0x8fe   :  { %v4387_v27 = vpop.f32.mrb[157].mxu0  ;;  %5073 = vrot.lane.b32.xlu0 %v4449_v61, %s11214_s19  ;;  %v4454_v32 = vadd.f32 %v4385_v17, %v16249_v19  ;;  %v14203_v61 = vpop.permute.xlu1 %4667 }
 0x8ff   :  { %v4389_v60 = vpop.f32.mrb[158].mxu0  ;;  %v14139_v54 = vadd.f32 %v4387_v27, %v16249_v19  ;;  %v11178_v27 = vld [vmem:[%s15903_s1 + $0xb4] ss:$8 sps:$4 sm:$0xff]  }
 0x900   :  { %v4473_v3 = vpack.c.bf16 %v4389_v60, %v4385_v17  ;;  %v4391_v31 = vpop.f32.mrb[159].mxu0  ;;  %4723 = vrot.lane.b32.xlu1 %v4450_v34, %s11214_s19  ;;  %v4456_v50 = vadd.f32 %v4389_v60, %v16249_v19  ;;  %v11177_v34 = vld [vmem:[%s15903_s1 + $0xa0] ss:$8 sps:$4 sm:$0xff]   ;;  %v14215_v60 = vpop.permute.xlu0 %5341 }
 0x901   :  { %v14143_v41 = vadd.f32 %v4391_v31, %v16249_v19  ;;  %v11161_v19 = vld [vmem:[%s15903_s1 + $0x20] ss:$8 sps:$4 sm:$0xff]   ;;  %v11179_v31 = vld [vmem:[%s15903_s1 + $0xb0] ss:$8 sps:$4 sm:$0xff]  }
 0x902   :  { %9133 = vmatprep.subr.bf16.mxu1 %v4473_v3  ;;  %4725 = vrot.lane.b32.xlu0 %v4452_v29, %s11214_s19  ;;  %v14207_v17 = vpop.permute.xlu1 %5339 }
 0x903   :  { %9134 = vmatpush3.bf16.msra.mxu1 %v16257_v4  ;;  %v11180_v4 = vld [vmem:[%s15903_s1 + $0xc4] ss:$8 sps:$4 sm:$0xff]  }
 0x904   :  { %5395 = vrot.lane.b32.xlu1 %v14116_v39, %s11215_s16  ;;  %v14219_v3 = vpop.permute.xlu0 %5021 }
 0x906   :  { %4507 = vmatmul.mubr.bf16.vlgmr.msra.gmra.mrb[160].mxu1 %v11157_v6  ;;  %5397 = vrot.lane.b32.xlu0 %v14123_v40, %s11215_s16  ;;  %v14217_v29 = vpop.permute.xlu1 %5019 }
 0x907   :  { %4514 = vmatprep.mubr.bf16.mxu1 %v11158_v38  ;;  %v11181_v38 = vld [vmem:[%s15903_s1 + $0xc0] ss:$8 sps:$4 sm:$0xff]  }
 0x908   :  { %4727 = vrot.lane.b32.xlu1 %v4454_v32, %s11214_s19  ;;  %v14229_v6 = vpop.permute.xlu0 %4673 }
 0x90a   :  { %4729 = vrot.lane.b32.xlu0 %v4456_v50, %s11214_s19  ;;  %v14227_v32 = vpop.permute.xlu1 %4671  ;;  %v11182_v50 = vld [vmem:[%s15903_s1 + $0xd4] ss:$8 sps:$4 sm:$0xff]  }
 0x90c   :  { %5399 = vrot.lane.b32.xlu1 %v14139_v54, %s11215_s16 }
 0x90e   :  { %4515 = vmatmul.mubr.bf16.gmra.mrb[164].mxu1 %v11159_v56  ;;  %5401 = vrot.lane.b32.xlu0 %v14143_v41, %s11215_s16  ;;  %v14237_v56 = vpop.permute.xlu1 %5343 }
 0x90f   :  { %4522 = vmatprep.mubr.bf16.mxu1 %v11160_v28  ;;  %v14239_v28 = vpop.permute.xlu0 %5345 }
 0x916   :  { %4523 = vmatmul.mubr.bf16.gmra.mrb[168].mxu1 %v11161_v19  ;;  %v14241_v19 = vpop.permute.xlu1 %5023 }
 0x917   :  { %4530 = vmatprep.mubr.bf16.mxu1 %v11162_v33  ;;  %16258 = vst [vmem:[#allocation37_spill] sm:$0xff] %v14241_v19  ;;  %v11183_v33 = vld [vmem:[%s15903_s1 + $0xd0] ss:$8 sps:$4 sm:$0xff]  }
 0x91e   :  { %4531 = vmatmul.mubr.bf16.gmra.mrb[172].mxu1 %v11163_v57  ;;  %v11184_v57 = vld [vmem:[%s15903_s1 + $0xe4] ss:$8 sps:$4 sm:$0xff]  }
 0x91f   :  { %4538 = vmatprep.mubr.bf16.mxu1 %v11164_v2  ;;  %v14249_v2 = vpop.permute.xlu0 %5025 }
 0x920   :  { %16259 = vst [vmem:[#allocation38_spill] sm:$0xff] %v14249_v2 }
 0x926   :  { %4539 = vmatmul.mubr.bf16.gmra.mrb[176].mxu1 %v11165_v52  ;;  %v14251_v52 = vpop.permute.xlu1 %4675 }
 0x927   :  { %4546 = vmatprep.mubr.bf16.mxu1 %v11166_v51  ;;  %v14253_v51 = vpop.permute.xlu0 %4677 }
 0x92e   :  { %4547 = vmatmul.mubr.bf16.gmra.mrb[180].mxu1 %v11167_v59  ;;  %v11185_v59 = vld [vmem:[%s15903_s1 + $0xe0] ss:$8 sps:$4 sm:$0xff]  }
 0x92f   :  { %4554 = vmatprep.mubr.bf16.mxu1 %v11168_v16  ;;  %v11186_v16 = vld [vmem:[%s15903_s1 + $0xf4] ss:$8 sps:$4 sm:$0xff]  }
 0x936   :  { %4555 = vmatmul.mubr.bf16.gmra.mrb[184].mxu1 %v11169_v20  ;;  %v14261_v20 = vpop.permute.xlu1 %5347 }
 0x937   :  { %4562 = vmatprep.mubr.bf16.mxu1 %v11170_v55  ;;  %v14263_v55 = vpop.permute.xlu0 %5349 }
 0x93e   :  { %4563 = vmatmul.mubr.bf16.gmra.mrb[188].mxu1 %v11171_v23  ;;  %v11187_v23 = vld [vmem:[%s15903_s1 + $0xf0] ss:$8 sps:$4 sm:$0xff]  }
 0x93f   :  { %4570 = vmatprep.mubr.bf16.mxu1 %v11172_v30  ;;  %v14268_v30 = vpop.permute.xlu1 %5027 }
 0x940   :  { %16260 = vst [vmem:[#allocation39_spill] sm:$0xff] %v14268_v30 }
 0x946   :  { %4571 = vmatmul.mubr.bf16.gmra.mrb[192].mxu1 %v11173_v62  ;;  %v14270_v62 = vpop.permute.xlu0 %5029 }
 0x947   :  { %4578 = vmatprep.mubr.bf16.mxu1 %v11174_v12  ;;  %16261 = vst [vmem:[#allocation44_spill] sm:$0xff] %v14270_v62  ;;  %v14272_v12 = vpop.permute.xlu1 %4679 }
 0x94e   :  { %4579 = vmatmul.mubr.bf16.gmra.mrb[196].mxu1 %v11175_v44  ;;  %v14274_v44 = vpop.permute.xlu0 %4681 }
 0x94f   :  { %4586 = vmatprep.mubr.bf16.mxu1 %v11176_v7  ;;  %v14276_v7 = vpop.permute.xlu1 %5351 }
 0x956   :  { %4587 = vmatmul.mubr.bf16.gmra.mrb[200].mxu1 %v11177_v34  ;;  %v14278_v34 = vpop.permute.xlu0 %5353 }
 0x957   :  { %4594 = vmatprep.mubr.bf16.mxu1 %v11178_v27  ;;  %v14280_v27 = vpop.permute.xlu1 %5031 }
 0x958   :  { %16262 = vst [vmem:[#allocation6_spill] sm:$0xff] %v14280_v27 }
 0x95e   :  { %4595 = vmatmul.mubr.bf16.gmra.mrb[204].mxu1 %v11179_v31  ;;  %v14282_v31 = vpop.permute.xlu0 %5033 }
 0x95f   :  { %4602 = vmatprep.mubr.bf16.mxu1 %v11180_v4  ;;  %16263 = vst [vmem:[#allocation7_spill] sm:$0xff] %v14282_v31  ;;  %v14284_v4 = vpop.permute.xlu1 %4683 }
 0x966   :  { %4603 = vmatmul.mubr.bf16.gmra.mrb[208].mxu1 %v11181_v38  ;;  %v14286_v38 = vpop.permute.xlu0 %4685 }
 0x967   :  { %4610 = vmatprep.mubr.bf16.mxu1 %v11182_v50  ;;  %v14288_v50 = vpop.permute.xlu1 %5355 }
 0x96e   :  { %4611 = vmatmul.mubr.bf16.gmra.mrb[212].mxu1 %v11183_v33  ;;  %v14290_v33 = vpop.permute.xlu0 %5357 }
 0x96f   :  { %4618 = vmatprep.mubr.bf16.mxu1 %v11184_v57  ;;  %v14292_v57 = vpop.permute.xlu1 %5035 }
 0x970   :  { %16264 = vst [vmem:[#allocation48_spill] sm:$0xff] %v14292_v57 }
 0x976   :  { %4619 = vmatmul.mubr.bf16.gmra.mrb[216].mxu1 %v11185_v59  ;;  %v14294_v59 = vpop.permute.xlu0 %5037 }
 0x977   :  { %4626 = vmatprep.mubr.bf16.mxu1 %v11186_v16  ;;  %16265 = vst [vmem:[#allocation45_spill] sm:$0xff] %v14294_v59  ;;  %v14296_v16 = vpop.permute.xlu1 %4687 }
 0x97b   :  { %v14300_v58 = vpop.permute.xlu1 %5359 }
 0x97e   :  { %4627 = vmatmul.mubr.bf16.gmra.mrb[220].mxu1 %v11187_v23  ;;  %v14298_v23 = vpop.permute.xlu0 %4689 }
 0x97f   :  { %v14304_v25 = vpop.permute.xlu1 %5039 }
 0x980   :  { %16266 = vst [vmem:[#allocation8_spill] sm:$0xff] %v14304_v25 }
 0x982   :  { %v14302_v22 = vpop.permute.xlu0 %5361 }
 0x983   :  { %v14308_v47 = vpop.permute.xlu1 %4691 }
 0x986   :  { %v14306_v53 = vpop.permute.xlu0 %5041 }
 0x987   :  { %16267 = vst [vmem:[#allocation9_spill] sm:$0xff] %v14306_v53  ;;  %v14312_v9 = vpop.permute.xlu1 %5363 }
 0x98a   :  { %v14310_v1 = vpop.permute.xlu0 %4693 }
 0x98b   :  { %v14316_v37 = vpop.permute.xlu1 %5043 }
 0x98c   :  { %16268 = vst [vmem:[#allocation10_spill] sm:$0xff] %v14316_v37 }
 0x98e   :  { %v14314_v46 = vpop.permute.xlu0 %5365 }
 0x98f   :  { %v14320_v42 = vpop.permute.xlu1 %4695 }
 0x992   :  { %v14318_v21 = vpop.permute.xlu0 %5045 }
 0x993   :  { %16269 = vst [vmem:[#allocation11_spill] sm:$0xff] %v14318_v21  ;;  %v14324_v14 = vpop.permute.xlu1 %5367 }
 0x996   :  { %v14322_v10 = vpop.permute.xlu0 %4697 }
 0x997   :  { %v14328_v36 = vpop.permute.xlu1 %5047 }
 0x998   :  { %16270 = vst [vmem:[#allocation28_spill] sm:$0xff] %v14328_v36 }
 0x99a   :  { %v14326_v5 = vpop.permute.xlu0 %5369 }
 0x99e   :  { %v14330_v8 = vpop.permute.xlu0 %5049 }
 0x99f   :  { %16271 = vst [vmem:[#allocation29_spill] sm:$0xff] %v14330_v8 }
 0x9a2   :  { %v14349_v26 = vpop.permute.xlu0 %4701 }
 0x9a6   :  { %v14361_v13 = vpop.permute.xlu0 %5373 }
 0x9aa   :  { %v14370_v57 = vpop.permute.xlu0 %5053 }
 0x9ab   :  { %16273 = vst [vmem:[#allocation52_spill] sm:$0xff] %v14370_v57 }
 0x9d9   :  { %v9135_v63 = vpop.f32.mrb[160].mxu1 }
 0x9da   :  { %v9136_v48 = vpop.f32.mrb[161].mxu1 }
 0x9db   :  { %v9137_v15 = vadd.f32 %v9136_v48, %v9135_v63  ;;  %v9138_v35 = vpop.f32.mrb[162].mxu1  ;;  %v14345_v48 = vpop.permute.xlu1 %4699 }
 0x9dc   :  { %v9139_v45 = vpop.f32.mrb[163].mxu1 }
 0x9dd   :  { %v14338_v18 = vadd.f32 %v14335_v43, %v9137_v15  ;;  %v9140_v24 = vadd.f32 %v9139_v45, %v9138_v35 }
 0x9df   :  { %v4763_v21 = vadd.f32 %v14203_v61, %v14338_v18  ;;  %v14343_v36 = vadd.f32 %v14335_v43, %v9140_v24  ;;  %v14354_v25 = vpop.permute.xlu1 %5371 }
 0x9e1   :  { %v8695_v63 = vmul.f32 -1.442695, %v4763_v21  ;;  %v4764_v8 = vadd.f32 %v14205_v11, %v14343_v36  ;;  %v9141_v37 = vpop.f32.mrb[164].mxu1 }
 0x9e2   :  { %v9142_v0 = vpop.f32.mrb[165].mxu1 }
 0x9e3   :  { %10276 = vpow2.f32 %v8695_v63  ;;  %v8696_v15 = vmul.f32 -1.442695, %v4764_v8  ;;  %v9143_v53 = vadd.f32 %v9142_v0, %v9141_v37  ;;  %v9144_v45 = vpop.f32.mrb[166].mxu1 }
 0x9e4   :  { %v9145_v35 = vpop.f32.mrb[167].mxu1 }
 0x9e5   :  { %10278 = vpow2.f32 %v8696_v15  ;;  %v14352_v61 = vadd.f32 %v14335_v43, %v9143_v53  ;;  %v9146_v24 = vadd.f32 %v9145_v35, %v9144_v45  ;;  %v14365_v35 = vpop.permute.xlu1 %5051 }
 0x9e6   :  { %16272 = vst [vmem:[#allocation5_spill] sm:$0xff] %v14365_v35 }
 0x9e7   :  { %v4765_v21 = vadd.f32 %v14227_v32, %v14352_v61  ;;  %v14359_v11 = vadd.f32 %v14335_v43, %v9146_v24 }
 0x9e9   :  { %v8697_v63 = vmul.f32 -1.442695, %v4765_v21  ;;  %v4766_v0 = vadd.f32 %v14229_v6, %v14359_v11  ;;  %v9147_v8 = vpop.f32.mrb[168].mxu1  ;;  %v14377_v35 = vpop.permute.xlu1 %4703 }
 0x9ea   :  { %v9148_v37 = vpop.f32.mrb[169].mxu1 }
 0x9eb   :  { %10280 = vpow2.f32 %v8697_v63  ;;  %v8698_v53 = vmul.f32 -1.442695, %v4766_v0  ;;  %v9149_v15 = vadd.f32 %v9148_v37, %v9147_v8  ;;  %v9150_v45 = vpop.f32.mrb[170].mxu1 }
 0x9ec   :  { %v9151_v49 = vpop.f32.mrb[171].mxu1 }
 0x9ed   :  { %v10277_v59 = vpop.eup %10276  ;;  %10282 = vpow2.f32 %v8698_v53  ;;  %v14368_v32 = vadd.f32 %v14335_v43, %v9149_v15  ;;  %v9152_v24 = vadd.f32 %v9151_v49, %v9150_v45  ;;  %v14381_v45 = vpop.permute.xlu0 %4705 }
 0x9ee   :  { %v4891_v21 = vadd.f32 1.0, %v10277_v59 }
 0x9ef   :  { %v10279_v31 = vpop.eup %10278  ;;  %v4767_v6 = vadd.f32 %v14251_v52, %v14368_v32  ;;  %v14375_v63 = vadd.f32 %v14335_v43, %v9152_v24 }
 0x9f0   :  { %10284 = vrcp.f32 %v4891_v21  ;;  %v4892_v0 = vadd.f32 1.0, %v10279_v31 }
 0x9f1   :  { %v8699_v8 = vmul.f32 -1.442695, %v4767_v6  ;;  %v9153_v37 = vpop.f32.mrb[172].mxu1  ;;  %v4768_v49 = vadd.f32 %v14253_v51, %v14375_v63  ;;  %v14388_v51 = vpop.permute.xlu1 %5375 }
 0x9f2   :  { %10286 = vrcp.f32 %v4892_v0  ;;  %v9154_v53 = vpop.f32.mrb[173].mxu1  ;;  %v14393_v30 = vpop.permute.xlu0 %5377 }
 0x9f3   :  { %v9155_v15 = vadd.f32 %v9154_v53, %v9153_v37  ;;  %v9156_v59 = vpop.f32.mrb[174].mxu1  ;;  %10288 = vpow2.f32 %v8699_v8  ;;  %v8700_v52 = vmul.f32 -1.442695, %v4768_v49 }
 0x9f4   :  { %v9157_v57 = vpop.f32.mrb[175].mxu1 }
 0x9f5   :  { %v10281_v24 = vpop.eup %10280  ;;  %v14384_v21 = vadd.f32 %v14335_v43, %v9155_v15  ;;  %v9158_v31 = vadd.f32 %v9157_v57, %v9156_v59  ;;  %10290 = vpow2.f32 %v8700_v52  ;;  %v14403_v19 = vpop.permute.xlu1 %5055 }
 0x9f6   :  { %v4893_v6 = vadd.f32 1.0, %v10281_v24  ;;  %16274 = vst [vmem:[#allocation53_spill] sm:$0xff] %v14403_v19 }
 0x9f7   :  { %v10283_v27 = vpop.eup %10282  ;;  %v4769_v0 = vadd.f32 %v14272_v12, %v14384_v21  ;;  %v14391_v53 = vadd.f32 %v14335_v43, %v9158_v31 }
 0x9f8   :  { %10292 = vrcp.f32 %v4893_v6  ;;  %v4894_v37 = vadd.f32 1.0, %v10283_v27 }
 0x9f9   :  { %v8701_v8 = vmul.f32 -1.442695, %v4769_v0  ;;  %v9159_v49 = vpop.f32.mrb[176].mxu1  ;;  %v4770_v57 = vadd.f32 %v14274_v44, %v14391_v53 }
 0x9fa   :  { %v10285_v62 = vpop.eup %10284  ;;  %10294 = vrcp.f32 %v4894_v37  ;;  %v9160_v15 = vpop.f32.mrb[177].mxu1 }
 0x9fb   :  { %v9161_v59 = vadd.f32 %v9160_v15, %v9159_v49  ;;  %v9162_v52 = vpop.f32.mrb[178].mxu1  ;;  %v5435_v12 = vmul.f32 %v10285_v62, %v14207_v17  ;;  %10296 = vpow2.f32 %v8701_v8  ;;  %v8702_v27 = vmul.f32 -1.442695, %v4770_v57  ;;  %v14408_v8 = vpop.permute.xlu0 %5057 }
 0x9fc   :  { %v10287_v24 = vpop.eup %10286  ;;  %v9163_v6 = vpop.f32.mrb[179].mxu1  ;;  %16275 = vst [vmem:[#allocation54_spill] sm:$0xff] %v14408_v8 }
 0x9fd   :  { %v14399_v31 = vadd.f32 %v14335_v43, %v9161_v59  ;;  %v9164_v0 = vadd.f32 %v9163_v6, %v9162_v52  ;;  %5499 = vrot.lane.b32.xlu1 %v5435_v12, %s11216_s25  ;;  %v5436_v37 = vmul.f32 %v10287_v24, %v14215_v60  ;;  %v10289_v2 = vpop.eup %10288  ;;  %10298 = vpow2.f32 %v8702_v27  ;;  %v14413_v52 = vpop.permute.xlu1 %4707 }
 0x9fe   :  { %v4895_v44 = vadd.f32 1.0, %v10289_v2 }
 0x9ff   :  { %v4771_v17 = vadd.f32 %v14284_v4, %v14399_v31  ;;  %5501 = vrot.lane.b32.xlu0 %v5436_v37, %s11216_s25  ;;  %v10291_v62 = vpop.eup %10290  ;;  %v14411_v49 = vadd.f32 %v14335_v43, %v9164_v0  ;;  %v14418_v37 = vpop.permute.xlu0 %4709 }
 0xa00   :  { %10300 = vrcp.f32 %v4895_v44  ;;  %v4896_v57 = vadd.f32 1.0, %v10291_v62 }
 0xa01   :  { %v8703_v15 = vmul.f32 -1.442695, %v4771_v17  ;;  %v9165_v60 = vpop.f32.mrb[180].mxu1  ;;  %v4772_v2 = vadd.f32 %v14286_v38, %v14411_v49 }
 0xa02   :  { %v10293_v59 = vpop.eup %10292  ;;  %v9166_v12 = vpop.f32.mrb[181].mxu1  ;;  %10302 = vrcp.f32 %v4896_v57 }
 0xa03   :  { %v9167_v4 = vadd.f32 %v9166_v12, %v9165_v60  ;;  %v9168_v24 = vpop.f32.mrb[182].mxu1  ;;  %v5437_v27 = vmul.f32 %v10293_v59, %v14237_v56  ;;  %v8704_v0 = vmul.f32 -1.442695, %v4772_v2  ;;  %10304 = vpow2.f32 %v8703_v15  ;;  %v14428_v59 = vpop.permute.xlu1 %5379 }
 0xa04   :  { %v10295_v6 = vpop.eup %10294  ;;  %v9169_v44 = vpop.f32.mrb[183].mxu1 }
 0xa05   :  { %v14421_v17 = vadd.f32 %v14335_v43, %v9167_v4  ;;  %v9170_v62 = vadd.f32 %v9169_v44, %v9168_v24  ;;  %5503 = vrot.lane.b32.xlu1 %v5437_v27, %s11216_s25  ;;  %v5438_v38 = vmul.f32 %v10295_v6, %v14239_v28  ;;  %v10297_v8 = vpop.eup %10296  ;;  %10306 = vpow2.f32 %v8704_v0  ;;  %v14433_v24 = vpop.permute.xlu0 %5381 }
 0xa06   :  { %v4897_v57 = vadd.f32 1.0, %v10297_v8 }
 0xa07   :  { %v4773_v56 = vadd.f32 %v14296_v16, %v14421_v17  ;;  %5505 = vrot.lane.b32.xlu0 %v5438_v38, %s11216_s25  ;;  %v10299_v60 = vpop.eup %10298  ;;  %v14431_v15 = vadd.f32 %v14335_v43, %v9170_v62 }
 0xa08   :  { %10308 = vrcp.f32 %v4897_v57  ;;  %v4898_v2 = vadd.f32 1.0, %v10299_v60  ;;  %v14441_v60 = vpop.permute.xlu1 %5059 }
 0xa09   :  { %v8705_v12 = vmul.f32 -1.442695, %v4773_v56  ;;  %v9171_v4 = vpop.f32.mrb[184].mxu1  ;;  %v4774_v28 = vadd.f32 %v14298_v23, %v14431_v15  ;;  %16276 = vst [vmem:[#allocation55_spill] sm:$0xff] %v14441_v60 }
 0xa0a   :  { %v9172_v8 = vpop.f32.mrb[185].mxu1  ;;  %v10301_v27 = vpop.eup %10300  ;;  %10310 = vrcp.f32 %v4898_v2 }
 0xa0b   :  { %v9173_v16 = vadd.f32 %v9172_v8, %v9171_v4  ;;  %v9174_v6 = vpop.f32.mrb[186].mxu1  ;;  %v8706_v0 = vmul.f32 -1.442695, %v4774_v28  ;;  %v5439_v38 = vmul.f32 %v10301_v27, %v14261_v20  ;;  %10312 = vpow2.f32 %v8705_v12  ;;  %v14450_v20 = vpop.permute.xlu0 %5061 }
 0xa0c   :  { %v9175_v44 = vpop.f32.mrb[187].mxu1  ;;  %v10303_v62 = vpop.eup %10302  ;;  %16277 = vst [vmem:[#allocation56_spill] sm:$0xff] %v14450_v20 }
 0xa0d   :  { %v14439_v57 = vadd.f32 %v14335_v43, %v9173_v16  ;;  %v9176_v56 = vadd.f32 %v9175_v44, %v9174_v6  ;;  %5507 = vrot.lane.b32.xlu1 %v5439_v38, %s11216_s25  ;;  %v5440_v23 = vmul.f32 %v10303_v62, %v14263_v55  ;;  %v10305_v19 = vpop.eup %10304  ;;  %10314 = vpow2.f32 %v8706_v0  ;;  %v14455_v38 = vpop.permute.xlu1 %4711 }
 0xa0e   :  { %v4899_v12 = vadd.f32 1.0, %v10305_v19 }
 0xa0f   :  { %v4775_v2 = vadd.f32 %v14308_v47, %v14439_v57  ;;  %v14448_v4 = vadd.f32 %v14335_v43, %v9176_v56  ;;  %5509 = vrot.lane.b32.xlu0 %v5440_v23, %s11216_s25  ;;  %v10307_v28 = vpop.eup %10306  ;;  %v14461_v60 = vpop.permute.xlu0 %4713 }
 0xa10   :  { %10316 = vrcp.f32 %v4899_v12  ;;  %v4900_v55 = vadd.f32 1.0, %v10307_v28 }
 0xa11   :  { %v4776_v8 = vadd.f32 %v14310_v1, %v14448_v4  ;;  %v9177_v27 = vpop.f32.mrb[188].mxu1  ;;  %v8707_v16 = vmul.f32 -1.442695, %v4775_v2 }
 0xa12   :  { %v9178_v6 = vpop.f32.mrb[189].mxu1  ;;  %v10309_v0 = vpop.eup %10308  ;;  %10318 = vrcp.f32 %v4900_v55 }
 0xa13   :  { %v9179_v44 = vadd.f32 %v9178_v6, %v9177_v27  ;;  %v9180_v47 = vpop.f32.mrb[190].mxu1  ;;  %v8708_v62 = vmul.f32 -1.442695, %v4776_v8  ;;  %v5441_v19 = vmul.f32 %v10309_v0, %v14276_v7  ;;  %10320 = vpow2.f32 %v8707_v16  ;;  %v14471_v6 = vpop.permute.xlu1 %5383 }
 0xa14   :  { %v9181_v56 = vpop.f32.mrb[191].mxu1  ;;  %v10311_v23 = vpop.eup %10310 }
 0xa15   :  { %v14459_v20 = vadd.f32 %v14335_v43, %v9179_v44  ;;  %v9182_v1 = vadd.f32 %v9181_v56, %v9180_v47  ;;  %5511 = vrot.lane.b32.xlu1 %v5441_v19, %s11216_s25  ;;  %v5442_v2 = vmul.f32 %v10311_v23, %v14278_v34  ;;  %v10313_v12 = vpop.eup %10312  ;;  %10322 = vpow2.f32 %v8708_v62  ;;  %v14475_v19 = vpop.permute.xlu0 %5385 }
 0xa16   :  { %v4901_v7 = vadd.f32 1.0, %v10313_v12 }
 0xa17   :  { %v4777_v28 = vadd.f32 %v14320_v42, %v14459_v20  ;;  %v14468_v8 = vadd.f32 %v14335_v43, %v9182_v1  ;;  %5513 = vrot.lane.b32.xlu0 %v5442_v2, %s11216_s25  ;;  %v10315_v27 = vpop.eup %10314 }
 0xa18   :  { %10324 = vrcp.f32 %v4901_v7  ;;  %v4902_v16 = vadd.f32 1.0, %v10315_v27 }
 0xa19   :  { %v9183_v55 = vpop.f32.mrb[192].mxu1  ;;  %v8709_v0 = vmul.f32 -1.442695, %v4777_v28  ;;  %v4778_v34 = vadd.f32 %v14322_v10, %v14468_v8 }
 0xa1a   :  { %v9184_v44 = vpop.f32.mrb[193].mxu1  ;;  %v10317_v56 = vpop.eup %10316  ;;  %10326 = vrcp.f32 %v4902_v16 }
 0xa1b   :  { %v9185_v47 = vadd.f32 %v9184_v44, %v9183_v55  ;;  %v9186_v42 = vpop.f32.mrb[194].mxu1  ;;  %v8710_v62 = vmul.f32 -1.442695, %v4778_v34  ;;  %v5443_v12 = vmul.f32 %v10317_v56, %v14288_v50  ;;  %10328 = vpow2.f32 %v8709_v0  ;;  %v14487_v55 = vpop.permute.xlu1 %5063 }
 0xa1c   :  { %v9187_v23 = vpop.f32.mrb[195].mxu1  ;;  %v10319_v7 = vpop.eup %10318  ;;  %16278 = vst [vmem:[#allocation57_spill] sm:$0xff] %v14487_v55 }
 0xa1d   :  { %v14478_v1 = vadd.f32 %v14335_v43, %v9185_v47  ;;  %v9188_v2 = vadd.f32 %v9187_v23, %v9186_v42  ;;  %5515 = vrot.lane.b32.xlu1 %v5443_v12, %s11216_s25  ;;  %v10321_v27 = vpop.eup %10320  ;;  %10330 = vpow2.f32 %v8710_v62  ;;  %v5444_v16 = vmul.f32 %v10319_v7, %v14290_v33  ;;  %v14490_v50 = vpop.permute.xlu0 %5065 }
 0xa1e   :  { %v4903_v34 = vadd.f32 1.0, %v10321_v27  ;;  %16279 = vst [vmem:[#allocation58_spill] sm:$0xff] %v14490_v50 }
 0xa1f   :  { %v4779_v10 = vadd.f32 %v14345_v48, %v14478_v1  ;;  %v14484_v28 = vadd.f32 %v14335_v43, %v9188_v2  ;;  %v10323_v47 = vpop.eup %10322  ;;  %5517 = vrot.lane.b32.xlu0 %v5444_v16, %s11216_s25 }
 0xa20   :  { %10332 = vrcp.f32 %v4903_v34  ;;  %v4904_v42 = vadd.f32 1.0, %v10323_v47 }
 0xa21   :  { %v9189_v44 = vpop.f32.mrb[196].mxu1  ;;  %v4780_v0 = vadd.f32 %v14349_v26, %v14484_v28  ;;  %v8711_v56 = vmul.f32 -1.442695, %v4779_v10  ;;  %v14499_v26 = vpop.permute.xlu1 %4715 }
 0xa22   :  { %v9190_v48 = vpop.f32.mrb[197].mxu1  ;;  %v10325_v12 = vpop.eup %10324  ;;  %10334 = vrcp.f32 %v4904_v42 }
 0xa23   :  { %v9191_v23 = vadd.f32 %v9190_v48, %v9189_v44  ;;  %v9192_v2 = vpop.f32.mrb[198].mxu1  ;;  %v8712_v62 = vmul.f32 -1.442695, %v4780_v0  ;;  %v5445_v27 = vmul.f32 %v10325_v12, %v14300_v58  ;;  %10336 = vpow2.f32 %v8711_v56  ;;  %v14507_v44 = vpop.permute.xlu0 %4717 }
 0xa24   :  { %v9193_v55 = vpop.f32.mrb[199].mxu1  ;;  %v10327_v50 = vpop.eup %10326 }
 0xa25   :  { %v14496_v33 = vadd.f32 %v14335_v43, %v9191_v23  ;;  %v9194_v7 = vadd.f32 %v9193_v55, %v9192_v2  ;;  %5519 = vrot.lane.b32.xlu1 %v5445_v27, %s11216_s25  ;;  %v10329_v34 = vpop.eup %10328  ;;  %v5446_v47 = vmul.f32 %v10327_v50, %v14302_v22  ;;  %10338 = vpow2.f32 %v8712_v62  ;;  %v14513_v12 = vpop.permute.xlu1 %5387 }
 0xa26   :  { %v4905_v55 = vadd.f32 1.0, %v10329_v34 }
 0xa27   :  { %v4781_v16 = vadd.f32 %v14377_v35, %v14496_v33  ;;  %v14504_v10 = vadd.f32 %v14335_v43, %v9194_v7  ;;  %v10331_v0 = vpop.eup %10330  ;;  %5521 = vrot.lane.b32.xlu0 %v5446_v47, %s11216_s25  ;;  %v14518_v34 = vpop.permute.xlu0 %5389 }
 0xa28   :  { %10340 = vrcp.f32 %v4905_v55  ;;  %v4906_v42 = vadd.f32 1.0, %v10331_v0 }
 0xa29   :  { %v9195_v58 = vpop.f32.mrb[200].mxu1  ;;  %v4782_v48 = vadd.f32 %v14381_v45, %v14504_v10  ;;  %v8713_v56 = vmul.f32 -1.442695, %v4781_v16 }
 0xa2a   :  { %v9196_v35 = vpop.f32.mrb[201].mxu1  ;;  %v10333_v27 = vpop.eup %10332  ;;  %10342 = vrcp.f32 %v4906_v42 }
 0xa2b   :  { %v9197_v23 = vadd.f32 %v9196_v35, %v9195_v58  ;;  %v9198_v2 = vpop.f32.mrb[202].mxu1  ;;  %v8714_v22 = vmul.f32 -1.442695, %v4782_v48  ;;  %v5447_v45 = vmul.f32 %v10333_v27, %v14312_v9  ;;  %10344 = vpow2.f32 %v8713_v56  ;;  %v14530_v9 = vpop.permute.xlu1 %5067 }
 0xa2c   :  { %v9199_v7 = vpop.f32.mrb[203].mxu1  ;;  %v10335_v47 = vpop.eup %10334  ;;  %16280 = vst [vmem:[#allocation59_spill] sm:$0xff] %v14530_v9 }
 0xa2d   :  { %v14516_v50 = vadd.f32 %v14335_v43, %v9197_v23  ;;  %v9200_v62 = vadd.f32 %v9199_v7, %v9198_v2  ;;  %5523 = vrot.lane.b32.xlu1 %v5447_v45, %s11216_s25  ;;  %v5448_v58 = vmul.f32 %v10335_v47, %v14314_v46  ;;  %v10337_v0 = vpop.eup %10336  ;;  %10346 = vpow2.f32 %v8714_v22  ;;  %v14533_v27 = vpop.permute.xlu0 %5069 }
 0xa2e   :  { %v4907_v56 = vadd.f32 1.0, %v10337_v0  ;;  %16281 = vst [vmem:[#allocation60_spill] sm:$0xff] %v14533_v27 }
 0xa2f   :  { %v4783_v16 = vadd.f32 %v14413_v52, %v14516_v50  ;;  %v14524_v55 = vadd.f32 %v14335_v43, %v9200_v62  ;;  %5525 = vrot.lane.b32.xlu0 %v5448_v58, %s11216_s25  ;;  %v10339_v23 = vpop.eup %10338 }
 0xa30   :  { %10348 = vrcp.f32 %v4907_v56  ;;  %v4908_v46 = vadd.f32 1.0, %v10339_v23  ;;  %v4720_v56 = vpop.permute.xlu1 %4719 }
 0xa31   :  { %v8715_v48 = vmul.f32 -1.442695, %v4783_v16  ;;  %v4784_v35 = vadd.f32 %v14418_v37, %v14524_v55  ;;  %v9201_v42 = vpop.f32.mrb[204].mxu1 }
 0xa32   :  { %v9202_v52 = vpop.f32.mrb[205].mxu1  ;;  %v10341_v22 = vpop.eup %10340 }
 0xa33   :  { %v9203_v2 = vadd.f32 %v9202_v52, %v9201_v42  ;;  %v9204_v7 = vpop.f32.mrb[206].mxu1  ;;  %10350 = vpow2.f32 %v8715_v48  ;;  %v8716_v45 = vmul.f32 -1.442695, %v4784_v35  ;;  %v5449_v16 = vmul.f32 %v10341_v22, %v14324_v14 }
 0xa34   :  { %v9205_v62 = vpop.f32.mrb[207].mxu1  ;;  %10352 = vrcp.f32 %v4908_v46  ;;  %v10343_v58 = vpop.eup %10342 }
 0xa35   :  { %v14536_v37 = vadd.f32 %v14335_v43, %v9203_v2  ;;  %v9206_v47 = vadd.f32 %v9205_v62, %v9204_v7  ;;  %5527 = vrot.lane.b32.xlu1 %v5449_v16, %s11216_s25  ;;  %v5450_v48 = vmul.f32 %v10343_v58, %v14326_v5  ;;  %v10345_v35 = vpop.eup %10344  ;;  %10354 = vpow2.f32 %v8716_v45  ;;  %v4722_v2 = vpop.permute.xlu0 %4721 }
 0xa36   :  { %v4909_v7 = vadd.f32 1.0, %v10345_v35 }
 0xa37   :  { %v4785_v0 = vadd.f32 %v14455_v38, %v14536_v37  ;;  %v14542_v42 = vadd.f32 %v14335_v43, %v9206_v47  ;;  %5529 = vrot.lane.b32.xlu0 %v5450_v48, %s11216_s25  ;;  %v10347_v46 = vpop.eup %10346 }
 0xa38   :  { %v4910_v47 = vadd.f32 1.0, %v10347_v46 }
 0xa39   :  { %v8717_v52 = vmul.f32 -1.442695, %v4785_v0  ;;  %v9207_v23 = vpop.f32.mrb[208].mxu1  ;;  %v4786_v14 = vadd.f32 %v14461_v60, %v14542_v42  ;;  %v14552_v0 = vpop.permute.xlu1 %5391 }
 0xa3a   :  { %v9208_v38 = vpop.f32.mrb[209].mxu1  ;;  %v10349_v58 = vpop.eup %10348 }
 0xa3b   :  { %10356 = vpow2.f32 %v8717_v52  ;;  %v9209_v62 = vadd.f32 %v9208_v38, %v9207_v23  ;;  %v9210_v22 = vpop.f32.mrb[210].mxu1  ;;  %v8718_v35 = vmul.f32 -1.442695, %v4786_v14  ;;  %v5451_v38 = vmul.f32 %v10349_v58, %v14354_v25 }
 0xa3c   :  { %10358 = vrcp.f32 %v4909_v7  ;;  %v9211_v16 = vpop.f32.mrb[211].mxu1  ;;  %v14559_v7 = vpop.permute.xlu0 %5393 }
 0xa3d   :  { %v14550_v5 = vadd.f32 %v14335_v43, %v9209_v62  ;;  %v9212_v45 = vadd.f32 %v9211_v16, %v9210_v22  ;;  %10360 = vrcp.f32 %v4910_v47  ;;  %v10351_v60 = vpop.eup %10350  ;;  %5531 = vrot.lane.b32.xlu1 %v5451_v38, %s11216_s25  ;;  %v14566_v9 = vpop.permute.xlu1 %5071 }
 0xa3e   :  { %v10353_v23 = vpop.eup %10352  ;;  %10362 = vpow2.f32 %v8718_v35  ;;  %v4911_v16 = vadd.f32 1.0, %v10351_v60 }
 0xa3f   :  { %16282 = vst [vmem:[#allocation61_spill] sm:$0xff] %v14550_v5  ;;  %v4787_v48 = vadd.f32 %v14499_v26, %v14550_v5  ;;  %v14557_v52 = vadd.f32 %v14335_v43, %v9212_v45  ;;  %v5452_v14 = vmul.f32 %v10353_v23, %v14361_v13  ;;  %v10355_v26 = vpop.eup %10354 }
 0xa40   :  { %v4912_v5 = vadd.f32 1.0, %v10355_v26  ;;  %v14572_v38 = vpop.permute.xlu0 %5073 }
 0xa41   :  { %v8719_v46 = vmul.f32 -1.442695, %v4787_v48  ;;  %v9213_v62 = vpop.f32.mrb[212].mxu1  ;;  %v4788_v22 = vadd.f32 %v14507_v44, %v14557_v52  ;;  %5533 = vrot.lane.b32.xlu0 %v5452_v14, %s11216_s25 }
 0xa42   :  { %v9214_v47 = vpop.f32.mrb[213].mxu1 }
 0xa43   :  { %v9215_v45 = vadd.f32 %v9214_v47, %v9213_v62  ;;  %v9216_v27 = vpop.f32.mrb[214].mxu1  ;;  %10364 = vpow2.f32 %v8719_v46  ;;  %v8720_v23 = vmul.f32 -1.442695, %v4788_v22 }
 0xa44   :  { %v9217_v25 = vpop.f32.mrb[215].mxu1  ;;  %10366 = vrcp.f32 %v4911_v16 }
 0xa45   :  { %v10357_v58 = vpop.eup %10356  ;;  %v14570_v35 = vadd.f32 %v14335_v43, %v9215_v45  ;;  %v9218_v44 = vadd.f32 %v9217_v25, %v9216_v27  ;;  %10368 = vrcp.f32 %v4912_v5  ;;  %v4724_v45 = vpop.permute.xlu1 %4723 }
 0xa46   :  { %v10359_v48 = vpop.eup %10358  ;;  %v4913_v13 = vadd.f32 1.0, %v10357_v58 }
 0xa47   :  { %v4789_v60 = vadd.f32 %v4720_v56, %v14570_v35  ;;  %v14576_v62 = vadd.f32 %v14335_v43, %v9218_v44  ;;  %v10361_v46 = vpop.eup %10360  ;;  %v5453_v14 = vmul.f32 %v10359_v48, %v14388_v51  ;;  %v4726_v44 = vpop.permute.xlu0 %4725 }
 0xa48   :  { %10370 = vrcp.f32 %v4913_v13  ;;  %v5454_v22 = vmul.f32 %v10361_v46, %v14393_v30  ;;  %v10363_v58 = vpop.eup %10362 }
 0xa49   :  { %v8721_v47 = vmul.f32 -1.442695, %v4789_v60  ;;  %v9219_v26 = vpop.f32.mrb[216].mxu1  ;;  %10372 = vpow2.f32 %v8720_v23  ;;  %v4790_v27 = vadd.f32 %v4722_v2, %v14576_v62  ;;  %5535 = vrot.lane.b32.xlu1 %v5453_v14, %s11216_s25  ;;  %v4914_v5 = vadd.f32 1.0, %v10363_v58  ;;  %v14592_v14 = vpop.permute.xlu1 %5395 }
 0xa4a   :  { %v9220_v16 = vpop.f32.mrb[217].mxu1  ;;  %5537 = vrot.lane.b32.xlu0 %v5454_v22, %s11216_s25 }
 0xa4b   :  { %v9221_v56 = vadd.f32 %v9220_v16, %v9219_v26  ;;  %v9222_v25 = vpop.f32.mrb[218].mxu1  ;;  %10374 = vpow2.f32 %v8721_v47  ;;  %v8722_v2 = vmul.f32 -1.442695, %v4790_v27 }
 0xa4c   :  { %v9223_v51 = vpop.f32.mrb[219].mxu1  ;;  %10376 = vrcp.f32 %v4914_v5 }
 0xa4d   :  { %v14584_v48 = vadd.f32 %v14335_v43, %v9221_v56  ;;  %v9224_v13 = vadd.f32 %v9223_v51, %v9222_v25  ;;  %v10365_v23 = vpop.eup %10364  ;;  %5075 = vrot.lane.b32.xlu1 %v14116_v39, %s11214_s19  ;;  %v14597_v39 = vpop.permute.xlu0 %5397 }
 0xa4e   :  { %v4915_v30 = vadd.f32 1.0, %v10365_v23  ;;  %5077 = vrot.lane.b32.xlu0 %v14123_v40, %s11214_s19  ;;  %v10367_v47 = vpop.eup %10366 }
 0xa4f   :  { %v4791_v60 = vadd.f32 %v4724_v45, %v14584_v48  ;;  %v14590_v46 = vadd.f32 %v14335_v43, %v9224_v13  ;;  %v10369_v16 = vpop.eup %10368  ;;  %v5455_v40 = vmul.f32 %v10367_v47, %v14428_v59 }
 0xa50   :  { %10378 = vrcp.f32 %v4915_v30  ;;  %v4728_v30 = vpop.permute.xlu1 %4727 }
 0xa51   :  { %v8723_v26 = vmul.f32 -1.442695, %v4791_v60  ;;  %v4792_v27 = vadd.f32 %v4726_v44, %v14590_v46  ;;  %v9225_v22 = vpop.f32.mrb[220].mxu1  ;;  %10380 = vpow2.f32 %v8722_v2  ;;  %5079 = vrot.lane.b32.xlu1 %v14139_v54, %s11214_s19  ;;  %v5456_v60 = vmul.f32 %v10369_v16, %v14433_v24  ;;  %v4730_v47 = vpop.permute.xlu0 %4729 }
 0xa52   :  { %v9226_v45 = vpop.f32.mrb[221].mxu1  ;;  %v10371_v56 = vpop.eup %10370  ;;  %5081 = vrot.lane.b32.xlu0 %v14143_v41, %s11214_s19 }
 0xa53   :  { %v8724_v25 = vmul.f32 -1.442695, %v4792_v27  ;;  %v9227_v58 = vadd.f32 %v9226_v45, %v9225_v22  ;;  %v9228_v51 = vpop.f32.mrb[222].mxu1  ;;  %v10373_v5 = vpop.eup %10372  ;;  %10382 = vpow2.f32 %v8723_v26  ;;  %v5457_v26 = vmul.f32 %v10371_v56, %v14471_v6 }
 0xa54   :  { %v9229_v44 = vpop.f32.mrb[223].mxu1  ;;  %v4916_v13 = vadd.f32 1.0, %v10373_v5 }
 0xa55   :  { %10384 = vpow2.f32 %v8724_v25  ;;  %v14605_v23 = vadd.f32 %v14335_v43, %v9227_v58  ;;  %v9230_v2 = vadd.f32 %v9229_v44, %v9228_v51  ;;  %v10375_v54 = vpop.eup %10374  ;;  %5539 = vrot.lane.b32.xlu1 %v5455_v40, %s11216_s25 }
 0xa56   :  { %10386 = vrcp.f32 %v4916_v13  ;;  %v4917_v27 = vadd.f32 1.0, %v10375_v54  ;;  %5541 = vrot.lane.b32.xlu0 %v5456_v60, %s11216_s25  ;;  %v10377_v22 = vpop.eup %10376 }
 0xa57   :  { %v4793_v41 = vadd.f32 %v4728_v30, %v14605_v23  ;;  %v14612_v59 = vadd.f32 %v14335_v43, %v9230_v2  ;;  %v5458_v24 = vmul.f32 %v10377_v22, %v14475_v19  ;;  %v5400_v22 = vpop.permute.xlu1 %5399 }
 0xa58   :  { %10388 = vrcp.f32 %v4917_v27 }
 0xa59   :  { %v8725_v45 = vmul.f32 -1.442695, %v4793_v41  ;;  %v4794_v25 = vadd.f32 %v4730_v47, %v14612_v59  ;;  %5543 = vrot.lane.b32.xlu1 %v5457_v26, %s11216_s25 }
 0xa5a   :  { %v10379_v6 = vpop.eup %10378  ;;  %5545 = vrot.lane.b32.xlu0 %v5458_v24, %s11216_s25 }
 0xa5b   :  { %10390 = vpow2.f32 %v8725_v45  ;;  %v8726_v16 = vmul.f32 -1.442695, %v4794_v25  ;;  %v10381_v56 = vpop.eup %10380  ;;  %v5459_v43 = vmul.f32 %v10379_v6, %v14513_v12  ;;  %v5402_v25 = vpop.permute.xlu0 %5401 }
 0xa5c   :  { %v4918_v58 = vadd.f32 1.0, %v10381_v56 }
 0xa5d   :  { %10392 = vpow2.f32 %v8726_v16  ;;  %v10383_v51 = vpop.eup %10382  ;;  %5547 = vrot.lane.b32.xlu1 %v5459_v43, %s11216_s25 }
 0xa5e   :  { %10394 = vrcp.f32 %v4918_v58  ;;  %v4919_v40 = vadd.f32 1.0, %v10383_v51 }
 0xa5f   :  { %v10385_v5 = vpop.eup %10384 }
 0xa60   :  { %v4920_v44 = vadd.f32 1.0, %v10385_v5  ;;  %v10387_v13 = vpop.eup %10386  ;;  %10396 = vrcp.f32 %v4919_v40 }
 0xa61   :  { %v5460_v19 = vmul.f32 %v10387_v13, %v14518_v34 }
 0xa62   :  { %10398 = vrcp.f32 %v4920_v44  ;;  %v10389_v2 = vpop.eup %10388 }
 0xa63   :  { %5549 = vrot.lane.b32.xlu0 %v5460_v19, %s11216_s25  ;;  %v5461_v54 = vmul.f32 %v10389_v2, %v14552_v0 }
 0xa65   :  { %v10391_v12 = vpop.eup %10390  ;;  %5551 = vrot.lane.b32.xlu1 %v5461_v54, %s11216_s25 }
 0xa66   :  { %v4921_v30 = vadd.f32 1.0, %v10391_v12 }
 0xa67   :  { %v10393_v60 = vpop.eup %10392 }
 0xa68   :  { %10400 = vrcp.f32 %v4921_v30  ;;  %v4922_v26 = vadd.f32 1.0, %v10393_v60  ;;  %v10395_v27 = vpop.eup %10394 }
 0xa69   :  { %v5462_v41 = vmul.f32 %v10395_v27, %v14559_v7 }
 0xa6a   :  { %10402 = vrcp.f32 %v4922_v26  ;;  %v10397_v47 = vpop.eup %10396 }
 0xa6b   :  { %5553 = vrot.lane.b32.xlu0 %v5462_v41, %s11216_s25  ;;  %v5463_v34 = vmul.f32 %v10397_v47, %v14592_v14 }
 0xa6c   :  { %v10399_v45 = vpop.eup %10398 }
 0xa6d   :  { %v5464_v0 = vmul.f32 %v10399_v45, %v14597_v39  ;;  %5555 = vrot.lane.b32.xlu1 %v5463_v34, %s11216_s25 }
 0xa6f   :  { %v5500_v24 = vpop.permute.xlu1 %5499  ;;  %5557 = vrot.lane.b32.xlu0 %v5464_v0, %s11216_s25 }
 0xa70   :  { %v5595_v6 = vadd.f32 %v5500_v24, %v14338_v18 }
 0xa71   :  { %v5502_v16 = vpop.permute.xlu0 %5501 }
 0xa72   :  { %v10401_v56 = vpop.eup %10400  ;;  %10404 = vtanh.f32 %v5595_v6  ;;  %v5596_v7 = vadd.f32 %v5502_v16, %v14343_v36 }
 0xa73   :  { %v5465_v43 = vmul.f32 %v10401_v56, %v5400_v22 }
 0xa74   :  { %v10403_v58 = vpop.eup %10402  ;;  %10406 = vtanh.f32 %v5596_v7 }
 0xa75   :  { %5559 = vrot.lane.b32.xlu1 %v5465_v43, %s11216_s25  ;;  %v5466_v14 = vmul.f32 %v10403_v58, %v5402_v25 }
 0xa77   :  { %v5504_v51 = vpop.permute.xlu1 %5503  ;;  %5561 = vrot.lane.b32.xlu0 %v5466_v14, %s11216_s25 }
 0xa78   :  { %v5597_v39 = vadd.f32 %v5504_v51, %v14352_v61 }
 0xa79   :  { %v5506_v5 = vpop.permute.xlu0 %5505 }
 0xa7a   :  { %10408 = vtanh.f32 %v5597_v39  ;;  %v5598_v40 = vadd.f32 %v5506_v5, %v14359_v11 }
 0xa7c   :  { %v10405_v44 = vpop.eup %10404  ;;  %10410 = vtanh.f32 %v5598_v40 }
 0xa7d   :  { %5723 = vrot.lane.b32.xlu1 %v10405_v44, %s11215_s16 }
 0xa7e   :  { %v10407_v13 = vpop.eup %10406 }
 0xa7f   :  { %5725 = vrot.lane.b32.xlu0 %v10407_v13, %s11215_s16  ;;  %v5508_v19 = vpop.permute.xlu1 %5507 }
 0xa80   :  { %v5599_v2 = vadd.f32 %v5508_v19, %v14368_v32 }
 0xa81   :  { %v5510_v54 = vpop.permute.xlu0 %5509 }
 0xa82   :  { %10412 = vtanh.f32 %v5599_v2  ;;  %v5600_v12 = vadd.f32 %v5510_v54, %v14375_v63 }
 0xa84   :  { %v10409_v30 = vpop.eup %10408  ;;  %10414 = vtanh.f32 %v5600_v12 }
 0xa85   :  { %5727 = vrot.lane.b32.xlu1 %v10409_v30, %s11215_s16 }
 0xa86   :  { %v10411_v60 = vpop.eup %10410 }
 0xa87   :  { %5729 = vrot.lane.b32.xlu0 %v10411_v60, %s11215_s16  ;;  %v5512_v26 = vpop.permute.xlu1 %5511 }
 0xa88   :  { %v5601_v27 = vadd.f32 %v5512_v26, %v14384_v21 }
 0xa89   :  { %v5514_v41 = vpop.permute.xlu0 %5513 }
 0xa8a   :  { %10416 = vtanh.f32 %v5601_v27  ;;  %v5602_v47 = vadd.f32 %v5514_v41, %v14391_v53 }
 0xa8c   :  { %v10413_v22 = vpop.eup %10412  ;;  %10418 = vtanh.f32 %v5602_v47 }
 0xa8d   :  { %5731 = vrot.lane.b32.xlu1 %v10413_v22, %s11215_s16 }
 0xa8e   :  { %v10415_v45 = vpop.eup %10414 }
 0xa8f   :  { %5733 = vrot.lane.b32.xlu0 %v10415_v45, %s11215_s16  ;;  %v5516_v34 = vpop.permute.xlu1 %5515 }
 0xa90   :  { %v5603_v25 = vadd.f32 %v5516_v34, %v14399_v31 }
 0xa91   :  { %v5518_v0 = vpop.permute.xlu0 %5517 }
 0xa92   :  { %10420 = vtanh.f32 %v5603_v25  ;;  %v5604_v6 = vadd.f32 %v5518_v0, %v14411_v49  ;;  %v9630_v25 = vld [vmem:[%s15909_s7] sm:$0xff]  }
 0xa93   :  { %9317 = vmatprep.subr.bf16.mxu0 %v9630_v25 }
 0xa94   :  { %v10417_v24 = vpop.eup %10416  ;;  %10422 = vtanh.f32 %v5604_v6  ;;  %9318 = vmatpush3.bf16.msra.mxu0 %v9630_v25 }
 0xa95   :  { %5735 = vrot.lane.b32.xlu1 %v10417_v24, %s11215_s16 }
 0xa96   :  { %v10419_v16 = vpop.eup %10418 }
 0xa97   :  { %5737 = vrot.lane.b32.xlu0 %v10419_v16, %s11215_s16  ;;  %v5520_v56 = vpop.permute.xlu1 %5519 }
 0xa98   :  { %v5605_v7 = vadd.f32 %v5520_v56, %v14421_v17 }
 0xa99   :  { %v5522_v43 = vpop.permute.xlu0 %5521 }
 0xa9a   :  { %10424 = vtanh.f32 %v5605_v7  ;;  %v5606_v58 = vadd.f32 %v5522_v43, %v14431_v15 }
 0xa9c   :  { %v10421_v14 = vpop.eup %10420  ;;  %10426 = vtanh.f32 %v5606_v58 }
 0xa9d   :  { %5739 = vrot.lane.b32.xlu1 %v10421_v14, %s11215_s16  ;;  %v5115_v14 = vadd.f32 %v14217_v29, %v14338_v18  ;;  %v5916_v18 = vld [vmem:[%s15904_s2 + $0x8] sm:$0xff] }
 0xa9e   :  { %v10423_v51 = vpop.eup %10422 }
 0xa9f   :  { %v5524_v39 = vpop.permute.xlu1 %5523  ;;  %5741 = vrot.lane.b32.xlu0 %v10423_v51, %s11215_s16 }
 0xaa0   :  { %v5607_v5 = vadd.f32 %v5524_v39, %v14439_v57  ;;  %v5116_v39 = vadd.f32 %v14219_v3, %v14343_v36 }
 0xaa1   :  { %v5526_v40 = vpop.permute.xlu0 %5525 }
 0xaa2   :  { %10428 = vtanh.f32 %v5607_v5  ;;  %v5608_v44 = vadd.f32 %v5526_v40, %v14448_v4  ;;  %v8727_v40 = vmul.f32 -1.442695, %v5115_v14  ;;  %v8728_v29 = vmul.f32 -1.442695, %v5116_v39 }
 0xaa4   :  { %v10425_v13 = vpop.eup %10424  ;;  %10430 = vtanh.f32 %v5608_v44 }
 0xaa5   :  { %5743 = vrot.lane.b32.xlu1 %v10425_v13, %s11215_s16 }
 0xaa6   :  { %v10427_v19 = vpop.eup %10426 }
 0xaa7   :  { %v5528_v2 = vpop.permute.xlu1 %5527  ;;  %5745 = vrot.lane.b32.xlu0 %v10427_v19, %s11215_s16 }
 0xaa8   :  { %v5609_v54 = vadd.f32 %v5528_v2, %v14459_v20  ;;  %v5915_v2 = vld [vmem:[%s15904_s2] sm:$0xff] }
 0xaa9   :  { %v5530_v12 = vpop.permute.xlu0 %5529 }
 0xaaa   :  { %10432 = vtanh.f32 %v5609_v54  ;;  %v5610_v30 = vadd.f32 %v5530_v12, %v14468_v8 }
 0xaac   :  { %v10429_v60 = vpop.eup %10428  ;;  %10434 = vtanh.f32 %v5610_v30  ;;  %v9404_v30 = vpack.i.bf16 %v5916_v18, %v5915_v2 }
 0xaad   :  { %5747 = vrot.lane.b32.xlu1 %v10429_v60, %s11215_s16 }
 0xaae   :  { %v10431_v26 = vpop.eup %10430 }
 0xaaf   :  { %5749 = vrot.lane.b32.xlu0 %v10431_v26, %s11215_s16  ;;  %v5532_v27 = vpop.permute.xlu1 %5531  ;;  %v5917_v26 = vld [vmem:[%s15904_s2 + $0x10] sm:$0xff] }
 0xab0   :  { %v5611_v41 = vadd.f32 %v5532_v27, %v14478_v1  ;;  %v5918_v27 = vld [vmem:[%s15904_s2 + $0x18] sm:$0xff] }
 0xab2   :  { %10436 = vtanh.f32 %v5611_v41  ;;  %v16283_v41 = vld [vmem:[#allocation37_spill] sm:$0xff] }
 0xab3   :  { %v5534_v47 = vpop.permute.xlu0 %5533 }
 0xab4   :  { %v10433_v22 = vpop.eup %10432  ;;  %v5612_v45 = vadd.f32 %v5534_v47, %v14484_v28  ;;  %v5117_v47 = vadd.f32 %v16283_v41, %v14352_v61 }
 0xab5   :  { %5751 = vrot.lane.b32.xlu1 %v10433_v22, %s11215_s16 }
 0xab6   :  { %v10435_v34 = vpop.eup %10434  ;;  %10438 = vtanh.f32 %v5612_v45  ;;  %v16284_v45 = vld [vmem:[#allocation38_spill] sm:$0xff] }
 0xab7   :  { %5753 = vrot.lane.b32.xlu0 %v10435_v34, %s11215_s16  ;;  %v5118_v34 = vadd.f32 %v16284_v45, %v14359_v11 }
 0xabb   :  { %v5536_v0 = vpop.permute.xlu1 %5535 }
 0xabc   :  { %v5613_v24 = vadd.f32 %v5536_v0, %v14496_v33  ;;  %v5538_v6 = vpop.permute.xlu0 %5537  ;;  %v10437_v7 = vpop.eup %10436 }
 0xabd   :  { %v5614_v16 = vadd.f32 %v5538_v6, %v14504_v10  ;;  %5755 = vrot.lane.b32.xlu1 %v10437_v7, %s11215_s16  ;;  %v16285_v6 = vld [vmem:[#allocation61_spill] sm:$0xff]  ;;  %v8729_v7 = vmul.f32 -1.442695, %v5117_v47  ;;  %v5921_v47 = vld [vmem:[%s15904_s2 + $0x30] sm:$0xff] }
 0xabe   :  { %10440 = vtanh.f32 %v5613_v24  ;;  %v9409_v24 = vpack.i.bf16 %v5918_v27, %v5917_v26 }
 0xabf   :  { %v14672_v56 = vpop.permute.xlu1 %5075  ;;  %10442 = vtanh.f32 %v5614_v16 }
 0xac0   :  { %v14675_v43 = vpop.permute.xlu0 %5077  ;;  %v10439_v58 = vpop.eup %10438  ;;  %10444 = vpow2.f32 %v8727_v40 }
 0xac1   :  { %5757 = vrot.lane.b32.xlu0 %v10439_v58, %s11215_s16  ;;  %v8730_v58 = vmul.f32 -1.442695, %v5118_v34 }
 0xac3   :  { %v14679_v51 = vpop.permute.xlu1 %5079 }
 0xac4   :  { %v14684_v5 = vpop.permute.xlu0 %5081 }
 0xac7   :  { %v5540_v44 = vpop.permute.xlu1 %5539 }
 0xac8   :  { %v10441_v13 = vpop.eup %10440  ;;  %v5615_v19 = vadd.f32 %v5540_v44, %v14516_v50  ;;  %v5542_v54 = vpop.permute.xlu0 %5541  ;;  %v16286_v44 = vld [vmem:[#allocation39_spill] sm:$0xff] }
 0xac9   :  { %5759 = vrot.lane.b32.xlu1 %v10441_v13, %s11215_s16  ;;  %v10443_v36 = vpop.eup %10442  ;;  %v5616_v3 = vadd.f32 %v5542_v54, %v14524_v55  ;;  %v5119_v13 = vadd.f32 %v16286_v44, %v14368_v32  ;;  %v5919_v54 = vld [vmem:[%s15904_s2 + $0x20] sm:$0xff] }
 0xaca   :  { %10446 = vtanh.f32 %v5615_v19  ;;  %5761 = vrot.lane.b32.xlu0 %v10443_v36, %s11215_s16  ;;  %v10445_v61 = vpop.eup %10444  ;;  %v5920_v36 = vld [vmem:[%s15904_s2 + $0x28] sm:$0xff] }
 0xacb   :  { %v5544_v12 = vpop.permute.xlu1 %5543  ;;  %10448 = vtanh.f32 %v5616_v3  ;;  %v5243_v3 = vadd.f32 1.0, %v10445_v61  ;;  %v8731_v26 = vmul.f32 -1.442695, %v5119_v13  ;;  %v9414_v27 = vpack.i.bf16 %v5920_v36, %v5919_v54 }
 0xacc   :  { %v5617_v60 = vadd.f32 %v5544_v12, %v14536_v37  ;;  %10450 = vpow2.f32 %v8728_v29  ;;  %v5546_v22 = vpop.permute.xlu0 %5545  ;;  %v16287_v12 = vld [vmem:[#allocation44_spill] sm:$0xff] }
 0xacd   :  { %v5618_v25 = vadd.f32 %v5546_v22, %v14542_v42  ;;  %v5120_v32 = vadd.f32 %v16287_v12, %v14375_v63  ;;  %v5922_v22 = vld [vmem:[%s15904_s2 + $0x38] sm:$0xff] }
 0xace   :  { %10452 = vtanh.f32 %v5617_v60  ;;  %9405 = vrot.lane.b32.xlu0 %v9404_v30, %s11214_s19 }
 0xacf   :  { %v5548_v0 = vpop.permute.xlu1 %5547  ;;  %10454 = vtanh.f32 %v5618_v25  ;;  %v8732_v63 = vmul.f32 -1.442695, %v5120_v32  ;;  %v9631_v25 = vld [vmem:[%s15909_s7 + $0x8] sm:$0xff]   ;;  %v5923_v32 = vld [vmem:[%s15904_s2 + $0x40] sm:$0xff] }
 0xad0   :  { %v5619_v16 = vadd.f32 %v5548_v0, %v16285_v6  ;;  %9319 = vmatprep.subr.bf16.mxu0 %v9631_v25 }
 0xad1   :  { %9320 = vmatpush3.bf16.msra.mxu0 %v9631_v25 }
 0xad2   :  { %10456 = vtanh.f32 %v5619_v16  ;;  %9410 = vrot.lane.b32.xlu0 %v9409_v24, %s11214_s19  ;;  %v9419_v16 = vpack.i.bf16 %v5922_v22, %v5921_v47 }
 0xad3   :  { %10458 = vpow2.f32 %v8729_v7 }
 0xad4   :  { %v10447_v14 = vpop.eup %10446  ;;  %10460 = vpow2.f32 %v8730_v58  ;;  %v16288_v58 = vld [vmem:[#allocation6_spill] sm:$0xff] }
 0xad5   :  { %v5550_v39 = vpop.permute.xlu0 %5549  ;;  %v10449_v11 = vpop.eup %10448  ;;  %5763 = vrot.lane.b32.xlu1 %v10447_v14, %s11215_s16  ;;  %v5121_v61 = vadd.f32 %v16288_v58, %v14384_v21 }
 0xad6   :  { %v10451_v40 = vpop.eup %10450  ;;  %5765 = vrot.lane.b32.xlu0 %v10449_v11, %s11215_s16  ;;  %v5620_v18 = vadd.f32 %v5550_v39, %v14557_v52  ;;  %v16289_v11 = vld [vmem:[#allocation7_spill] sm:$0xff] }
 0xad7   :  { %v5552_v19 = vpop.permute.xlu1 %5551  ;;  %v5244_v60 = vadd.f32 1.0, %v10451_v40  ;;  %v5122_v40 = vadd.f32 %v16289_v11, %v14391_v53 }
 0xad8   :  { %v10453_v2 = vpop.eup %10452  ;;  %v5621_v29 = vadd.f32 %v5552_v19, %v14570_v35  ;;  %v8733_v19 = vmul.f32 -1.442695, %v5121_v61 }
 0xad9   :  { %v10455_v30 = vpop.eup %10454  ;;  %5767 = vrot.lane.b32.xlu1 %v10453_v2, %s11215_s16 }
 0xada   :  { %10462 = vtanh.f32 %v5621_v29  ;;  %5769 = vrot.lane.b32.xlu0 %v10455_v30, %s11215_s16  ;;  %v5924_v30 = vld [vmem:[%s15904_s2 + $0x48] sm:$0xff] }
 0xadb   :  { %10464 = vtanh.f32 %v5620_v18  ;;  %v8734_v18 = vmul.f32 -1.442695, %v5122_v40 }
 0xadc   :  { %v10457_v41 = vpop.eup %10456  ;;  %10466 = vrcp.f32 %v5243_v3 }
 0xadd   :  { %v5554_v45 = vpop.permute.xlu0 %5553  ;;  %10468 = vrcp.f32 %v5244_v60  ;;  %5771 = vrot.lane.b32.xlu1 %v10457_v41, %s11215_s16  ;;  %v10459_v0 = vpop.eup %10458 }
 0xade   :  { %v5622_v34 = vadd.f32 %v5554_v45, %v14576_v62  ;;  %10470 = vpow2.f32 %v8731_v26  ;;  %9415 = vrot.lane.b32.xlu0 %v9414_v27, %s11214_s19  ;;  %v10461_v7 = vpop.eup %10460  ;;  %v5245_v39 = vadd.f32 1.0, %v10459_v0  ;;  %v16290_v27 = vld [vmem:[#allocation48_spill] sm:$0xff]  ;;  %v5925_v0 = vld [vmem:[%s15904_s2 + $0x50] sm:$0xff] }
 0xadf   :  { %v5556_v24 = vpop.permute.xlu1 %5555  ;;  %v5246_v44 = vadd.f32 1.0, %v10461_v7  ;;  %v5123_v41 = vadd.f32 %v16290_v27, %v14399_v31 }
 0xae0   :  { %10472 = vtanh.f32 %v5622_v34  ;;  %v5623_v14 = vadd.f32 %v5556_v24, %v14584_v48  ;;  %v16291_v34 = vld [vmem:[#allocation45_spill] sm:$0xff]  ;;  %v5926_v24 = vld [vmem:[%s15904_s2 + $0x58] sm:$0xff] }
 0xae1   :  { %10474 = vpow2.f32 %v8732_v63  ;;  %v5558_v2 = vpop.permute.xlu0 %5557  ;;  %v9424_v63 = vpack.i.bf16 %v5924_v30, %v5923_v32  ;;  %v5124_v25 = vadd.f32 %v16291_v34, %v14411_v49  ;;  %v8735_v7 = vmul.f32 -1.442695, %v5123_v41  ;;  %v9632_v32 = vld [vmem:[%s15909_s7 + $0x10] sm:$0xff]  }
 0xae2   :  { %10476 = vtanh.f32 %v5623_v14  ;;  %9420 = vrot.lane.b32.xlu0 %v9419_v16, %s11214_s19  ;;  %v5624_v3 = vadd.f32 %v5558_v2, %v14590_v46  ;;  %v9429_v14 = vpack.i.bf16 %v5926_v24, %v5925_v0  ;;  %9321 = vmatprep.subr.bf16.mxu0 %v9632_v32 }
 0xae3   :  { %10478 = vrcp.f32 %v5245_v39  ;;  %v8736_v40 = vmul.f32 -1.442695, %v5124_v25  ;;  %9322 = vmatpush3.bf16.msra.mxu0 %v9632_v32 }
 0xae4   :  { %v10463_v13 = vpop.eup %10462  ;;  %10480 = vrcp.f32 %v5246_v44 }
 0xae5   :  { %5775 = vrot.lane.b32.xlu1 %v10463_v13, %s11215_s16  ;;  %v10465_v21 = vpop.eup %10464  ;;  %10482 = vpow2.f32 %v8733_v19  ;;  %v16292_v19 = vld [vmem:[#allocation51_spill] sm:$0xff] }
 0xae6   :  { %v10467_v54 = vpop.eup %10466  ;;  %5773 = vrot.lane.b32.xlu0 %v10465_v21, %s11215_s16  ;;  %v16293_v21 = vld [vmem:[#allocation16_spill] sm:$0xff] }
 0xae7   :  { %v5560_v29 = vpop.permute.xlu1 %5559  ;;  %v10469_v53 = vpop.eup %10468  ;;  %v5659_v16 = vsub.f32 1.0, %v10467_v54  ;;  %v5851_v2 = vmul.f32 %v10467_v54, %v16292_v19  ;;  %v16295_v54 = vld [vmem:[#allocation9_spill] sm:$0xff] }
 0xae8   :  { %v5625_v36 = vadd.f32 %v5560_v29, %v14605_v23  ;;  %v10471_v60 = vpop.eup %10470  ;;  %v5660_v39 = vsub.f32 1.0, %v10469_v53 }
 0xae9   :  { %v5562_v12 = vpop.permute.xlu0 %5561  ;;  %v5247_v31 = vadd.f32 1.0, %v10471_v60 }
 0xaea   :  { %10484 = vtanh.f32 %v5625_v36  ;;  %v10473_v26 = vpop.eup %10472  ;;  %v5626_v47 = vadd.f32 %v5562_v12, %v14612_v59 }
 0xaeb   :  { %10486 = vpow2.f32 %v8734_v18  ;;  %v10475_v22 = vpop.eup %10474  ;;  %5777 = vrot.lane.b32.xlu0 %v10473_v26, %s11215_s16  ;;  %v5852_v18 = vmul.f32 %v10469_v53, %v16293_v21  ;;  %v5126_v53 = vadd.f32 %v16295_v54, %v14431_v15 }
 0xaec   :  { %v10477_v45 = vpop.eup %10476  ;;  %10488 = vtanh.f32 %v5624_v3  ;;  %v5248_v61 = vadd.f32 1.0, %v10475_v22  ;;  %v16294_v3 = vld [vmem:[#allocation8_spill] sm:$0xff] }
 0xaed   :  { %5779 = vrot.lane.b32.xlu1 %v10477_v45, %s11215_s16  ;;  %10490 = vtanh.f32 %v5626_v47  ;;  %v10479_v11 = vpop.eup %10478  ;;  %v5125_v12 = vadd.f32 %v16294_v3, %v14421_v17  ;;  %v9633_v22 = vld [vmem:[%s15909_s7 + $0x18] sm:$0xff]   ;;  %v16299_v3 = vld [vmem:[#allocation11_spill] sm:$0xff] }
 0xaee   :  { %v10481_v13 = vpop.eup %10480  ;;  %10492 = vrcp.f32 %v5247_v31  ;;  %v5661_v47 = vsub.f32 1.0, %v10479_v11  ;;  %9323 = vmatprep.subr.bf16.mxu0 %v9633_v22  ;;  %v8738_v31 = vmul.f32 -1.442695, %v5126_v53 }
 0xaef   :  { %v5724_v58 = vpop.permute.xlu1 %5723  ;;  %9425 = vrot.lane.b32.xlu0 %v9424_v63, %s11214_s19  ;;  %v10483_v36 = vpop.eup %10482  ;;  %10494 = vpow2.f32 %v8735_v7  ;;  %v8737_v45 = vmul.f32 -1.442695, %v5125_v12  ;;  %v5662_v24 = vsub.f32 1.0, %v10481_v13  ;;  %v5927_v7 = vld [vmem:[%s15904_s2 + $0x60] sm:$0xff]  ;;  %9324 = vmatpush3.bf16.msra.mxu0 %v9633_v22  ;;  %v5932_v22 = vld [vmem:[%s15904_s2 + $0x88] sm:$0xff] }
 0xaf0   :  { %v5819_v49 = vmul.f32 %v5724_v58, %v5659_v16  ;;  %10496 = vrcp.f32 %v5248_v61  ;;  %v5249_v41 = vadd.f32 1.0, %v10483_v36  ;;  %v5928_v58 = vld [vmem:[%s15904_s2 + $0x68] sm:$0xff]  ;;  %v16296_v61 = vld [vmem:[#allocation17_spill] sm:$0xff] }
 0xaf1   :  { %v5726_v44 = vpop.permute.xlu0 %5725  ;;  %10498 = vpow2.f32 %v8736_v40 }
 0xaf2   :  { %v5820_v29 = vmul.f32 %v5726_v44, %v5660_v39  ;;  %v5883_v60 = vadd.f32 %v5851_v2, %v5819_v49  ;;  %10500 = vrcp.f32 %v5249_v41  ;;  %v5853_v49 = vmul.f32 %v10479_v11, %v16296_v61  ;;  %v16298_v44 = vld [vmem:[#allocation10_spill] sm:$0xff] }
 0xaf3   :  { %9430 = vrot.lane.b32.xlu0 %v9429_v14, %s11214_s19  ;;  %v16297_v14 = vld [vmem:[#allocation33_spill] sm:$0xff]  ;;  %10502 = vpow2.f32 %v8737_v45  ;;  %v5127_v19 = vadd.f32 %v16298_v44, %v14439_v57  ;;  %v5128_v11 = vadd.f32 %v16299_v3, %v14448_v4  ;;  %v5930_v57 = vld [vmem:[%s15904_s2 + $0x78] sm:$0xff]  ;;  %v16300_v45 = vld [vmem:[#allocation18_spill] sm:$0xff] }
 0xaf4   :  { %v10485_v30 = vpop.eup %10484  ;;  %v5884_v26 = vadd.f32 %v5852_v18, %v5820_v29  ;;  %v5854_v39 = vmul.f32 %v10481_v13, %v16297_v14  ;;  %v9439_v29 = vpack.i.bf16 %v5928_v58, %v5927_v7  ;;  %v5929_v13 = vld [vmem:[%s15904_s2 + $0x70] sm:$0xff] }
 0xaf5   :  { %v10487_v27 = vpop.eup %10486  ;;  %5783 = vrot.lane.b32.xlu1 %v10485_v30, %s11215_s16  ;;  %v9444_v4 = vpack.i.bf16 %v5930_v57, %v5929_v13  ;;  %v8740_v53 = vmul.f32 -1.442695, %v5128_v11  ;;  %v5933_v44 = vld [vmem:[%s15904_s2 + $0x90] sm:$0xff] }
 0xaf6   :  { %v9434_v17 = vpack.i.bf16 %v5884_v26, %v5883_v60  ;;  %v10489_v63 = vpop.eup %10488  ;;  %v5250_v25 = vadd.f32 1.0, %v10487_v27  ;;  %v8739_v60 = vmul.f32 -1.442695, %v5127_v19 }
 0xaf7   :  { %v5728_v34 = vpop.permute.xlu1 %5727  ;;  %5781 = vrot.lane.b32.xlu0 %v10489_v63, %s11215_s16  ;;  %v10491_v15 = vpop.eup %10490 }
 0xaf8   :  { %v5821_v0 = vmul.f32 %v5728_v34, %v5661_v47  ;;  %v10493_v2 = vpop.eup %10492  ;;  %10504 = vrcp.f32 %v5250_v25  ;;  %v5931_v47 = vld [vmem:[%s15904_s2 + $0x80] sm:$0xff] }
 0xaf9   :  { %9435 = vrot.lane.b32.xlu1 %v9434_v17, %s11215_s16  ;;  %v5730_v16 = vpop.permute.xlu0 %5729  ;;  %v10495_v36 = vpop.eup %10494  ;;  %10506 = vpow2.f32 %v8738_v31  ;;  %v5663_v26 = vsub.f32 1.0, %v10493_v2  ;;  %v5855_v34 = vmul.f32 %v10493_v2, %v16300_v45  ;;  %v9449_v58 = vpack.i.bf16 %v5932_v22, %v5931_v47  ;;  %v16306_v47 = vld [vmem:[#allocation5_spill] sm:$0xff] }
 0xafa   :  { %v5822_v40 = vmul.f32 %v5730_v16, %v5662_v24  ;;  %v5885_v21 = vadd.f32 %v5853_v49, %v5821_v0  ;;  %v10497_v12 = vpop.eup %10496  ;;  %v5251_v27 = vadd.f32 1.0, %v10495_v36  ;;  %10508 = vpow2.f32 %v8739_v60  ;;  %v16301_v0 = vld [vmem:[#allocation28_spill] sm:$0xff]  ;;  %v16303_v49 = vld [vmem:[#allocation29_spill] sm:$0xff] }
 0xafb   :  { %5785 = vrot.lane.b32.xlu0 %v10491_v15, %s11215_s16  ;;  %v10499_v30 = vpop.eup %10498  ;;  %v5664_v17 = vsub.f32 1.0, %v10497_v12  ;;  %v5129_v24 = vadd.f32 %v16301_v0, %v14459_v20  ;;  %v16302_v15 = vld [vmem:[#allocation19_spill] sm:$0xff]  ;;  %v5130_v14 = vadd.f32 %v16303_v49, %v14468_v8  ;;  %v5934_v20 = vld [vmem:[%s15904_s2 + $0x98] sm:$0xff]  ;;  %v5131_v22 = vadd.f32 %v16306_v47, %v14478_v1 }
 0xafc   :  { %v5886_v18 = vadd.f32 %v5854_v39, %v5822_v40  ;;  %v5252_v63 = vadd.f32 1.0, %v10499_v30  ;;  %v5856_v31 = vmul.f32 %v10497_v12, %v16302_v15  ;;  %v10501_v7 = vpop.eup %10500  ;;  %10510 = vrcp.f32 %v5251_v27  ;;  %v5935_v12 = vld [vmem:[%s15904_s2 + $0xa0] sm:$0xff]  ;;  %v16307_v15 = vld [vmem:[#allocation52_spill] sm:$0xff] }
 0xafd   :  { %v10503_v61 = vpop.eup %10502  ;;  %10512 = vpow2.f32 %v8740_v53  ;;  %v9499_v8 = vpack.i.bf16 %v5934_v20, %v5933_v44  ;;  %v8742_v11 = vmul.f32 -1.442695, %v5130_v14 }
 0xafe   :  { %v9454_v32 = vpack.i.bf16 %v5886_v18, %v5885_v21  ;;  %10514 = vrcp.f32 %v5252_v63  ;;  %v8741_v21 = vmul.f32 -1.442695, %v5129_v24  ;;  %v5253_v36 = vadd.f32 1.0, %v10503_v61 }
 0xaff   :  { %v5732_v54 = vpop.permute.xlu1 %5731  ;;  %9440 = vrot.lane.b32.xlu0 %v9439_v29, %s11214_s19  ;;  %v5665_v29 = vsub.f32 1.0, %v10501_v7  ;;  %v8743_v61 = vmul.f32 -1.442695, %v5131_v22 }
 0xb00   :  { %9455 = vrot.lane.b32.xlu1 %v9454_v32, %s11215_s16  ;;  %v5823_v41 = vmul.f32 %v5732_v54, %v5663_v26  ;;  %v5936_v32 = vld [vmem:[%s15904_s2 + $0xa8] sm:$0xff]  ;;  %10516 = vpow2.f32 %v8741_v21  ;;  %v16304_v26 = vld [vmem:[#allocation49_spill] sm:$0xff]  ;;  %v16305_v54 = vld [vmem:[#allocation40_spill] sm:$0xff] }
 0xb01   :  { %v5734_v25 = vpop.permute.xlu0 %5733  ;;  %v5857_v27 = vmul.f32 %v10501_v7, %v16304_v26  ;;  %10518 = vrcp.f32 %v5253_v36  ;;  %v16311_v26 = vld [vmem:[#allocation54_spill] sm:$0xff] }
 0xb02   :  { %v5824_v16 = vmul.f32 %v5734_v25, %v5664_v17  ;;  %v5887_v39 = vadd.f32 %v5855_v34, %v5823_v41  ;;  %v10505_v19 = vpop.eup %10504  ;;  %v9504_v41 = vpack.i.bf16 %v5936_v32, %v5935_v12  ;;  %10520 = vpow2.f32 %v8742_v11  ;;  %v5937_v34 = vld [vmem:[%s15904_s2 + $0xb0] sm:$0xff]  ;;  %v5938_v25 = vld [vmem:[%s15904_s2 + $0xb8] sm:$0xff]  ;;  %v16310_v11 = vld [vmem:[#allocation42_spill] sm:$0xff] }
 0xb03   :  { %9445 = vrot.lane.b32.xlu0 %v9444_v4, %s11214_s19  ;;  %v10507_v2 = vpop.eup %10506  ;;  %v5666_v57 = vsub.f32 1.0, %v10505_v19  ;;  %v5858_v4 = vmul.f32 %v10505_v19, %v16305_v54  ;;  %v9519_v1 = vpack.i.bf16 %v5938_v25, %v5937_v34  ;;  %v5941_v12 = vld [vmem:[%s15904_s2 + $0xd0] sm:$0xff]  ;;  %v5942_v32 = vld [vmem:[%s15904_s2 + $0xd8] sm:$0xff]  ;;  %v5944_v34 = vld [vmem:[%s15904_s2 + $0xe8] sm:$0xff] }
 0xb04   :  { %v5888_v40 = vadd.f32 %v5856_v31, %v5824_v16  ;;  %v5254_v30 = vadd.f32 1.0, %v10507_v2  ;;  %v10509_v17 = vpop.eup %10508  ;;  %v5132_v31 = vadd.f32 %v16307_v15, %v14484_v28  ;;  %v16308_v2 = vld [vmem:[#allocation41_spill] sm:$0xff] }
 0xb06   :  { %v9459_v18 = vpack.i.bf16 %v5888_v40, %v5887_v39  ;;  %v10511_v0 = vpop.eup %10510  ;;  %10522 = vrcp.f32 %v5254_v30  ;;  %v5939_v39 = vld [vmem:[%s15904_s2 + $0xc0] sm:$0xff]  ;;  %v5940_v40 = vld [vmem:[%s15904_s2 + $0xc8] sm:$0xff]  ;;  %v8744_v44 = vmul.f32 -1.442695, %v5132_v31 }
 0xb07   :  { %v5736_v3 = vpop.permute.xlu1 %5735  ;;  %9450 = vrot.lane.b32.xlu0 %v9449_v58, %s11214_s19  ;;  %v10513_v24 = vpop.eup %10512  ;;  %v5255_v58 = vadd.f32 1.0, %v10509_v17  ;;  %v5667_v49 = vsub.f32 1.0, %v10511_v0  ;;  %v5859_v21 = vmul.f32 %v10511_v0, %v16308_v2 }
 0xb08   :  { %v5825_v13 = vmul.f32 %v5736_v3, %v5665_v29  ;;  %9460 = vrot.lane.b32.xlu1 %v9459_v18, %s11215_s16  ;;  %v10515_v7 = vpop.eup %10514  ;;  %v5256_v28 = vadd.f32 1.0, %v10513_v24  ;;  %v9524_v29 = vpack.i.bf16 %v5940_v40, %v5939_v39  ;;  %v16309_v3 = vld [vmem:[#allocation53_spill] sm:$0xff] }
 0xb09   :  { %v5738_v60 = vpop.permute.xlu0 %5737  ;;  %v5668_v19 = vsub.f32 1.0, %v10515_v7  ;;  %10524 = vrcp.f32 %v5255_v58  ;;  %v16313_v58 = vld [vmem:[#allocation15_spill] sm:$0xff] }
 0xb0a   :  { %v5826_v53 = vmul.f32 %v5738_v60, %v5666_v57  ;;  %v5889_v63 = vadd.f32 %v5857_v27, %v5825_v13  ;;  %v10517_v36 = vpop.eup %10516  ;;  %10526 = vpow2.f32 %v8743_v61  ;;  %v5860_v13 = vmul.f32 %v10515_v7, %v16310_v11  ;;  %v16315_v11 = vld [vmem:[#allocation56_spill] sm:$0xff] }
 0xb0b   :  { %9500 = vrot.lane.b32.xlu0 %v9499_v8, %s11214_s19  ;;  %v5133_v8 = vadd.f32 %v16309_v3, %v14496_v33  ;;  %v10519_v30 = vpop.eup %10518  ;;  %10528 = vrcp.f32 %v5256_v28  ;;  %v5134_v27 = vadd.f32 %v16311_v26, %v14504_v10 }
 0xb0c   :  { %v5890_v45 = vadd.f32 %v5858_v4, %v5826_v53  ;;  %v10521_v60 = vpop.eup %10520  ;;  %10530 = vpow2.f32 %v8744_v44  ;;  %v5257_v53 = vadd.f32 1.0, %v10517_v36  ;;  %v5669_v22 = vsub.f32 1.0, %v10519_v30 }
 0xb0d   :  { %v8745_v17 = vmul.f32 -1.442695, %v5133_v8  ;;  %v5258_v10 = vadd.f32 1.0, %v10521_v60  ;;  %v8746_v25 = vmul.f32 -1.442695, %v5134_v27 }
 0xb0e   :  { %v9464_v16 = vpack.i.bf16 %v5890_v45, %v5889_v63  ;;  %v5943_v45 = vld [vmem:[%s15904_s2 + $0xe0] sm:$0xff]  ;;  %10532 = vrcp.f32 %v5257_v53 }
 0xb0f   :  { %9505 = vrot.lane.b32.xlu0 %v9504_v41, %s11214_s19  ;;  %v5740_v14 = vpop.permute.xlu1 %5739  ;;  %v9539_v41 = vpack.i.bf16 %v5942_v32, %v5941_v12  ;;  %v9544_v31 = vpack.i.bf16 %v5944_v34, %v5943_v45  ;;  %10534 = vpow2.f32 %v8745_v17 }
 0xb10   :  { %9465 = vrot.lane.b32.xlu1 %v9464_v16, %s11215_s16  ;;  %v5827_v20 = vmul.f32 %v5740_v14, %v5667_v49  ;;  %v10523_v4 = vpop.eup %10522  ;;  %v16312_v16 = vld [vmem:[#allocation43_spill] sm:$0xff]  ;;  %v5946_v14 = vld [vmem:[%s15904_s2 + $0xf8] sm:$0xff]  ;;  %10536 = vrcp.f32 %v5258_v10 }
 0xb11   :  { %v5742_v18 = vpop.permute.xlu0 %5741  ;;  %v5670_v24 = vsub.f32 1.0, %v10523_v4  ;;  %v5861_v7 = vmul.f32 %v10519_v30, %v16312_v16  ;;  %v5945_v49 = vld [vmem:[%s15904_s2 + $0xf0] sm:$0xff]  ;;  %10538 = vpow2.f32 %v8746_v25  ;;  %v16316_v30 = vld [vmem:[#allocation12_spill] sm:$0xff] }
 0xb12   :  { %v5828_v57 = vmul.f32 %v5742_v18, %v5668_v19  ;;  %v5891_v54 = vadd.f32 %v5859_v21, %v5827_v20  ;;  %v9559_v19 = vpack.i.bf16 %v5946_v14, %v5945_v49  ;;  %v16314_v21 = vld [vmem:[#allocation55_spill] sm:$0xff]  ;;  %v16321_v49 = vld [vmem:[#allocation13_spill] sm:$0xff] }
 0xb13   :  { %9520 = vrot.lane.b32.xlu0 %v9519_v1, %s11214_s19  ;;  %v5862_v1 = vmul.f32 %v10523_v4, %v16313_v58  ;;  %v10525_v39 = vpop.eup %10524  ;;  %v5135_v18 = vadd.f32 %v16314_v21, %v14516_v50  ;;  %v16317_v50 = vld [vmem:[#allocation57_spill] sm:$0xff] }
 0xb14   :  { %v5892_v33 = vadd.f32 %v5860_v13, %v5828_v57  ;;  %v10527_v40 = vpop.eup %10526  ;;  %v5671_v36 = vsub.f32 1.0, %v10525_v39  ;;  %v5136_v13 = vadd.f32 %v16315_v11, %v14524_v55  ;;  %v5863_v60 = vmul.f32 %v10525_v39, %v16316_v30 }
 0xb15   :  { %v10529_v20 = vpop.eup %10528  ;;  %v5259_v3 = vadd.f32 1.0, %v10527_v40  ;;  %v8747_v27 = vmul.f32 -1.442695, %v5135_v18 }
 0xb16   :  { %v9469_v47 = vpack.i.bf16 %v5892_v33, %v5891_v54  ;;  %v10531_v2 = vpop.eup %10530  ;;  %v5672_v12 = vsub.f32 1.0, %v10529_v20  ;;  %v5137_v54 = vadd.f32 %v16317_v50, %v14536_v37  ;;  %v16318_v33 = vld [vmem:[#allocation14_spill] sm:$0xff]  ;;  %v8748_v17 = vmul.f32 -1.442695, %v5136_v13 }
 0xb17   :  { %9525 = vrot.lane.b32.xlu0 %v9524_v29, %s11214_s19  ;;  %v5744_v63 = vpop.permute.xlu1 %5743  ;;  %v5260_v32 = vadd.f32 1.0, %v10531_v2  ;;  %v5864_v4 = vmul.f32 %v10529_v20, %v16318_v33  ;;  %10540 = vrcp.f32 %v5259_v3  ;;  %v16322_v20 = vld [vmem:[#allocation59_spill] sm:$0xff] }
 0xb18   :  { %v5829_v0 = vmul.f32 %v5744_v63, %v5669_v22  ;;  %9470 = vrot.lane.b32.xlu1 %v9469_v47, %s11215_s16  ;;  %v16319_v47 = vld [vmem:[#allocation58_spill] sm:$0xff]  ;;  %v8749_v25 = vmul.f32 -1.442695, %v5137_v54  ;;  %v16325_v54 = vld [vmem:[#allocation20_spill] sm:$0xff] }
 0xb19   :  { %v5746_v15 = vpop.permute.xlu0 %5745  ;;  %v5138_v22 = vadd.f32 %v16319_v47, %v14542_v42  ;;  %10542 = vrcp.f32 %v5260_v32  ;;  %v16320_v42 = vld [vmem:[#allocation46_spill] sm:$0xff] }
 0xb1a   :  { %v5830_v61 = vmul.f32 %v5746_v15, %v5670_v24  ;;  %v5893_v28 = vadd.f32 %v5861_v7, %v5829_v0  ;;  %10544 = vpow2.f32 %v8747_v27 }
 0xb1b   :  { %9540 = vrot.lane.b32.xlu0 %v9539_v41, %s11214_s19  ;;  %v10533_v41 = vpop.eup %10532  ;;  %10546 = vpow2.f32 %v8748_v17 }
 0xb1c   :  { %v5894_v44 = vadd.f32 %v5862_v1, %v5830_v61  ;;  %v10535_v55 = vpop.eup %10534  ;;  %v5673_v24 = vsub.f32 1.0, %v10533_v41  ;;  %10548 = vpow2.f32 %v8749_v25  ;;  %v5865_v61 = vmul.f32 %v10533_v41, %v16320_v42 }
 0xb1d   :  { %v10537_v34 = vpop.eup %10536  ;;  %v5261_v37 = vadd.f32 1.0, %v10535_v55 }
 0xb1e   :  { %v9474_v29 = vpack.i.bf16 %v5894_v44, %v5893_v28  ;;  %v10539_v10 = vpop.eup %10538  ;;  %v5674_v7 = vsub.f32 1.0, %v10537_v34  ;;  %v5866_v14 = vmul.f32 %v10537_v34, %v16321_v49  ;;  %v5144_v49 = vadd.f32 %v14675_v43, %v14590_v46 }
 0xb1f   :  { %9545 = vrot.lane.b32.xlu0 %v9544_v31, %s11214_s19  ;;  %v5748_v8 = vpop.permute.xlu1 %5747  ;;  %v8750_v31 = vmul.f32 -1.442695, %v5138_v22  ;;  %v5262_v58 = vadd.f32 1.0, %v10539_v10  ;;  %10550 = vrcp.f32 %v5261_v37 }
 0xb20   :  { %v5831_v57 = vmul.f32 %v5748_v8, %v5671_v36  ;;  %9475 = vrot.lane.b32.xlu1 %v9474_v29, %s11215_s16  ;;  %v16323_v29 = vld [vmem:[#allocation60_spill] sm:$0xff] }
 0xb21   :  { %v5750_v26 = vpop.permute.xlu0 %5749  ;;  %10552 = vpow2.f32 %v8750_v31  ;;  %v10541_v44 = vpop.eup %10540  ;;  %v5140_v36 = vadd.f32 %v16323_v29, %v14557_v52  ;;  %v5142_v52 = vadd.f32 %v14572_v38, %v14576_v62 }
 0xb22   :  { %v5832_v53 = vmul.f32 %v5750_v26, %v5672_v12  ;;  %v5895_v63 = vadd.f32 %v5863_v60, %v5831_v57  ;;  %10554 = vrcp.f32 %v5262_v58  ;;  %v5675_v3 = vsub.f32 1.0, %v10541_v44  ;;  %v16324_v60 = vld [vmem:[#allocation23_spill] sm:$0xff] }
 0xb23   :  { %9560 = vrot.lane.b32.xlu0 %v9559_v19, %s11214_s19  ;;  %v5139_v19 = vadd.f32 %v16322_v20, %v16285_v6  ;;  %v10543_v21 = vpop.eup %10542  ;;  %v5141_v57 = vadd.f32 %v14566_v9, %v14570_v35  ;;  %v5867_v6 = vmul.f32 %v10541_v44, %v16324_v60  ;;  %v8752_v50 = vmul.f32 -1.442695, %v5140_v36 }
 0xb24   :  { %v5896_v45 = vadd.f32 %v5864_v4, %v5832_v53  ;;  %v10545_v18 = vpop.eup %10544  ;;  %v5676_v32 = vsub.f32 1.0, %v10543_v21  ;;  %v5868_v33 = vmul.f32 %v10543_v21, %v16325_v54  ;;  %v5145_v44 = vadd.f32 %v14679_v51, %v14605_v23  ;;  %v16330_v54 = vld [vmem:[#allocation47_spill] sm:$0xff] }
 0xb25   :  { %v10547_v11 = vpop.eup %10546  ;;  %v8751_v13 = vmul.f32 -1.442695, %v5139_v19  ;;  %v5263_v30 = vadd.f32 1.0, %v10545_v18  ;;  %v8753_v17 = vmul.f32 -1.442695, %v5141_v57  ;;  %v5146_v21 = vadd.f32 %v14684_v5, %v14612_v59 }
 0xb26   :  { %v9479_v0 = vpack.i.bf16 %v5896_v45, %v5895_v63  ;;  %v10549_v27 = vpop.eup %10548  ;;  %v5264_v41 = vadd.f32 1.0, %v10547_v11  ;;  %v8754_v63 = vmul.f32 -1.442695, %v5142_v52  ;;  %v8757_v36 = vmul.f32 -1.442695, %v5145_v44  ;;  %v16328_v11 = vld [vmem:[#allocation27_spill] sm:$0xff] }
 0xb27   :  { %v5752_v15 = vpop.permute.xlu1 %5751  ;;  %10556 = vpow2.f32 %v8751_v13  ;;  %v5265_v22 = vadd.f32 1.0, %v10549_v27 }
 0xb28   :  { %v5833_v16 = vmul.f32 %v5752_v15, %v5673_v24  ;;  %9480 = vrot.lane.b32.xlu1 %v9479_v0, %s11215_s16  ;;  %10558 = vrcp.f32 %v5263_v30  ;;  %v16326_v24 = vld [vmem:[#allocation21_spill] sm:$0xff]  ;;  %v16327_v15 = vld [vmem:[#allocation50_spill] sm:$0xff] }
 0xb29   :  { %v5754_v1 = vpop.permute.xlu0 %5753  ;;  %v10551_v53 = vpop.eup %10550  ;;  %10560 = vpow2.f32 %v8752_v50  ;;  %v16329_v30 = vld [vmem:[#allocation25_spill] sm:$0xff] }
 0xb2a   :  { %v5834_v39 = vmul.f32 %v5754_v1, %v5674_v7  ;;  %v5897_v40 = vadd.f32 %v5865_v61, %v5833_v16  ;;  %v5677_v34 = vsub.f32 1.0, %v10551_v53  ;;  %10562 = vrcp.f32 %v5264_v41 }
 0xb2b   :  { %v10553_v55 = vpop.eup %10552  ;;  %10564 = vpow2.f32 %v8753_v17  ;;  %v5869_v37 = vmul.f32 %v10551_v53, %v16326_v24  ;;  %v5143_v7 = vadd.f32 %v14672_v56, %v14584_v48 }
 0xb2c   :  { %v5898_v28 = vadd.f32 %v5866_v14, %v5834_v39  ;;  %v10555_v47 = vpop.eup %10554  ;;  %v5266_v10 = vadd.f32 1.0, %v10553_v55  ;;  %10566 = vrcp.f32 %v5265_v22  ;;  %v16331_v55 = vld [vmem:[#allocation32_spill] sm:$0xff] }
 0xb2d   :  { %v5678_v25 = vsub.f32 1.0, %v10555_v47  ;;  %10568 = vpow2.f32 %v8754_v63  ;;  %v5870_v31 = vmul.f32 %v10555_v47, %v16327_v15 }
 0xb2e   :  { %v9484_v2 = vpack.i.bf16 %v5898_v28, %v5897_v40  ;;  %10570 = vrcp.f32 %v5266_v10  ;;  %v8755_v28 = vmul.f32 -1.442695, %v5143_v7 }
 0xb2f   :  { %v5756_v8 = vpop.permute.xlu1 %5755 }
 0xb30   :  { %9485 = vrot.lane.b32.xlu1 %v9484_v2, %s11215_s16  ;;  %v5835_v12 = vmul.f32 %v5756_v8, %v5675_v3  ;;  %v8756_v2 = vmul.f32 -1.442695, %v5144_v49  ;;  %10572 = vpow2.f32 %v8755_v28  ;;  %v16333_v28 = vld [vmem:[#allocation22_spill] sm:$0xff] }
 0xb31   :  { %v10557_v61 = vpop.eup %10556 }
 0xb32   :  { %v5899_v9 = vadd.f32 %v5867_v6, %v5835_v12  ;;  %v10559_v39 = vpop.eup %10558  ;;  %v5267_v19 = vadd.f32 1.0, %v10557_v61 }
 0xb33   :  { %v5758_v26 = vpop.permute.xlu0 %5757  ;;  %v10561_v40 = vpop.eup %10560  ;;  %v5679_v43 = vsub.f32 1.0, %v10559_v39  ;;  %v5871_v13 = vmul.f32 %v10559_v39, %v16328_v11  ;;  %v16332_v39 = vld [vmem:[#allocation24_spill] sm:$0xff] }
 0xb34   :  { %v5836_v4 = vmul.f32 %v5758_v26, %v5676_v32  ;;  %v10563_v20 = vpop.eup %10562  ;;  %v5268_v46 = vadd.f32 1.0, %v10561_v40  ;;  %10574 = vrcp.f32 %v5267_v19  ;;  %v8758_v32 = vmul.f32 -1.442695, %v5146_v21 }
 0xb35   :  { %v10565_v56 = vpop.eup %10564  ;;  %v5680_v8 = vsub.f32 1.0, %v10563_v20  ;;  %10576 = vpow2.f32 %v8756_v2  ;;  %v5872_v60 = vmul.f32 %v10563_v20, %v16329_v30 }
 0xb36   :  { %v5900_v35 = vadd.f32 %v5868_v33, %v5836_v4  ;;  %v10567_v18 = vpop.eup %10566  ;;  %v5269_v51 = vadd.f32 1.0, %v10565_v56  ;;  %10578 = vrcp.f32 %v5268_v46 }
 0xb37   :  { %v10569_v29 = vpop.eup %10568  ;;  %v5681_v6 = vsub.f32 1.0, %v10567_v18  ;;  %10580 = vpow2.f32 %v8757_v36  ;;  %v5873_v33 = vmul.f32 %v10567_v18, %v16330_v54  ;;  %v16334_v36 = vld [vmem:[#allocation26_spill] sm:$0xff] }
 0xb38   :  { %v9489_v45 = vpack.i.bf16 %v5900_v35, %v5899_v9  ;;  %v10571_v23 = vpop.eup %10570  ;;  %v5270_v5 = vadd.f32 1.0, %v10569_v29  ;;  %10582 = vrcp.f32 %v5269_v51 }
 0xb39   :  { %v5682_v52 = vsub.f32 1.0, %v10571_v23  ;;  %10584 = vpow2.f32 %v8758_v32  ;;  %v5874_v17 = vmul.f32 %v10571_v23, %v16331_v55 }
 0xb3a   :  { %9490 = vrot.lane.b32.xlu1 %v9489_v45, %s11215_s16  ;;  %10586 = vrcp.f32 %v5270_v5  ;;  %v10573_v63 = vpop.eup %10572 }
 0xb3b   :  { %v5760_v38 = vpop.permute.xlu1 %5759 }
 0xb3c   :  { %v5837_v62 = vmul.f32 %v5760_v38, %v5677_v34  ;;  %v5762_v0 = vpop.permute.xlu0 %5761 }
 0xb3d   :  { %v5838_v16 = vmul.f32 %v5762_v0, %v5678_v25 }
 0xb3e   :  { %v5901_v58 = vadd.f32 %v5869_v37, %v5837_v62  ;;  %v10575_v34 = vpop.eup %10574  ;;  %v5271_v62 = vadd.f32 1.0, %v10573_v63 }
 0xb3f   :  { %v5902_v1 = vadd.f32 %v5870_v31, %v5838_v16  ;;  %v10577_v10 = vpop.eup %10576  ;;  %v5683_v37 = vsub.f32 1.0, %v10575_v34  ;;  %v5875_v40 = vmul.f32 %v10575_v34, %v16332_v39 }
 0xb40   :  { %v14916_v42 = vpop.permute.xlu0 %9405  ;;  %v10579_v38 = vpop.eup %10578  ;;  %v5272_v31 = vadd.f32 1.0, %v10577_v10  ;;  %10588 = vrcp.f32 %v5271_v62 }
 0xb41   :  { %v9494_v14 = vpack.i.bf16 %v5902_v1, %v5901_v58  ;;  %v10581_v24 = vpop.eup %10580  ;;  %v5684_v58 = vsub.f32 1.0, %v10579_v38  ;;  %v5876_v44 = vmul.f32 %v10579_v38, %v16333_v28 }
 0xb42   :  { %v10583_v15 = vpop.eup %10582  ;;  %v5273_v61 = vadd.f32 1.0, %v10581_v24  ;;  %10590 = vrcp.f32 %v5272_v31  ;;  %v16338_v24 = vld [vmem:[#allocation35_spill] sm:$0xff] }
 0xb43   :  { %9495 = vrot.lane.b32.xlu1 %v9494_v14, %s11215_s16  ;;  %v10585_v16 = vpop.eup %10584  ;;  %v5685_v19 = vsub.f32 1.0, %v10583_v15 }
 0xb44   :  { %v14923_v48 = vpop.permute.xlu0 %9410  ;;  %v10587_v1 = vpop.eup %10586  ;;  %v5274_v56 = vadd.f32 1.0, %v10585_v16  ;;  %10592 = vrcp.f32 %v5273_v61 }
 0xb45   :  { %v5686_v46 = vsub.f32 1.0, %v10587_v1 }
 0xb46   :  { %10594 = vrcp.f32 %v5274_v56 }
 0xb47   :  { %v5764_v3 = vpop.permute.xlu1 %5763 }
 0xb48   :  { %v5839_v57 = vmul.f32 %v5764_v3, %v5679_v43  ;;  %v5766_v12 = vpop.permute.xlu0 %5765  ;;  %v5877_v3 = vmul.f32 %v10583_v15, %v16334_v36 }
 0xb49   :  { %v5840_v59 = vmul.f32 %v5766_v12, %v5680_v8  ;;  %v16335_v8 = vld [vmem:[#allocation30_spill] sm:$0xff] }
 0xb4a   :  { %v5903_v26 = vadd.f32 %v5871_v13, %v5839_v57  ;;  %v5878_v23 = vmul.f32 %v10587_v1, %v16335_v8  ;;  %v10589_v30 = vpop.eup %10588 }
 0xb4b   :  { %v5904_v27 = vadd.f32 %v5872_v60, %v5840_v59  ;;  %v5768_v50 = vpop.permute.xlu1 %5767  ;;  %v5687_v5 = vsub.f32 1.0, %v10589_v30 }
 0xb4c   :  { %v5841_v4 = vmul.f32 %v5768_v50, %v5681_v6  ;;  %v5770_v53 = vpop.permute.xlu0 %5769  ;;  %v10591_v60 = vpop.eup %10590 }
 0xb4d   :  { %v9509_v41 = vpack.i.bf16 %v5904_v27, %v5903_v26  ;;  %v5842_v9 = vmul.f32 %v5770_v53, %v5682_v52  ;;  %v5688_v50 = vsub.f32 1.0, %v10591_v60  ;;  %v16337_v53 = vld [vmem:[#allocation34_spill] sm:$0xff] }
 0xb4e   :  { %v5905_v35 = vadd.f32 %v5873_v33, %v5841_v4  ;;  %v10593_v26 = vpop.eup %10592  ;;  %v16336_v33 = vld [vmem:[#allocation31_spill] sm:$0xff] }
 0xb4f   :  { %v5906_v47 = vadd.f32 %v5874_v17, %v5842_v9  ;;  %9510 = vrot.lane.b32.xlu1 %v9509_v41, %s11215_s16  ;;  %v5772_v25 = vpop.permute.xlu1 %5771  ;;  %v5879_v4 = vmul.f32 %v10589_v30, %v16336_v33  ;;  %v5880_v41 = vmul.f32 %v10591_v60, %v16337_v53  ;;  %v5689_v17 = vsub.f32 1.0, %v10593_v26  ;;  %v6735_v60 = vld [vmem:[%s15905_s3 + $0x58] sm:$0xff] }
 0xb50   :  { %v14932_v22 = vpop.permute.xlu0 %9415  ;;  %v5843_v7 = vmul.f32 %v5772_v25, %v5683_v37  ;;  %v10595_v52 = vpop.eup %10594  ;;  %v6725_v25 = vld [vmem:[%s15905_s3 + $0x8] sm:$0xff]  ;;  %v5881_v37 = vmul.f32 %v10593_v26, %v16338_v24 }
 0xb51   :  { %v9514_v45 = vpack.i.bf16 %v5906_v47, %v5905_v35  ;;  %v9408_v35 = vunpack.i.h.bf16 %v14916_v42  ;;  %v9407_v47 = vunpack.i.l.bf16 %v14916_v42  ;;  %v5690_v62 = vsub.f32 1.0, %v10595_v52  ;;  %6790 = vrot.lane.b32.xlu0 %v6725_v25, %s11214_s19  ;;  %v6745_v25 = vld [vmem:[%s15905_s3 + $0xa8] sm:$0xff] }
 0xb52   :  { %v5907_v2 = vadd.f32 %v5875_v40, %v5843_v7  ;;  %v16339_v7 = vld [vmem:[#allocation36_spill] sm:$0xff]  ;;  %v9413_v40 = vunpack.i.h.bf16 %v14923_v48  ;;  %v9418_v8 = vunpack.i.h.bf16 %v14932_v22 }
 0xb53   :  { %9515 = vrot.lane.b32.xlu1 %v9514_v45, %s11215_s16 }
 0xb54   :  { %v14935_v0 = vpop.permute.xlu0 %9420 }
 0xb55   :  { %v9423_v26 = vunpack.i.h.bf16 %v14935_v0 }
 0xb57   :  { %v5776_v14 = vpop.permute.xlu1 %5775 }
 0xb58   :  { %v5774_v49 = vpop.permute.xlu0 %5773  ;;  %v5845_v18 = vmul.f32 %v5776_v14, %v5685_v19 }
 0xb59   :  { %v5844_v20 = vmul.f32 %v5774_v49, %v5684_v58  ;;  %v5882_v58 = vmul.f32 %v10595_v52, %v16339_v7  ;;  %v6727_v49 = vld [vmem:[%s15905_s3 + $0x18] sm:$0xff] }
 0xb5a   :  { %v5909_v11 = vadd.f32 %v5877_v3, %v5845_v18  ;;  %6794 = vrot.lane.b32.xlu0 %v6727_v49, %s11214_s19  ;;  %v6733_v3 = vld [vmem:[%s15905_s3 + $0x48] sm:$0xff]  ;;  %v6747_v7 = vld [vmem:[%s15905_s3 + $0xb8] sm:$0xff] }
 0xb5b   :  { %v5908_v21 = vadd.f32 %v5876_v44, %v5844_v20  ;;  %v9412_v44 = vunpack.i.l.bf16 %v14923_v48  ;;  %v6731_v48 = vld [vmem:[%s15905_s3 + $0x38] sm:$0xff] }
 0xb5d   :  { %v5778_v43 = vpop.permute.xlu0 %5777  ;;  %v9529_v29 = vpack.i.bf16 %v5908_v21, %v5907_v2  ;;  %v6729_v2 = vld [vmem:[%s15905_s3 + $0x28] sm:$0xff] }
 0xb5e   :  { %v5846_v51 = vmul.f32 %v5778_v43, %v5686_v46  ;;  %v6724_v43 = vld [vmem:[%s15905_s3] sm:$0xff]  ;;  %6798 = vrot.lane.b32.xlu0 %v6729_v2, %s11214_s19 }
 0xb5f   :  { %9530 = vrot.lane.b32.xlu1 %v9529_v29, %s11215_s16  ;;  %v5780_v32 = vpop.permute.xlu1 %5779  ;;  %v6726_v29 = vld [vmem:[%s15905_s3 + $0x10] sm:$0xff] }
 0xb60   :  { %v5910_v13 = vadd.f32 %v5878_v23, %v5846_v51  ;;  %v5847_v27 = vmul.f32 %v5780_v32, %v5687_v5  ;;  %v9417_v23 = vunpack.i.l.bf16 %v14932_v22  ;;  %v6728_v32 = vld [vmem:[%s15905_s3 + $0x20] sm:$0xff]  ;;  %v6730_v22 = vld [vmem:[%s15905_s3 + $0x30] sm:$0xff] }
 0xb61   :  { %v14942_v57 = vpop.permute.xlu0 %9425 }
 0xb62   :  { %v9534_v12 = vpack.i.bf16 %v5910_v13, %v5909_v11  ;;  %v5911_v34 = vadd.f32 %v5879_v4, %v5847_v27  ;;  %6802 = vrot.lane.b32.xlu0 %v6731_v48, %s11214_s19  ;;  %v9422_v27 = vunpack.i.l.bf16 %v14935_v0  ;;  %v6732_v4 = vld [vmem:[%s15905_s3 + $0x40] sm:$0xff]  ;;  %v6734_v0 = vld [vmem:[%s15905_s3 + $0x50] sm:$0xff] }
 0xb64   :  { %9535 = vrot.lane.b32.xlu1 %v9534_v12, %s11215_s16 }
 0xb65   :  { %v14945_v59 = vpop.permute.xlu0 %9430 }
 0xb66   :  { %6806 = vrot.lane.b32.xlu0 %v6733_v3, %s11214_s19 }
 0xb67   :  { %v5784_v6 = vpop.permute.xlu1 %5783 }
 0xb68   :  { %v5849_v38 = vmul.f32 %v5784_v6, %v5689_v17  ;;  %v6737_v6 = vld [vmem:[%s15905_s3 + $0x68] sm:$0xff] }
 0xb69   :  { %v5782_v54 = vpop.permute.xlu0 %5781 }
 0xb6a   :  { %v5848_v55 = vmul.f32 %v5782_v54, %v5688_v50  ;;  %v5913_v14 = vadd.f32 %v5881_v37, %v5849_v38  ;;  %6810 = vrot.lane.b32.xlu0 %v6735_v60, %s11214_s19  ;;  %v9433_v37 = vunpack.i.h.bf16 %v14945_v59 }
 0xb6b   :  { %v9436_v9 = vpop.permute.xlu1 %9435 }
 0xb6c   :  { %v9438_v63 = vunpack.i.h.bf16 %v9436_v9  ;;  %v9437_v45 = vunpack.i.l.bf16 %v9436_v9  ;;  %v5912_v10 = vadd.f32 %v5880_v41, %v5848_v55  ;;  %v6739_v41 = vld [vmem:[%s15905_s3 + $0x78] sm:$0xff]  ;;  %v6741_v55 = vld [vmem:[%s15905_s3 + $0x88] sm:$0xff]  ;;  %v9428_v9 = vunpack.i.h.bf16 %v14942_v57 }
 0xb6d   :  { %v5786_v15 = vpop.permute.xlu0 %5785 }
 0xb6e   :  { %v6203_v31 = vsel %vm148_vm0, %v9437_v45, %v9407_v47  ;;  %v6204_v16 = vsel %vm148_vm0, %v9438_v63, %v9408_v35  ;;  %v9549_v42 = vpack.i.bf16 %v5912_v10, %v5911_v34  ;;  %v5850_v1 = vmul.f32 %v5786_v15, %v5690_v62  ;;  %6814 = vrot.lane.b32.xlu0 %v6737_v6, %s11214_s19  ;;  %v6736_v45 = vld [vmem:[%s15905_s3 + $0x60] sm:$0xff]  ;;  %v6743_v34 = vld [vmem:[%s15905_s3 + $0x98] sm:$0xff] }
 0xb6f   :  { %v6235_v61 = vpack.c.bf16 %v6204_v16, %v6203_v31  ;;  %v9427_v35 = vunpack.i.l.bf16 %v14942_v57  ;;  %v6738_v57 = vld [vmem:[%s15905_s3 + $0x70] sm:$0xff]  ;;  %v9432_v15 = vunpack.i.l.bf16 %v14945_v59 }
 0xb70   :  { %v5914_v39 = vadd.f32 %v5882_v58, %v5850_v1  ;;  %9550 = vrot.lane.b32.xlu1 %v9549_v42, %s11215_s16  ;;  %v6740_v42 = vld [vmem:[%s15905_s3 + $0x80] sm:$0xff]  ;;  %v6742_v59 = vld [vmem:[%s15905_s3 + $0x90] sm:$0xff] }
 0xb71   :  { %9325 = vmatprep.mubr.msk.bf16.mxu0 %vm6290_vm1, %v6235_v61  ;;  %v9441_v49 = vpop.permute.xlu0 %9440 }
 0xb72   :  { %v9456_v28 = vpop.permute.xlu1 %9455  ;;  %v9554_v20 = vpack.i.bf16 %v5914_v39, %v5913_v14  ;;  %6818 = vrot.lane.b32.xlu0 %v6739_v41, %s11214_s19  ;;  %v9443_v14 = vunpack.i.h.bf16 %v9441_v49  ;;  %v9442_v39 = vunpack.i.l.bf16 %v9441_v49 }
 0xb73   :  { %v9458_v19 = vunpack.i.h.bf16 %v9456_v28  ;;  %v9457_v56 = vunpack.i.l.bf16 %v9456_v28 }
 0xb74   :  { %9555 = vrot.lane.b32.xlu1 %v9554_v20, %s11215_s16  ;;  %v6744_v20 = vld [vmem:[%s15905_s3 + $0xa0] sm:$0xff] }
 0xb75   :  { %v6205_v21 = vsel %vm148_vm0, %v9457_v56, %v9412_v44  ;;  %v6206_v18 = vsel %vm148_vm0, %v9458_v19, %v9413_v40 }
 0xb76   :  { %v6236_v46 = vpack.c.bf16 %v6206_v18, %v6205_v21  ;;  %6822 = vrot.lane.b32.xlu0 %v6741_v55, %s11214_s19  ;;  %v9446_v21 = vpop.permute.xlu0 %9445  ;;  %v6746_v18 = vld [vmem:[%s15905_s3 + $0xb0] sm:$0xff] }
 0xb78   :  { %9326 = vmatmul.mubr.msk.bf16.vlgmr.msra.gmra.mrb[160].mxu0 %vm6290_vm1, %v6236_v46  ;;  %6788 = vrot.lane.b32.xlu1 %v6724_v43, %s11214_s19  ;;  %v9448_v46 = vunpack.i.h.bf16 %v9446_v21  ;;  %v9447_v43 = vunpack.i.l.bf16 %v9446_v21 }
 0xb7a   :  { %v9461_v36 = vpop.permute.xlu1 %9460  ;;  %6826 = vrot.lane.b32.xlu0 %v6743_v34, %s11214_s19 }
 0xb7b   :  { %v9463_v51 = vunpack.i.h.bf16 %v9461_v36  ;;  %v9462_v11 = vunpack.i.l.bf16 %v9461_v36 }
 0xb7c   :  { %6792 = vrot.lane.b32.xlu1 %v6726_v29, %s11214_s19 }
 0xb7d   :  { %v6207_v13 = vsel %vm148_vm0, %v9462_v11, %v9417_v23  ;;  %v6208_v12 = vsel %vm148_vm0, %v9463_v51, %v9418_v8  ;;  %v9451_v51 = vpop.permute.xlu0 %9450 }
 0xb7e   :  { %v6237_v30 = vpack.c.bf16 %v6208_v12, %v6207_v13  ;;  %6830 = vrot.lane.b32.xlu0 %v6745_v25, %s11214_s19  ;;  %v9453_v11 = vunpack.i.h.bf16 %v9451_v51  ;;  %v9452_v13 = vunpack.i.l.bf16 %v9451_v51 }
 0xb80   :  { %9329 = vmatprep.mubr.msk.bf16.mxu0 %vm6290_vm1, %v6237_v30  ;;  %6796 = vrot.lane.b32.xlu1 %v6728_v32, %s11214_s19 }
 0xb81   :  { %v9501_v6 = vpop.permute.xlu0 %9500 }
 0xb82   :  { %v9466_v5 = vpop.permute.xlu1 %9465  ;;  %6834 = vrot.lane.b32.xlu0 %v6747_v7, %s11214_s19 }
 0xb83   :  { %v9468_v50 = vunpack.i.h.bf16 %v9466_v5  ;;  %v9467_v52 = vunpack.i.l.bf16 %v9466_v5 }
 0xb84   :  { %6800 = vrot.lane.b32.xlu1 %v6730_v22, %s11214_s19 }
 0xb85   :  { %v6209_v54 = vsel %vm148_vm0, %v9467_v52, %v9422_v27  ;;  %v6210_v33 = vsel %vm148_vm0, %v9468_v50, %v9423_v26  ;;  %v9503_v26 = vunpack.i.h.bf16 %v9501_v6  ;;  %v9502_v27 = vunpack.i.l.bf16 %v9501_v6  ;;  %v9506_v41 = vpop.permute.xlu0 %9505 }
 0xb86   :  { %v6238_v53 = vpack.c.bf16 %v6210_v33, %v6209_v54  ;;  %v9507_v55 = vunpack.i.l.bf16 %v9506_v41 }
 0xb88   :  { %9330 = vmatmul.mubr.msk.bf16.gmra.mrb[164].mxu0 %vm6290_vm1, %v6238_v53  ;;  %6804 = vrot.lane.b32.xlu1 %v6732_v4, %s11214_s19 }
 0xb8a   :  { %v9471_v17 = vpop.permute.xlu1 %9470 }
 0xb8b   :  { %v9473_v47 = vunpack.i.h.bf16 %v9471_v17  ;;  %v9472_v63 = vunpack.i.l.bf16 %v9471_v17 }
 0xb8c   :  { %6808 = vrot.lane.b32.xlu1 %v6734_v0, %s11214_s19  ;;  %v9508_v0 = vunpack.i.h.bf16 %v9506_v41 }
 0xb8d   :  { %v6211_v10 = vsel %vm148_vm0, %v9472_v63, %v9427_v35  ;;  %v6212_v38 = vsel %vm148_vm0, %v9473_v47, %v9428_v9  ;;  %v9521_v9 = vpop.permute.xlu0 %9520 }
 0xb8e   :  { %v6239_v62 = vpack.c.bf16 %v6212_v38, %v6211_v10  ;;  %v9523_v34 = vunpack.i.h.bf16 %v9521_v9  ;;  %v9522_v10 = vunpack.i.l.bf16 %v9521_v9 }
 0xb90   :  { %6812 = vrot.lane.b32.xlu1 %v6736_v45, %s11214_s19  ;;  %9333 = vmatprep.mubr.msk.bf16.mxu0 %vm6290_vm1, %v6239_v62 }
 0xb92   :  { %v9476_v24 = vpop.permute.xlu1 %9475 }
 0xb93   :  { %v9478_v31 = vunpack.i.h.bf16 %v9476_v24  ;;  %v9477_v16 = vunpack.i.l.bf16 %v9476_v24 }
 0xb94   :  { %6816 = vrot.lane.b32.xlu1 %v6738_v57, %s11214_s19 }
 0xb95   :  { %v6213_v58 = vsel %vm148_vm0, %v9477_v16, %v9432_v15  ;;  %v6214_v1 = vsel %vm148_vm0, %v9478_v31, %v9433_v37  ;;  %v9526_v31 = vpop.permute.xlu0 %9525 }
 0xb96   :  { %v6240_v61 = vpack.c.bf16 %v6214_v1, %v6213_v58  ;;  %v9528_v16 = vunpack.i.h.bf16 %v9526_v31 }
 0xb98   :  { %6820 = vrot.lane.b32.xlu1 %v6740_v42, %s11214_s19  ;;  %9334 = vmatmul.mubr.msk.bf16.gmra.mrb[168].mxu0 %vm6290_vm1, %v6240_v61  ;;  %v9527_v42 = vunpack.i.l.bf16 %v9526_v31 }
 0xb99   :  { %v9541_v58 = vpop.permute.xlu0 %9540 }
 0xb9a   :  { %v9481_v40 = vpop.permute.xlu1 %9480 }
 0xb9b   :  { %v9483_v28 = vunpack.i.h.bf16 %v9481_v40  ;;  %v9482_v44 = vunpack.i.l.bf16 %v9481_v40 }
 0xb9c   :  { %6824 = vrot.lane.b32.xlu1 %v6742_v59, %s11214_s19 }
 0xb9d   :  { %v6216_v19 = vsel %vm148_vm0, %v9483_v28, %v9443_v14  ;;  %v6215_v56 = vsel %vm148_vm0, %v9482_v44, %v9442_v39  ;;  %v9543_v14 = vunpack.i.h.bf16 %v9541_v58  ;;  %v9542_v39 = vunpack.i.l.bf16 %v9541_v58  ;;  %v6748_v44 = vld [vmem:[%s15905_s3 + $0xc0] sm:$0xff] }
 0xb9e   :  { %v6241_v2 = vpack.c.bf16 %v6216_v19, %v6215_v56  ;;  %v6749_v56 = vld [vmem:[%s15905_s3 + $0xc8] sm:$0xff] }
 0xb9f   :  { %6838 = vrot.lane.b32.xlu0 %v6749_v56, %s11214_s19 }
 0xba0   :  { %6828 = vrot.lane.b32.xlu1 %v6744_v20, %s11214_s19  ;;  %9337 = vmatprep.mubr.msk.bf16.mxu0 %vm6290_vm1, %v6241_v2 }
 0xba2   :  { %v9486_v48 = vpop.permute.xlu1 %9485 }
 0xba3   :  { %v9488_v29 = vunpack.i.h.bf16 %v9486_v48  ;;  %v9487_v36 = vunpack.i.l.bf16 %v9486_v48  ;;  %v6751_v48 = vld [vmem:[%s15905_s3 + $0xd8] sm:$0xff] }
 0xba4   :  { %6832 = vrot.lane.b32.xlu1 %v6746_v18, %s11214_s19  ;;  %6842 = vrot.lane.b32.xlu0 %v6751_v48, %s11214_s19 }
 0xba5   :  { %v6218_v3 = vsel %vm148_vm0, %v9488_v29, %v9448_v46  ;;  %v6217_v8 = vsel %vm148_vm0, %v9487_v36, %v9447_v43  ;;  %v6750_v46 = vld [vmem:[%s15905_s3 + $0xd0] sm:$0xff]  ;;  %v9546_v43 = vpop.permute.xlu0 %9545 }
 0xba6   :  { %v6242_v23 = vpack.c.bf16 %v6218_v3, %v6217_v8  ;;  %v9548_v29 = vunpack.i.h.bf16 %v9546_v43  ;;  %v9547_v36 = vunpack.i.l.bf16 %v9546_v43 }
 0xba8   :  { %9338 = vmatmul.mubr.msk.bf16.gmra.mrb[172].mxu0 %vm6290_vm1, %v6242_v23  ;;  %6836 = vrot.lane.b32.xlu1 %v6748_v44, %s11214_s19 }
 0xba9   :  { %v9561_v8 = vpop.permute.xlu0 %9560 }
 0xbac   :  { %v9491_v12 = vpop.permute.xlu1 %9490  ;;  %6840 = vrot.lane.b32.xlu1 %v6750_v46, %s11214_s19 }
 0xbad   :  { %v9493_v32 = vunpack.i.h.bf16 %v9491_v12  ;;  %v9492_v30 = vunpack.i.l.bf16 %v9491_v12  ;;  %v9563_v12 = vunpack.i.h.bf16 %v9561_v8 }
 0xbaf   :  { %v6220_v60 = vsel %vm148_vm0, %v9493_v32, %v9453_v11  ;;  %v6219_v22 = vsel %vm148_vm0, %v9492_v30, %v9452_v13  ;;  %v9562_v32 = vunpack.i.l.bf16 %v9561_v8 }
 0xbb0   :  { %v6243_v5 = vpack.c.bf16 %v6220_v60, %v6219_v22 }
 0xbb2   :  { %9341 = vmatprep.mubr.msk.bf16.mxu0 %vm6290_vm1, %v6243_v5 }
 0xbb5   :  { %v9496_v50 = vpop.permute.xlu1 %9495 }
 0xbb6   :  { %v9498_v52 = vunpack.i.h.bf16 %v9496_v50  ;;  %v9497_v54 = vunpack.i.l.bf16 %v9496_v50  ;;  %v15128_v50 = vld [vmem:[%s15910_s8] ss:$0 sm:$0xff] }
 0xbb8   :  { %v6222_v33 = vsel %vm148_vm0, %v9498_v52, %v9503_v26  ;;  %v6221_v4 = vsel %vm148_vm0, %v9497_v54, %v9502_v27 }
 0xbb9   :  { %v6244_v53 = vpack.c.bf16 %v6222_v33, %v6221_v4 }
 0xbbb   :  { %9342 = vmatmul.mubr.msk.bf16.gmra.mrb[176].mxu0 %vm6290_vm1, %v6244_v53 }
 0xbc1   :  { %v9511_v17 = vpop.permute.xlu1 %9510 }
 0xbc2   :  { %v9513_v35 = vunpack.i.h.bf16 %v9511_v17  ;;  %v9512_v47 = vunpack.i.l.bf16 %v9511_v17 }
 0xbc4   :  { %v6224_v63 = vsel %vm148_vm0, %v9513_v35, %v9508_v0  ;;  %v6223_v45 = vsel %vm148_vm0, %v9512_v47, %v9507_v55 }
 0xbc5   :  { %v9516_v38 = vpop.permute.xlu1 %9515  ;;  %v6245_v62 = vpack.c.bf16 %v6224_v63, %v6223_v45 }
 0xbc6   :  { %v9518_v57 = vunpack.i.h.bf16 %v9516_v38  ;;  %v9517_v25 = vunpack.i.l.bf16 %v9516_v38 }
 0xbc7   :  { %9345 = vmatprep.mubr.msk.bf16.mxu0 %vm6290_vm1, %v6245_v62 }
 0xbc8   :  { %v6226_v24 = vsel %vm148_vm0, %v9518_v57, %v9523_v34  ;;  %v6225_v37 = vsel %vm148_vm0, %v9517_v25, %v9522_v10 }
 0xbc9   :  { %v6246_v15 = vpack.c.bf16 %v6226_v24, %v6225_v37 }
 0xbcb   :  { %9346 = vmatmul.mubr.msk.bf16.gmra.mrb[180].mxu0 %vm6290_vm1, %v6246_v15 }
 0xbd1   :  { %v9531_v7 = vpop.permute.xlu1 %9530 }
 0xbd2   :  { %v9533_v1 = vunpack.i.h.bf16 %v9531_v7  ;;  %v9532_v61 = vunpack.i.l.bf16 %v9531_v7 }
 0xbd4   :  { %v6228_v49 = vsel %vm148_vm0, %v9533_v1, %v9528_v16  ;;  %v6227_v59 = vsel %vm148_vm0, %v9532_v61, %v9527_v42 }
 0xbd5   :  { %v6247_v28 = vpack.c.bf16 %v6228_v49, %v6227_v59 }
 0xbd6   :  { %v9536_v40 = vpop.permute.xlu1 %9535 }
 0xbd7   :  { %v9538_v20 = vunpack.i.h.bf16 %v9536_v40  ;;  %v9537_v19 = vunpack.i.l.bf16 %v9536_v40  ;;  %9349 = vmatprep.mubr.msk.bf16.mxu0 %vm6290_vm1, %v6247_v28 }
 0xbd9   :  { %v6230_v2 = vsel %vm148_vm0, %v9538_v20, %v9543_v14  ;;  %v6229_v21 = vsel %vm148_vm0, %v9537_v19, %v9542_v39 }
 0xbda   :  { %v6248_v18 = vpack.c.bf16 %v6230_v2, %v6229_v21 }
 0xbdc   :  { %9350 = vmatmul.mubr.msk.bf16.gmra.mrb[184].mxu0 %vm6290_vm1, %v6248_v18 }
 0xbe2   :  { %v9551_v3 = vpop.permute.xlu1 %9550 }
 0xbe3   :  { %v9553_v23 = vunpack.i.h.bf16 %v9551_v3  ;;  %v9552_v51 = vunpack.i.l.bf16 %v9551_v3 }
 0xbe5   :  { %v6232_v11 = vsel %vm148_vm0, %v9553_v23, %v9548_v29  ;;  %v6231_v13 = vsel %vm148_vm0, %v9552_v51, %v9547_v36  ;;  %v15211_v36 = vpop.permute.xlu0 %6790 }
 0xbe6   :  { %v9556_v30 = vpop.permute.xlu1 %9555  ;;  %v6249_v60 = vpack.c.bf16 %v6232_v11, %v6231_v13 }
 0xbe7   :  { %v9558_v22 = vunpack.i.h.bf16 %v9556_v30  ;;  %v9557_v5 = vunpack.i.l.bf16 %v9556_v30 }
 0xbe8   :  { %9353 = vmatprep.mubr.msk.bf16.mxu0 %vm6290_vm1, %v6249_v60 }
 0xbe9   :  { %v6234_v6 = vsel %vm148_vm0, %v9558_v22, %v9563_v12  ;;  %v6233_v26 = vsel %vm148_vm0, %v9557_v5, %v9562_v32  ;;  %v15224_v60 = vpop.permute.xlu0 %6794 }
 0xbea   :  { %v6250_v27 = vpack.c.bf16 %v6234_v6, %v6233_v26  ;;  %v15199_v46 = vpop.permute.xlu1 %6788 }
 0xbec   :  { %9354 = vmatmul.mubr.msk.bf16.gmra.mrb[188].mxu0 %vm6290_vm1, %v6250_v27 }
 0xbed   :  { %v15233_v26 = vpop.permute.xlu0 %6798 }
 0xbee   :  { %v15208_v29 = vpop.permute.xlu1 %6792 }
 0xbf2   :  { %v15213_v23 = vpop.permute.xlu1 %6796 }
 0xbf6   :  { %v15229_v6 = vpop.permute.xlu1 %6800 }
 0xc4b   :  { %v9327_v52 = vpop.f32.mrb[160].mxu0 }
 0xc4c   :  { %v15131_v54 = vadd.f32 %v9327_v52, %v15128_v50  ;;  %v6373_v33 = vpop.f32.mrb[161].mxu0  ;;  %v15239_v52 = vpop.permute.xlu1 %6804 }
 0xc4d   :  { %v9328_v4 = vpop.f32.mrb[162].mxu0  ;;  %v15135_v53 = vadd.f32 %v15128_v50, %v6373_v33 }
 0xc4e   :  { %10596 = vtanh.f32 %v15131_v54  ;;  %v6376_v41 = vpop.f32.mrb[163].mxu0  ;;  %v15138_v0 = vadd.f32 %v9328_v4, %v15128_v50  ;;  %v15243_v4 = vpop.permute.xlu0 %6802 }
 0xc4f   :  { %10598 = vtanh.f32 %v15135_v53  ;;  %v15143_v55 = vadd.f32 %v15128_v50, %v6376_v41 }
 0xc50   :  { %10600 = vtanh.f32 %v15138_v0 }
 0xc51   :  { %10602 = vtanh.f32 %v15143_v55 }
 0xc58   :  { %v10597_v17 = vpop.eup %10596 }
 0xc59   :  { %6952 = vrot.lane.b32.xlu1 %v10597_v17, %s11216_s25  ;;  %v10599_v9 = vpop.eup %10598 }
 0xc5a   :  { %v10601_v47 = vpop.eup %10600 }
 0xc5b   :  { %v9331_v35 = vpop.f32.mrb[164].mxu0  ;;  %6954 = vrot.lane.b32.xlu0 %v10601_v47, %s11216_s25  ;;  %v10603_v62 = vpop.eup %10602 }
 0xc5c   :  { %v15148_v63 = vadd.f32 %v9331_v35, %v15128_v50  ;;  %v6389_v45 = vpop.f32.mrb[165].mxu0 }
 0xc5d   :  { %6948 = vrot.lane.b32.xlu1 %v10599_v9, %s11216_s25  ;;  %v9332_v34 = vpop.f32.mrb[166].mxu0  ;;  %v15154_v38 = vadd.f32 %v15128_v50, %v6389_v45  ;;  %v15245_v9 = vpop.permute.xlu1 %6808 }
 0xc5e   :  { %v6392_v10 = vpop.f32.mrb[167].mxu0  ;;  %10604 = vtanh.f32 %v15148_v63  ;;  %v15157_v57 = vadd.f32 %v9332_v34, %v15128_v50  ;;  %v15251_v34 = vpop.permute.xlu0 %6806 }
 0xc5f   :  { %6950 = vrot.lane.b32.xlu0 %v10603_v62, %s11216_s25  ;;  %10606 = vtanh.f32 %v15154_v38  ;;  %v15163_v25 = vadd.f32 %v15128_v50, %v6392_v10 }
 0xc60   :  { %10608 = vtanh.f32 %v15157_v57 }
 0xc61   :  { %10610 = vtanh.f32 %v15163_v25 }
 0xc68   :  { %v10605_v24 = vpop.eup %10604 }
 0xc69   :  { %6960 = vrot.lane.b32.xlu1 %v10605_v24, %s11216_s25  ;;  %v10607_v37 = vpop.eup %10606  ;;  %v15254_v24 = vpop.permute.xlu1 %6812 }
 0xc6a   :  { %v10609_v42 = vpop.eup %10608 }
 0xc6b   :  { %v9335_v15 = vpop.f32.mrb[168].mxu0  ;;  %6962 = vrot.lane.b32.xlu0 %v10609_v42, %s11216_s25  ;;  %v10611_v61 = vpop.eup %10610 }
 0xc6c   :  { %v15168_v31 = vadd.f32 %v9335_v15, %v15128_v50  ;;  %v6405_v16 = vpop.f32.mrb[169].mxu0  ;;  %v15263_v42 = vpop.permute.xlu0 %6810 }
 0xc6d   :  { %6956 = vrot.lane.b32.xlu1 %v10607_v37, %s11216_s25  ;;  %v9336_v7 = vpop.f32.mrb[170].mxu0  ;;  %v15174_v1 = vadd.f32 %v15128_v50, %v6405_v16 }
 0xc6e   :  { %10612 = vtanh.f32 %v15168_v31  ;;  %v6408_v58 = vpop.f32.mrb[171].mxu0  ;;  %v15177_v49 = vadd.f32 %v9336_v7, %v15128_v50  ;;  %v15267_v7 = vpop.permute.xlu1 %6816 }
 0xc6f   :  { %6958 = vrot.lane.b32.xlu0 %v10611_v61, %s11216_s25  ;;  %10614 = vtanh.f32 %v15174_v1  ;;  %v15183_v59 = vadd.f32 %v15128_v50, %v6408_v58 }
 0xc70   :  { %10616 = vtanh.f32 %v15177_v49  ;;  %v15273_v61 = vpop.permute.xlu0 %6814 }
 0xc71   :  { %10618 = vtanh.f32 %v15183_v59 }
 0xc78   :  { %v10613_v14 = vpop.eup %10612 }
 0xc79   :  { %6968 = vrot.lane.b32.xlu1 %v10613_v14, %s11216_s25  ;;  %v10615_v44 = vpop.eup %10614 }
 0xc7a   :  { %v10617_v56 = vpop.eup %10616 }
 0xc7b   :  { %v9339_v39 = vpop.f32.mrb[172].mxu0  ;;  %6970 = vrot.lane.b32.xlu0 %v10617_v56, %s11216_s25  ;;  %v10619_v18 = vpop.eup %10618 }
 0xc7c   :  { %v15188_v40 = vadd.f32 %v9339_v39, %v15128_v50  ;;  %v6421_v28 = vpop.f32.mrb[173].mxu0  ;;  %v15275_v39 = vpop.permute.xlu1 %6820 }
 0xc7d   :  { %v9340_v20 = vpop.f32.mrb[174].mxu0  ;;  %6964 = vrot.lane.b32.xlu1 %v10615_v44, %s11216_s25  ;;  %v15194_v2 = vadd.f32 %v15128_v50, %v6421_v28  ;;  %v15282_v56 = vpop.permute.xlu0 %6818 }
 0xc7e   :  { %10620 = vtanh.f32 %v15188_v40  ;;  %v6424_v19 = vpop.f32.mrb[175].mxu0  ;;  %v15197_v21 = vadd.f32 %v9340_v20, %v15128_v50 }
 0xc7f   :  { %10622 = vtanh.f32 %v15194_v2  ;;  %6966 = vrot.lane.b32.xlu0 %v10619_v18, %s11216_s25  ;;  %v15205_v43 = vadd.f32 %v15128_v50, %v6424_v19 }
 0xc80   :  { %10624 = vtanh.f32 %v15197_v21 }
 0xc81   :  { %10626 = vtanh.f32 %v15205_v43 }
 0xc88   :  { %v10621_v48 = vpop.eup %10620 }
 0xc89   :  { %6976 = vrot.lane.b32.xlu1 %v10621_v48, %s11216_s25  ;;  %v10623_v8 = vpop.eup %10622 }
 0xc8a   :  { %v10625_v12 = vpop.eup %10624 }
 0xc8b   :  { %6978 = vrot.lane.b32.xlu0 %v10625_v12, %s11216_s25  ;;  %v10627_v5 = vpop.eup %10626  ;;  %v8780_v12 = vmul.f32 -1.442695, %v15135_v53 }
 0xc8d   :  { %6972 = vrot.lane.b32.xlu1 %v10623_v8, %s11216_s25  ;;  %v15286_v8 = vpop.permute.xlu1 %6824 }
 0xc8e   :  { %v9343_v3 = vpop.f32.mrb[176].mxu0 }
 0xc8f   :  { %v15216_v51 = vadd.f32 %v9343_v3, %v15128_v50  ;;  %v6437_v11 = vpop.f32.mrb[177].mxu0  ;;  %6974 = vrot.lane.b32.xlu0 %v10627_v5, %s11216_s25  ;;  %v8782_v3 = vmul.f32 -1.442695, %v15131_v54 }
 0xc90   :  { %v9344_v13 = vpop.f32.mrb[178].mxu0  ;;  %v15221_v32 = vadd.f32 %v15128_v50, %v6437_v11 }
 0xc91   :  { %10628 = vtanh.f32 %v15216_v51  ;;  %v6440_v30 = vpop.f32.mrb[179].mxu0  ;;  %v15227_v22 = vadd.f32 %v9344_v13, %v15128_v50  ;;  %v15300_v54 = vpop.permute.xlu1 %6828 }
 0xc92   :  { %10630 = vtanh.f32 %v15221_v32  ;;  %v15237_v27 = vadd.f32 %v15128_v50, %v6440_v30  ;;  %v15293_v30 = vpop.permute.xlu0 %6822 }
 0xc93   :  { %10632 = vtanh.f32 %v15227_v22 }
 0xc94   :  { %10634 = vtanh.f32 %v15237_v27 }
 0xc9b   :  { %v10629_v33 = vpop.eup %10628 }
 0xc9c   :  { %6984 = vrot.lane.b32.xlu1 %v10629_v33, %s11216_s25  ;;  %v10631_v17 = vpop.eup %10630 }
 0xc9d   :  { %v10633_v62 = vpop.eup %10632 }
 0xc9e   :  { %v9347_v41 = vpop.f32.mrb[180].mxu0  ;;  %6986 = vrot.lane.b32.xlu0 %v10633_v62, %s11216_s25  ;;  %v10635_v15 = vpop.eup %10634  ;;  %v8781_v62 = vmul.f32 -1.442695, %v15143_v55 }
 0xc9f   :  { %v15248_v35 = vadd.f32 %v9347_v41, %v15128_v50  ;;  %v6453_v47 = vpop.f32.mrb[181].mxu0  ;;  %v8783_v41 = vmul.f32 -1.442695, %v15138_v0 }
 0xca0   :  { %v9348_v45 = vpop.f32.mrb[182].mxu0  ;;  %6980 = vrot.lane.b32.xlu1 %v10631_v17, %s11216_s25  ;;  %v15258_v37 = vadd.f32 %v15128_v50, %v6453_v47  ;;  %v8786_v47 = vmul.f32 -1.442695, %v15148_v63 }
 0xca1   :  { %v6456_v10 = vpop.f32.mrb[183].mxu0  ;;  %10636 = vtanh.f32 %v15248_v35  ;;  %v15261_v16 = vadd.f32 %v9348_v45, %v15128_v50  ;;  %v15309_v45 = vpop.permute.xlu0 %6826 }
 0xca2   :  { %6982 = vrot.lane.b32.xlu0 %v10635_v15, %s11216_s25  ;;  %10638 = vtanh.f32 %v15258_v37  ;;  %v15271_v58 = vadd.f32 %v15128_v50, %v6456_v10  ;;  %v15312_v10 = vpop.permute.xlu1 %6832  ;;  %v8784_v15 = vmul.f32 -1.442695, %v15154_v38  ;;  %v8787_v38 = vmul.f32 -1.442695, %v15157_v57 }
 0xca3   :  { %10640 = vtanh.f32 %v15261_v16 }
 0xca4   :  { %10642 = vtanh.f32 %v15271_v58 }
 0xcab   :  { %v10637_v14 = vpop.eup %10636 }
 0xcac   :  { %6992 = vrot.lane.b32.xlu1 %v10637_v14, %s11216_s25  ;;  %v10639_v48 = vpop.eup %10638  ;;  %v15317_v14 = vpop.permute.xlu0 %6830 }
 0xcad   :  { %v10641_v13 = vpop.eup %10640 }
 0xcae   :  { %6994 = vrot.lane.b32.xlu0 %v10641_v13, %s11216_s25  ;;  %v10643_v33 = vpop.eup %10642 }
 0xcaf   :  { %v9351_v28 = vpop.f32.mrb[184].mxu0 }
 0xcb0   :  { %v15280_v44 = vadd.f32 %v9351_v28, %v15128_v50  ;;  %v6469_v20 = vpop.f32.mrb[185].mxu0  ;;  %6988 = vrot.lane.b32.xlu1 %v10639_v48, %s11216_s25 }
 0xcb1   :  { %v9352_v19 = vpop.f32.mrb[186].mxu0  ;;  %v15289_v11 = vadd.f32 %v15128_v50, %v6469_v20 }
 0xcb2   :  { %10644 = vtanh.f32 %v15280_v44  ;;  %v6472_v18 = vpop.f32.mrb[187].mxu0  ;;  %v15297_v5 = vadd.f32 %v9352_v19, %v15128_v50  ;;  %6990 = vrot.lane.b32.xlu0 %v10643_v33, %s11216_s25 }
 0xcb3   :  { %10646 = vpow2.f32 %v8782_v3  ;;  %v15306_v53 = vadd.f32 %v15128_v50, %v6472_v18  ;;  %v15326_v3 = vpop.permute.xlu1 %6836 }
 0xcb4   :  { %10648 = vtanh.f32 %v15289_v11  ;;  %16340 = vst [vmem:[#allocation37_spill] sm:$0xff] %v15326_v3 }
 0xcb5   :  { %10650 = vpow2.f32 %v8780_v12 }
 0xcb6   :  { %10652 = vtanh.f32 %v15297_v5 }
 0xcb7   :  { %10654 = vpow2.f32 %v8783_v41  ;;  %v15330_v41 = vpop.permute.xlu0 %6834 }
 0xcb8   :  { %10656 = vtanh.f32 %v15306_v53 }
 0xcb9   :  { %10658 = vpow2.f32 %v8786_v47  ;;  %v8785_v47 = vmul.f32 -1.442695, %v15163_v25 }
 0xcbc   :  { %v10645_v17 = vpop.eup %10644 }
 0xcbd   :  { %7000 = vrot.lane.b32.xlu1 %v10645_v17, %s11216_s25  ;;  %v10647_v20 = vpop.eup %10646 }
 0xcbe   :  { %v10649_v18 = vpop.eup %10648  ;;  %v6598_v12 = vadd.f32 1.0, %v10647_v20 }
 0xcbf   :  { %v9355_v0 = vpop.f32.mrb[188].mxu0  ;;  %v10651_v13 = vpop.eup %10650 }
 0xcc0   :  { %v15320_v28 = vadd.f32 %v9355_v0, %v15128_v50  ;;  %v6485_v63 = vpop.f32.mrb[189].mxu0  ;;  %v10653_v33 = vpop.eup %10652  ;;  %v6596_v57 = vadd.f32 1.0, %v10651_v13 }
 0xcc1   :  { %v9356_v19 = vpop.f32.mrb[190].mxu0  ;;  %v15324_v48 = vadd.f32 %v15128_v50, %v6485_v63  ;;  %6996 = vrot.lane.b32.xlu1 %v10649_v18, %s11216_s25  ;;  %7002 = vrot.lane.b32.xlu0 %v10653_v33, %s11216_s25  ;;  %v15338_v0 = vpop.permute.xlu1 %6840  ;;  %v8790_v33 = vmul.f32 -1.442695, %v15168_v31 }
 0xcc2   :  { %10660 = vtanh.f32 %v15320_v28  ;;  %v6488_v55 = vpop.f32.mrb[191].mxu0  ;;  %v15335_v17 = vadd.f32 %v9356_v19, %v15128_v50  ;;  %16341 = vst [vmem:[#allocation38_spill] sm:$0xff] %v15338_v0  ;;  %v15345_v18 = vpop.permute.xlu0 %6838 }
 0xcc3   :  { %10662 = vpow2.f32 %v8781_v62  ;;  %v10655_v62 = vpop.eup %10654  ;;  %v15342_v20 = vadd.f32 %v15128_v50, %v6488_v55  ;;  %16342 = vst [vmem:[#allocation61_spill] sm:$0xff] %v15345_v18 }
 0xcc4   :  { %10664 = vpow2.f32 %v8784_v15  ;;  %v10657_v63 = vpop.eup %10656  ;;  %v6599_v25 = vadd.f32 1.0, %v10655_v62 }
 0xcc5   :  { %10666 = vtanh.f32 %v15324_v48  ;;  %v10659_v15 = vpop.eup %10658  ;;  %6998 = vrot.lane.b32.xlu0 %v10657_v63, %s11216_s25 }
 0xcc6   :  { %10668 = vpow2.f32 %v8787_v38  ;;  %v15350_v63 = vpop.permute.xlu0 %6842 }
 0xcc7   :  { %10670 = vrcp.f32 %v6598_v12  ;;  %v6602_v12 = vadd.f32 1.0, %v10659_v15  ;;  %16343 = vst [vmem:[#allocation39_spill] sm:$0xff] %v15350_v63 }
 0xcc8   :  { %10672 = vtanh.f32 %v15335_v17 }
 0xcc9   :  { %10674 = vpow2.f32 %v8785_v47 }
 0xcca   :  { %10676 = vrcp.f32 %v6596_v57  ;;  %v8788_v57 = vmul.f32 -1.442695, %v15174_v1 }
 0xccb   :  { %10678 = vtanh.f32 %v15342_v20  ;;  %v6953_v3 = vpop.permute.xlu1 %6952 }
 0xccc   :  { %v10661_v19 = vpop.eup %10660  ;;  %10680 = vrcp.f32 %v6599_v25 }
 0xccd   :  { %v10663_v38 = vpop.eup %10662  ;;  %7008 = vrot.lane.b32.xlu1 %v10661_v19, %s11216_s25  ;;  %10682 = vrcp.f32 %v6602_v12 }
 0xcce   :  { %v10665_v13 = vpop.eup %10664  ;;  %v6597_v55 = vadd.f32 1.0, %v10663_v38  ;;  %10684 = vpow2.f32 %v8790_v33  ;;  %v8791_v38 = vmul.f32 -1.442695, %v15177_v49 }
 0xccf   :  { %v10667_v50 = vpop.eup %10666  ;;  %v6600_v47 = vadd.f32 1.0, %v10665_v13  ;;  %v6949_v0 = vpop.permute.xlu1 %6948 }
 0xcd0   :  { %v10669_v18 = vpop.eup %10668  ;;  %10686 = vrcp.f32 %v6597_v55  ;;  %v6955_v13 = vpop.permute.xlu0 %6954 }
 0xcd1   :  { %7004 = vrot.lane.b32.xlu1 %v10667_v50, %s11216_s25  ;;  %v15353_v62 = vpop.eup %10670  ;;  %v6603_v19 = vadd.f32 1.0, %v10669_v18  ;;  %10688 = vrcp.f32 %v6600_v47  ;;  %v8789_v18 = vmul.f32 -1.442695, %v15183_v59 }
 0xcd2   :  { %v7046_v31 = vmul.f32 %v15353_v62, %v6953_v3  ;;  %v10673_v15 = vpop.eup %10672  ;;  %10690 = vpow2.f32 %v8788_v57 }
 0xcd3   :  { %v10675_v25 = vpop.eup %10674  ;;  %7010 = vrot.lane.b32.xlu0 %v10673_v15, %s11216_s25  ;;  %10692 = vrcp.f32 %v6603_v19 }
 0xcd4   :  { %v15360_v12 = vpop.eup %10676  ;;  %v6601_v3 = vadd.f32 1.0, %v10675_v25  ;;  %10694 = vpow2.f32 %v8791_v38  ;;  %v6951_v57 = vpop.permute.xlu0 %6950 }
 0xcd5   :  { %7112 = vrot.lane.b32.xlu1 %v7046_v31, %s11214_s19  ;;  %v7044_v1 = vmul.f32 %v15360_v12, %v6949_v0  ;;  %v10679_v33 = vpop.eup %10678  ;;  %v8794_v31 = vmul.f32 -1.442695, %v15188_v40 }
 0xcd6   :  { %v15366_v49 = vpop.eup %10680  ;;  %10696 = vrcp.f32 %v6601_v3 }
 0xcd7   :  { %7006 = vrot.lane.b32.xlu0 %v10679_v33, %s11216_s25  ;;  %v15368_v50 = vpop.eup %10682  ;;  %v7047_v55 = vmul.f32 %v15366_v49, %v6955_v13  ;;  %10698 = vpow2.f32 %v8789_v18 }
 0xcd8   :  { %v10685_v47 = vpop.eup %10684  ;;  %10700 = vpow2.f32 %v8794_v31 }
 0xcd9   :  { %7108 = vrot.lane.b32.xlu1 %v7044_v1, %s11214_s19  ;;  %v6606_v25 = vadd.f32 1.0, %v10685_v47  ;;  %v8792_v47 = vmul.f32 -1.442695, %v15194_v2 }
 0xcda   :  { %v15374_v15 = vpop.eup %10686 }
 0xcdb   :  { %v6961_v0 = vpop.permute.xlu1 %6960  ;;  %7114 = vrot.lane.b32.xlu0 %v7047_v55, %s11214_s19  ;;  %v15376_v19 = vpop.eup %10688  ;;  %v7045_v38 = vmul.f32 %v15374_v15, %v6951_v57  ;;  %10702 = vrcp.f32 %v6606_v25  ;;  %v8795_v57 = vmul.f32 -1.442695, %v15197_v21  ;;  %v8793_v25 = vmul.f32 -1.442695, %v15205_v43 }
 0xcdc   :  { %v7050_v59 = vmul.f32 %v15368_v50, %v6961_v0  ;;  %v10691_v13 = vpop.eup %10690 }
 0xcdd   :  { %v15382_v33 = vpop.eup %10692  ;;  %v6963_v3 = vpop.permute.xlu0 %6962  ;;  %v6604_v55 = vadd.f32 1.0, %v10691_v13 }
 0xcde   :  { %7120 = vrot.lane.b32.xlu1 %v7050_v59, %s11214_s19  ;;  %v10695_v18 = vpop.eup %10694  ;;  %v7051_v0 = vmul.f32 %v15382_v33, %v6963_v3 }
 0xcdf   :  { %v6957_v1 = vpop.permute.xlu1 %6956  ;;  %7110 = vrot.lane.b32.xlu0 %v7045_v38, %s11214_s19  ;;  %v6607_v59 = vadd.f32 1.0, %v10695_v18  ;;  %10704 = vrcp.f32 %v6604_v55  ;;  %v8798_v55 = vmul.f32 -1.442695, %v15216_v51 }
 0xce0   :  { %v7048_v40 = vmul.f32 %v15376_v19, %v6957_v1  ;;  %v15389_v31 = vpop.eup %10696  ;;  %10706 = vpow2.f32 %v8792_v47 }
 0xce1   :  { %v6959_v38 = vpop.permute.xlu0 %6958  ;;  %v10699_v1 = vpop.eup %10698  ;;  %10708 = vpow2.f32 %v8795_v57 }
 0xce2   :  { %7116 = vrot.lane.b32.xlu1 %v7048_v40, %s11214_s19  ;;  %v7049_v63 = vmul.f32 %v15389_v31, %v6959_v38  ;;  %10710 = vrcp.f32 %v6607_v59  ;;  %v6605_v2 = vadd.f32 1.0, %v10699_v1  ;;  %v10701_v13 = vpop.eup %10700  ;;  %v8796_v38 = vmul.f32 -1.442695, %v15221_v32 }
 0xce3   :  { %7122 = vrot.lane.b32.xlu0 %v7051_v0, %s11214_s19  ;;  %10712 = vpow2.f32 %v8793_v25  ;;  %v6610_v3 = vadd.f32 1.0, %v10701_v13 }
 0xce4   :  { %10714 = vrcp.f32 %v6605_v2 }
 0xce5   :  { %v15394_v21 = vpop.eup %10702  ;;  %10716 = vrcp.f32 %v6610_v3 }
 0xce6   :  { %10718 = vpow2.f32 %v8798_v55 }
 0xce7   :  { %7118 = vrot.lane.b32.xlu0 %v7049_v63, %s11214_s19  ;;  %10720 = vpow2.f32 %v8796_v38 }
 0xce9   :  { %v15399_v0 = vpop.eup %10704 }
 0xcea   :  { %v10707_v43 = vpop.eup %10706 }
 0xceb   :  { %v6969_v40 = vpop.permute.xlu1 %6968  ;;  %v10709_v47 = vpop.eup %10708  ;;  %v6608_v25 = vadd.f32 1.0, %v10707_v43  ;;  %v8797_v43 = vmul.f32 -1.442695, %v15237_v27 }
 0xcec   :  { %v7054_v18 = vmul.f32 %v15394_v21, %v6969_v40  ;;  %v15402_v59 = vpop.eup %10710  ;;  %v6611_v51 = vadd.f32 1.0, %v10709_v47  ;;  %v8799_v40 = vmul.f32 -1.442695, %v15227_v22 }
 0xced   :  { %v6971_v1 = vpop.permute.xlu0 %6970  ;;  %v10713_v13 = vpop.eup %10712  ;;  %10722 = vrcp.f32 %v6608_v25 }
 0xcee   :  { %7128 = vrot.lane.b32.xlu1 %v7054_v18, %s11214_s19  ;;  %v7055_v2 = vmul.f32 %v15402_v59, %v6971_v1  ;;  %v15409_v3 = vpop.eup %10714  ;;  %10724 = vrcp.f32 %v6611_v51  ;;  %v6609_v32 = vadd.f32 1.0, %v10713_v13  ;;  %v8802_v1 = vmul.f32 -1.442695, %v15248_v35 }
 0xcef   :  { %v6965_v63 = vpop.permute.xlu1 %6964  ;;  %10726 = vpow2.f32 %v8799_v40 }
 0xcf0   :  { %v7052_v57 = vmul.f32 %v15399_v0, %v6965_v63  ;;  %7130 = vrot.lane.b32.xlu0 %v7055_v2, %s11214_s19  ;;  %v15414_v63 = vpop.eup %10716  ;;  %10728 = vrcp.f32 %v6609_v32 }
 0xcf1   :  { %v6967_v18 = vpop.permute.xlu0 %6966  ;;  %v10719_v47 = vpop.eup %10718  ;;  %10730 = vpow2.f32 %v8797_v43  ;;  %v8800_v43 = vmul.f32 -1.442695, %v15258_v37  ;;  %v8801_v37 = vmul.f32 -1.442695, %v15271_v58 }
 0xcf2   :  { %7124 = vrot.lane.b32.xlu1 %v7052_v57, %s11214_s19  ;;  %v7053_v55 = vmul.f32 %v15409_v3, %v6967_v18  ;;  %v6614_v38 = vadd.f32 1.0, %v10719_v47  ;;  %v10721_v25 = vpop.eup %10720 }
 0xcf3   :  { %v6612_v18 = vadd.f32 1.0, %v10721_v25 }
 0xcf4   :  { %7126 = vrot.lane.b32.xlu0 %v7053_v55, %s11214_s19  ;;  %10732 = vrcp.f32 %v6614_v38 }
 0xcf5   :  { %10734 = vpow2.f32 %v8802_v1 }
 0xcf6   :  { %10736 = vrcp.f32 %v6612_v18  ;;  %v8806_v18 = vmul.f32 -1.442695, %v15280_v44 }
 0xcf7   :  { %v15419_v2 = vpop.eup %10722  ;;  %10738 = vpow2.f32 %v8800_v43 }
 0xcf8   :  { %v15421_v27 = vpop.eup %10724 }
 0xcf9   :  { %v10727_v40 = vpop.eup %10726 }
 0xcfa   :  { %v15427_v35 = vpop.eup %10728  ;;  %v6615_v47 = vadd.f32 1.0, %v10727_v40 }
 0xcfb   :  { %v6977_v22 = vpop.permute.xlu1 %6976 }
 0xcfc   :  { %v7058_v57 = vmul.f32 %v15414_v63, %v6977_v22  ;;  %v10731_v22 = vpop.eup %10730  ;;  %10740 = vrcp.f32 %v6615_v47 }
 0xcfd   :  { %v6979_v55 = vpop.permute.xlu0 %6978  ;;  %v6613_v1 = vadd.f32 1.0, %v10731_v22 }
 0xcfe   :  { %7136 = vrot.lane.b32.xlu1 %v7058_v57, %s11214_s19  ;;  %v7059_v32 = vmul.f32 %v15421_v27, %v6979_v55  ;;  %v8803_v57 = vmul.f32 -1.442695, %v15261_v16 }
 0xcff   :  { %v6973_v51 = vpop.permute.xlu1 %6972 }
 0xd00   :  { %v7056_v13 = vmul.f32 %v15419_v2, %v6973_v51  ;;  %7138 = vrot.lane.b32.xlu0 %v7059_v32, %s11214_s19  ;;  %10742 = vpow2.f32 %v8803_v57  ;;  %v15434_v51 = vpop.eup %10732  ;;  %v8804_v57 = vmul.f32 -1.442695, %v15289_v11 }
 0xd01   :  { %v6975_v38 = vpop.permute.xlu0 %6974  ;;  %10744 = vrcp.f32 %v6613_v1  ;;  %v6752_v1 = vld [vmem:[%s15905_s3 + $0xe0] sm:$0xff] }
 0xd02   :  { %7132 = vrot.lane.b32.xlu1 %v7056_v13, %s11214_s19  ;;  %v7057_v25 = vmul.f32 %v15427_v35, %v6975_v38  ;;  %v10735_v13 = vpop.eup %10734  ;;  %10746 = vpow2.f32 %v8801_v37 }
 0xd03   :  { %v6618_v55 = vadd.f32 1.0, %v10735_v13  ;;  %v15439_v32 = vpop.eup %10736  ;;  %10748 = vpow2.f32 %v8806_v18  ;;  %v8807_v13 = vmul.f32 -1.442695, %v15297_v5  ;;  %v8805_v5 = vmul.f32 -1.442695, %v15306_v53 }
 0xd04   :  { %7134 = vrot.lane.b32.xlu0 %v7057_v25, %s11214_s19  ;;  %v10739_v58 = vpop.eup %10738 }
 0xd05   :  { %10750 = vrcp.f32 %v6618_v55  ;;  %v6616_v37 = vadd.f32 1.0, %v10739_v58 }
 0xd06   :  { %v15442_v22 = vpop.eup %10740  ;;  %10752 = vpow2.f32 %v8804_v57  ;;  %v6753_v57 = vld [vmem:[%s15905_s3 + $0xe8] sm:$0xff] }
 0xd07   :  { %10754 = vrcp.f32 %v6616_v37 }
 0xd08   :  { %10756 = vpow2.f32 %v8807_v13  ;;  %v8808_v13 = vmul.f32 -1.442695, %v15324_v48 }
 0xd0a   :  { %v10743_v44 = vpop.eup %10742 }
 0xd0b   :  { %v6619_v18 = vadd.f32 1.0, %v10743_v44 }
 0xd0d   :  { %10758 = vrcp.f32 %v6619_v18 }
 0xd0e   :  { %v6985_v40 = vpop.permute.xlu1 %6984  ;;  %10760 = vpow2.f32 %v8805_v5 }
 0xd0f   :  { %v7062_v16 = vmul.f32 %v15434_v51, %v6985_v40  ;;  %v15452_v40 = vpop.eup %10744 }
 0xd10   :  { %v6987_v38 = vpop.permute.xlu0 %6986 }
 0xd11   :  { %7144 = vrot.lane.b32.xlu1 %v7062_v16, %s11214_s19  ;;  %v7063_v25 = vmul.f32 %v15442_v22, %v6987_v38  ;;  %v10747_v16 = vpop.eup %10746 }
 0xd12   :  { %v6981_v43 = vpop.permute.xlu1 %6980  ;;  %v6617_v58 = vadd.f32 1.0, %v10747_v16 }
 0xd13   :  { %v7060_v47 = vmul.f32 %v15439_v32, %v6981_v43  ;;  %7146 = vrot.lane.b32.xlu0 %v7063_v25, %s11214_s19  ;;  %v6754_v43 = vld [vmem:[%s15905_s3 + $0xf0] sm:$0xff] }
 0xd14   :  { %v6983_v11 = vpop.permute.xlu0 %6982  ;;  %10762 = vrcp.f32 %v6617_v58 }
 0xd15   :  { %7140 = vrot.lane.b32.xlu1 %v7060_v47, %s11214_s19  ;;  %v7061_v55 = vmul.f32 %v15452_v40, %v6983_v11  ;;  %v10749_v47 = vpop.eup %10748 }
 0xd16   :  { %v15465_v38 = vpop.eup %10750  ;;  %v6622_v25 = vadd.f32 1.0, %v10749_v47 }
 0xd17   :  { %7142 = vrot.lane.b32.xlu0 %v7061_v55, %s11214_s19  ;;  %v10753_v37 = vpop.eup %10752 }
 0xd18   :  { %10764 = vrcp.f32 %v6622_v25  ;;  %v15475_v18 = vpop.eup %10754  ;;  %v6620_v55 = vadd.f32 1.0, %v10753_v37  ;;  %v8809_v25 = vmul.f32 -1.442695, %v15342_v20 }
 0xd19   :  { %6844 = vrot.lane.b32.xlu1 %v6752_v1, %s11214_s19  ;;  %v6755_v1 = vld [vmem:[%s15905_s3 + $0xf8] sm:$0xff]  ;;  %v10757_v16 = vpop.eup %10756  ;;  %10766 = vpow2.f32 %v8808_v13 }
 0xd1a   :  { %v15478_v5 = vpop.eup %10758  ;;  %10768 = vrcp.f32 %v6620_v55 }
 0xd1b   :  { %6846 = vrot.lane.b32.xlu0 %v6753_v57, %s11214_s19  ;;  %v6623_v57 = vadd.f32 1.0, %v10757_v16  ;;  %v10761_v48 = vpop.eup %10760 }
 0xd1c   :  { %v6621_v37 = vadd.f32 1.0, %v10761_v48 }
 0xd1d   :  { %6848 = vrot.lane.b32.xlu1 %v6754_v43, %s11214_s19  ;;  %10770 = vrcp.f32 %v6623_v57 }
 0xd1e   :  { %v6993_v44 = vpop.permute.xlu1 %6992  ;;  %10772 = vpow2.f32 %v8809_v25 }
 0xd1f   :  { %v7066_v53 = vmul.f32 %v15465_v38, %v6993_v44  ;;  %6850 = vrot.lane.b32.xlu0 %v6755_v1, %s11214_s19  ;;  %v15483_v44 = vpop.eup %10762  ;;  %10774 = vrcp.f32 %v6621_v37 }
 0xd20   :  { %v6995_v47 = vpop.permute.xlu0 %6994 }
 0xd21   :  { %7152 = vrot.lane.b32.xlu1 %v7066_v53, %s11214_s19  ;;  %v7067_v58 = vmul.f32 %v15478_v5, %v6995_v47 }
 0xd22   :  { %v6989_v11 = vpop.permute.xlu1 %6988  ;;  %v15487_v13 = vpop.eup %10764 }
 0xd23   :  { %v7064_v43 = vmul.f32 %v15475_v18, %v6989_v11  ;;  %7154 = vrot.lane.b32.xlu0 %v7067_v58, %s11214_s19  ;;  %v10767_v55 = vpop.eup %10766 }
 0xd24   :  { %v6991_v53 = vpop.permute.xlu0 %6990  ;;  %v6624_v20 = vadd.f32 1.0, %v10767_v55 }
 0xd25   :  { %7148 = vrot.lane.b32.xlu1 %v7064_v43, %s11214_s19  ;;  %v7065_v1 = vmul.f32 %v15483_v44, %v6991_v53  ;;  %v15492_v43 = vpop.eup %10768 }
 0xd26   :  { %10776 = vrcp.f32 %v6624_v20  ;;  %v8810_v20 = vmul.f32 -1.442695, %v15320_v28  ;;  %v8811_v28 = vmul.f32 -1.442695, %v15335_v17  ;;  %v6885_v17 = vmul.f32 %v15374_v15, %v15211_v36 }
 0xd27   :  { %7150 = vrot.lane.b32.xlu0 %v7065_v1, %s11214_s19  ;;  %v15495_v57 = vpop.eup %10770 }
 0xd28   :  { %16344 = vst [vmem:[#allocation44_spill] sm:$0xff] %v15495_v57  ;;  %v10773_v53 = vpop.eup %10772 }
 0xd29   :  { %v15500_v1 = vpop.eup %10774 }
 0xd2a   :  { %16345 = vst [vmem:[#allocation6_spill] sm:$0xff] %v15500_v1 }
 0xd2f   :  { %v7001_v11 = vpop.permute.xlu1 %7000 }
 0xd30   :  { %v7070_v16 = vmul.f32 %v15487_v13, %v7001_v11  ;;  %v6625_v11 = vadd.f32 1.0, %v10773_v53 }
 0xd32   :  { %7160 = vrot.lane.b32.xlu1 %v7070_v16, %s11214_s19  ;;  %10778 = vrcp.f32 %v6625_v11  ;;  %v6884_v11 = vmul.f32 %v15360_v12, %v15199_v46  ;;  %v6890_v46 = vmul.f32 %v15368_v50, %v15229_v6  ;;  %v6891_v6 = vmul.f32 %v15382_v33, %v15243_v4 }
 0xd33   :  { %v6997_v47 = vpop.permute.xlu1 %6996  ;;  %v7003_v48 = vpop.permute.xlu0 %7002  ;;  %10780 = vpow2.f32 %v8810_v20 }
 0xd34   :  { %v7068_v58 = vmul.f32 %v15492_v43, %v6997_v47  ;;  %v7071_v25 = vmul.f32 %v15495_v57, %v7003_v48  ;;  %v15506_v47 = vpop.eup %10776 }
 0xd35   :  { %16346 = vst [vmem:[#allocation7_spill] sm:$0xff] %v15506_v47 }
 0xd36   :  { %7156 = vrot.lane.b32.xlu1 %v7068_v58, %s11214_s19  ;;  %7162 = vrot.lane.b32.xlu0 %v7071_v25, %s11214_s19  ;;  %v6886_v25 = vmul.f32 %v15353_v62, %v15208_v29 }
 0xd37   :  { %v6999_v37 = vpop.permute.xlu0 %6998 }
 0xd38   :  { %v7069_v16 = vmul.f32 %v15500_v1, %v6999_v37 }
 0xd3a   :  { %7158 = vrot.lane.b32.xlu0 %v7069_v16, %s11214_s19 }
 0xd3c   :  { %v15517_v57 = vpop.eup %10778 }
 0xd3f   :  { %v15504_v55 = vpop.permute.xlu1 %7008 }
 0xd43   :  { %v7005_v58 = vpop.permute.xlu1 %7004 }
 0xd44   :  { %v7072_v48 = vmul.f32 %v15506_v47, %v7005_v58 }
 0xd45   :  { %v15513_v53 = vpop.permute.xlu0 %7010 }
 0xd46   :  { %7164 = vrot.lane.b32.xlu1 %v7072_v48, %s11214_s19  ;;  %v6887_v48 = vmul.f32 %v15366_v49, %v15224_v60  ;;  %v6888_v60 = vmul.f32 %v15376_v19, %v15213_v23  ;;  %v6889_v23 = vmul.f32 %v15389_v31, %v15233_v26 }
 0xd47   :  { %v7113_v37 = vpop.permute.xlu1 %7112 }
 0xd48   :  { %v7206_v16 = vadd.f32 %v7113_v37, %v6886_v25 }
 0xd49   :  { %v7007_v1 = vpop.permute.xlu0 %7006 }
 0xd4a   :  { %10782 = vtanh.f32 %v7206_v16  ;;  %v7073_v47 = vmul.f32 %v15517_v57, %v7007_v1  ;;  %v10781_v16 = vpop.eup %10780 }
 0xd4b   :  { %v7109_v58 = vpop.permute.xlu1 %7108 }
 0xd4c   :  { %v7204_v29 = vadd.f32 %v7109_v58, %v6884_v11  ;;  %7166 = vrot.lane.b32.xlu0 %v7073_v47, %s11214_s19 }
 0xd4d   :  { %v7115_v20 = vpop.permute.xlu0 %7114 }
 0xd4e   :  { %10784 = vtanh.f32 %v7204_v29  ;;  %v7207_v25 = vadd.f32 %v7115_v20, %v6887_v48 }
 0xd4f   :  { %10786 = vpow2.f32 %v8811_v28  ;;  %v6626_v28 = vadd.f32 1.0, %v10781_v16 }
 0xd50   :  { %v7121_v37 = vpop.permute.xlu1 %7120  ;;  %10788 = vtanh.f32 %v7207_v25 }
 0xd51   :  { %v7210_v1 = vadd.f32 %v7121_v37, %v6890_v46  ;;  %v7111_v11 = vpop.permute.xlu0 %7110 }
 0xd52   :  { %v7205_v47 = vadd.f32 %v7111_v11, %v6885_v17 }
 0xd53   :  { %10790 = vtanh.f32 %v7210_v1 }
 0xd54   :  { %v10783_v58 = vpop.eup %10782  ;;  %v7117_v29 = vpop.permute.xlu1 %7116  ;;  %10792 = vtanh.f32 %v7205_v47 }
 0xd55   :  { %7304 = vrot.lane.b32.xlu1 %v10783_v58, %s11216_s25  ;;  %v7208_v48 = vadd.f32 %v7117_v29, %v6888_v60  ;;  %v7123_v20 = vpop.permute.xlu0 %7122  ;;  %v6892_v29 = vmul.f32 %v15399_v0, %v15239_v52  ;;  %v6893_v52 = vmul.f32 %v15409_v3, %v15251_v34 }
 0xd56   :  { %v7211_v25 = vadd.f32 %v7123_v20, %v6891_v6  ;;  %v6894_v20 = vmul.f32 %v15394_v21, %v15245_v9  ;;  %v6895_v9 = vmul.f32 %v15402_v59, %v15263_v42 }
 0xd57   :  { %10794 = vtanh.f32 %v7208_v48 }
 0xd58   :  { %v10785_v36 = vpop.eup %10784  ;;  %10796 = vrcp.f32 %v6626_v28 }
 0xd59   :  { %v10787_v46 = vpop.eup %10786  ;;  %7300 = vrot.lane.b32.xlu1 %v10785_v36, %s11216_s25  ;;  %10798 = vtanh.f32 %v7211_v25  ;;  %v7119_v37 = vpop.permute.xlu0 %7118 }
 0xd5a   :  { %v10789_v16 = vpop.eup %10788  ;;  %v6627_v17 = vadd.f32 1.0, %v10787_v46  ;;  %v7209_v1 = vadd.f32 %v7119_v37, %v6889_v23 }
 0xd5b   :  { %7306 = vrot.lane.b32.xlu0 %v10789_v16, %s11216_s25 }
 0xd5c   :  { %10800 = vtanh.f32 %v7209_v1 }
 0xd5d   :  { %v10791_v4 = vpop.eup %10790  ;;  %10802 = vrcp.f32 %v6627_v17 }
 0xd5e   :  { %7312 = vrot.lane.b32.xlu1 %v10791_v4, %s11216_s25  ;;  %v10793_v11 = vpop.eup %10792 }
 0xd5f   :  { %7302 = vrot.lane.b32.xlu0 %v10793_v11, %s11216_s25 }
 0xd60   :  { %v7129_v60 = vpop.permute.xlu1 %7128 }
 0xd61   :  { %v10795_v58 = vpop.eup %10794  ;;  %v7214_v23 = vadd.f32 %v7129_v60, %v6894_v20 }
 0xd62   :  { %v15539_v47 = vpop.eup %10796  ;;  %7308 = vrot.lane.b32.xlu1 %v10795_v58, %s11216_s25  ;;  %v7131_v25 = vpop.permute.xlu0 %7130  ;;  %v6898_v58 = vmul.f32 %v15414_v63, %v15267_v7 }
 0xd63   :  { %v10799_v26 = vpop.eup %10798  ;;  %v7074_v28 = vmul.f32 %v15539_v47, %v15504_v55  ;;  %v7215_v17 = vadd.f32 %v7131_v25, %v6895_v9 }
 0xd64   :  { %7314 = vrot.lane.b32.xlu0 %v10799_v26, %s11216_s25  ;;  %v7125_v6 = vpop.permute.xlu1 %7124 }
 0xd65   :  { %v7212_v36 = vadd.f32 %v7125_v6, %v6892_v29  ;;  %v6897_v29 = vmul.f32 %v15427_v35, %v15273_v61 }
 0xd66   :  { %7168 = vrot.lane.b32.xlu1 %v7074_v28, %s11214_s19  ;;  %v10801_v48 = vpop.eup %10800  ;;  %v7127_v37 = vpop.permute.xlu0 %7126 }
 0xd67   :  { %v15551_v46 = vpop.eup %10802  ;;  %10804 = vtanh.f32 %v7212_v36  ;;  %v7213_v16 = vadd.f32 %v7127_v37, %v6893_v52  ;;  %v6902_v52 = vmul.f32 %v15434_v51, %v15286_v8  ;;  %v6903_v8 = vmul.f32 %v15442_v22, %v15309_v45 }
 0xd68   :  { %7310 = vrot.lane.b32.xlu0 %v10801_v48, %s11216_s25  ;;  %v7075_v55 = vmul.f32 %v15551_v46, %v15513_v53  ;;  %10806 = vtanh.f32 %v7214_v23  ;;  %v6896_v53 = vmul.f32 %v15419_v2, %v15254_v24  ;;  %v6899_v24 = vmul.f32 %v15421_v27, %v15282_v56 }
 0xd69   :  { %10808 = vtanh.f32 %v7213_v16  ;;  %v6900_v23 = vmul.f32 %v15439_v32, %v15275_v39  ;;  %v6904_v45 = vmul.f32 %v15475_v18, %v15300_v54  ;;  %v6907_v54 = vmul.f32 %v15478_v5, %v15330_v41 }
 0xd6a   :  { %10810 = vtanh.f32 %v7215_v17 }
 0xd6c   :  { %7170 = vrot.lane.b32.xlu0 %v7075_v55, %s11214_s19 }
 0xd70   :  { %v7137_v1 = vpop.permute.xlu1 %7136 }
 0xd71   :  { %v10805_v4 = vpop.eup %10804  ;;  %v7218_v28 = vadd.f32 %v7137_v1, %v6898_v58  ;;  %v6901_v1 = vmul.f32 %v15452_v40, %v15293_v30 }
 0xd72   :  { %7316 = vrot.lane.b32.xlu1 %v10805_v4, %s11216_s25  ;;  %v10807_v11 = vpop.eup %10806  ;;  %v7139_v26 = vpop.permute.xlu0 %7138 }
 0xd73   :  { %v10809_v42 = vpop.eup %10808  ;;  %v7219_v7 = vadd.f32 %v7139_v26, %v6899_v24 }
 0xd74   :  { %v7133_v34 = vpop.permute.xlu1 %7132  ;;  %7318 = vrot.lane.b32.xlu0 %v10809_v42, %s11216_s25  ;;  %v10811_v6 = vpop.eup %10810 }
 0xd75   :  { %v7216_v60 = vadd.f32 %v7133_v34, %v6896_v53 }
 0xd76   :  { %7320 = vrot.lane.b32.xlu1 %v10807_v11, %s11216_s25  ;;  %v7135_v48 = vpop.permute.xlu0 %7134 }
 0xd77   :  { %10812 = vtanh.f32 %v7216_v60  ;;  %v7217_v20 = vadd.f32 %v7135_v48, %v6897_v29 }
 0xd78   :  { %10814 = vtanh.f32 %v7218_v28  ;;  %7322 = vrot.lane.b32.xlu0 %v10811_v6, %s11216_s25  ;;  %v6906_v6 = vmul.f32 %v15465_v38, %v15312_v10 }
 0xd79   :  { %10816 = vtanh.f32 %v7217_v20 }
 0xd7a   :  { %10818 = vtanh.f32 %v7219_v7 }
 0xd81   :  { %v10813_v25 = vpop.eup %10812 }
 0xd82   :  { %7324 = vrot.lane.b32.xlu1 %v10813_v25, %s11216_s25  ;;  %v10815_v55 = vpop.eup %10814 }
 0xd83   :  { %v7145_v36 = vpop.permute.xlu1 %7144  ;;  %v10817_v37 = vpop.eup %10816 }
 0xd84   :  { %v7222_v9 = vadd.f32 %v7145_v36, %v6902_v52  ;;  %7326 = vrot.lane.b32.xlu0 %v10817_v37, %s11216_s25  ;;  %v10819_v39 = vpop.eup %10818  ;;  %v6905_v36 = vmul.f32 %v15483_v44, %v15317_v14 }
 0xd85   :  { %v7147_v16 = vpop.permute.xlu0 %7146 }
 0xd86   :  { %7328 = vrot.lane.b32.xlu1 %v10815_v55, %s11216_s25  ;;  %v7223_v34 = vadd.f32 %v7147_v16, %v6903_v8  ;;  %v16349_v8 = vld [vmem:[#allocation61_spill] sm:$0xff] }
 0xd87   :  { %v7141_v61 = vpop.permute.xlu1 %7140 }
 0xd88   :  { %v7220_v56 = vadd.f32 %v7141_v61, %v6900_v23  ;;  %7330 = vrot.lane.b32.xlu0 %v10819_v39, %s11216_s25  ;;  %v16347_v61 = vld [vmem:[#allocation38_spill] sm:$0xff] }
 0xd89   :  { %v7143_v4 = vpop.permute.xlu0 %7142  ;;  %v6910_v10 = vmul.f32 %v15487_v13, %v16347_v61 }
 0xd8a   :  { %10820 = vtanh.f32 %v7220_v56  ;;  %v7221_v53 = vadd.f32 %v7143_v4, %v6901_v1 }
 0xd8b   :  { %v15579_v17 = vpop.permute.xlu1 %6844  ;;  %10822 = vtanh.f32 %v7222_v9  ;;  %v16348_v9 = vld [vmem:[#allocation37_spill] sm:$0xff] }
 0xd8c   :  { %10824 = vtanh.f32 %v7221_v53  ;;  %v6908_v14 = vmul.f32 %v15492_v43, %v16348_v9  ;;  %v16350_v53 = vld [vmem:[#allocation6_spill] sm:$0xff] }
 0xd8d   :  { %v15588_v58 = vpop.permute.xlu0 %6846  ;;  %10826 = vtanh.f32 %v7223_v34  ;;  %v6909_v34 = vmul.f32 %v16350_v53, %v16349_v8 }
 0xd8f   :  { %v15586_v11 = vpop.permute.xlu1 %6848 }
 0xd91   :  { %v15591_v30 = vpop.permute.xlu0 %6850 }
 0xd93   :  { %v7153_v42 = vpop.permute.xlu1 %7152 }
 0xd94   :  { %v10821_v60 = vpop.eup %10820  ;;  %v7226_v20 = vadd.f32 %v7153_v42, %v6906_v6 }
 0xd95   :  { %7332 = vrot.lane.b32.xlu1 %v10821_v60, %s11216_s25  ;;  %v10823_v26 = vpop.eup %10822  ;;  %v7155_v24 = vpop.permute.xlu0 %7154 }
 0xd96   :  { %v10825_v29 = vpop.eup %10824  ;;  %v7227_v55 = vadd.f32 %v7155_v24, %v6907_v54 }
 0xd97   :  { %v7149_v28 = vpop.permute.xlu1 %7148  ;;  %7334 = vrot.lane.b32.xlu0 %v10825_v29, %s11216_s25  ;;  %v10827_v7 = vpop.eup %10826  ;;  %v9634_v29 = vld [vmem:[%s15911_s9] sm:$0xff]  }
 0xd98   :  { %v7224_v48 = vadd.f32 %v7149_v28, %v6904_v45  ;;  %9357 = vmatprep.subr.bf16.mxu1 %v9634_v29 }
 0xd99   :  { %7336 = vrot.lane.b32.xlu1 %v10823_v26, %s11216_s25  ;;  %v7151_v25 = vpop.permute.xlu0 %7150  ;;  %9358 = vmatpush3.bf16.msra.mxu1 %v9634_v29 }
 0xd9a   :  { %10828 = vtanh.f32 %v7224_v48  ;;  %v7225_v23 = vadd.f32 %v7151_v25, %v6905_v36  ;;  %v16351_v36 = vld [vmem:[#allocation39_spill] sm:$0xff]  ;;  %v16352_v25 = vld [vmem:[#allocation44_spill] sm:$0xff] }
 0xd9b   :  { %7338 = vrot.lane.b32.xlu0 %v10827_v7, %s11216_s25  ;;  %10830 = vtanh.f32 %v7226_v20  ;;  %v9635_v20 = vld [vmem:[%s15911_s9 + $0x8] sm:$0xff]   ;;  %v6911_v54 = vmul.f32 %v16352_v25, %v16351_v36 }
 0xd9c   :  { %10832 = vtanh.f32 %v7225_v23  ;;  %9359 = vmatprep.subr.bf16.mxu1 %v9635_v20 }
 0xd9d   :  { %10834 = vtanh.f32 %v7227_v55  ;;  %9360 = vmatpush3.bf16.msra.mxu1 %v9635_v20 }
 0xda4   :  { %v7161_v52 = vpop.permute.xlu1 %7160  ;;  %v10829_v37 = vpop.eup %10828 }
 0xda5   :  { %v7230_v56 = vadd.f32 %v7161_v52, %v6910_v10  ;;  %7340 = vrot.lane.b32.xlu1 %v10829_v37, %s11216_s25  ;;  %v10831_v41 = vpop.eup %10830 }
 0xda6   :  { %v10833_v4 = vpop.eup %10832 }
 0xda7   :  { %10836 = vtanh.f32 %v7230_v56  ;;  %7342 = vrot.lane.b32.xlu0 %v10833_v4, %s11216_s25  ;;  %v10835_v42 = vpop.eup %10834  ;;  %v6913_v56 = vmul.f32 %v15517_v57, %v15588_v58 }
 0xda8   :  { %v7157_v16 = vpop.permute.xlu1 %7156  ;;  %v7163_v39 = vpop.permute.xlu0 %7162 }
 0xda9   :  { %v7228_v1 = vadd.f32 %v7157_v16, %v6908_v14  ;;  %7344 = vrot.lane.b32.xlu1 %v10831_v41, %s11216_s25  ;;  %v7231_v10 = vadd.f32 %v7163_v39, %v6911_v54 }
 0xdab   :  { %10838 = vtanh.f32 %v7228_v1  ;;  %7346 = vrot.lane.b32.xlu0 %v10835_v42, %s11216_s25 }
 0xdac   :  { %v7159_v60 = vpop.permute.xlu0 %7158 }
 0xdad   :  { %v7229_v26 = vadd.f32 %v7159_v60, %v6909_v34 }
 0xdaf   :  { %10840 = vtanh.f32 %v7229_v26 }
 0xdb0   :  { %10842 = vtanh.f32 %v7231_v10 }
 0xdb1   :  { %v10837_v45 = vpop.eup %10836 }
 0xdb2   :  { %7352 = vrot.lane.b32.xlu0 %v10837_v45, %s11216_s25 }
 0xdb5   :  { %v10839_v28 = vpop.eup %10838 }
 0xdb6   :  { %7348 = vrot.lane.b32.xlu1 %v10839_v28, %s11216_s25 }
 0xdb8   :  { %v7165_v48 = vpop.permute.xlu1 %7164 }
 0xdb9   :  { %v10841_v6 = vpop.eup %10840 }
 0xdba   :  { %7350 = vrot.lane.b32.xlu0 %v10841_v6, %s11216_s25 }
 0xdbe   :  { %v7167_v7 = vpop.permute.xlu0 %7166 }
 0xdbf   :  { %v7233_v1 = vadd.f32 %v7167_v7, %v6913_v56  ;;  %v10843_v7 = vpop.eup %10842 }
 0xdc1   :  { %10844 = vtanh.f32 %v7233_v1 }
 0xdc7   :  { %v7305_v24 = vpop.permute.xlu1 %7304 }
 0xdc8   :  { %v7398_v61 = vmul.f32 %v15353_v62, %v7305_v24  ;;  %v16353_v62 = vld [vmem:[#allocation7_spill] sm:$0xff] }
 0xdc9   :  { %v6912_v39 = vmul.f32 %v16353_v62, %v15579_v17 }
 0xdca   :  { %v7430_v9 = vmax.f32 %v7398_v61, 0.0 }
 0xdcb   :  { %v7301_v23 = vpop.permute.xlu1 %7300  ;;  %v7232_v42 = vadd.f32 %v7165_v48, %v6912_v39  ;;  %v10845_v54 = vpop.eup %10844 }
 0xdcc   :  { %v7396_v16 = vmul.f32 %v15360_v12, %v7301_v23  ;;  %v6914_v12 = vmul.f32 %v15539_v47, %v15586_v11 }
 0xdcd   :  { %v7307_v55 = vpop.permute.xlu0 %7306  ;;  %10846 = vtanh.f32 %v7232_v42 }
 0xdce   :  { %v7399_v52 = vmul.f32 %v15366_v49, %v7307_v55  ;;  %v7428_v60 = vmax.f32 %v7396_v16, 0.0 }
 0xdd0   :  { %v7313_v37 = vpop.permute.xlu1 %7312  ;;  %v7431_v14 = vmax.f32 %v7399_v52, 0.0 }
 0xdd1   :  { %v7303_v41 = vpop.permute.xlu0 %7302  ;;  %v7402_v58 = vmul.f32 %v15368_v50, %v7313_v37 }
 0xdd2   :  { %v7461_v4 = vpack.c.bf16 %v7431_v14, %v7430_v9  ;;  %v7397_v8 = vmul.f32 %v15374_v15, %v7303_v41 }
 0xdd3   :  { %v7434_v17 = vmax.f32 %v7402_v58, 0.0 }
 0xdd4   :  { %v7309_v34 = vpop.permute.xlu1 %7308  ;;  %v7429_v49 = vmax.f32 %v7397_v8, 0.0  ;;  %7505 = vrot.lane.b32.xlu0 %v7461_v4, %s11214_s19 }
 0xdd5   :  { %v7400_v6 = vmul.f32 %v15376_v19, %v7309_v34 }
 0xdd6   :  { %v7315_v26 = vpop.permute.xlu0 %7314  ;;  %v7460_v45 = vpack.c.bf16 %v7429_v49, %v7428_v60 }
 0xdd7   :  { %v7403_v28 = vmul.f32 %v15382_v33, %v7315_v26  ;;  %v7432_v11 = vmax.f32 %v7400_v6, 0.0  ;;  %v10847_v19 = vpop.eup %10846 }
 0xdd8   :  { %v7169_v15 = vpop.permute.xlu1 %7168  ;;  %7503 = vrot.lane.b32.xlu1 %v7460_v45, %s11214_s19 }
 0xdd9   :  { %v7435_v29 = vmax.f32 %v7403_v28, 0.0  ;;  %v7234_v24 = vadd.f32 %v7169_v15, %v6914_v12 }
 0xdda   :  { %v7311_v20 = vpop.permute.xlu0 %7310 }
 0xddb   :  { %v7463_v50 = vpack.c.bf16 %v7435_v29, %v7434_v17  ;;  %v7401_v48 = vmul.f32 %v15389_v31, %v7311_v20  ;;  %10848 = vtanh.f32 %v7234_v24  ;;  %v6915_v31 = vmul.f32 %v15551_v46, %v15591_v30 }
 0xddc   :  { %7354 = vrot.lane.b32.xlu1 %v10843_v7, %s11216_s25 }
 0xddd   :  { %v7433_v36 = vmax.f32 %v7401_v48, 0.0  ;;  %7509 = vrot.lane.b32.xlu0 %v7463_v50, %s11214_s19 }
 0xdde   :  { %v7171_v61 = vpop.permute.xlu0 %7170 }
 0xddf   :  { %v7462_v33 = vpack.c.bf16 %v7433_v36, %v7432_v11  ;;  %v7235_v55 = vadd.f32 %v7171_v61, %v6915_v31 }
 0xde1   :  { %7358 = vrot.lane.b32.xlu0 %v10845_v54, %s11216_s25  ;;  %7507 = vrot.lane.b32.xlu1 %v7462_v33, %s11214_s19  ;;  %10850 = vtanh.f32 %v7235_v55 }
 0xde4   :  { %v7317_v10 = vpop.permute.xlu1 %7316 }
 0xde5   :  { %v10849_v23 = vpop.eup %10848  ;;  %7356 = vrot.lane.b32.xlu1 %v10847_v19, %s11216_s25  ;;  %v7404_v52 = vmul.f32 %v15399_v0, %v7317_v10 }
 0xde6   :  { %7360 = vrot.lane.b32.xlu0 %v10849_v23, %s11216_s25  ;;  %v7319_v56 = vpop.permute.xlu0 %7318 }
 0xde7   :  { %v7405_v9 = vmul.f32 %v15409_v3, %v7319_v56  ;;  %v7436_v14 = vmax.f32 %v7404_v52, 0.0 }
 0xde8   :  { %v7321_v37 = vpop.permute.xlu1 %7320 }
 0xde9   :  { %v7437_v16 = vmax.f32 %v7405_v9, 0.0  ;;  %v7406_v1 = vmul.f32 %v15394_v21, %v7321_v37 }
 0xdea   :  { %v7323_v41 = vpop.permute.xlu0 %7322 }
 0xdeb   :  { %v7464_v4 = vpack.c.bf16 %v7437_v16, %v7436_v14  ;;  %v7407_v8 = vmul.f32 %v15402_v59, %v7323_v41  ;;  %v7438_v30 = vmax.f32 %v7406_v1, 0.0  ;;  %v10851_v60 = vpop.eup %10850 }
 0xded   :  { %v7439_v39 = vmax.f32 %v7407_v8, 0.0  ;;  %7511 = vrot.lane.b32.xlu1 %v7464_v4, %s11214_s19 }
 0xdef   :  { %v7465_v34 = vpack.c.bf16 %v7439_v39, %v7438_v30 }
 0xdf1   :  { %7362 = vrot.lane.b32.xlu1 %v10851_v60, %s11216_s25  ;;  %7513 = vrot.lane.b32.xlu0 %v7465_v34, %s11214_s19 }
 0xdf4   :  { %v7325_v0 = vpop.permute.xlu1 %7324 }
 0xdf5   :  { %v7408_v3 = vmul.f32 %v15419_v2, %v7325_v0 }
 0xdf6   :  { %v7327_v49 = vpop.permute.xlu0 %7326 }
 0xdf7   :  { %v7409_v21 = vmul.f32 %v15427_v35, %v7327_v49  ;;  %v7440_v42 = vmax.f32 %v7408_v3, 0.0 }
 0xdf8   :  { %v7329_v58 = vpop.permute.xlu1 %7328 }
 0xdf9   :  { %v7441_v26 = vmax.f32 %v7409_v21, 0.0  ;;  %v7410_v59 = vmul.f32 %v15414_v63, %v7329_v58 }
 0xdfa   :  { %v7331_v12 = vpop.permute.xlu0 %7330 }
 0xdfb   :  { %v7466_v45 = vpack.c.bf16 %v7441_v26, %v7440_v42  ;;  %v7411_v28 = vmul.f32 %v15421_v27, %v7331_v12  ;;  %v7442_v15 = vmax.f32 %v7410_v59, 0.0 }
 0xdfd   :  { %v7443_v17 = vmax.f32 %v7411_v28, 0.0  ;;  %7515 = vrot.lane.b32.xlu1 %v7466_v45, %s11214_s19 }
 0xdff   :  { %v7467_v29 = vpack.c.bf16 %v7443_v17, %v7442_v15 }
 0xe01   :  { %7517 = vrot.lane.b32.xlu0 %v7467_v29, %s11214_s19 }
 0xe07   :  { %v7333_v2 = vpop.permute.xlu1 %7332 }
 0xe08   :  { %v7412_v6 = vmul.f32 %v15439_v32, %v7333_v2 }
 0xe09   :  { %v7335_v24 = vpop.permute.xlu0 %7334 }
 0xe0a   :  { %v7413_v20 = vmul.f32 %v15452_v40, %v7335_v24  ;;  %v7444_v50 = vmax.f32 %v7412_v6, 0.0 }
 0xe0b   :  { %v7337_v35 = vpop.permute.xlu1 %7336 }
 0xe0c   :  { %v7445_v63 = vmax.f32 %v7413_v20, 0.0  ;;  %v7414_v48 = vmul.f32 %v15434_v51, %v7337_v35 }
 0xe0d   :  { %v7339_v7 = vpop.permute.xlu0 %7338 }
 0xe0e   :  { %v7468_v27 = vpack.c.bf16 %v7445_v63, %v7444_v50  ;;  %v7415_v11 = vmul.f32 %v15442_v22, %v7339_v7  ;;  %v7446_v36 = vmax.f32 %v7414_v48, 0.0  ;;  %v15705_v7 = vld [vmem:[%s15912_s10] ss:$0 sm:$0xff] }
 0xe10   :  { %v7447_v33 = vmax.f32 %v7415_v11, 0.0  ;;  %7519 = vrot.lane.b32.xlu1 %v7468_v27, %s11214_s19 }
 0xe12   :  { %v7469_v54 = vpack.c.bf16 %v7447_v33, %v7446_v36 }
 0xe14   :  { %7521 = vrot.lane.b32.xlu0 %v7469_v54, %s11214_s19 }
 0xe17   :  { %v7341_v32 = vpop.permute.xlu1 %7340 }
 0xe18   :  { %v7416_v19 = vmul.f32 %v15475_v18, %v7341_v32 }
 0xe19   :  { %v7343_v23 = vpop.permute.xlu0 %7342 }
 0xe1a   :  { %v7417_v61 = vmul.f32 %v15483_v44, %v7343_v23  ;;  %v7448_v31 = vmax.f32 %v7416_v19, 0.0 }
 0xe1b   :  { %v7345_v40 = vpop.permute.xlu1 %7344 }
 0xe1c   :  { %v7449_v51 = vmax.f32 %v7417_v61, 0.0  ;;  %v7418_v10 = vmul.f32 %v15465_v38, %v7345_v40 }
 0xe1d   :  { %v7347_v55 = vpop.permute.xlu0 %7346 }
 0xe1e   :  { %v7470_v22 = vpack.c.bf16 %v7449_v51, %v7448_v31  ;;  %v7419_v52 = vmul.f32 %v15478_v5, %v7347_v55  ;;  %v7450_v56 = vmax.f32 %v7418_v10, 0.0 }
 0xe20   :  { %v7451_v37 = vmax.f32 %v7419_v52, 0.0  ;;  %7523 = vrot.lane.b32.xlu1 %v7470_v22, %s11214_s19 }
 0xe22   :  { %v7471_v9 = vpack.c.bf16 %v7451_v37, %v7450_v56 }
 0xe24   :  { %7525 = vrot.lane.b32.xlu0 %v7471_v9, %s11214_s19  ;;  %v7353_v18 = vpop.permute.xlu0 %7352 }
 0xe25   :  { %v7422_v30 = vmul.f32 %v15487_v13, %v7353_v18 }
 0xe27   :  { %v7454_v60 = vmax.f32 %v7422_v30, 0.0 }
 0xe28   :  { %v7349_v14 = vpop.permute.xlu1 %7348 }
 0xe29   :  { %v7420_v16 = vmul.f32 %v15492_v43, %v7349_v14 }
 0xe2b   :  { %v7452_v41 = vmax.f32 %v7420_v16, 0.0 }
 0xe2c   :  { %v7351_v44 = vpop.permute.xlu0 %7350 }
 0xe2d   :  { %v7421_v1 = vmul.f32 %v16350_v53, %v7351_v44 }
 0xe2f   :  { %v7453_v38 = vmax.f32 %v7421_v1, 0.0 }
 0xe31   :  { %v7472_v4 = vpack.c.bf16 %v7453_v38, %v7452_v41 }
 0xe33   :  { %7527 = vrot.lane.b32.xlu1 %v7472_v4, %s11214_s19 }
 0xe46   :  { %v7506_v5 = vpop.permute.xlu0 %7505 }
 0xe4a   :  { %v7504_v8 = vpop.permute.xlu1 %7503 }
 0xe4b   :  { %9361 = vmatprep.mubr.msk.bf16.mxu1 %vm148_vm0, %v7504_v8 }
 0xe4c   :  { %9362 = vmatmul.mubr.msk.bf16.vlgmr.msra.gmra.mrb[224].mxu1 %vm148_vm0, %v7506_v5 }
 0xe4e   :  { %v7355_v39 = vpop.permute.xlu1 %7354 }
 0xe4f   :  { %v7510_v34 = vpop.permute.xlu0 %7509  ;;  %v7423_v43 = vmul.f32 %v16352_v25, %v7355_v39 }
 0xe51   :  { %v7455_v0 = vmax.f32 %v7423_v43, 0.0 }
 0xe53   :  { %v7359_v53 = vpop.permute.xlu0 %7358  ;;  %v7508_v3 = vpop.permute.xlu1 %7507  ;;  %v7473_v49 = vpack.c.bf16 %v7455_v0, %v7454_v60 }
 0xe54   :  { %9365 = vmatprep.mubr.msk.bf16.mxu1 %vm148_vm0, %v7508_v3  ;;  %v7425_v58 = vmul.f32 %v15517_v57, %v7359_v53 }
 0xe55   :  { %9366 = vmatmul.mubr.msk.bf16.gmra.mrb[228].mxu1 %vm148_vm0, %v7510_v34  ;;  %7529 = vrot.lane.b32.xlu0 %v7473_v49, %s11214_s19 }
 0xe56   :  { %v7457_v42 = vmax.f32 %v7425_v58, 0.0 }
 0xe57   :  { %v7357_v21 = vpop.permute.xlu1 %7356 }
 0xe58   :  { %v7424_v13 = vmul.f32 %v16353_v62, %v7357_v21  ;;  %v7361_v25 = vpop.permute.xlu0 %7360 }
 0xe59   :  { %v7426_v45 = vmul.f32 %v15539_v47, %v7361_v25 }
 0xe5a   :  { %v7456_v26 = vmax.f32 %v7424_v13, 0.0 }
 0xe5b   :  { %v7458_v57 = vmax.f32 %v7426_v45, 0.0 }
 0xe5c   :  { %v7474_v59 = vpack.c.bf16 %v7457_v42, %v7456_v26 }
 0xe5e   :  { %7531 = vrot.lane.b32.xlu1 %v7474_v59, %s11214_s19 }
 0xe5f   :  { %v7512_v12 = vpop.permute.xlu1 %7511 }
 0xe60   :  { %9369 = vmatprep.mubr.msk.bf16.mxu1 %vm148_vm0, %v7512_v12 }
 0xe63   :  { %v7514_v28 = vpop.permute.xlu0 %7513  ;;  %v7363_v15 = vpop.permute.xlu1 %7362 }
 0xe64   :  { %v7427_v17 = vmul.f32 %v15551_v46, %v7363_v15  ;;  %9370 = vmatmul.mubr.msk.bf16.gmra.mrb[232].mxu1 %vm148_vm0, %v7514_v28 }
 0xe66   :  { %v7459_v29 = vmax.f32 %v7427_v17, 0.0 }
 0xe68   :  { %v7475_v62 = vpack.c.bf16 %v7459_v29, %v7458_v57 }
 0xe6a   :  { %7533 = vrot.lane.b32.xlu0 %v7475_v62, %s11214_s19 }
 0xe6f   :  { %v7516_v2 = vpop.permute.xlu1 %7515 }
 0xe70   :  { %9373 = vmatprep.mubr.msk.bf16.mxu1 %vm148_vm0, %v7516_v2 }
 0xe73   :  { %v7518_v6 = vpop.permute.xlu0 %7517 }
 0xe74   :  { %9374 = vmatmul.mubr.msk.bf16.gmra.mrb[236].mxu1 %vm148_vm0, %v7518_v6 }
 0xe82   :  { %v7520_v24 = vpop.permute.xlu1 %7519 }
 0xe83   :  { %9377 = vmatprep.mubr.msk.bf16.mxu1 %vm148_vm0, %v7520_v24 }
 0xe86   :  { %v7522_v47 = vpop.permute.xlu0 %7521 }
 0xe87   :  { %9378 = vmatmul.mubr.msk.bf16.gmra.mrb[240].mxu1 %vm148_vm0, %v7522_v47 }
 0xe92   :  { %v7524_v46 = vpop.permute.xlu1 %7523 }
 0xe93   :  { %9381 = vmatprep.mubr.msk.bf16.mxu1 %vm148_vm0, %v7524_v46 }
 0xe96   :  { %v7526_v35 = vpop.permute.xlu0 %7525 }
 0xe97   :  { %9382 = vmatmul.mubr.msk.bf16.gmra.mrb[244].mxu1 %vm148_vm0, %v7526_v35 }
 0xea5   :  { %v7528_v20 = vpop.permute.xlu1 %7527 }
 0xea6   :  { %9385 = vmatprep.mubr.msk.bf16.mxu1 %vm148_vm0, %v7528_v20 }
 0xec7   :  { %v7530_v50 = vpop.permute.xlu0 %7529 }
 0xec8   :  { %9386 = vmatmul.mubr.msk.bf16.gmra.mrb[248].mxu1 %vm148_vm0, %v7530_v50 }
 0xed0   :  { %v7532_v63 = vpop.permute.xlu1 %7531 }
 0xed1   :  { %9389 = vmatprep.mubr.msk.bf16.mxu1 %vm148_vm0, %v7532_v63 }
 0xedc   :  { %v7534_v48 = vpop.permute.xlu0 %7533 }
 0xedd   :  { %9390 = vmatmul.mubr.msk.bf16.gmra.mrb[252].mxu1 %vm148_vm0, %v7534_v48 }
 0xf1f   :  { %v9363_v27 = vpop.f32.mrb[224].mxu1 }
 0xf20   :  { %v7638_v11 = vadd.f32 %v9363_v27, %v15705_v7  ;;  %v7629_v36 = vpop.f32.mrb[225].mxu1 }
 0xf21   :  { %v7630_v33 = vadd.f32 %v15705_v7, %v7629_v36  ;;  %v9364_v54 = vpop.f32.mrb[226].mxu1 }
 0xf22   :  { %7758 = vst [vmem:[%s15913_s11 + $0x10] sm:$0xff] %v7638_v11  ;;  %v7641_v32 = vadd.f32 %v9364_v54, %v15705_v7  ;;  %v7632_v19 = vpop.f32.mrb[227].mxu1 }
 0xf23   :  { %7756 = vst [vmem:[%s15913_s11] sm:$0xff] %v7630_v33  ;;  %v7633_v23 = vadd.f32 %v15705_v7, %v7632_v19 }
 0xf24   :  { %7759 = vst [vmem:[%s15913_s11 + $0x18] sm:$0xff] %v7641_v32  ;;  %v15720_v40 = vpack.c.bf16 %v7641_v32, %v7638_v11 }
 0xf25   :  { %7757 = vst [vmem:[%s15913_s11 + $0x8] sm:$0xff] %v7633_v23  ;;  %v15725_v61 = vpack.c.bf16 %v7633_v23, %v7630_v33 }
 0xf27   :  { %9285 = vmatprep.mubr.bf16.mxu0 %v15725_v61 }
 0xf28   :  { %v9367_v31 = vpop.f32.mrb[228].mxu1 }
 0xf29   :  { %v7654_v51 = vadd.f32 %v9367_v31, %v15705_v7  ;;  %v7645_v10 = vpop.f32.mrb[229].mxu1 }
 0xf2a   :  { %v7646_v55 = vadd.f32 %v15705_v7, %v7645_v10  ;;  %v9368_v22 = vpop.f32.mrb[230].mxu1 }
 0xf2b   :  { %7762 = vst [vmem:[%s15913_s11 + $0x30] sm:$0xff] %v7654_v51  ;;  %v7657_v52 = vadd.f32 %v9368_v22, %v15705_v7  ;;  %v7648_v56 = vpop.f32.mrb[231].mxu1 }
 0xf2c   :  { %7760 = vst [vmem:[%s15913_s11 + $0x20] sm:$0xff] %v7646_v55  ;;  %v7649_v37 = vadd.f32 %v15705_v7, %v7648_v56 }
 0xf2d   :  { %7763 = vst [vmem:[%s15913_s11 + $0x38] sm:$0xff] %v7657_v52  ;;  %v15741_v9 = vpack.c.bf16 %v7657_v52, %v7654_v51 }
 0xf2e   :  { %7761 = vst [vmem:[%s15913_s11 + $0x28] sm:$0xff] %v7649_v37  ;;  %v15746_v18 = vpack.c.bf16 %v7649_v37, %v7646_v55 }
 0xf37   :  { %v9371_v14 = vpop.f32.mrb[232].mxu1 }
 0xf38   :  { %v7670_v16 = vadd.f32 %v9371_v14, %v15705_v7  ;;  %v7661_v44 = vpop.f32.mrb[233].mxu1 }
 0xf39   :  { %v7662_v1 = vadd.f32 %v15705_v7, %v7661_v44  ;;  %v9372_v41 = vpop.f32.mrb[234].mxu1 }
 0xf3a   :  { %7766 = vst [vmem:[%s15913_s11 + $0x50] sm:$0xff] %v7670_v16  ;;  %v7673_v38 = vadd.f32 %v9372_v41, %v15705_v7  ;;  %v7664_v4 = vpop.f32.mrb[235].mxu1 }
 0xf3b   :  { %7764 = vst [vmem:[%s15913_s11 + $0x40] sm:$0xff] %v7662_v1  ;;  %v7665_v5 = vadd.f32 %v15705_v7, %v7664_v4 }
 0xf3c   :  { %7767 = vst [vmem:[%s15913_s11 + $0x58] sm:$0xff] %v7673_v38  ;;  %v15761_v8 = vpack.c.bf16 %v7673_v38, %v7670_v16 }
 0xf3d   :  { %7765 = vst [vmem:[%s15913_s11 + $0x48] sm:$0xff] %v7665_v5  ;;  %v15766_v30 = vpack.c.bf16 %v7665_v5, %v7662_v1 }
 0xf47   :  { %v9375_v39 = vpop.f32.mrb[236].mxu1 }
 0xf48   :  { %v7686_v34 = vadd.f32 %v9375_v39, %v15705_v7  ;;  %v7677_v43 = vpop.f32.mrb[237].mxu1 }
 0xf49   :  { %v7678_v60 = vadd.f32 %v15705_v7, %v7677_v43  ;;  %v9376_v0 = vpop.f32.mrb[238].mxu1 }
 0xf4a   :  { %7770 = vst [vmem:[%s15913_s11 + $0x70] sm:$0xff] %v7686_v34  ;;  %v7689_v53 = vadd.f32 %v9376_v0, %v15705_v7  ;;  %v7680_v3 = vpop.f32.mrb[239].mxu1 }
 0xf4b   :  { %7768 = vst [vmem:[%s15913_s11 + $0x60] sm:$0xff] %v7678_v60  ;;  %v7681_v49 = vadd.f32 %v15705_v7, %v7680_v3 }
 0xf4c   :  { %7771 = vst [vmem:[%s15913_s11 + $0x78] sm:$0xff] %v7689_v53  ;;  %v15781_v58 = vpack.c.bf16 %v7689_v53, %v7686_v34 }
 0xf4d   :  { %7769 = vst [vmem:[%s15913_s11 + $0x68] sm:$0xff] %v7681_v49  ;;  %v15786_v21 = vpack.c.bf16 %v7681_v49, %v7678_v60 }
 0xf5a   :  { %v9379_v13 = vpop.f32.mrb[240].mxu1 }
 0xf5b   :  { %v7702_v42 = vadd.f32 %v9379_v13, %v15705_v7  ;;  %v7693_v26 = vpop.f32.mrb[241].mxu1 }
 0xf5c   :  { %v7694_v59 = vadd.f32 %v15705_v7, %v7693_v26  ;;  %v9380_v25 = vpop.f32.mrb[242].mxu1 }
 0xf5d   :  { %7774 = vst [vmem:[%s15913_s11 + $0x90] sm:$0xff] %v7702_v42  ;;  %v7705_v12 = vadd.f32 %v9380_v25, %v15705_v7  ;;  %v7696_v45 = vpop.f32.mrb[243].mxu1 }
 0xf5e   :  { %7772 = vst [vmem:[%s15913_s11 + $0x80] sm:$0xff] %v7694_v59  ;;  %v7697_v28 = vadd.f32 %v15705_v7, %v7696_v45 }
 0xf5f   :  { %7775 = vst [vmem:[%s15913_s11 + $0x98] sm:$0xff] %v7705_v12  ;;  %v15801_v15 = vpack.c.bf16 %v7705_v12, %v7702_v42 }
 0xf60   :  { %7773 = vst [vmem:[%s15913_s11 + $0x88] sm:$0xff] %v7697_v28  ;;  %v15806_v17 = vpack.c.bf16 %v7697_v28, %v7694_v59 }
 0xf62   :  { %9269 = vmatprep.subr.bf16.mxu0 %v15806_v17 }
 0xf63   :  { %9270 = vmatpush3.bf16.xpose.msra.mxu0 %v15725_v61 }
 0xf64   :  { %9271 = vmatprep.subr.bf16.mxu0 %v15801_v15 }
 0xf6a   :  { %v9383_v57 = vpop.f32.mrb[244].mxu1 }
 0xf6b   :  { %9272 = vmatpush3.bf16.xpose.msra.mxu0 %v15720_v40  ;;  %v7718_v29 = vadd.f32 %v9383_v57, %v15705_v7  ;;  %v7709_v62 = vpop.f32.mrb[245].mxu1 }
 0xf6c   :  { %v7710_v2 = vadd.f32 %v15705_v7, %v7709_v62  ;;  %v9384_v6 = vpop.f32.mrb[246].mxu1 }
 0xf6d   :  { %7778 = vst [vmem:[%s15913_s11 + $0xb0] sm:$0xff] %v7718_v29  ;;  %v7721_v24 = vadd.f32 %v9384_v6, %v15705_v7  ;;  %v7712_v47 = vpop.f32.mrb[247].mxu1 }
 0xf6e   :  { %7776 = vst [vmem:[%s15913_s11 + $0xa0] sm:$0xff] %v7710_v2  ;;  %v7713_v46 = vadd.f32 %v15705_v7, %v7712_v47 }
 0xf6f   :  { %7779 = vst [vmem:[%s15913_s11 + $0xb8] sm:$0xff] %v7721_v24  ;;  %v15825_v35 = vpack.c.bf16 %v7721_v24, %v7718_v29 }
 0xf70   :  { %7777 = vst [vmem:[%s15913_s11 + $0xa8] sm:$0xff] %v7713_v46  ;;  %v7798_v20 = vpack.c.bf16 %v7713_v46, %v7710_v2 }
 0xf72   :  { %9273 = vmatprep.subr.bf16.mxu0 %v7798_v20 }
 0xf73   :  { %9274 = vmatpush3.bf16.xpose.msra.mxu0 %v15746_v18 }
 0xf74   :  { %9275 = vmatprep.subr.bf16.mxu0 %v15825_v35 }
 0xf7b   :  { %9276 = vmatpush3.bf16.xpose.msra.mxu0 %v15741_v9 }
 0xf9b   :  { %v9387_v50 = vpop.f32.mrb[248].mxu1 }
 0xf9c   :  { %v7734_v63 = vadd.f32 %v9387_v50, %v15705_v7  ;;  %v7725_v48 = vpop.f32.mrb[249].mxu1 }
 0xf9d   :  { %v7726_v27 = vadd.f32 %v15705_v7, %v7725_v48  ;;  %v9388_v11 = vpop.f32.mrb[250].mxu1 }
 0xf9e   :  { %7782 = vst [vmem:[%s15913_s11 + $0xd0] sm:$0xff] %v7734_v63  ;;  %v7737_v36 = vadd.f32 %v9388_v11, %v15705_v7  ;;  %v7728_v33 = vpop.f32.mrb[251].mxu1 }
 0xf9f   :  { %7780 = vst [vmem:[%s15913_s11 + $0xc0] sm:$0xff] %v7726_v27  ;;  %v7729_v54 = vadd.f32 %v15705_v7, %v7728_v33 }
 0xfa0   :  { %7783 = vst [vmem:[%s15913_s11 + $0xd8] sm:$0xff] %v7737_v36  ;;  %v7801_v32 = vpack.c.bf16 %v7737_v36, %v7734_v63 }
 0xfa1   :  { %7781 = vst [vmem:[%s15913_s11 + $0xc8] sm:$0xff] %v7729_v54  ;;  %v7800_v19 = vpack.c.bf16 %v7729_v54, %v7726_v27 }
 0xfa3   :  { %9277 = vmatprep.subr.bf16.mxu0 %v7800_v19 }
 0xfa4   :  { %9278 = vmatpush3.bf16.xpose.msra.mxu0 %v15766_v30 }
 0xfa5   :  { %9279 = vmatprep.subr.bf16.mxu0 %v7801_v32 }
 0xfac   :  { %9280 = vmatpush3.bf16.xpose.msra.mxu0 %v15761_v8 }
 0xfb0   :  { %v9391_v23 = vpop.f32.mrb[252].mxu1 }
 0xfb1   :  { %v7750_v31 = vadd.f32 %v9391_v23, %v15705_v7  ;;  %v7741_v51 = vpop.f32.mrb[253].mxu1 }
 0xfb2   :  { %v7742_v10 = vadd.f32 %v15705_v7, %v7741_v51  ;;  %v9392_v55 = vpop.f32.mrb[254].mxu1 }
 0xfb3   :  { %7786 = vst [vmem:[%s15913_s11 + $0xf0] sm:$0xff] %v7750_v31  ;;  %v7753_v22 = vadd.f32 %v9392_v55, %v15705_v7  ;;  %v7744_v52 = vpop.f32.mrb[255].mxu1 }
 0xfb4   :  { %7784 = vst [vmem:[%s15913_s11 + $0xe0] sm:$0xff] %v7742_v10  ;;  %v7745_v56 = vadd.f32 %v15705_v7, %v7744_v52 }
 0xfb5   :  { %7787 = vst [vmem:[%s15913_s11 + $0xf8] sm:$0xff] %v7753_v22  ;;  %v7803_v37 = vpack.c.bf16 %v7753_v22, %v7750_v31 }
 0xfb6   :  { %7785 = vst [vmem:[%s15913_s11 + $0xe8] sm:$0xff] %v7745_v56  ;;  %v7802_v14 = vpack.c.bf16 %v7745_v56, %v7742_v10  ;;  %s11217_s11 = smov [#allocation2]  }
 0xfb7   :  { %s8452_s23 = sshll.u32 %s11217_s11, 4  ;;  %s8453_s23 = int_to_ptr.vmem [resolvable:$true] %s8452_s23 }
 0xfb8   :  { %9281 = vmatprep.subr.bf16.mxu0 %v7802_v14  ;;  %s11189_s24 = scalar_lea.vmem %s8453_s23, 8192  ;;  %p11194_p1 = scmp.lt.s32.totalorder %s8453_s23, %s8453_s23 }
 0xfb9   :  { %9282 = vmatpush3.bf16.xpose.msra.mxu0 %v15786_v21  ;;  %p11190_p0 = scmp.ne.s32.totalorder %s8453_s23, %s11189_s24  ;;  %p11195_p2 = scmp.lt.s32.totalorder %s11189_s24, %s11189_s24 }
 0xfba   :  { %9283 = vmatprep.subr.bf16.mxu0 %v7803_v37 }
 0xfbb   :  { %p11196_p3 = por %p11195_p2, %p11194_p1 }
 0xfbd   :  { %p11197_p4 = pnand %p11196_p3, %p11190_p0 }
 0xfc1   :  { %9284 = vmatpush3.bf16.xpose.msra.mxu0 %v15781_v58 }
 0xfc8   :  { %9286 = vmatmul.mubr.bf16.vlgmr.msra.gmra.mrb[192].mxu0 %v15725_v61 }
 0xfc9   :  { %9287 = vmatprep.mubr.bf16.mxu0 %v15720_v40 }
 0xfd0   :  { %9288 = vmatmul.mubr.bf16.gmra.mrb[196].mxu0 %v15720_v40 }
 0xfd1   :  { %9289 = vmatprep.mubr.bf16.mxu0 %v15746_v18 }
 0xfd8   :  { %9290 = vmatmul.mubr.bf16.gmra.mrb[200].mxu0 %v15746_v18 }
 0xfd9   :  { %9291 = vmatprep.mubr.bf16.mxu0 %v15741_v9 }
 0xfe0   :  { %9292 = vmatmul.mubr.bf16.gmra.mrb[204].mxu0 %v15741_v9 }
 0xfe1   :  { %9293 = vmatprep.mubr.bf16.mxu0 %v15766_v30 }
 0xfe8   :  { %9294 = vmatmul.mubr.bf16.gmra.mrb[208].mxu0 %v15766_v30 }
 0xfe9   :  { %9295 = vmatprep.mubr.bf16.mxu0 %v15761_v8 }
 0xff0   :  { %9296 = vmatmul.mubr.bf16.gmra.mrb[212].mxu0 %v15761_v8 }
 0xff1   :  { %9297 = vmatprep.mubr.bf16.mxu0 %v15786_v21 }
 0xff8   :  { %9298 = vmatmul.mubr.bf16.gmra.mrb[216].mxu0 %v15786_v21 }
 0xff9   :  { %9299 = vmatprep.mubr.bf16.mxu0 %v15781_v58 }
0x1000   :  { %9300 = vmatmul.mubr.bf16.gmra.mrb[220].mxu0 %v15781_v58 }
0x1001   :  { %9301 = vmatprep.mubr.bf16.mxu0 %v15806_v17 }
0x1008   :  { %9302 = vmatmul.mubr.bf16.gmra.mrb[224].mxu0 %v15806_v17 }
0x1009   :  { %9303 = vmatprep.mubr.bf16.mxu0 %v15801_v15 }
0x1010   :  { %9304 = vmatmul.mubr.bf16.gmra.mrb[228].mxu0 %v15801_v15 }
0x1011   :  { %9305 = vmatprep.mubr.bf16.mxu0 %v7798_v20 }
0x1018   :  { %9306 = vmatmul.mubr.bf16.gmra.mrb[232].mxu0 %v7798_v20 }
0x1019   :  { %9307 = vmatprep.mubr.bf16.mxu0 %v15825_v35 }
0x1020   :  { %9308 = vmatmul.mubr.bf16.gmra.mrb[236].mxu0 %v15825_v35 }
0x1021   :  { %9309 = vmatprep.mubr.bf16.mxu0 %v7800_v19 }
0x1028   :  { %9310 = vmatmul.mubr.bf16.gmra.mrb[240].mxu0 %v7800_v19 }
0x1029   :  { %9311 = vmatprep.mubr.bf16.mxu0 %v7801_v32 }
0x1030   :  { %9312 = vmatmul.mubr.bf16.gmra.mrb[244].mxu0 %v7801_v32 }
0x1031   :  { %9313 = vmatprep.mubr.bf16.mxu0 %v7802_v14 }
0x1038   :  { %9314 = vmatmul.mubr.bf16.gmra.mrb[248].mxu0 %v7802_v14 }
0x1039   :  { %9315 = vmatprep.mubr.bf16.mxu0 %v7803_v37 }
0x1040   :  { %9316 = vmatmul.mubr.bf16.gmra.mrb[252].mxu0 %v7803_v37 }
0x109b   :  { %v7838_v7 = vpop.f32.mrb[192].mxu0 }
0x109c   :  { %v8831_v40 = vmul.f32 -1.442695, %v7838_v7  ;;  %v7840_v61 = vpop.f32.mrb[193].mxu0 }
0x109d   :  { %v8832_v9 = vmul.f32 -1.442695, %v7840_v61  ;;  %v7842_v18 = vpop.f32.mrb[194].mxu0 }
0x109e   :  { %10852 = vpow2.f32 %v8831_v40  ;;  %v8833_v16 = vmul.f32 -1.442695, %v7842_v18  ;;  %v7844_v44 = vpop.f32.mrb[195].mxu0 }
0x109f   :  { %10854 = vpow2.f32 %v8832_v9  ;;  %v8834_v1 = vmul.f32 -1.442695, %v7844_v44 }
0x10a0   :  { %10856 = vpow2.f32 %v8833_v16 }
0x10a1   :  { %10858 = vpow2.f32 %v8834_v1 }
0x10a3   :  { %v7848_v41 = vpop.f32.mrb[196].mxu0 }
0x10a4   :  { %v8835_v38 = vmul.f32 -1.442695, %v7848_v41  ;;  %v7850_v4 = vpop.f32.mrb[197].mxu0 }
0x10a5   :  { %v8836_v5 = vmul.f32 -1.442695, %v7850_v4  ;;  %v7852_v8 = vpop.f32.mrb[198].mxu0 }
0x10a6   :  { %10860 = vpow2.f32 %v8835_v38  ;;  %v8837_v30 = vmul.f32 -1.442695, %v7852_v8  ;;  %v7854_v39 = vpop.f32.mrb[199].mxu0 }
0x10a7   :  { %10862 = vpow2.f32 %v8836_v5  ;;  %v8838_v34 = vmul.f32 -1.442695, %v7854_v39 }
0x10a8   :  { %v10853_v43 = vpop.eup %10852  ;;  %10864 = vpow2.f32 %v8837_v30 }
0x10a9   :  { %v10855_v60 = vpop.eup %10854  ;;  %v8189_v0 = vadd.f32 1.0, %v10853_v43  ;;  %10866 = vpow2.f32 %v8838_v34 }
0x10aa   :  { %v10857_v53 = vpop.eup %10856  ;;  %v8190_v3 = vadd.f32 1.0, %v10855_v60 }
0x10ab   :  { %v10859_v49 = vpop.eup %10858  ;;  %10868 = vrcp.f32 %v8189_v0  ;;  %v8191_v58 = vadd.f32 1.0, %v10857_v53  ;;  %v7858_v21 = vpop.f32.mrb[200].mxu0 }
0x10ac   :  { %10870 = vrcp.f32 %v8190_v3  ;;  %v8192_v13 = vadd.f32 1.0, %v10859_v49  ;;  %v8839_v42 = vmul.f32 -1.442695, %v7858_v21  ;;  %v7860_v26 = vpop.f32.mrb[201].mxu0 }
0x10ad   :  { %10872 = vrcp.f32 %v8191_v58  ;;  %v8840_v59 = vmul.f32 -1.442695, %v7860_v26  ;;  %v7862_v25 = vpop.f32.mrb[202].mxu0 }
0x10ae   :  { %10874 = vrcp.f32 %v8192_v13  ;;  %v8841_v12 = vmul.f32 -1.442695, %v7862_v25  ;;  %v7864_v45 = vpop.f32.mrb[203].mxu0 }
0x10af   :  { %10876 = vpow2.f32 %v8839_v42  ;;  %v8842_v28 = vmul.f32 -1.442695, %v7864_v45 }
0x10b0   :  { %v10861_v15 = vpop.eup %10860  ;;  %10878 = vpow2.f32 %v8840_v59 }
0x10b1   :  { %v10863_v17 = vpop.eup %10862  ;;  %v8193_v57 = vadd.f32 1.0, %v10861_v15  ;;  %10880 = vpow2.f32 %v8841_v12 }
0x10b2   :  { %v10865_v29 = vpop.eup %10864  ;;  %v8194_v62 = vadd.f32 1.0, %v10863_v17  ;;  %10882 = vpow2.f32 %v8842_v28 }
0x10b3   :  { %v10867_v2 = vpop.eup %10866  ;;  %10884 = vrcp.f32 %v8193_v57  ;;  %v8195_v6 = vadd.f32 1.0, %v10865_v29  ;;  %v7868_v24 = vpop.f32.mrb[204].mxu0 }
0x10b4   :  { %10886 = vrcp.f32 %v8194_v62  ;;  %v8196_v47 = vadd.f32 1.0, %v10867_v2  ;;  %v8843_v46 = vmul.f32 -1.442695, %v7868_v24  ;;  %v7870_v35 = vpop.f32.mrb[205].mxu0 }
0x10b5   :  { %v10869_v20 = vpop.eup %10868  ;;  %10888 = vrcp.f32 %v8195_v6  ;;  %v8844_v50 = vmul.f32 -1.442695, %v7870_v35  ;;  %v7872_v63 = vpop.f32.mrb[206].mxu0 }
0x10b6   :  { %v10871_v48 = vpop.eup %10870  ;;  %8381 = vst [vmem:[#allocation2] sm:$0xff] %v10869_v20  ;;  %10890 = vrcp.f32 %v8196_v47  ;;  %v8845_v27 = vmul.f32 -1.442695, %v7872_v63  ;;  %v7874_v11 = vpop.f32.mrb[207].mxu0 }
0x10b7   :  { %v10873_v36 = vpop.eup %10872  ;;  %8382 = vst [vmem:[#allocation2 + $0x8] sm:$0xff] %v10871_v48  ;;  %10892 = vpow2.f32 %v8843_v46  ;;  %v8846_v33 = vmul.f32 -1.442695, %v7874_v11 }
0x10b8   :  { %v10875_v54 = vpop.eup %10874  ;;  %8383 = vst [vmem:[#allocation2 + $0x10] sm:$0xff] %v10873_v36  ;;  %10894 = vpow2.f32 %v8844_v50 }
0x10b9   :  { %v10877_v32 = vpop.eup %10876  ;;  %8384 = vst [vmem:[#allocation2 + $0x18] sm:$0xff] %v10875_v54  ;;  %10896 = vpow2.f32 %v8845_v27 }
0x10ba   :  { %v10879_v19 = vpop.eup %10878  ;;  %v8197_v23 = vadd.f32 1.0, %v10877_v32  ;;  %10898 = vpow2.f32 %v8846_v33 }
0x10bb   :  { %v10881_v31 = vpop.eup %10880  ;;  %v8198_v51 = vadd.f32 1.0, %v10879_v19  ;;  %v7878_v10 = vpop.f32.mrb[208].mxu0 }
0x10bc   :  { %v10883_v55 = vpop.eup %10882  ;;  %10900 = vrcp.f32 %v8197_v23  ;;  %v8199_v22 = vadd.f32 1.0, %v10881_v31  ;;  %v8847_v52 = vmul.f32 -1.442695, %v7878_v10  ;;  %v7880_v56 = vpop.f32.mrb[209].mxu0 }
0x10bd   :  { %v10885_v37 = vpop.eup %10884  ;;  %10902 = vrcp.f32 %v8198_v51  ;;  %v8200_v14 = vadd.f32 1.0, %v10883_v55  ;;  %v8848_v7 = vmul.f32 -1.442695, %v7880_v56  ;;  %v7882_v40 = vpop.f32.mrb[210].mxu0 }
0x10be   :  { %v10887_v61 = vpop.eup %10886  ;;  %8385 = vst [vmem:[#allocation2 + $0x20] sm:$0xff] %v10885_v37  ;;  %10904 = vrcp.f32 %v8199_v22  ;;  %v8849_v9 = vmul.f32 -1.442695, %v7882_v40  ;;  %v7884_v18 = vpop.f32.mrb[211].mxu0 }
0x10bf   :  { %v10889_v16 = vpop.eup %10888  ;;  %8386 = vst [vmem:[#allocation2 + $0x28] sm:$0xff] %v10887_v61  ;;  %10906 = vrcp.f32 %v8200_v14  ;;  %v8850_v44 = vmul.f32 -1.442695, %v7884_v18 }
0x10c0   :  { %v10891_v1 = vpop.eup %10890  ;;  %8387 = vst [vmem:[#allocation2 + $0x30] sm:$0xff] %v10889_v16  ;;  %10908 = vpow2.f32 %v8847_v52 }
0x10c1   :  { %v10893_v41 = vpop.eup %10892  ;;  %8388 = vst [vmem:[#allocation2 + $0x38] sm:$0xff] %v10891_v1  ;;  %10910 = vpow2.f32 %v8848_v7 }
0x10c2   :  { %v10895_v38 = vpop.eup %10894  ;;  %v8201_v4 = vadd.f32 1.0, %v10893_v41  ;;  %10912 = vpow2.f32 %v8849_v9 }
0x10c3   :  { %v10897_v5 = vpop.eup %10896  ;;  %v8202_v8 = vadd.f32 1.0, %v10895_v38  ;;  %10914 = vpow2.f32 %v8850_v44  ;;  %v7888_v30 = vpop.f32.mrb[212].mxu0 }
0x10c4   :  { %v10899_v39 = vpop.eup %10898  ;;  %10916 = vrcp.f32 %v8201_v4  ;;  %v8203_v34 = vadd.f32 1.0, %v10897_v5  ;;  %v8851_v43 = vmul.f32 -1.442695, %v7888_v30  ;;  %v7890_v60 = vpop.f32.mrb[213].mxu0 }
0x10c5   :  { %10918 = vrcp.f32 %v8202_v8  ;;  %v8204_v0 = vadd.f32 1.0, %v10899_v39  ;;  %v8852_v53 = vmul.f32 -1.442695, %v7890_v60  ;;  %v7892_v3 = vpop.f32.mrb[214].mxu0 }
0x10c6   :  { %v10901_v49 = vpop.eup %10900  ;;  %10920 = vrcp.f32 %v8203_v34  ;;  %v8853_v58 = vmul.f32 -1.442695, %v7892_v3  ;;  %v7894_v21 = vpop.f32.mrb[215].mxu0 }
0x10c7   :  { %v10903_v13 = vpop.eup %10902  ;;  %8389 = vst [vmem:[#allocation2 + $0x40] sm:$0xff] %v10901_v49  ;;  %10922 = vrcp.f32 %v8204_v0  ;;  %v8854_v42 = vmul.f32 -1.442695, %v7894_v21 }
0x10c8   :  { %v10905_v26 = vpop.eup %10904  ;;  %8390 = vst [vmem:[#allocation2 + $0x48] sm:$0xff] %v10903_v13  ;;  %10924 = vpow2.f32 %v8851_v43 }
0x10c9   :  { %v10907_v59 = vpop.eup %10906  ;;  %8391 = vst [vmem:[#allocation2 + $0x50] sm:$0xff] %v10905_v26  ;;  %10926 = vpow2.f32 %v8852_v53 }
0x10ca   :  { %v10909_v25 = vpop.eup %10908  ;;  %8392 = vst [vmem:[#allocation2 + $0x58] sm:$0xff] %v10907_v59  ;;  %10928 = vpow2.f32 %v8853_v58 }
0x10cb   :  { %v10911_v12 = vpop.eup %10910  ;;  %v8205_v45 = vadd.f32 1.0, %v10909_v25  ;;  %10930 = vpow2.f32 %v8854_v42  ;;  %v7898_v28 = vpop.f32.mrb[216].mxu0 }
0x10cc   :  { %v10913_v15 = vpop.eup %10912  ;;  %v8206_v17 = vadd.f32 1.0, %v10911_v12  ;;  %v7900_v57 = vpop.f32.mrb[217].mxu0  ;;  %v8855_v2 = vmul.f32 -1.442695, %v7898_v28 }
0x10cd   :  { %v10915_v29 = vpop.eup %10914  ;;  %10932 = vrcp.f32 %v8205_v45  ;;  %v8207_v62 = vadd.f32 1.0, %v10913_v15  ;;  %v7902_v6 = vpop.f32.mrb[218].mxu0  ;;  %v8856_v46 = vmul.f32 -1.442695, %v7900_v57 }
0x10ce   :  { %v10917_v24 = vpop.eup %10916  ;;  %10934 = vrcp.f32 %v8206_v17  ;;  %v8208_v47 = vadd.f32 1.0, %v10915_v29  ;;  %v7904_v35 = vpop.f32.mrb[219].mxu0  ;;  %v8857_v50 = vmul.f32 -1.442695, %v7902_v6 }
0x10cf   :  { %v10919_v20 = vpop.eup %10918  ;;  %8393 = vst [vmem:[#allocation2 + $0x60] sm:$0xff] %v10917_v24  ;;  %10936 = vrcp.f32 %v8207_v62  ;;  %v8858_v48 = vmul.f32 -1.442695, %v7904_v35 }
0x10d0   :  { %v10921_v63 = vpop.eup %10920  ;;  %8394 = vst [vmem:[#allocation2 + $0x68] sm:$0xff] %v10919_v20  ;;  %10938 = vrcp.f32 %v8208_v47 }
0x10d1   :  { %v10923_v27 = vpop.eup %10922  ;;  %8395 = vst [vmem:[#allocation2 + $0x70] sm:$0xff] %v10921_v63  ;;  %10940 = vpow2.f32 %v8855_v2 }
0x10d2   :  { %v10925_v11 = vpop.eup %10924  ;;  %8396 = vst [vmem:[#allocation2 + $0x78] sm:$0xff] %v10923_v27  ;;  %10942 = vpow2.f32 %v8856_v46 }
0x10d3   :  { %v10927_v36 = vpop.eup %10926  ;;  %v8209_v33 = vadd.f32 1.0, %v10925_v11  ;;  %10944 = vpow2.f32 %v8857_v50  ;;  %v7908_v54 = vpop.f32.mrb[220].mxu0 }
0x10d4   :  { %v10929_v32 = vpop.eup %10928  ;;  %v8210_v19 = vadd.f32 1.0, %v10927_v36  ;;  %10946 = vpow2.f32 %v8858_v48  ;;  %v7910_v23 = vpop.f32.mrb[221].mxu0  ;;  %v8859_v10 = vmul.f32 -1.442695, %v7908_v54 }
0x10d5   :  { %v10931_v31 = vpop.eup %10930  ;;  %10948 = vrcp.f32 %v8209_v33  ;;  %v8211_v51 = vadd.f32 1.0, %v10929_v32  ;;  %v7912_v55 = vpop.f32.mrb[222].mxu0  ;;  %v8860_v52 = vmul.f32 -1.442695, %v7910_v23 }
0x10d6   :  { %10950 = vrcp.f32 %v8210_v19  ;;  %v8212_v22 = vadd.f32 1.0, %v10931_v31  ;;  %v7914_v56 = vpop.f32.mrb[223].mxu0  ;;  %v8861_v14 = vmul.f32 -1.442695, %v7912_v55 }
0x10d7   :  { %v10933_v37 = vpop.eup %10932  ;;  %10952 = vrcp.f32 %v8211_v51  ;;  %v8862_v40 = vmul.f32 -1.442695, %v7914_v56 }
0x10d8   :  { %v10935_v7 = vpop.eup %10934  ;;  %8397 = vst [vmem:[#allocation2 + $0x80] sm:$0xff] %v10933_v37  ;;  %10954 = vrcp.f32 %v8212_v22 }
0x10d9   :  { %v10937_v61 = vpop.eup %10936  ;;  %8398 = vst [vmem:[#allocation2 + $0x88] sm:$0xff] %v10935_v7  ;;  %10956 = vpow2.f32 %v8859_v10 }
0x10da   :  { %v10939_v9 = vpop.eup %10938  ;;  %8399 = vst [vmem:[#allocation2 + $0x90] sm:$0xff] %v10937_v61  ;;  %10958 = vpow2.f32 %v8860_v52 }
0x10db   :  { %v10941_v18 = vpop.eup %10940  ;;  %8400 = vst [vmem:[#allocation2 + $0x98] sm:$0xff] %v10939_v9  ;;  %10960 = vpow2.f32 %v8861_v14  ;;  %v7918_v16 = vpop.f32.mrb[224].mxu0 }
0x10dc   :  { %v10943_v44 = vpop.eup %10942  ;;  %v8213_v1 = vadd.f32 1.0, %v10941_v18  ;;  %10962 = vpow2.f32 %v8862_v40  ;;  %v7920_v41 = vpop.f32.mrb[225].mxu0  ;;  %v8863_v39 = vmul.f32 -1.442695, %v7918_v16 }
0x10dd   :  { %v10945_v38 = vpop.eup %10944  ;;  %v8214_v4 = vadd.f32 1.0, %v10943_v44  ;;  %v7922_v5 = vpop.f32.mrb[226].mxu0  ;;  %v8864_v0 = vmul.f32 -1.442695, %v7920_v41 }
0x10de   :  { %v10947_v8 = vpop.eup %10946  ;;  %10964 = vrcp.f32 %v8213_v1  ;;  %v8215_v30 = vadd.f32 1.0, %v10945_v38  ;;  %v7924_v34 = vpop.f32.mrb[227].mxu0  ;;  %v8865_v3 = vmul.f32 -1.442695, %v7922_v5 }
0x10df   :  { %v10949_v43 = vpop.eup %10948  ;;  %10966 = vrcp.f32 %v8214_v4  ;;  %v8216_v60 = vadd.f32 1.0, %v10947_v8  ;;  %v8866_v58 = vmul.f32 -1.442695, %v7924_v34 }
0x10e0   :  { %v10951_v53 = vpop.eup %10950  ;;  %8401 = vst [vmem:[#allocation2 + $0xa0] sm:$0xff] %v10949_v43  ;;  %10968 = vrcp.f32 %v8215_v30 }
0x10e1   :  { %v10953_v49 = vpop.eup %10952  ;;  %8402 = vst [vmem:[#allocation2 + $0xa8] sm:$0xff] %v10951_v53  ;;  %10970 = vrcp.f32 %v8216_v60 }
0x10e2   :  { %v10955_v21 = vpop.eup %10954  ;;  %8403 = vst [vmem:[#allocation2 + $0xb0] sm:$0xff] %v10953_v49  ;;  %10972 = vpow2.f32 %v8863_v39 }
0x10e3   :  { %v10957_v13 = vpop.eup %10956  ;;  %8404 = vst [vmem:[#allocation2 + $0xb8] sm:$0xff] %v10955_v21  ;;  %10974 = vpow2.f32 %v8864_v0  ;;  %v7928_v42 = vpop.f32.mrb[228].mxu0 }
0x10e4   :  { %v10959_v26 = vpop.eup %10958  ;;  %v8217_v59 = vadd.f32 1.0, %v10957_v13  ;;  %10976 = vpow2.f32 %v8865_v3  ;;  %v7930_v25 = vpop.f32.mrb[229].mxu0  ;;  %v8867_v57 = vmul.f32 -1.442695, %v7928_v42 }
0x10e5   :  { %v10961_v12 = vpop.eup %10960  ;;  %v8218_v45 = vadd.f32 1.0, %v10959_v26  ;;  %10978 = vpow2.f32 %v8866_v58  ;;  %v7932_v28 = vpop.f32.mrb[230].mxu0  ;;  %v8868_v2 = vmul.f32 -1.442695, %v7930_v25 }
0x10e6   :  { %v10963_v15 = vpop.eup %10962  ;;  %10980 = vrcp.f32 %v8217_v59  ;;  %v8219_v17 = vadd.f32 1.0, %v10961_v12  ;;  %v7934_v29 = vpop.f32.mrb[231].mxu0  ;;  %v8869_v24 = vmul.f32 -1.442695, %v7932_v28 }
0x10e7   :  { %10982 = vrcp.f32 %v8218_v45  ;;  %v8220_v62 = vadd.f32 1.0, %v10963_v15  ;;  %v8870_v46 = vmul.f32 -1.442695, %v7934_v29 }
0x10e8   :  { %v10965_v6 = vpop.eup %10964  ;;  %10984 = vrcp.f32 %v8219_v17 }
0x10e9   :  { %v10967_v47 = vpop.eup %10966  ;;  %8405 = vst [vmem:[#allocation2 + $0xc0] sm:$0xff] %v10965_v6  ;;  %10986 = vrcp.f32 %v8220_v62 }
0x10ea   :  { %v10969_v35 = vpop.eup %10968  ;;  %8406 = vst [vmem:[#allocation2 + $0xc8] sm:$0xff] %v10967_v47  ;;  %10988 = vpow2.f32 %v8867_v57 }
0x10eb   :  { %v10971_v20 = vpop.eup %10970  ;;  %8407 = vst [vmem:[#allocation2 + $0xd0] sm:$0xff] %v10969_v35  ;;  %10990 = vpow2.f32 %v8868_v2  ;;  %v7938_v50 = vpop.f32.mrb[232].mxu0 }
0x10ec   :  { %v10973_v63 = vpop.eup %10972  ;;  %8408 = vst [vmem:[#allocation2 + $0xd8] sm:$0xff] %v10971_v20  ;;  %10992 = vpow2.f32 %v8869_v24  ;;  %v8871_v48 = vmul.f32 -1.442695, %v7938_v50  ;;  %v7940_v27 = vpop.f32.mrb[233].mxu0 }
0x10ed   :  { %v10975_v11 = vpop.eup %10974  ;;  %v8221_v36 = vadd.f32 1.0, %v10973_v63  ;;  %10994 = vpow2.f32 %v8870_v46  ;;  %v7942_v33 = vpop.f32.mrb[234].mxu0  ;;  %v8872_v51 = vmul.f32 -1.442695, %v7940_v27 }
0x10ee   :  { %v10977_v54 = vpop.eup %10976  ;;  %v8222_v32 = vadd.f32 1.0, %v10975_v11  ;;  %10996 = vpow2.f32 %v8871_v48  ;;  %v7944_v19 = vpop.f32.mrb[235].mxu0  ;;  %v8873_v22 = vmul.f32 -1.442695, %v7942_v33 }
0x10ef   :  { %v10979_v23 = vpop.eup %10978  ;;  %10998 = vrcp.f32 %v8221_v36  ;;  %v8223_v31 = vadd.f32 1.0, %v10977_v54  ;;  %v8874_v56 = vmul.f32 -1.442695, %v7944_v19 }
0x10f0   :  { %v10981_v10 = vpop.eup %10980  ;;  %11000 = vrcp.f32 %v8222_v32  ;;  %v8224_v55 = vadd.f32 1.0, %v10979_v23 }
0x10f1   :  { %v10983_v52 = vpop.eup %10982  ;;  %8409 = vst [vmem:[#allocation2 + $0xe0] sm:$0xff] %v10981_v10  ;;  %11002 = vrcp.f32 %v8223_v31 }
0x10f2   :  { %v10985_v37 = vpop.eup %10984  ;;  %8410 = vst [vmem:[#allocation2 + $0xe8] sm:$0xff] %v10983_v52  ;;  %11004 = vrcp.f32 %v8224_v55 }
0x10f3   :  { %v10987_v14 = vpop.eup %10986  ;;  %8411 = vst [vmem:[#allocation2 + $0xf0] sm:$0xff] %v10985_v37  ;;  %11006 = vpow2.f32 %v8872_v51  ;;  %v7948_v7 = vpop.f32.mrb[236].mxu0 }
0x10f4   :  { %v10989_v40 = vpop.eup %10988  ;;  %8412 = vst [vmem:[#allocation2 + $0xf8] sm:$0xff] %v10987_v14  ;;  %11008 = vpow2.f32 %v8873_v22  ;;  %v8875_v61 = vmul.f32 -1.442695, %v7948_v7  ;;  %v7950_v9 = vpop.f32.mrb[237].mxu0 }
0x10f5   :  { %v10991_v18 = vpop.eup %10990  ;;  %v8225_v16 = vadd.f32 1.0, %v10989_v40  ;;  %11010 = vpow2.f32 %v8874_v56  ;;  %v7952_v44 = vpop.f32.mrb[238].mxu0  ;;  %v8876_v39 = vmul.f32 -1.442695, %v7950_v9 }
0x10f6   :  { %v10993_v1 = vpop.eup %10992  ;;  %v8226_v41 = vadd.f32 1.0, %v10991_v18  ;;  %11012 = vpow2.f32 %v8875_v61  ;;  %v7954_v38 = vpop.f32.mrb[239].mxu0  ;;  %v8877_v60 = vmul.f32 -1.442695, %v7952_v44 }
0x10f7   :  { %v10995_v4 = vpop.eup %10994  ;;  %11014 = vrcp.f32 %v8225_v16  ;;  %v8227_v5 = vadd.f32 1.0, %v10993_v1  ;;  %v8878_v53 = vmul.f32 -1.442695, %v7954_v38 }
0x10f8   :  { %v10997_v8 = vpop.eup %10996  ;;  %11016 = vrcp.f32 %v8226_v41  ;;  %v8228_v30 = vadd.f32 1.0, %v10995_v4 }
0x10f9   :  { %v10999_v34 = vpop.eup %10998  ;;  %11018 = vrcp.f32 %v8227_v5  ;;  %v8229_v43 = vadd.f32 1.0, %v10997_v8 }
0x10fa   :  { %v11001_v0 = vpop.eup %11000  ;;  %8413 = vst [vmem:[#allocation2 + $0x100] sm:$0xff] %v10999_v34  ;;  %11020 = vrcp.f32 %v8228_v30 }
0x10fb   :  { %v11003_v3 = vpop.eup %11002  ;;  %8414 = vst [vmem:[#allocation2 + $0x108] sm:$0xff] %v11001_v0  ;;  %11022 = vrcp.f32 %v8229_v43  ;;  %v7958_v49 = vpop.f32.mrb[240].mxu0 }
0x10fc   :  { %v11005_v58 = vpop.eup %11004  ;;  %8415 = vst [vmem:[#allocation2 + $0x110] sm:$0xff] %v11003_v3  ;;  %11024 = vpow2.f32 %v8876_v39  ;;  %v8879_v21 = vmul.f32 -1.442695, %v7958_v49  ;;  %v7960_v13 = vpop.f32.mrb[241].mxu0 }
0x10fd   :  { %v11007_v42 = vpop.eup %11006  ;;  %8416 = vst [vmem:[#allocation2 + $0x118] sm:$0xff] %v11005_v58  ;;  %11026 = vpow2.f32 %v8877_v60  ;;  %v7962_v26 = vpop.f32.mrb[242].mxu0  ;;  %v8880_v57 = vmul.f32 -1.442695, %v7960_v13 }
0x10fe   :  { %v11009_v59 = vpop.eup %11008  ;;  %v8230_v25 = vadd.f32 1.0, %v11007_v42  ;;  %11028 = vpow2.f32 %v8878_v53  ;;  %v7964_v12 = vpop.f32.mrb[243].mxu0  ;;  %v8881_v2 = vmul.f32 -1.442695, %v7962_v26 }
0x10ff   :  { %v11011_v45 = vpop.eup %11010  ;;  %v8231_v28 = vadd.f32 1.0, %v11009_v59  ;;  %11030 = vpow2.f32 %v8879_v21  ;;  %v8882_v24 = vmul.f32 -1.442695, %v7964_v12 }
0x1100   :  { %v11013_v15 = vpop.eup %11012  ;;  %11032 = vrcp.f32 %v8230_v25  ;;  %v8232_v17 = vadd.f32 1.0, %v11011_v45 }
0x1101   :  { %v11015_v29 = vpop.eup %11014  ;;  %11034 = vrcp.f32 %v8231_v28  ;;  %v8233_v62 = vadd.f32 1.0, %v11013_v15 }
0x1102   :  { %v11017_v6 = vpop.eup %11016  ;;  %8417 = vst [vmem:[#allocation2 + $0x120] sm:$0xff] %v11015_v29  ;;  %11036 = vrcp.f32 %v8232_v17 }
0x1103   :  { %v11019_v47 = vpop.eup %11018  ;;  %8418 = vst [vmem:[#allocation2 + $0x128] sm:$0xff] %v11017_v6  ;;  %11038 = vrcp.f32 %v8233_v62  ;;  %v7968_v46 = vpop.f32.mrb[244].mxu0 }
0x1104   :  { %v11021_v35 = vpop.eup %11020  ;;  %8419 = vst [vmem:[#allocation2 + $0x130] sm:$0xff] %v11019_v47  ;;  %11040 = vpow2.f32 %v8880_v57  ;;  %v8883_v20 = vmul.f32 -1.442695, %v7968_v46  ;;  %v7970_v50 = vpop.f32.mrb[245].mxu0 }
0x1105   :  { %v11023_v63 = vpop.eup %11022  ;;  %8420 = vst [vmem:[#allocation2 + $0x138] sm:$0xff] %v11021_v35  ;;  %11042 = vpow2.f32 %v8881_v2  ;;  %v8884_v48 = vmul.f32 -1.442695, %v7970_v50  ;;  %v7972_v27 = vpop.f32.mrb[246].mxu0 }
0x1106   :  { %v11025_v11 = vpop.eup %11024  ;;  %8421 = vst [vmem:[#allocation2 + $0x140] sm:$0xff] %v11023_v63  ;;  %11044 = vpow2.f32 %v8882_v24  ;;  %v7974_v36 = vpop.f32.mrb[247].mxu0  ;;  %v8885_v51 = vmul.f32 -1.442695, %v7972_v27 }
0x1107   :  { %v11027_v33 = vpop.eup %11026  ;;  %v8234_v54 = vadd.f32 1.0, %v11025_v11  ;;  %11046 = vpow2.f32 %v8883_v20  ;;  %v8886_v22 = vmul.f32 -1.442695, %v7974_v36 }
0x1108   :  { %v11029_v32 = vpop.eup %11028  ;;  %v8235_v19 = vadd.f32 1.0, %v11027_v33  ;;  %11048 = vpow2.f32 %v8884_v48 }
0x1109   :  { %v11031_v23 = vpop.eup %11030  ;;  %11050 = vrcp.f32 %v8234_v54  ;;  %v8236_v31 = vadd.f32 1.0, %v11029_v32 }
0x110a   :  { %v11033_v10 = vpop.eup %11032  ;;  %11052 = vrcp.f32 %v8235_v19  ;;  %v8237_v55 = vadd.f32 1.0, %v11031_v23 }
0x110b   :  { %v11035_v52 = vpop.eup %11034  ;;  %8422 = vst [vmem:[#allocation2 + $0x148] sm:$0xff] %v11033_v10  ;;  %11054 = vrcp.f32 %v8236_v31  ;;  %v7978_v56 = vpop.f32.mrb[248].mxu0 }
0x110c   :  { %v11037_v37 = vpop.eup %11036  ;;  %8423 = vst [vmem:[#allocation2 + $0x150] sm:$0xff] %v11035_v52  ;;  %11056 = vrcp.f32 %v8237_v55  ;;  %v8887_v14 = vmul.f32 -1.442695, %v7978_v56  ;;  %v7980_v7 = vpop.f32.mrb[249].mxu0 }
0x110d   :  { %v11039_v40 = vpop.eup %11038  ;;  %8424 = vst [vmem:[#allocation2 + $0x158] sm:$0xff] %v11037_v37  ;;  %11058 = vpow2.f32 %v8885_v51  ;;  %v8888_v61 = vmul.f32 -1.442695, %v7980_v7  ;;  %v7982_v9 = vpop.f32.mrb[250].mxu0 }
0x110e   :  { %v11041_v18 = vpop.eup %11040  ;;  %8425 = vst [vmem:[#allocation2 + $0x160] sm:$0xff] %v11039_v40  ;;  %11060 = vpow2.f32 %v8886_v22  ;;  %v7984_v16 = vpop.f32.mrb[251].mxu0  ;;  %v8889_v39 = vmul.f32 -1.442695, %v7982_v9 }
0x110f   :  { %v11043_v44 = vpop.eup %11042  ;;  %v8238_v1 = vadd.f32 1.0, %v11041_v18  ;;  %11062 = vpow2.f32 %v8887_v14  ;;  %v8890_v60 = vmul.f32 -1.442695, %v7984_v16 }
0x1110   :  { %v11045_v41 = vpop.eup %11044  ;;  %v8239_v38 = vadd.f32 1.0, %v11043_v44  ;;  %11064 = vpow2.f32 %v8888_v61 }
0x1111   :  { %v11047_v4 = vpop.eup %11046  ;;  %11066 = vrcp.f32 %v8238_v1  ;;  %v8240_v5 = vadd.f32 1.0, %v11045_v41 }
0x1112   :  { %v11049_v8 = vpop.eup %11048  ;;  %11068 = vrcp.f32 %v8239_v38  ;;  %v8241_v30 = vadd.f32 1.0, %v11047_v4 }
0x1113   :  { %v11051_v34 = vpop.eup %11050  ;;  %11070 = vrcp.f32 %v8240_v5  ;;  %v8242_v43 = vadd.f32 1.0, %v11049_v8  ;;  %v7988_v0 = vpop.f32.mrb[252].mxu0 }
0x1114   :  { %v11053_v53 = vpop.eup %11052  ;;  %8426 = vst [vmem:[#allocation2 + $0x168] sm:$0xff] %v11051_v34  ;;  %11072 = vrcp.f32 %v8241_v30  ;;  %v8891_v3 = vmul.f32 -1.442695, %v7988_v0  ;;  %v7990_v49 = vpop.f32.mrb[253].mxu0 }
0x1115   :  { %v11055_v58 = vpop.eup %11054  ;;  %8427 = vst [vmem:[#allocation2 + $0x170] sm:$0xff] %v11053_v53  ;;  %11074 = vrcp.f32 %v8242_v43  ;;  %v8892_v21 = vmul.f32 -1.442695, %v7990_v49  ;;  %v7992_v13 = vpop.f32.mrb[254].mxu0 }
0x1116   :  { %v11057_v42 = vpop.eup %11056  ;;  %8428 = vst [vmem:[#allocation2 + $0x178] sm:$0xff] %v11055_v58  ;;  %11076 = vpow2.f32 %v8889_v39  ;;  %v7994_v26 = vpop.f32.mrb[255].mxu0  ;;  %v8893_v57 = vmul.f32 -1.442695, %v7992_v13 }
0x1117   :  { %v11059_v59 = vpop.eup %11058  ;;  %8429 = vst [vmem:[#allocation2 + $0x180] sm:$0xff] %v11057_v42  ;;  %11078 = vpow2.f32 %v8890_v60  ;;  %v8894_v2 = vmul.f32 -1.442695, %v7994_v26 }
0x1118   :  { %v11061_v25 = vpop.eup %11060  ;;  %v8243_v12 = vadd.f32 1.0, %v11059_v59  ;;  %11080 = vpow2.f32 %v8891_v3 }
0x1119   :  { %v11063_v45 = vpop.eup %11062  ;;  %v8244_v28 = vadd.f32 1.0, %v11061_v25  ;;  %11082 = vpow2.f32 %v8892_v21 }
0x111a   :  { %v11065_v15 = vpop.eup %11064  ;;  %11084 = vrcp.f32 %v8243_v12  ;;  %v8245_v17 = vadd.f32 1.0, %v11063_v45 }
0x111b   :  { %v11067_v29 = vpop.eup %11066  ;;  %11086 = vrcp.f32 %v8244_v28  ;;  %v8246_v62 = vadd.f32 1.0, %v11065_v15 }
0x111c   :  { %v11069_v6 = vpop.eup %11068  ;;  %8430 = vst [vmem:[#allocation2 + $0x188] sm:$0xff] %v11067_v29  ;;  %11088 = vrcp.f32 %v8245_v17 }
0x111d   :  { %v11071_v24 = vpop.eup %11070  ;;  %8431 = vst [vmem:[#allocation2 + $0x190] sm:$0xff] %v11069_v6  ;;  %11090 = vrcp.f32 %v8246_v62 }
0x111e   :  { %v11073_v47 = vpop.eup %11072  ;;  %8432 = vst [vmem:[#allocation2 + $0x198] sm:$0xff] %v11071_v24  ;;  %11092 = vpow2.f32 %v8893_v57 }
0x111f   :  { %v11075_v46 = vpop.eup %11074  ;;  %8433 = vst [vmem:[#allocation2 + $0x1a0] sm:$0xff] %v11073_v47  ;;  %11094 = vpow2.f32 %v8894_v2 }
0x1120   :  { %v11077_v35 = vpop.eup %11076  ;;  %8434 = vst [vmem:[#allocation2 + $0x1a8] sm:$0xff] %v11075_v46 }
0x1121   :  { %v11079_v20 = vpop.eup %11078  ;;  %v8247_v50 = vadd.f32 1.0, %v11077_v35 }
0x1122   :  { %v11081_v63 = vpop.eup %11080  ;;  %v8248_v48 = vadd.f32 1.0, %v11079_v20 }
0x1123   :  { %v11083_v27 = vpop.eup %11082  ;;  %11096 = vrcp.f32 %v8247_v50  ;;  %v8249_v11 = vadd.f32 1.0, %v11081_v63 }
0x1124   :  { %v11085_v36 = vpop.eup %11084  ;;  %11098 = vrcp.f32 %v8248_v48  ;;  %v8250_v33 = vadd.f32 1.0, %v11083_v27 }
0x1125   :  { %v11087_v54 = vpop.eup %11086  ;;  %8435 = vst [vmem:[#allocation2 + $0x1b0] sm:$0xff] %v11085_v36  ;;  %11100 = vrcp.f32 %v8249_v11 }
0x1126   :  { %v11089_v32 = vpop.eup %11088  ;;  %8436 = vst [vmem:[#allocation2 + $0x1b8] sm:$0xff] %v11087_v54  ;;  %11102 = vrcp.f32 %v8250_v33 }
0x1127   :  { %v11091_v19 = vpop.eup %11090  ;;  %8437 = vst [vmem:[#allocation2 + $0x1c0] sm:$0xff] %v11089_v32 }
0x1128   :  { %v11093_v23 = vpop.eup %11092  ;;  %8438 = vst [vmem:[#allocation2 + $0x1c8] sm:$0xff] %v11091_v19 }
0x1129   :  { %v11095_v31 = vpop.eup %11094  ;;  %v8251_v51 = vadd.f32 1.0, %v11093_v23 }
0x112a   :  { %v8252_v10 = vadd.f32 1.0, %v11095_v31 }
0x112b   :  { %11104 = vrcp.f32 %v8251_v51 }
0x112c   :  { %11106 = vrcp.f32 %v8252_v10 }
0x112d   :  { %v11097_v55 = vpop.eup %11096 }
0x112e   :  { %v11099_v22 = vpop.eup %11098  ;;  %8439 = vst [vmem:[#allocation2 + $0x1d0] sm:$0xff] %v11097_v55 }
0x112f   :  { %v11101_v52 = vpop.eup %11100  ;;  %8440 = vst [vmem:[#allocation2 + $0x1d8] sm:$0xff] %v11099_v22 }
0x1130   :  { %v11103_v56 = vpop.eup %11102  ;;  %8441 = vst [vmem:[#allocation2 + $0x1e0] sm:$0xff] %v11101_v52 }
0x1131   :  { %8442 = vst [vmem:[#allocation2 + $0x1e8] sm:$0xff] %v11103_v56 }
0x1135   :  { %v11105_v37 = vpop.eup %11104 }
0x1136   :  { %v11107_v14 = vpop.eup %11106  ;;  %8443 = vst [vmem:[#allocation2 + $0x1f0] sm:$0xff] %v11105_v37 }
0x1137   :  { %8444 = vst [vmem:[#allocation2 + $0x1f8] sm:$0xff] %v11107_v14 }
0x1138   :  { %11200 = shalt.err (!%p11197_p4)
}
0x1139   :  { %s11201_s27 = scalar_lea.hbm %s15914_s12, 8192 }
0x113a   :  { %p11202_p5 = scmp.ne.s32.totalorder %s15914_s12, %s11201_s27  ;;  %p11205_p6 = scmp.lt.u32.totalorder %s11201_s27, %s15914_s12 }
0x113c   :  { %p11207_p7 = pnand %p11205_p6, %p11202_p5 }
0x113e   :  { %11210 = shalt.err (!%p11207_p7)
}
0x113f   :  { %s11218_s8 = smov 256   ;;  %s11219_s30 = smov 16  }
0x1140   :  { %8458 = dma.vmem_to_hbm [thread:$0]  %s8453_s23, 8192, %s15914_s12, [#allocation3], %s11218_s8, %s11218_s8, %s11219_s30  }
0x1141   :  { %11211 = dma.done.wait [#allocation3], 8192  }
0x1142   :  { %11212 = vsyncadd [#allocation3], 4294959104 }
0x1143   :  { %8464 = vsyncpa [#allocation3], 1 }

</bundles_post_ra>
